<compile_context>
chip_gen: v7x
topology: tpu7x:2x2x1
jax: 0.10.0
libtpu: 0.0.40
codegen_flags: <defaults>
</compile_context>

<pallas_src>
import numpy as np
import jax
import jax.numpy as jnp
from jax import lax
from jax.experimental import pallas as pl
from jax.experimental.pallas import tpu as pltpu

# ----------------------------- static config --------------------------------
CFG = dict(
    state_dim=2,
    action_dim=4,
    horizon=4,
    n_history=1,
    n_particle=16,
    n_relation=64,
    num_classes=2,
    obj_size=0.05,
    forbidden_radius=0.0,
    far_factor=5.0,
    forbidden=True,
    cls_idx=[list(range(0, 8)), list(range(8, 16))],
    fix_others=True,
    cost_weight=5.0,
    action_norm=[0.1, 0.1, 0.1, 0.1],
    cost_norm=2,
    only_final_cost=False,
    hidden=32,
)
PENALTY_FACTOR = 1.0e5


# ------------------------------- kernel --------------------------------------
def _make_kernel(cfg, bt, sub):
    horizon = cfg["horizon"]
    N = cfg["n_particle"]
    R = cfg["n_relation"]
    cost_norm = cfg["cost_norm"]
    only_final = cfg["only_final_cost"]
    forbidden = cfg["forbidden"]
    close_dis = float((cfg["obj_size"] + cfg["forbidden_radius"]) ** 2)
    far_dis = float((cfg["far_factor"] * cfg["obj_size"]) ** 2)
    step_w = [(j + 1) / horizon for j in range(horizon)]
    G = sub * bt

    def kernel(nvalid_ref,                                    # scalar prefetch (SMEM)
               act_ref,                                       # (sub, horizon, 4*bt)
               init_ref, refc_ref, wrow_ref, rrs_ref, rrt_ref, pair_ref, place_ref,
               w1r_ref, w1s_ref, wb12_ref, we2_ref, b3_ref, wn2_ref,
               be1_ref, be2_ref, bn1_ref, bn2_ref,
               out_ref):

        def mxu(a, b):
            return jnp.dot(a, b, preferred_element_type=jnp.float32)

        # Fresh output block each grid step: zero it so skipped (padded)
        # sub-blocks have a defined value, then accumulate lane-dense rows.
        out_ref[0] = jnp.zeros((1, G), jnp.float32)

        n_valid = nvalid_ref[0]
        base0 = pl.program_id(0) * G

        def sub_block(s, carry):
            @pl.when(base0 + s * bt < n_valid)                # skip padded tail
            def _():
                act_tile = act_ref[s]                         # (horizon, 4*bt)
                curr = init_ref[...]                          # (N, 2*bt)
                ref_comb = refc_ref[...]                      # (N, 2*bt)
                wrow = wrow_ref[...]                          # (1, N)
                pair = pair_ref[...]                          # (2*bt, bt)
                cost_col = jnp.zeros((1, 2 * bt), jnp.float32)
                pen_row = jnp.zeros((1, bt), jnp.float32)

                def class_cost_col(state):
                    diff = state - ref_comb
                    pp = diff * diff if cost_norm == 2 else jnp.abs(diff)
                    # fused C-class weighted particle reduction -> one tiny matmul
                    return mxu(wrow, pp)                      # (1, 2*bt)

                for j in range(horizon):                      # small static unroll
                    a_move = act_tile[j:j + 1, :2 * bt]       # (1, 2*bt)
                    a_tail = act_tile[j:j + 1, 2 * bt:]       # (1, 2*bt)
                    so = curr - a_move                        # (N, 2*bt)

                    if forbidden:                             # f32 penalty path
                        sqr = mxu(so * so, pair)              # (N, bt)
                        min_sqr = jnp.min(sqr, axis=0, keepdims=True)
                        pen_row = (pen_row
                                   + jnp.maximum(close_dis - min_sqr, 0.0)
                                   + jnp.maximum(min_sqr - far_dis, 0.0))

                    sd = so - a_tail
                    x = jnp.concatenate([so, sd], axis=1)     # (N, 4*bt)

                    # ---- synthetic propagation-net GNN (stand-in for PyG_GNN) --
                    # TODO(synk): real PyG_GNN weights come from a checkpoint; a
                    # deterministic stand-in with the same I/O contract is used,
                    # evaluated with block-diagonal lane-batched weights read at
                    # their use sites (keeps vreg live ranges short).
                    y = mxu(rrs_ref[...], x)                  # (2R, 4*bt)
                    e1 = jnp.maximum(mxu(y[:R], w1r_ref[...])
                                     + mxu(y[R:], w1s_ref[...])
                                     + be1_ref[...], 0.0)     # (R, BH)
                    e2 = jnp.maximum(mxu(e1, we2_ref[...]) + be2_ref[...], 0.0)
                    agg = mxu(rrt_ref[...], e2)               # (N, BH)
                    h = jnp.maximum(mxu(x, wb12_ref[...])
                                    + mxu(agg, b3_ref[...])
                                    + bn1_ref[...], 0.0)
                    delta = mxu(h, wn2_ref[...]) + bn2_ref[...]   # (N, 2*bt)
                    # ------------------------------------------------------------

                    curr = curr + delta
                    if not only_final:
                        cost_col = cost_col + step_w[j] * class_cost_col(curr)

                if only_final:
                    cost_col = class_cost_col(curr)
                final_row = mxu(cost_col, pair) + pen_row * PENALTY_FACTOR  # (1, bt)
                # scatter this sub-block's bt-wide row into its lane slot of the
                # dense (1, G) output via a 0/1 matmul (no dynamic-lane stores)
                out_ref[0] = out_ref[0] + mxu(final_row, place_ref[s])
            return carry

        lax.fori_loop(0, sub, sub_block, 0)

    return kernel


# ------------------------ host-side weight packing ----------------------------
def _block_diag(w, bt):
    w = np.asarray(w, np.float32)
    r, c = w.shape
    out = np.zeros((bt * r, bt * c), np.float32)
    for b in range(bt):
        out[b * r:(b + 1) * r, b * c:(b + 1) * c] = w
    return jnp.asarray(out)


def _block_diag_pair(wa, wb, bt, H):
    # rows: [2*bt cols of part-a | 2*bt cols of part-b] -> (4*bt, bt*H)
    wa = np.asarray(wa, np.float32)
    wb = np.asarray(wb, np.float32)
    out = np.zeros((4 * bt, bt * H), np.float32)
    for b in range(bt):
        out[2 * b:2 * b + 2, b * H:(b + 1) * H] = wa
        out[2 * bt + 2 * b:2 * bt + 2 * b + 2, b * H:(b + 1) * H] = wb
    return jnp.asarray(out)


def _pair_sum_matrix(bt):
    p = np.zeros((2 * bt, bt), np.float32)
    for b in range(bt):
        p[2 * b, b] = 1.0
        p[2 * b + 1, b] = 1.0
    return jnp.asarray(p)


def _place_matrix(bt, sub):
    m = np.zeros((sub, bt, sub * bt), np.float32)
    for s in range(sub):
        for c in range(bt):
            m[s, c, s * bt + c] = 1.0
    return jnp.asarray(m)


# ------------------------------- wrapper --------------------------------------
def wrapped_model_gnn_forward(act_seq, buffers, params, cfg, *, bt=16, sub=8):
    horizon, action_dim = cfg["horizon"], cfg["action_dim"]
    N, R, C, H = (cfg["n_particle"], cfg["n_relation"],
                  cfg["num_classes"], cfg["hidden"])
    BH = bt * H
    G = bt * sub
    B = act_seq.shape[0]

    # act_seq.view(-1, horizon, action_dim) * action_norm   (glue)
    act = act_seq.reshape(B, horizon, action_dim).astype(jnp.float32) * jnp.asarray(
        cfg["action_norm"], jnp.float32)

    # pad the batch up to a multiple of the per-grid-step block G
    nb = max(1, -(-B // G))
    Bpad = nb * G
    if Bpad != B:
        act = jnp.concatenate(
            [act, jnp.zeros((Bpad - B, horizon, action_dim), jnp.float32)], 0)

    # merged action tensor: one (horizon, 4*bt) tile per sub-block,
    # lane layout: column 2*c + f for within-sub-block element c, feature f
    act4 = act.reshape(nb * sub, bt, horizon, action_dim)
    amove = jnp.transpose(act4[..., 0:2], (0, 2, 1, 3)).reshape(
        nb * sub, horizon, 2 * bt)
    atail = jnp.transpose(act4[..., 2:action_dim], (0, 2, 1, 3)).reshape(
        nb * sub, horizon, 2 * bt)
    act_packed = jnp.concatenate([amove, atail], axis=-1)    # (nb*sub, horizon, 4*bt)

    # batch-invariant buffers, tiled along the lane-batch
    known = buffers["known_input"][0]            # (N, 2)
    target = buffers["target_state"][0]
    init_state = buffers["initial_state"][0]
    Rr, Rs = buffers["Rr"][0], buffers["Rs"][0]
    mask = np.asarray(buffers["cls_mask"], np.float32)       # (N, C)
    # fused class cost requires a one-hot particle partition
    assert np.allclose(mask.sum(axis=1), 1.0), "cls_mask must partition particles"

    cls_w = np.array(
        [cfg["cost_weight"] if ((cfg["fix_others"] and i != 0) or
                                ((not cfg["fix_others"]) and i == 0)) else 1.0
         for i in range(C)], np.float32)
    wrow = jnp.asarray((mask * cls_w[None, :]).sum(axis=1)[None, :])   # (1, N)

    tgt_np = np.asarray(target, np.float32)
    ini_np = np.asarray(init_state, np.float32)
    ref_np = np.zeros((N, 2), np.float32)
    for i in range(C):
        ref_i = ini_np if (cfg["fix_others"] and i != 0) else tgt_np
        ref_np += mask[:, i:i + 1] * ref_i
    ref_comb = jnp.tile(jnp.asarray(ref_np), (1, bt))        # (N, 2*bt)

    curr_init = jnp.tile(known, (1, bt))                     # (N, 2*bt)
    rrs = jnp.concatenate([Rr, Rs], axis=0)                  # (2R, N)
    rrt = Rr.T                                               # (N, R), host-side transpose
    pair = _pair_sum_matrix(bt)                              # (2*bt, bt)
    place = _place_matrix(bt, sub)                           # (sub, bt, G)

    # block-diagonal (lane-batched) GNN weights, built once on the host (f32;
    # bf16 intentionally skipped: the 1e5 penalty factor amplifies rounding)
    p = params
    w1r = _block_diag_pair(p["A1"], p["A2"], bt, H)
    w1s = _block_diag_pair(p["A3"], p["A4"], bt, H)
    wb12 = _block_diag_pair(p["B1"], p["B2"], bt, H)
    we2 = _block_diag(p["We2"], bt)
    b3 = _block_diag(p["B3"], bt)
    wn2 = _block_diag(p["Wn2"], bt)
    be1 = jnp.tile(p["be1"], (1, bt))                        # (1, BT*H)
    be2 = jnp.tile(p["be2"], (1, bt))
    bn1 = jnp.tile(p["bn1"], (1, bt))
    bn2 = jnp.tile(p["bn2"], (1, bt))                        # (1, 2*BT)

    def _const_spec(shape):
        nd = len(shape)
        return pl.BlockSpec(shape, lambda g, nv, _nd=nd: (0,) * _nd)

    in_specs = [
        pl.BlockSpec((sub, horizon, 4 * bt), lambda g, nv: (g, 0, 0)),  # actions
        _const_spec((N, 2 * bt)), _const_spec((N, 2 * bt)), _const_spec((1, N)),
        _const_spec((2 * R, N)), _const_spec((N, R)),
        _const_spec((2 * bt, bt)), _const_spec((sub, bt, G)),
        _const_spec((4 * bt, BH)), _const_spec((4 * bt, BH)), _const_spec((4 * bt, BH)),
        _const_spec((BH, BH)), _const_spec((BH, BH)), _const_spec((BH, 2 * bt)),
        _const_spec((1, BH)), _const_spec((1, BH)), _const_spec((1, BH)),
        _const_spec((1, 2 * bt)),
    ]

    # rough cost hint for XLA's scheduler
    per_step_flops = 2 * ((2 * R) * N * (4 * bt)
                          + 2 * R * (4 * bt) * BH
                          + R * BH * BH
                          + N * R * BH
                          + N * (4 * bt) * BH + N * BH * BH
                          + N * BH * (2 * bt)
                          + N * (2 * bt) * bt + N * (2 * bt)
                          + (2 * bt) * bt + bt * G)
    flops = int(nb * sub * horizon * per_step_flops)
    n_valid = jnp.asarray([B], jnp.int32)
    inputs = (act_packed, curr_init, ref_comb, wrow, rrs, rrt, pair, place,
              w1r, w1s, wb12, we2, b3, wn2, be1, be2, bn1, bn2)
    bytes_accessed = int(sum(4 * int(x.size) for x in inputs) + 4 * nb * G + 4)

    out = pl.pallas_call(
        _make_kernel(cfg, bt, sub),
        out_shape=jax.ShapeDtypeStruct((nb, 1, G), jnp.float32),
        grid_spec=pltpu.PrefetchScalarGridSpec(
            num_scalar_prefetch=1,
            grid=(nb,),
            in_specs=in_specs,
            out_specs=pl.BlockSpec((1, 1, G), lambda g, nv: (g, 0, 0)),
        ),
        compiler_params=pltpu.CompilerParams(
            dimension_semantics=("parallel",),
            vmem_limit_bytes=32 * 1024 * 1024),
        cost_estimate=pl.CostEstimate(flops=flops, transcendentals=0,
                                      bytes_accessed=bytes_accessed),
    )(n_valid, *inputs)

    return out.reshape(Bpad, 1)[:B]              # (B, 1)


# ------------------------- pure-JAX reference ---------------------------------
def reference_forward(act_seq, buffers, params, cfg):
    horizon, action_dim = cfg["horizon"], cfg["action_dim"]
    B = act_seq.shape[0]
    act = act_seq.reshape(B, horizon, action_dim) * jnp.asarray(
        cfg["action_norm"], jnp.float32)
    known = buffers["known_input"][0]
    target = buffers["target_state"][0]
    init_st = buffers["initial_state"][0]
    Rr = buffers["Rr"][0]
    Rs = buffers["Rs"][0]
    masks = buffers["cls_mask"]
    close_dis = (cfg["obj_size"] + cfg["forbidden_radius"]) ** 2
    far_dis = (cfg["far_factor"] * cfg["obj_size"]) ** 2
    step_w = [(j + 1) / horizon for j in range(horizon)]
    p = params

    def step_cost(state):
        c = 0.0
        for i in range(cfg["num_classes"]):
            ref = init_st if (cfg["fix_others"] and i != 0) else target
            diff = state - ref
            if cfg["cost_norm"] == 2:
                pp = jnp.sum(diff * diff, axis=-1)
            else:
                pp = jnp.sum(jnp.abs(diff), axis=-1)
            cls_cost = jnp.sum(pp * masks[:, i])
            if (cfg["fix_others"] and i != 0) or ((not cfg["fix_others"]) and i == 0):
                cls_cost = cls_cost * cfg["cost_weight"]
            c = c + cls_cost
        return c

    def single(act_b):
        curr = known
        cost = 0.0
        penalty = 0.0
        for j in range(horizon):
            a_move = act_b[j:j + 1, 0:2]
            a_tail = act_b[j:j + 1, 2:action_dim]
            so = curr - a_move
            if cfg["forbidden"]:
                sqr = jnp.sum(so * so, axis=-1)
                min_sqr = jnp.min(sqr)
                penalty = (penalty + jnp.maximum(close_dis - min_sqr, 0.0)
                           + jnp.maximum(min_sqr - far_dis, 0.0))
            sd = so - a_tail
            recv_so, recv_sd = Rr @ so, Rr @ sd
            send_so, send_sd = Rs @ so, Rs @ sd
            e = jax.nn.relu(recv_so @ p["A1"] + recv_sd @ p["A2"]
                            + send_so @ p["A3"] + send_sd @ p["A4"] + p["be1"])
            e = jax.nn.relu(e @ p["We2"] + p["be2"])
            agg = Rr.T @ e
            h = jax.nn.relu(so @ p["B1"] + sd @ p["B2"] + agg @ p["B3"] + p["bn1"])
            delta = h @ p["Wn2"] + p["bn2"]
            curr = delta + curr
            cost = cost + step_cost(curr) * step_w[j]
        if cfg["only_final_cost"]:
            cost = step_cost(curr)
        return jnp.reshape(cost + penalty * PENALTY_FACTOR, (1,))

    return jax.vmap(single)(act)     # (B, 1)


# ------------------------------ init helpers ----------------------------------
def init_buffers(key, cfg):
    N, R = cfg["n_particle"], cfg["n_relation"]
    k1, k2, k3, k4, k5 = jax.random.split(key, 5)
    mask = np.zeros((N, cfg["num_classes"]), np.float32)
    for i, idx in enumerate(cfg["cls_idx"]):
        mask[np.asarray(idx), i] = 1.0
    return dict(
        known_input=jax.random.uniform(k1, (1, N, 2), jnp.float32),
        target_state=jax.random.uniform(k2, (1, N, 2), jnp.float32),
        initial_state=jax.random.uniform(k3, (1, N, 2), jnp.float32),
        Rr=jax.random.uniform(k4, (1, R, N), jnp.float32),
        Rs=jax.random.uniform(k5, (1, R, N), jnp.float32),
        cls_mask=jnp.asarray(mask),
    )


def init_params(key, H):
    keys = jax.random.split(key, 12)

    def w(k, shape, scale=0.3):
        return scale * jax.random.normal(k, shape, jnp.float32)

    return dict(
        A1=w(keys[0], (2, H)), A2=w(keys[1], (2, H)),
        A3=w(keys[2], (2, H)), A4=w(keys[3], (2, H)),
        be1=w(keys[4], (1, H), 0.1),
        We2=w(keys[5], (H, H), 0.2), be2=w(keys[6], (1, H), 0.1),
        B1=w(keys[7], (2, H)), B2=w(keys[8], (2, H)),
        B3=w(keys[9], (H, H), 0.2), bn1=w(keys[10], (1, H), 0.1),
        Wn2=w(keys[11], (H, 2), 0.2),
        bn2=jnp.zeros((1, 2), jnp.float32),
    )


# ---------------------------------- main ---------------------------------------
if __name__ == "__main__":
    cfg = CFG
    key = jax.random.PRNGKey(0)
    kb, kp, ka = jax.random.split(key, 3)

    buffers = init_buffers(kb, cfg)
    params = init_params(kp, cfg["hidden"])

    # B chosen so the G = bt*sub = 128 batch block gives >=2 "parallel" grid
    # steps (keeps both v7x TensorCores busy) and a padded tail (exercises the
    # scalar-prefetched valid-count + pl.when skip of dead sub-blocks).
    B = 200
    act_seq = 0.5 * jax.random.normal(
        ka, (B, cfg["horizon"] * cfg["action_dim"]), jnp.float32)

    out = jax.block_until_ready(
        wrapped_model_gnn_forward(act_seq, buffers, params, cfg, bt=16, sub=8))

    with jax.default_matmul_precision("highest"):
        ref = jax.block_until_ready(
            reference_forward(act_seq, buffers, params, cfg))

    # kernel matmuls run at default MXU precision; reference runs at "highest"
    np.testing.assert_allclose(np.asarray(out), np.asarray(ref),
                               rtol=2e-3, atol=1e-3)
    print("KERNEL_OK")
</pallas_src>

<mosaic_0001>
module attributes {stable_mosaic.version = 11 : i64} {
  func.func @kernel(%arg0: i32, %arg1: memref<1xi32, #tpu.memory_space<smem>>, %arg2: memref<8x4x64xf32, #tpu.memory_space<vmem>>, %arg3: memref<16x32xf32, #tpu.memory_space<vmem>>, %arg4: memref<16x32xf32, #tpu.memory_space<vmem>>, %arg5: memref<1x16xf32, #tpu.memory_space<vmem>>, %arg6: memref<128x16xf32, #tpu.memory_space<vmem>>, %arg7: memref<16x64xf32, #tpu.memory_space<vmem>>, %arg8: memref<32x16xf32, #tpu.memory_space<vmem>>, %arg9: memref<8x16x128xf32, #tpu.memory_space<vmem>>, %arg10: memref<64x512xf32, #tpu.memory_space<vmem>>, %arg11: memref<64x512xf32, #tpu.memory_space<vmem>>, %arg12: memref<64x512xf32, #tpu.memory_space<vmem>>, %arg13: memref<512x512xf32, #tpu.memory_space<vmem>>, %arg14: memref<512x512xf32, #tpu.memory_space<vmem>>, %arg15: memref<512x32xf32, #tpu.memory_space<vmem>>, %arg16: memref<1x512xf32, #tpu.memory_space<vmem>>, %arg17: memref<1x512xf32, #tpu.memory_space<vmem>>, %arg18: memref<1x512xf32, #tpu.memory_space<vmem>>, %arg19: memref<1x32xf32, #tpu.memory_space<vmem>>, %arg20: memref<1x1x128xf32, #tpu.memory_space<vmem>>) attributes {dimension_semantics = [#tpu.dimension_semantics<parallel>], iteration_bounds = array<i64: 2>, scalar_prefetch = 1 : i64, scratch_operands = 0 : i64, tpu.core_type = #tpu.core_type<tc>, window_params = [{transform_indices = @transform_0, window_bounds = array<i64: 8, 4, 64>}, {pipeline_mode = #tpu.pipeline_mode<synchronous>, transform_indices = @transform_1, window_bounds = array<i64: 16, 32>}, {pipeline_mode = #tpu.pipeline_mode<synchronous>, transform_indices = @transform_2, window_bounds = array<i64: 16, 32>}, {pipeline_mode = #tpu.pipeline_mode<synchronous>, transform_indices = @transform_3, window_bounds = array<i64: 1, 16>}, {pipeline_mode = #tpu.pipeline_mode<synchronous>, transform_indices = @transform_4, window_bounds = array<i64: 128, 16>}, {pipeline_mode = #tpu.pipeline_mode<synchronous>, transform_indices = @transform_5, window_bounds = array<i64: 16, 64>}, {pipeline_mode = #tpu.pipeline_mode<synchronous>, transform_indices = @transform_6, window_bounds = array<i64: 32, 16>}, {pipeline_mode = #tpu.pipeline_mode<synchronous>, transform_indices = @transform_7, window_bounds = array<i64: 8, 16, 128>}, {pipeline_mode = #tpu.pipeline_mode<synchronous>, transform_indices = @transform_8, window_bounds = array<i64: 64, 512>}, {pipeline_mode = #tpu.pipeline_mode<synchronous>, transform_indices = @transform_9, window_bounds = array<i64: 64, 512>}, {pipeline_mode = #tpu.pipeline_mode<synchronous>, transform_indices = @transform_10, window_bounds = array<i64: 64, 512>}, {pipeline_mode = #tpu.pipeline_mode<synchronous>, transform_indices = @transform_11, window_bounds = array<i64: 512, 512>}, {pipeline_mode = #tpu.pipeline_mode<synchronous>, transform_indices = @transform_12, window_bounds = array<i64: 512, 512>}, {pipeline_mode = #tpu.pipeline_mode<synchronous>, transform_indices = @transform_13, window_bounds = array<i64: 512, 32>}, {pipeline_mode = #tpu.pipeline_mode<synchronous>, transform_indices = @transform_14, window_bounds = array<i64: 1, 512>}, {pipeline_mode = #tpu.pipeline_mode<synchronous>, transform_indices = @transform_15, window_bounds = array<i64: 1, 512>}, {pipeline_mode = #tpu.pipeline_mode<synchronous>, transform_indices = @transform_16, window_bounds = array<i64: 1, 512>}, {pipeline_mode = #tpu.pipeline_mode<synchronous>, transform_indices = @transform_17, window_bounds = array<i64: 1, 32>}, {transform_indices = @transform_18, window_bounds = array<i64: 1, 1, 128>}]} {
    %cst = arith.constant 0.000000e+00 : f32
    %0 = vector.broadcast %cst : f32 to vector<1x128xf32>
    %c0 = arith.constant 0 : index
    %c0_0 = arith.constant 0 : index
    %c0_1 = arith.constant 0 : index
    %1 = vector.load %arg20[%c0, %c0_0, %c0_1] : memref<1x1x128xf32, #tpu.memory_space<vmem>>, vector<1x1x128xf32>
    %2 = vector.shape_cast %1 : vector<1x1x128xf32> to vector<1x128xf32>
    %3 = vector.shape_cast %0 : vector<1x128xf32> to vector<1x1x128xf32>
    tpu.vector_store %arg20[%c0, %c0_0, %c0_1], %3 {strides = array<i32>} : memref<1x1x128xf32, #tpu.memory_space<vmem>>, vector<1x1x128xf32>,
    %c0_2 = arith.constant 0 : index
    %4 = memref.load %arg1[%c0_2] : memref<1xi32, #tpu.memory_space<smem>>
    %c128_i32 = arith.constant 128 : i32
    %5 = arith.muli %arg0, %c128_i32 : i32
    %c0_i32 = arith.constant 0 : i32
    %c8_i32 = arith.constant 8 : i32
    %6 = arith.addi %c0_i32, %c8_i32 : i32
    %c1_i32 = arith.constant 1 : i32
    scf.for %arg21 = %c0_i32 to %6 step %c1_i32  : i32 {
      %c16_i32 = arith.constant 16 : i32
      %7 = arith.muli %arg21, %c16_i32 : i32
      %8 = arith.addi %5, %7 : i32
      %9 = arith.cmpi slt, %8, %4 : i32
      %10 = arith.extui %9 : i1 to i32
      %c0_i32_4 = arith.constant 0 : i32
      %11 = arith.cmpi ne, %10, %c0_i32_4 : i32
      scf.if %11 {
        %12 = arith.index_cast %arg21 : i32 to index
        %c0_5 = arith.constant 0 : index
        %c0_6 = arith.constant 0 : index
        %13 = vector.load %arg2[%12, %c0_5, %c0_6] : memref<8x4x64xf32, #tpu.memory_space<vmem>>, vector<1x4x64xf32>
        %14 = vector.shape_cast %13 : vector<1x4x64xf32> to vector<4x64xf32>
        %c0_7 = arith.constant 0 : index
        %c0_8 = arith.constant 0 : index
        %15 = vector.load %arg3[%c0_7, %c0_8] : memref<16x32xf32, #tpu.memory_space<vmem>>, vector<16x32xf32>
        %c0_9 = arith.constant 0 : index
        %c0_10 = arith.constant 0 : index
        %16 = vector.load %arg4[%c0_9, %c0_10] : memref<16x32xf32, #tpu.memory_space<vmem>>, vector<16x32xf32>
        %c0_11 = arith.constant 0 : index
        %c0_12 = arith.constant 0 : index
        %17 = vector.load %arg5[%c0_11, %c0_12] : memref<1x16xf32, #tpu.memory_space<vmem>>, vector<1x16xf32>
        %c0_13 = arith.constant 0 : index
        %c0_14 = arith.constant 0 : index
        %18 = vector.load %arg8[%c0_13, %c0_14] : memref<32x16xf32, #tpu.memory_space<vmem>>, vector<32x16xf32>
        %cst_15 = arith.constant 0.000000e+00 : f32
        %19 = vector.broadcast %cst_15 : f32 to vector<1x32xf32>
        %cst_16 = arith.constant 0.000000e+00 : f32
        %20 = vector.broadcast %cst_16 : f32 to vector<1x16xf32>
        %21 = vector.extract_strided_slice %14 {offsets = [0, 0], sizes = [1, 32], strides = [1, 1]} : vector<4x64xf32> to vector<1x32xf32>
        %22 = vector.extract_strided_slice %14 {offsets = [0, 32], sizes = [1, 32], strides = [1, 1]} : vector<4x64xf32> to vector<1x32xf32>
        %23 = vector.broadcast %21 : vector<1x32xf32> to vector<16x32xf32>
        %24 = arith.subf %15, %23 : vector<16x32xf32>
        %25 = arith.mulf %24, %24 : vector<16x32xf32>
        %cst_17 = arith.constant dense<0.000000e+00> : vector<16x16xf32>
        %26 = tpu.matmul %25, %18, %cst_17 {dimension_numbers = #tpu.dot_dimension_numbers<[1], [0], [0], [1], [0, 0, 1, 1], [], []>} : vector<16x32xf32>, vector<32x16xf32>, vector<16x16xf32> -> vector<16x16xf32>
        %cst_18 = arith.constant dense<0x7F800000> : vector<16xf32>
        %27 = vector.multi_reduction <minimumf>, %26, %cst_18 [0] : vector<16x16xf32> to vector<16xf32>
        %28 = vector.shape_cast %27 : vector<16xf32> to vector<1x16xf32>
        %cst_19 = arith.constant 2.500000e-03 : f32
        %29 = vector.broadcast %cst_19 : f32 to vector<1x16xf32>
        %30 = arith.subf %29, %28 : vector<1x16xf32>
        %cst_20 = arith.constant 0.000000e+00 : f32
        %31 = vector.broadcast %cst_20 : f32 to vector<1x16xf32>
        %32 = arith.maximumf %30, %31 : vector<1x16xf32>
        %33 = arith.addf %20, %32 : vector<1x16xf32>
        %cst_21 = arith.constant 6.250000e-02 : f32
        %34 = vector.broadcast %cst_21 : f32 to vector<1x16xf32>
        %35 = arith.subf %28, %34 : vector<1x16xf32>
        %cst_22 = arith.constant 0.000000e+00 : f32
        %36 = vector.broadcast %cst_22 : f32 to vector<1x16xf32>
        %37 = arith.maximumf %35, %36 : vector<1x16xf32>
        %38 = arith.addf %33, %37 : vector<1x16xf32>
        %39 = vector.broadcast %22 : vector<1x32xf32> to vector<16x32xf32>
        %40 = arith.subf %24, %39 : vector<16x32xf32>
        %41 = tpu.concatenate %24, %40 in 1 : vector<16x32xf32>, vector<16x32xf32> -> vector<16x64xf32>
        %c0_23 = arith.constant 0 : index
        %c0_24 = arith.constant 0 : index
        %42 = vector.load %arg6[%c0_23, %c0_24] : memref<128x16xf32, #tpu.memory_space<vmem>>, vector<128x16xf32>
        %cst_25 = arith.constant dense<0.000000e+00> : vector<128x64xf32>
        %43 = tpu.matmul %42, %41, %cst_25 {dimension_numbers = #tpu.dot_dimension_numbers<[1], [0], [0], [1], [0, 0, 1, 1], [], []>} : vector<128x16xf32>, vector<16x64xf32>, vector<128x64xf32> -> vector<128x64xf32>
        %44 = vector.extract_strided_slice %43 {offsets = [0, 0], sizes = [64, 64], strides = [1, 1]} : vector<128x64xf32> to vector<64x64xf32>
        %c0_26 = arith.constant 0 : index
        %c0_27 = arith.constant 0 : index
        %45 = vector.load %arg10[%c0_26, %c0_27] : memref<64x512xf32, #tpu.memory_space<vmem>>, vector<64x512xf32>
        %cst_28 = arith.constant dense<0.000000e+00> : vector<64x512xf32>
        %46 = tpu.matmul %44, %45, %cst_28 {dimension_numbers = #tpu.dot_dimension_numbers<[1], [0], [0], [1], [0, 0, 1, 1], [], []>} : vector<64x64xf32>, vector<64x512xf32>, vector<64x512xf32> -> vector<64x512xf32>
        %47 = vector.extract_strided_slice %43 {offsets = [64, 0], sizes = [64, 64], strides = [1, 1]} : vector<128x64xf32> to vector<64x64xf32>
        %c0_29 = arith.constant 0 : index
        %c0_30 = arith.constant 0 : index
        %48 = vector.load %arg11[%c0_29, %c0_30] : memref<64x512xf32, #tpu.memory_space<vmem>>, vector<64x512xf32>
        %cst_31 = arith.constant dense<0.000000e+00> : vector<64x512xf32>
        %49 = tpu.matmul %47, %48, %cst_31 {dimension_numbers = #tpu.dot_dimension_numbers<[1], [0], [0], [1], [0, 0, 1, 1], [], []>} : vector<64x64xf32>, vector<64x512xf32>, vector<64x512xf32> -> vector<64x512xf32>
        %50 = arith.addf %46, %49 : vector<64x512xf32>
        %c0_32 = arith.constant 0 : index
        %c0_33 = arith.constant 0 : index
        %51 = vector.load %arg16[%c0_32, %c0_33] : memref<1x512xf32, #tpu.memory_space<vmem>>, vector<1x512xf32>
        %52 = vector.broadcast %51 : vector<1x512xf32> to vector<64x512xf32>
        %53 = arith.addf %50, %52 : vector<64x512xf32>
        %cst_34 = arith.constant 0.000000e+00 : f32
        %54 = vector.broadcast %cst_34 : f32 to vector<64x512xf32>
        %55 = arith.maximumf %53, %54 : vector<64x512xf32>
        %c0_35 = arith.constant 0 : index
        %c0_36 = arith.constant 0 : index
        %56 = vector.load %arg13[%c0_35, %c0_36] : memref<512x512xf32, #tpu.memory_space<vmem>>, vector<512x512xf32>
        %cst_37 = arith.constant dense<0.000000e+00> : vector<64x512xf32>
        %57 = tpu.matmul %55, %56, %cst_37 {dimension_numbers = #tpu.dot_dimension_numbers<[1], [0], [0], [1], [0, 0, 1, 1], [], []>} : vector<64x512xf32>, vector<512x512xf32>, vector<64x512xf32> -> vector<64x512xf32>
        %c0_38 = arith.constant 0 : index
        %c0_39 = arith.constant 0 : index
        %58 = vector.load %arg17[%c0_38, %c0_39] : memref<1x512xf32, #tpu.memory_space<vmem>>, vector<1x512xf32>
        %59 = vector.broadcast %58 : vector<1x512xf32> to vector<64x512xf32>
        %60 = arith.addf %57, %59 : vector<64x512xf32>
        %cst_40 = arith.constant 0.000000e+00 : f32
        %61 = vector.broadcast %cst_40 : f32 to vector<64x512xf32>
        %62 = arith.maximumf %60, %61 : vector<64x512xf32>
        %c0_41 = arith.constant 0 : index
        %c0_42 = arith.constant 0 : index
        %63 = vector.load %arg7[%c0_41, %c0_42] : memref<16x64xf32, #tpu.memory_space<vmem>>, vector<16x64xf32>
        %cst_43 = arith.constant dense<0.000000e+00> : vector<16x512xf32>
        %64 = tpu.matmul %63, %62, %cst_43 {dimension_numbers = #tpu.dot_dimension_numbers<[1], [0], [0], [1], [0, 0, 1, 1], [], []>} : vector<16x64xf32>, vector<64x512xf32>, vector<16x512xf32> -> vector<16x512xf32>
        %c0_44 = arith.constant 0 : index
        %c0_45 = arith.constant 0 : index
        %65 = vector.load %arg12[%c0_44, %c0_45] : memref<64x512xf32, #tpu.memory_space<vmem>>, vector<64x512xf32>
        %cst_46 = arith.constant dense<0.000000e+00> : vector<16x512xf32>
        %66 = tpu.matmul %41, %65, %cst_46 {dimension_numbers = #tpu.dot_dimension_numbers<[1], [0], [0], [1], [0, 0, 1, 1], [], []>} : vector<16x64xf32>, vector<64x512xf32>, vector<16x512xf32> -> vector<16x512xf32>
        %c0_47 = arith.constant 0 : index
        %c0_48 = arith.constant 0 : index
        %67 = vector.load %arg14[%c0_47, %c0_48] : memref<512x512xf32, #tpu.memory_space<vmem>>, vector<512x512xf32>
        %cst_49 = arith.constant dense<0.000000e+00> : vector<16x512xf32>
        %68 = tpu.matmul %64, %67, %cst_49 {dimension_numbers = #tpu.dot_dimension_numbers<[1], [0], [0], [1], [0, 0, 1, 1], [], []>} : vector<16x512xf32>, vector<512x512xf32>, vector<16x512xf32> -> vector<16x512xf32>
        %69 = arith.addf %66, %68 : vector<16x512xf32>
        %c0_50 = arith.constant 0 : index
        %c0_51 = arith.constant 0 : index
        %70 = vector.load %arg18[%c0_50, %c0_51] : memref<1x512xf32, #tpu.memory_space<vmem>>, vector<1x512xf32>
        %71 = vector.broadcast %70 : vector<1x512xf32> to vector<16x512xf32>
        %72 = arith.addf %69, %71 : vector<16x512xf32>
        %cst_52 = arith.constant 0.000000e+00 : f32
        %73 = vector.broadcast %cst_52 : f32 to vector<16x512xf32>
        %74 = arith.maximumf %72, %73 : vector<16x512xf32>
        %c0_53 = arith.constant 0 : index
        %c0_54 = arith.constant 0 : index
        %75 = vector.load %arg15[%c0_53, %c0_54] : memref<512x32xf32, #tpu.memory_space<vmem>>, vector<512x32xf32>
        %cst_55 = arith.constant dense<0.000000e+00> : vector<16x32xf32>
        %76 = tpu.matmul %74, %75, %cst_55 {dimension_numbers = #tpu.dot_dimension_numbers<[1], [0], [0], [1], [0, 0, 1, 1], [], []>} : vector<16x512xf32>, vector<512x32xf32>, vector<16x32xf32> -> vector<16x32xf32>
        %c0_56 = arith.constant 0 : index
        %c0_57 = arith.constant 0 : index
        %77 = vector.load %arg19[%c0_56, %c0_57] : memref<1x32xf32, #tpu.memory_space<vmem>>, vector<1x32xf32>
        %78 = vector.broadcast %77 : vector<1x32xf32> to vector<16x32xf32>
        %79 = arith.addf %76, %78 : vector<16x32xf32>
        %80 = arith.addf %15, %79 : vector<16x32xf32>
        %81 = arith.subf %80, %16 : vector<16x32xf32>
        %82 = arith.mulf %81, %81 : vector<16x32xf32>
        %cst_58 = arith.constant dense<0.000000e+00> : vector<1x32xf32>
        %83 = tpu.matmul %17, %82, %cst_58 {dimension_numbers = #tpu.dot_dimension_numbers<[1], [0], [0], [1], [0, 0, 1, 1], [], []>} : vector<1x16xf32>, vector<16x32xf32>, vector<1x32xf32> -> vector<1x32xf32>
        %cst_59 = arith.constant 2.500000e-01 : f32
        %84 = vector.broadcast %cst_59 : f32 to vector<1x32xf32>
        %85 = arith.mulf %84, %83 : vector<1x32xf32>
        %86 = arith.addf %19, %85 : vector<1x32xf32>
        %87 = vector.extract_strided_slice %14 {offsets = [1, 0], sizes = [1, 32], strides = [1, 1]} : vector<4x64xf32> to vector<1x32xf32>
        %88 = vector.extract_strided_slice %14 {offsets = [1, 32], sizes = [1, 32], strides = [1, 1]} : vector<4x64xf32> to vector<1x32xf32>
        %89 = vector.broadcast %87 : vector<1x32xf32> to vector<16x32xf32>
        %90 = arith.subf %80, %89 : vector<16x32xf32>
        %91 = arith.mulf %90, %90 : vector<16x32xf32>
        %cst_60 = arith.constant dense<0.000000e+00> : vector<16x16xf32>
        %92 = tpu.matmul %91, %18, %cst_60 {dimension_numbers = #tpu.dot_dimension_numbers<[1], [0], [0], [1], [0, 0, 1, 1], [], []>} : vector<16x32xf32>, vector<32x16xf32>, vector<16x16xf32> -> vector<16x16xf32>
        %cst_61 = arith.constant dense<0x7F800000> : vector<16xf32>
        %93 = vector.multi_reduction <minimumf>, %92, %cst_61 [0] : vector<16x16xf32> to vector<16xf32>
        %94 = vector.shape_cast %93 : vector<16xf32> to vector<1x16xf32>
        %cst_62 = arith.constant 2.500000e-03 : f32
        %95 = vector.broadcast %cst_62 : f32 to vector<1x16xf32>
        %96 = arith.subf %95, %94 : vector<1x16xf32>
        %cst_63 = arith.constant 0.000000e+00 : f32
        %97 = vector.broadcast %cst_63 : f32 to vector<1x16xf32>
        %98 = arith.maximumf %96, %97 : vector<1x16xf32>
        %99 = arith.addf %38, %98 : vector<1x16xf32>
        %cst_64 = arith.constant 6.250000e-02 : f32
        %100 = vector.broadcast %cst_64 : f32 to vector<1x16xf32>
        %101 = arith.subf %94, %100 : vector<1x16xf32>
        %cst_65 = arith.constant 0.000000e+00 : f32
        %102 = vector.broadcast %cst_65 : f32 to vector<1x16xf32>
        %103 = arith.maximumf %101, %102 : vector<1x16xf32>
        %104 = arith.addf %99, %103 : vector<1x16xf32>
        %105 = vector.broadcast %88 : vector<1x32xf32> to vector<16x32xf32>
        %106 = arith.subf %90, %105 : vector<16x32xf32>
        %107 = tpu.concatenate %90, %106 in 1 : vector<16x32xf32>, vector<16x32xf32> -> vector<16x64xf32>
        %c0_66 = arith.constant 0 : index
        %c0_67 = arith.constant 0 : index
        %108 = vector.load %arg6[%c0_66, %c0_67] : memref<128x16xf32, #tpu.memory_space<vmem>>, vector<128x16xf32>
        %cst_68 = arith.constant dense<0.000000e+00> : vector<128x64xf32>
        %109 = tpu.matmul %108, %107, %cst_68 {dimension_numbers = #tpu.dot_dimension_numbers<[1], [0], [0], [1], [0, 0, 1, 1], [], []>} : vector<128x16xf32>, vector<16x64xf32>, vector<128x64xf32> -> vector<128x64xf32>
        %110 = vector.extract_strided_slice %109 {offsets = [0, 0], sizes = [64, 64], strides = [1, 1]} : vector<128x64xf32> to vector<64x64xf32>
        %c0_69 = arith.constant 0 : index
        %c0_70 = arith.constant 0 : index
        %111 = vector.load %arg10[%c0_69, %c0_70] : memref<64x512xf32, #tpu.memory_space<vmem>>, vector<64x512xf32>
        %cst_71 = arith.constant dense<0.000000e+00> : vector<64x512xf32>
        %112 = tpu.matmul %110, %111, %cst_71 {dimension_numbers = #tpu.dot_dimension_numbers<[1], [0], [0], [1], [0, 0, 1, 1], [], []>} : vector<64x64xf32>, vector<64x512xf32>, vector<64x512xf32> -> vector<64x512xf32>
        %113 = vector.extract_strided_slice %109 {offsets = [64, 0], sizes = [64, 64], strides = [1, 1]} : vector<128x64xf32> to vector<64x64xf32>
        %c0_72 = arith.constant 0 : index
        %c0_73 = arith.constant 0 : index
        %114 = vector.load %arg11[%c0_72, %c0_73] : memref<64x512xf32, #tpu.memory_space<vmem>>, vector<64x512xf32>
        %cst_74 = arith.constant dense<0.000000e+00> : vector<64x512xf32>
        %115 = tpu.matmul %113, %114, %cst_74 {dimension_numbers = #tpu.dot_dimension_numbers<[1], [0], [0], [1], [0, 0, 1, 1], [], []>} : vector<64x64xf32>, vector<64x512xf32>, vector<64x512xf32> -> vector<64x512xf32>
        %116 = arith.addf %112, %115 : vector<64x512xf32>
        %c0_75 = arith.constant 0 : index
        %c0_76 = arith.constant 0 : index
        %117 = vector.load %arg16[%c0_75, %c0_76] : memref<1x512xf32, #tpu.memory_space<vmem>>, vector<1x512xf32>
        %118 = vector.broadcast %117 : vector<1x512xf32> to vector<64x512xf32>
        %119 = arith.addf %116, %118 : vector<64x512xf32>
        %cst_77 = arith.constant 0.000000e+00 : f32
        %120 = vector.broadcast %cst_77 : f32 to vector<64x512xf32>
        %121 = arith.maximumf %119, %120 : vector<64x512xf32>
        %c0_78 = arith.constant 0 : index
        %c0_79 = arith.constant 0 : index
        %122 = vector.load %arg13[%c0_78, %c0_79] : memref<512x512xf32, #tpu.memory_space<vmem>>, vector<512x512xf32>
        %cst_80 = arith.constant dense<0.000000e+00> : vector<64x512xf32>
        %123 = tpu.matmul %121, %122, %cst_80 {dimension_numbers = #tpu.dot_dimension_numbers<[1], [0], [0], [1], [0, 0, 1, 1], [], []>} : vector<64x512xf32>, vector<512x512xf32>, vector<64x512xf32> -> vector<64x512xf32>
        %c0_81 = arith.constant 0 : index
        %c0_82 = arith.constant 0 : index
        %124 = vector.load %arg17[%c0_81, %c0_82] : memref<1x512xf32, #tpu.memory_space<vmem>>, vector<1x512xf32>
        %125 = vector.broadcast %124 : vector<1x512xf32> to vector<64x512xf32>
        %126 = arith.addf %123, %125 : vector<64x512xf32>
        %cst_83 = arith.constant 0.000000e+00 : f32
        %127 = vector.broadcast %cst_83 : f32 to vector<64x512xf32>
        %128 = arith.maximumf %126, %127 : vector<64x512xf32>
        %c0_84 = arith.constant 0 : index
        %c0_85 = arith.constant 0 : index
        %129 = vector.load %arg7[%c0_84, %c0_85] : memref<16x64xf32, #tpu.memory_space<vmem>>, vector<16x64xf32>
        %cst_86 = arith.constant dense<0.000000e+00> : vector<16x512xf32>
        %130 = tpu.matmul %129, %128, %cst_86 {dimension_numbers = #tpu.dot_dimension_numbers<[1], [0], [0], [1], [0, 0, 1, 1], [], []>} : vector<16x64xf32>, vector<64x512xf32>, vector<16x512xf32> -> vector<16x512xf32>
        %c0_87 = arith.constant 0 : index
        %c0_88 = arith.constant 0 : index
        %131 = vector.load %arg12[%c0_87, %c0_88] : memref<64x512xf32, #tpu.memory_space<vmem>>, vector<64x512xf32>
        %cst_89 = arith.constant dense<0.000000e+00> : vector<16x512xf32>
        %132 = tpu.matmul %107, %131, %cst_89 {dimension_numbers = #tpu.dot_dimension_numbers<[1], [0], [0], [1], [0, 0, 1, 1], [], []>} : vector<16x64xf32>, vector<64x512xf32>, vector<16x512xf32> -> vector<16x512xf32>
        %c0_90 = arith.constant 0 : index
        %c0_91 = arith.constant 0 : index
        %133 = vector.load %arg14[%c0_90, %c0_91] : memref<512x512xf32, #tpu.memory_space<vmem>>, vector<512x512xf32>
        %cst_92 = arith.constant dense<0.000000e+00> : vector<16x512xf32>
        %134 = tpu.matmul %130, %133, %cst_92 {dimension_numbers = #tpu.dot_dimension_numbers<[1], [0], [0], [1], [0, 0, 1, 1], [], []>} : vector<16x512xf32>, vector<512x512xf32>, vector<16x512xf32> -> vector<16x512xf32>
        %135 = arith.addf %132, %134 : vector<16x512xf32>
        %c0_93 = arith.constant 0 : index
        %c0_94 = arith.constant 0 : index
        %136 = vector.load %arg18[%c0_93, %c0_94] : memref<1x512xf32, #tpu.memory_space<vmem>>, vector<1x512xf32>
        %137 = vector.broadcast %136 : vector<1x512xf32> to vector<16x512xf32>
        %138 = arith.addf %135, %137 : vector<16x512xf32>
        %cst_95 = arith.constant 0.000000e+00 : f32
        %139 = vector.broadcast %cst_95 : f32 to vector<16x512xf32>
        %140 = arith.maximumf %138, %139 : vector<16x512xf32>
        %c0_96 = arith.constant 0 : index
        %c0_97 = arith.constant 0 : index
        %141 = vector.load %arg15[%c0_96, %c0_97] : memref<512x32xf32, #tpu.memory_space<vmem>>, vector<512x32xf32>
        %cst_98 = arith.constant dense<0.000000e+00> : vector<16x32xf32>
        %142 = tpu.matmul %140, %141, %cst_98 {dimension_numbers = #tpu.dot_dimension_numbers<[1], [0], [0], [1], [0, 0, 1, 1], [], []>} : vector<16x512xf32>, vector<512x32xf32>, vector<16x32xf32> -> vector<16x32xf32>
        %c0_99 = arith.constant 0 : index
        %c0_100 = arith.constant 0 : index
        %143 = vector.load %arg19[%c0_99, %c0_100] : memref<1x32xf32, #tpu.memory_space<vmem>>, vector<1x32xf32>
        %144 = vector.broadcast %143 : vector<1x32xf32> to vector<16x32xf32>
        %145 = arith.addf %142, %144 : vector<16x32xf32>
        %146 = arith.addf %80, %145 : vector<16x32xf32>
        %147 = arith.subf %146, %16 : vector<16x32xf32>
        %148 = arith.mulf %147, %147 : vector<16x32xf32>
        %cst_101 = arith.constant dense<0.000000e+00> : vector<1x32xf32>
        %149 = tpu.matmul %17, %148, %cst_101 {dimension_numbers = #tpu.dot_dimension_numbers<[1], [0], [0], [1], [0, 0, 1, 1], [], []>} : vector<1x16xf32>, vector<16x32xf32>, vector<1x32xf32> -> vector<1x32xf32>
        %cst_102 = arith.constant 5.000000e-01 : f32
        %150 = vector.broadcast %cst_102 : f32 to vector<1x32xf32>
        %151 = arith.mulf %150, %149 : vector<1x32xf32>
        %152 = arith.addf %86, %151 : vector<1x32xf32>
        %153 = vector.extract_strided_slice %14 {offsets = [2, 0], sizes = [1, 32], strides = [1, 1]} : vector<4x64xf32> to vector<1x32xf32>
        %154 = vector.extract_strided_slice %14 {offsets = [2, 32], sizes = [1, 32], strides = [1, 1]} : vector<4x64xf32> to vector<1x32xf32>
        %155 = vector.broadcast %153 : vector<1x32xf32> to vector<16x32xf32>
        %156 = arith.subf %146, %155 : vector<16x32xf32>
        %157 = arith.mulf %156, %156 : vector<16x32xf32>
        %cst_103 = arith.constant dense<0.000000e+00> : vector<16x16xf32>
        %158 = tpu.matmul %157, %18, %cst_103 {dimension_numbers = #tpu.dot_dimension_numbers<[1], [0], [0], [1], [0, 0, 1, 1], [], []>} : vector<16x32xf32>, vector<32x16xf32>, vector<16x16xf32> -> vector<16x16xf32>
        %cst_104 = arith.constant dense<0x7F800000> : vector<16xf32>
        %159 = vector.multi_reduction <minimumf>, %158, %cst_104 [0] : vector<16x16xf32> to vector<16xf32>
        %160 = vector.shape_cast %159 : vector<16xf32> to vector<1x16xf32>
        %cst_105 = arith.constant 2.500000e-03 : f32
        %161 = vector.broadcast %cst_105 : f32 to vector<1x16xf32>
        %162 = arith.subf %161, %160 : vector<1x16xf32>
        %cst_106 = arith.constant 0.000000e+00 : f32
        %163 = vector.broadcast %cst_106 : f32 to vector<1x16xf32>
        %164 = arith.maximumf %162, %163 : vector<1x16xf32>
        %165 = arith.addf %104, %164 : vector<1x16xf32>
        %cst_107 = arith.constant 6.250000e-02 : f32
        %166 = vector.broadcast %cst_107 : f32 to vector<1x16xf32>
        %167 = arith.subf %160, %166 : vector<1x16xf32>
        %cst_108 = arith.constant 0.000000e+00 : f32
        %168 = vector.broadcast %cst_108 : f32 to vector<1x16xf32>
        %169 = arith.maximumf %167, %168 : vector<1x16xf32>
        %170 = arith.addf %165, %169 : vector<1x16xf32>
        %171 = vector.broadcast %154 : vector<1x32xf32> to vector<16x32xf32>
        %172 = arith.subf %156, %171 : vector<16x32xf32>
        %173 = tpu.concatenate %156, %172 in 1 : vector<16x32xf32>, vector<16x32xf32> -> vector<16x64xf32>
        %c0_109 = arith.constant 0 : index
        %c0_110 = arith.constant 0 : index
        %174 = vector.load %arg6[%c0_109, %c0_110] : memref<128x16xf32, #tpu.memory_space<vmem>>, vector<128x16xf32>
        %cst_111 = arith.constant dense<0.000000e+00> : vector<128x64xf32>
        %175 = tpu.matmul %174, %173, %cst_111 {dimension_numbers = #tpu.dot_dimension_numbers<[1], [0], [0], [1], [0, 0, 1, 1], [], []>} : vector<128x16xf32>, vector<16x64xf32>, vector<128x64xf32> -> vector<128x64xf32>
        %176 = vector.extract_strided_slice %175 {offsets = [0, 0], sizes = [64, 64], strides = [1, 1]} : vector<128x64xf32> to vector<64x64xf32>
        %c0_112 = arith.constant 0 : index
        %c0_113 = arith.constant 0 : index
        %177 = vector.load %arg10[%c0_112, %c0_113] : memref<64x512xf32, #tpu.memory_space<vmem>>, vector<64x512xf32>
        %cst_114 = arith.constant dense<0.000000e+00> : vector<64x512xf32>
        %178 = tpu.matmul %176, %177, %cst_114 {dimension_numbers = #tpu.dot_dimension_numbers<[1], [0], [0], [1], [0, 0, 1, 1], [], []>} : vector<64x64xf32>, vector<64x512xf32>, vector<64x512xf32> -> vector<64x512xf32>
        %179 = vector.extract_strided_slice %175 {offsets = [64, 0], sizes = [64, 64], strides = [1, 1]} : vector<128x64xf32> to vector<64x64xf32>
        %c0_115 = arith.constant 0 : index
        %c0_116 = arith.constant 0 : index
        %180 = vector.load %arg11[%c0_115, %c0_116] : memref<64x512xf32, #tpu.memory_space<vmem>>, vector<64x512xf32>
        %cst_117 = arith.constant dense<0.000000e+00> : vector<64x512xf32>
        %181 = tpu.matmul %179, %180, %cst_117 {dimension_numbers = #tpu.dot_dimension_numbers<[1], [0], [0], [1], [0, 0, 1, 1], [], []>} : vector<64x64xf32>, vector<64x512xf32>, vector<64x512xf32> -> vector<64x512xf32>
        %182 = arith.addf %178, %181 : vector<64x512xf32>
        %c0_118 = arith.constant 0 : index
        %c0_119 = arith.constant 0 : index
        %183 = vector.load %arg16[%c0_118, %c0_119] : memref<1x512xf32, #tpu.memory_space<vmem>>, vector<1x512xf32>
        %184 = vector.broadcast %183 : vector<1x512xf32> to vector<64x512xf32>
        %185 = arith.addf %182, %184 : vector<64x512xf32>
        %cst_120 = arith.constant 0.000000e+00 : f32
        %186 = vector.broadcast %cst_120 : f32 to vector<64x512xf32>
        %187 = arith.maximumf %185, %186 : vector<64x512xf32>
        %c0_121 = arith.constant 0 : index
        %c0_122 = arith.constant 0 : index
        %188 = vector.load %arg13[%c0_121, %c0_122] : memref<512x512xf32, #tpu.memory_space<vmem>>, vector<512x512xf32>
        %cst_123 = arith.constant dense<0.000000e+00> : vector<64x512xf32>
        %189 = tpu.matmul %187, %188, %cst_123 {dimension_numbers = #tpu.dot_dimension_numbers<[1], [0], [0], [1], [0, 0, 1, 1], [], []>} : vector<64x512xf32>, vector<512x512xf32>, vector<64x512xf32> -> vector<64x512xf32>
        %c0_124 = arith.constant 0 : index
        %c0_125 = arith.constant 0 : index
        %190 = vector.load %arg17[%c0_124, %c0_125] : memref<1x512xf32, #tpu.memory_space<vmem>>, vector<1x512xf32>
        %191 = vector.broadcast %190 : vector<1x512xf32> to vector<64x512xf32>
        %192 = arith.addf %189, %191 : vector<64x512xf32>
        %cst_126 = arith.constant 0.000000e+00 : f32
        %193 = vector.broadcast %cst_126 : f32 to vector<64x512xf32>
        %194 = arith.maximumf %192, %193 : vector<64x512xf32>
        %c0_127 = arith.constant 0 : index
        %c0_128 = arith.constant 0 : index
        %195 = vector.load %arg7[%c0_127, %c0_128] : memref<16x64xf32, #tpu.memory_space<vmem>>, vector<16x64xf32>
        %cst_129 = arith.constant dense<0.000000e+00> : vector<16x512xf32>
        %196 = tpu.matmul %195, %194, %cst_129 {dimension_numbers = #tpu.dot_dimension_numbers<[1], [0], [0], [1], [0, 0, 1, 1], [], []>} : vector<16x64xf32>, vector<64x512xf32>, vector<16x512xf32> -> vector<16x512xf32>
        %c0_130 = arith.constant 0 : index
        %c0_131 = arith.constant 0 : index
        %197 = vector.load %arg12[%c0_130, %c0_131] : memref<64x512xf32, #tpu.memory_space<vmem>>, vector<64x512xf32>
        %cst_132 = arith.constant dense<0.000000e+00> : vector<16x512xf32>
        %198 = tpu.matmul %173, %197, %cst_132 {dimension_numbers = #tpu.dot_dimension_numbers<[1], [0], [0], [1], [0, 0, 1, 1], [], []>} : vector<16x64xf32>, vector<64x512xf32>, vector<16x512xf32> -> vector<16x512xf32>
        %c0_133 = arith.constant 0 : index
        %c0_134 = arith.constant 0 : index
        %199 = vector.load %arg14[%c0_133, %c0_134] : memref<512x512xf32, #tpu.memory_space<vmem>>, vector<512x512xf32>
        %cst_135 = arith.constant dense<0.000000e+00> : vector<16x512xf32>
        %200 = tpu.matmul %196, %199, %cst_135 {dimension_numbers = #tpu.dot_dimension_numbers<[1], [0], [0], [1], [0, 0, 1, 1], [], []>} : vector<16x512xf32>, vector<512x512xf32>, vector<16x512xf32> -> vector<16x512xf32>
        %201 = arith.addf %198, %200 : vector<16x512xf32>
        %c0_136 = arith.constant 0 : index
        %c0_137 = arith.constant 0 : index
        %202 = vector.load %arg18[%c0_136, %c0_137] : memref<1x512xf32, #tpu.memory_space<vmem>>, vector<1x512xf32>
        %203 = vector.broadcast %202 : vector<1x512xf32> to vector<16x512xf32>
        %204 = arith.addf %201, %203 : vector<16x512xf32>
        %cst_138 = arith.constant 0.000000e+00 : f32
        %205 = vector.broadcast %cst_138 : f32 to vector<16x512xf32>
        %206 = arith.maximumf %204, %205 : vector<16x512xf32>
        %c0_139 = arith.constant 0 : index
        %c0_140 = arith.constant 0 : index
        %207 = vector.load %arg15[%c0_139, %c0_140] : memref<512x32xf32, #tpu.memory_space<vmem>>, vector<512x32xf32>
        %cst_141 = arith.constant dense<0.000000e+00> : vector<16x32xf32>
        %208 = tpu.matmul %206, %207, %cst_141 {dimension_numbers = #tpu.dot_dimension_numbers<[1], [0], [0], [1], [0, 0, 1, 1], [], []>} : vector<16x512xf32>, vector<512x32xf32>, vector<16x32xf32> -> vector<16x32xf32>
        %c0_142 = arith.constant 0 : index
        %c0_143 = arith.constant 0 : index
        %209 = vector.load %arg19[%c0_142, %c0_143] : memref<1x32xf32, #tpu.memory_space<vmem>>, vector<1x32xf32>
        %210 = vector.broadcast %209 : vector<1x32xf32> to vector<16x32xf32>
        %211 = arith.addf %208, %210 : vector<16x32xf32>
        %212 = arith.addf %146, %211 : vector<16x32xf32>
        %213 = arith.subf %212, %16 : vector<16x32xf32>
        %214 = arith.mulf %213, %213 : vector<16x32xf32>
        %cst_144 = arith.constant dense<0.000000e+00> : vector<1x32xf32>
        %215 = tpu.matmul %17, %214, %cst_144 {dimension_numbers = #tpu.dot_dimension_numbers<[1], [0], [0], [1], [0, 0, 1, 1], [], []>} : vector<1x16xf32>, vector<16x32xf32>, vector<1x32xf32> -> vector<1x32xf32>
        %cst_145 = arith.constant 7.500000e-01 : f32
        %216 = vector.broadcast %cst_145 : f32 to vector<1x32xf32>
        %217 = arith.mulf %216, %215 : vector<1x32xf32>
        %218 = arith.addf %152, %217 : vector<1x32xf32>
        %219 = vector.extract_strided_slice %14 {offsets = [3, 0], sizes = [1, 32], strides = [1, 1]} : vector<4x64xf32> to vector<1x32xf32>
        %220 = vector.extract_strided_slice %14 {offsets = [3, 32], sizes = [1, 32], strides = [1, 1]} : vector<4x64xf32> to vector<1x32xf32>
        %221 = vector.broadcast %219 : vector<1x32xf32> to vector<16x32xf32>
        %222 = arith.subf %212, %221 : vector<16x32xf32>
        %223 = arith.mulf %222, %222 : vector<16x32xf32>
        %cst_146 = arith.constant dense<0.000000e+00> : vector<16x16xf32>
        %224 = tpu.matmul %223, %18, %cst_146 {dimension_numbers = #tpu.dot_dimension_numbers<[1], [0], [0], [1], [0, 0, 1, 1], [], []>} : vector<16x32xf32>, vector<32x16xf32>, vector<16x16xf32> -> vector<16x16xf32>
        %cst_147 = arith.constant dense<0x7F800000> : vector<16xf32>
        %225 = vector.multi_reduction <minimumf>, %224, %cst_147 [0] : vector<16x16xf32> to vector<16xf32>
        %226 = vector.shape_cast %225 : vector<16xf32> to vector<1x16xf32>
        %cst_148 = arith.constant 2.500000e-03 : f32
        %227 = vector.broadcast %cst_148 : f32 to vector<1x16xf32>
        %228 = arith.subf %227, %226 : vector<1x16xf32>
        %cst_149 = arith.constant 0.000000e+00 : f32
        %229 = vector.broadcast %cst_149 : f32 to vector<1x16xf32>
        %230 = arith.maximumf %228, %229 : vector<1x16xf32>
        %231 = arith.addf %170, %230 : vector<1x16xf32>
        %cst_150 = arith.constant 6.250000e-02 : f32
        %232 = vector.broadcast %cst_150 : f32 to vector<1x16xf32>
        %233 = arith.subf %226, %232 : vector<1x16xf32>
        %cst_151 = arith.constant 0.000000e+00 : f32
        %234 = vector.broadcast %cst_151 : f32 to vector<1x16xf32>
        %235 = arith.maximumf %233, %234 : vector<1x16xf32>
        %236 = arith.addf %231, %235 : vector<1x16xf32>
        %237 = vector.broadcast %220 : vector<1x32xf32> to vector<16x32xf32>
        %238 = arith.subf %222, %237 : vector<16x32xf32>
        %239 = tpu.concatenate %222, %238 in 1 : vector<16x32xf32>, vector<16x32xf32> -> vector<16x64xf32>
        %c0_152 = arith.constant 0 : index
        %c0_153 = arith.constant 0 : index
        %240 = vector.load %arg6[%c0_152, %c0_153] : memref<128x16xf32, #tpu.memory_space<vmem>>, vector<128x16xf32>
        %cst_154 = arith.constant dense<0.000000e+00> : vector<128x64xf32>
        %241 = tpu.matmul %240, %239, %cst_154 {dimension_numbers = #tpu.dot_dimension_numbers<[1], [0], [0], [1], [0, 0, 1, 1], [], []>} : vector<128x16xf32>, vector<16x64xf32>, vector<128x64xf32> -> vector<128x64xf32>
        %242 = vector.extract_strided_slice %241 {offsets = [0, 0], sizes = [64, 64], strides = [1, 1]} : vector<128x64xf32> to vector<64x64xf32>
        %c0_155 = arith.constant 0 : index
        %c0_156 = arith.constant 0 : index
        %243 = vector.load %arg10[%c0_155, %c0_156] : memref<64x512xf32, #tpu.memory_space<vmem>>, vector<64x512xf32>
        %cst_157 = arith.constant dense<0.000000e+00> : vector<64x512xf32>
        %244 = tpu.matmul %242, %243, %cst_157 {dimension_numbers = #tpu.dot_dimension_numbers<[1], [0], [0], [1], [0, 0, 1, 1], [], []>} : vector<64x64xf32>, vector<64x512xf32>, vector<64x512xf32> -> vector<64x512xf32>
        %245 = vector.extract_strided_slice %241 {offsets = [64, 0], sizes = [64, 64], strides = [1, 1]} : vector<128x64xf32> to vector<64x64xf32>
        %c0_158 = arith.constant 0 : index
        %c0_159 = arith.constant 0 : index
        %246 = vector.load %arg11[%c0_158, %c0_159] : memref<64x512xf32, #tpu.memory_space<vmem>>, vector<64x512xf32>
        %cst_160 = arith.constant dense<0.000000e+00> : vector<64x512xf32>
        %247 = tpu.matmul %245, %246, %cst_160 {dimension_numbers = #tpu.dot_dimension_numbers<[1], [0], [0], [1], [0, 0, 1, 1], [], []>} : vector<64x64xf32>, vector<64x512xf32>, vector<64x512xf32> -> vector<64x512xf32>
        %248 = arith.addf %244, %247 : vector<64x512xf32>
        %c0_161 = arith.constant 0 : index
        %c0_162 = arith.constant 0 : index
        %249 = vector.load %arg16[%c0_161, %c0_162] : memref<1x512xf32, #tpu.memory_space<vmem>>, vector<1x512xf32>
        %250 = vector.broadcast %249 : vector<1x512xf32> to vector<64x512xf32>
        %251 = arith.addf %248, %250 : vector<64x512xf32>
        %cst_163 = arith.constant 0.000000e+00 : f32
        %252 = vector.broadcast %cst_163 : f32 to vector<64x512xf32>
        %253 = arith.maximumf %251, %252 : vector<64x512xf32>
        %c0_164 = arith.constant 0 : index
        %c0_165 = arith.constant 0 : index
        %254 = vector.load %arg13[%c0_164, %c0_165] : memref<512x512xf32, #tpu.memory_space<vmem>>, vector<512x512xf32>
        %cst_166 = arith.constant dense<0.000000e+00> : vector<64x512xf32>
        %255 = tpu.matmul %253, %254, %cst_166 {dimension_numbers = #tpu.dot_dimension_numbers<[1], [0], [0], [1], [0, 0, 1, 1], [], []>} : vector<64x512xf32>, vector<512x512xf32>, vector<64x512xf32> -> vector<64x512xf32>
        %c0_167 = arith.constant 0 : index
        %c0_168 = arith.constant 0 : index
        %256 = vector.load %arg17[%c0_167, %c0_168] : memref<1x512xf32, #tpu.memory_space<vmem>>, vector<1x512xf32>
        %257 = vector.broadcast %256 : vector<1x512xf32> to vector<64x512xf32>
        %258 = arith.addf %255, %257 : vector<64x512xf32>
        %cst_169 = arith.constant 0.000000e+00 : f32
        %259 = vector.broadcast %cst_169 : f32 to vector<64x512xf32>
        %260 = arith.maximumf %258, %259 : vector<64x512xf32>
        %c0_170 = arith.constant 0 : index
        %c0_171 = arith.constant 0 : index
        %261 = vector.load %arg7[%c0_170, %c0_171] : memref<16x64xf32, #tpu.memory_space<vmem>>, vector<16x64xf32>
        %cst_172 = arith.constant dense<0.000000e+00> : vector<16x512xf32>
        %262 = tpu.matmul %261, %260, %cst_172 {dimension_numbers = #tpu.dot_dimension_numbers<[1], [0], [0], [1], [0, 0, 1, 1], [], []>} : vector<16x64xf32>, vector<64x512xf32>, vector<16x512xf32> -> vector<16x512xf32>
        %c0_173 = arith.constant 0 : index
        %c0_174 = arith.constant 0 : index
        %263 = vector.load %arg12[%c0_173, %c0_174] : memref<64x512xf32, #tpu.memory_space<vmem>>, vector<64x512xf32>
        %cst_175 = arith.constant dense<0.000000e+00> : vector<16x512xf32>
        %264 = tpu.matmul %239, %263, %cst_175 {dimension_numbers = #tpu.dot_dimension_numbers<[1], [0], [0], [1], [0, 0, 1, 1], [], []>} : vector<16x64xf32>, vector<64x512xf32>, vector<16x512xf32> -> vector<16x512xf32>
        %c0_176 = arith.constant 0 : index
        %c0_177 = arith.constant 0 : index
        %265 = vector.load %arg14[%c0_176, %c0_177] : memref<512x512xf32, #tpu.memory_space<vmem>>, vector<512x512xf32>
        %cst_178 = arith.constant dense<0.000000e+00> : vector<16x512xf32>
        %266 = tpu.matmul %262, %265, %cst_178 {dimension_numbers = #tpu.dot_dimension_numbers<[1], [0], [0], [1], [0, 0, 1, 1], [], []>} : vector<16x512xf32>, vector<512x512xf32>, vector<16x512xf32> -> vector<16x512xf32>
        %267 = arith.addf %264, %266 : vector<16x512xf32>
        %c0_179 = arith.constant 0 : index
        %c0_180 = arith.constant 0 : index
        %268 = vector.load %arg18[%c0_179, %c0_180] : memref<1x512xf32, #tpu.memory_space<vmem>>, vector<1x512xf32>
        %269 = vector.broadcast %268 : vector<1x512xf32> to vector<16x512xf32>
        %270 = arith.addf %267, %269 : vector<16x512xf32>
        %cst_181 = arith.constant 0.000000e+00 : f32
        %271 = vector.broadcast %cst_181 : f32 to vector<16x512xf32>
        %272 = arith.maximumf %270, %271 : vector<16x512xf32>
        %c0_182 = arith.constant 0 : index
        %c0_183 = arith.constant 0 : index
        %273 = vector.load %arg15[%c0_182, %c0_183] : memref<512x32xf32, #tpu.memory_space<vmem>>, vector<512x32xf32>
        %cst_184 = arith.constant dense<0.000000e+00> : vector<16x32xf32>
        %274 = tpu.matmul %272, %273, %cst_184 {dimension_numbers = #tpu.dot_dimension_numbers<[1], [0], [0], [1], [0, 0, 1, 1], [], []>} : vector<16x512xf32>, vector<512x32xf32>, vector<16x32xf32> -> vector<16x32xf32>
        %c0_185 = arith.constant 0 : index
        %c0_186 = arith.constant 0 : index
        %275 = vector.load %arg19[%c0_185, %c0_186] : memref<1x32xf32, #tpu.memory_space<vmem>>, vector<1x32xf32>
        %276 = vector.broadcast %275 : vector<1x32xf32> to vector<16x32xf32>
        %277 = arith.addf %274, %276 : vector<16x32xf32>
        %278 = arith.addf %212, %277 : vector<16x32xf32>
        %279 = arith.subf %278, %16 : vector<16x32xf32>
        %280 = arith.mulf %279, %279 : vector<16x32xf32>
        %cst_187 = arith.constant dense<0.000000e+00> : vector<1x32xf32>
        %281 = tpu.matmul %17, %280, %cst_187 {dimension_numbers = #tpu.dot_dimension_numbers<[1], [0], [0], [1], [0, 0, 1, 1], [], []>} : vector<1x16xf32>, vector<16x32xf32>, vector<1x32xf32> -> vector<1x32xf32>
        %cst_188 = arith.constant 1.000000e+00 : f32
        %282 = vector.broadcast %cst_188 : f32 to vector<1x32xf32>
        %283 = arith.mulf %282, %281 : vector<1x32xf32>
        %284 = arith.addf %218, %283 : vector<1x32xf32>
        %cst_189 = arith.constant dense<0.000000e+00> : vector<1x16xf32>
        %285 = tpu.matmul %284, %18, %cst_189 {dimension_numbers = #tpu.dot_dimension_numbers<[1], [0], [0], [1], [0, 0, 1, 1], [], []>} : vector<1x32xf32>, vector<32x16xf32>, vector<1x16xf32> -> vector<1x16xf32>
        %cst_190 = arith.constant 1.000000e+05 : f32
        %286 = vector.broadcast %cst_190 : f32 to vector<1x16xf32>
        %287 = arith.mulf %236, %286 : vector<1x16xf32>
        %288 = arith.addf %285, %287 : vector<1x16xf32>
        %c0_191 = arith.constant 0 : index
        %c0_192 = arith.constant 0 : index
        %c0_193 = arith.constant 0 : index
        %289 = vector.load %arg20[%c0_191, %c0_192, %c0_193] : memref<1x1x128xf32, #tpu.memory_space<vmem>>, vector<1x1x128xf32>
        %290 = vector.shape_cast %289 : vector<1x1x128xf32> to vector<1x128xf32>
        %291 = arith.index_cast %arg21 : i32 to index
        %c0_194 = arith.constant 0 : index
        %c0_195 = arith.constant 0 : index
        %292 = vector.load %arg9[%291, %c0_194, %c0_195] : memref<8x16x128xf32, #tpu.memory_space<vmem>>, vector<1x16x128xf32>
        %293 = vector.shape_cast %292 : vector<1x16x128xf32> to vector<16x128xf32>
        %cst_196 = arith.constant dense<0.000000e+00> : vector<1x128xf32>
        %294 = tpu.matmul %288, %293, %cst_196 {dimension_numbers = #tpu.dot_dimension_numbers<[1], [0], [0], [1], [0, 0, 1, 1], [], []>} : vector<1x16xf32>, vector<16x128xf32>, vector<1x128xf32> -> vector<1x128xf32>
        %295 = arith.addf %290, %294 : vector<1x128xf32>
        %c0_197 = arith.constant 0 : index
        %c0_198 = arith.constant 0 : index
        %c0_199 = arith.constant 0 : index
        %296 = vector.load %arg20[%c0_197, %c0_198, %c0_199] : memref<1x1x128xf32, #tpu.memory_space<vmem>>, vector<1x1x128xf32>
        %297 = vector.shape_cast %296 : vector<1x1x128xf32> to vector<1x128xf32>
        %298 = vector.shape_cast %295 : vector<1x128xf32> to vector<1x1x128xf32>
        tpu.vector_store %arg20[%c0_197, %c0_198, %c0_199], %298 {strides = array<i32>} : memref<1x1x128xf32, #tpu.memory_space<vmem>>, vector<1x1x128xf32>,
      } else {
      }
    }
    %c8_i32_3 = arith.constant 8 : i32
    return
  }
  func.func @transform_0(%arg0: i32, %arg1: memref<1xi32, #tpu.memory_space<smem>>) -> (i32, i32, i32) {
    %c0_i32 = arith.constant 0 : i32
    %c0_i32_0 = arith.constant 0 : i32
    %c0_i32_1 = arith.constant 0 : i32
    return %arg0, %c0_i32, %c0_i32_0 : i32, i32, i32
  }
  func.func @transform_1(%arg0: i32, %arg1: memref<1xi32, #tpu.memory_space<smem>>) -> (i32, i32) {
    %c0_i32 = arith.constant 0 : i32
    %c0_i32_0 = arith.constant 0 : i32
    %c0_i32_1 = arith.constant 0 : i32
    return %c0_i32, %c0_i32_0 : i32, i32
  }
  func.func @transform_2(%arg0: i32, %arg1: memref<1xi32, #tpu.memory_space<smem>>) -> (i32, i32) {
    %c0_i32 = arith.constant 0 : i32
    %c0_i32_0 = arith.constant 0 : i32
    %c0_i32_1 = arith.constant 0 : i32
    return %c0_i32, %c0_i32_0 : i32, i32
  }
  func.func @transform_3(%arg0: i32, %arg1: memref<1xi32, #tpu.memory_space<smem>>) -> (i32, i32) {
    %c0_i32 = arith.constant 0 : i32
    %c0_i32_0 = arith.constant 0 : i32
    %c0_i32_1 = arith.constant 0 : i32
    return %c0_i32, %c0_i32_0 : i32, i32
  }
  func.func @transform_4(%arg0: i32, %arg1: memref<1xi32, #tpu.memory_space<smem>>) -> (i32, i32) {
    %c0_i32 = arith.constant 0 : i32
    %c0_i32_0 = arith.constant 0 : i32
    %c0_i32_1 = arith.constant 0 : i32
    return %c0_i32, %c0_i32_0 : i32, i32
  }
  func.func @transform_5(%arg0: i32, %arg1: memref<1xi32, #tpu.memory_space<smem>>) -> (i32, i32) {
    %c0_i32 = arith.constant 0 : i32
    %c0_i32_0 = arith.constant 0 : i32
    %c0_i32_1 = arith.constant 0 : i32
    return %c0_i32, %c0_i32_0 : i32, i32
  }
  func.func @transform_6(%arg0: i32, %arg1: memref<1xi32, #tpu.memory_space<smem>>) -> (i32, i32) {
    %c0_i32 = arith.constant 0 : i32
    %c0_i32_0 = arith.constant 0 : i32
    %c0_i32_1 = arith.constant 0 : i32
    return %c0_i32, %c0_i32_0 : i32, i32
  }
  func.func @transform_7(%arg0: i32, %arg1: memref<1xi32, #tpu.memory_space<smem>>) -> (i32, i32, i32) {
    %c0_i32 = arith.constant 0 : i32
    %c0_i32_0 = arith.constant 0 : i32
    %c0_i32_1 = arith.constant 0 : i32
    %c0_i32_2 = arith.constant 0 : i32
    return %c0_i32, %c0_i32_0, %c0_i32_1 : i32, i32, i32
  }
  func.func @transform_8(%arg0: i32, %arg1: memref<1xi32, #tpu.memory_space<smem>>) -> (i32, i32) {
    %c0_i32 = arith.constant 0 : i32
    %c0_i32_0 = arith.constant 0 : i32
    %c0_i32_1 = arith.constant 0 : i32
    return %c0_i32, %c0_i32_0 : i32, i32
  }
  func.func @transform_9(%arg0: i32, %arg1: memref<1xi32, #tpu.memory_space<smem>>) -> (i32, i32) {
    %c0_i32 = arith.constant 0 : i32
    %c0_i32_0 = arith.constant 0 : i32
    %c0_i32_1 = arith.constant 0 : i32
    return %c0_i32, %c0_i32_0 : i32, i32
  }
  func.func @transform_10(%arg0: i32, %arg1: memref<1xi32, #tpu.memory_space<smem>>) -> (i32, i32) {
    %c0_i32 = arith.constant 0 : i32
    %c0_i32_0 = arith.constant 0 : i32
    %c0_i32_1 = arith.constant 0 : i32
    return %c0_i32, %c0_i32_0 : i32, i32
  }
  func.func @transform_11(%arg0: i32, %arg1: memref<1xi32, #tpu.memory_space<smem>>) -> (i32, i32) {
    %c0_i32 = arith.constant 0 : i32
    %c0_i32_0 = arith.constant 0 : i32
    %c0_i32_1 = arith.constant 0 : i32
    return %c0_i32, %c0_i32_0 : i32, i32
  }
  func.func @transform_12(%arg0: i32, %arg1: memref<1xi32, #tpu.memory_space<smem>>) -> (i32, i32) {
    %c0_i32 = arith.constant 0 : i32
    %c0_i32_0 = arith.constant 0 : i32
    %c0_i32_1 = arith.constant 0 : i32
    return %c0_i32, %c0_i32_0 : i32, i32
  }
  func.func @transform_13(%arg0: i32, %arg1: memref<1xi32, #tpu.memory_space<smem>>) -> (i32, i32) {
    %c0_i32 = arith.constant 0 : i32
    %c0_i32_0 = arith.constant 0 : i32
    %c0_i32_1 = arith.constant 0 : i32
    return %c0_i32, %c0_i32_0 : i32, i32
  }
  func.func @transform_14(%arg0: i32, %arg1: memref<1xi32, #tpu.memory_space<smem>>) -> (i32, i32) {
    %c0_i32 = arith.constant 0 : i32
    %c0_i32_0 = arith.constant 0 : i32
    %c0_i32_1 = arith.constant 0 : i32
    return %c0_i32, %c0_i32_0 : i32, i32
  }
  func.func @transform_15(%arg0: i32, %arg1: memref<1xi32, #tpu.memory_space<smem>>) -> (i32, i32) {
    %c0_i32 = arith.constant 0 : i32
    %c0_i32_0 = arith.constant 0 : i32
    %c0_i32_1 = arith.constant 0 : i32
    return %c0_i32, %c0_i32_0 : i32, i32
  }
  func.func @transform_16(%arg0: i32, %arg1: memref<1xi32, #tpu.memory_space<smem>>) -> (i32, i32) {
    %c0_i32 = arith.constant 0 : i32
    %c0_i32_0 = arith.constant 0 : i32
    %c0_i32_1 = arith.constant 0 : i32
    return %c0_i32, %c0_i32_0 : i32, i32
  }
  func.func @transform_17(%arg0: i32, %arg1: memref<1xi32, #tpu.memory_space<smem>>) -> (i32, i32) {
    %c0_i32 = arith.constant 0 : i32
    %c0_i32_0 = arith.constant 0 : i32
    %c0_i32_1 = arith.constant 0 : i32
    return %c0_i32, %c0_i32_0 : i32, i32
  }
  func.func @transform_18(%arg0: i32, %arg1: memref<1xi32, #tpu.memory_space<smem>>) -> (i32, i32, i32) {
    %c0_i32 = arith.constant 0 : i32
    %c0_i32_0 = arith.constant 0 : i32
    %c0_i32_1 = arith.constant 0 : i32
    return %arg0, %c0_i32, %c0_i32_0 : i32, i32, i32
  }
}

</mosaic_0001>

<bundles_post_ra>
// kernel: tpu_custom_call.1
= control target key start
LH: loop header
LB: loop body
LE: loop exit
PB: predicated region body
PF: predicated region fallthrough
CT: control target
= control target key end

     0   :  { %s19486_s0 = inlined_call_operand.<no memory space> [shape: s32[1], index: 0, kind: input, shape index: {}]   ;;  %s19487_s1 = inlined_call_operand.vmem [shape: f32[16,4,64], index: 1, kind: input, shape index: {}]   ;;  %s19488_s2 = inlined_call_operand.vmem [shape: f32[16,32], index: 2, kind: input, shape index: {}]   ;;  %s19489_s3 = inlined_call_operand.vmem [shape: f32[16,32], index: 3, kind: input, shape index: {}]   ;;  %s19490_s4 = inlined_call_operand.hbm [shape: f32[1,16], index: 4, kind: input, shape index: {}]   ;;  %s19491_s5 = inlined_call_operand.vmem [shape: f32[128,16], index: 5, kind: input, shape index: {}]   ;;  %s19492_s6 = inlined_call_operand.vmem [shape: f32[16,64], index: 6, kind: input, shape index: {}]   ;;  %s19493_s7 = inlined_call_operand.vmem [shape: f32[32,16], index: 7, kind: input, shape index: {}]   ;;  %s19494_s8 = inlined_call_operand.vmem [shape: f32[8,16,128], index: 8, kind: input, shape index: {}]   ;;  %s19495_s9 = inlined_call_operand.vmem [shape: f32[64,512], index: 9, kind: input, shape index: {}]   ;;  %s19496_s10 = inlined_call_operand.vmem [shape: f32[64,512], index: 10, kind: input, shape index: {}]   ;;  %s19497_s11 = inlined_call_operand.hbm [shape: f32[64,512], index: 11, kind: input, shape index: {}]   ;;  %s19498_s12 = inlined_call_operand.hbm [shape: f32[512,512], index: 12, kind: input, shape index: {}]   ;;  %s19499_s13 = inlined_call_operand.hbm [shape: f32[512,512], index: 13, kind: input, shape index: {}]   ;;  %s19500_s14 = inlined_call_operand.vmem [shape: f32[512,32], index: 14, kind: input, shape index: {}]   ;;  %s19501_s15 = inlined_call_operand.vmem [shape: f32[1,512], index: 15, kind: input, shape index: {}]   ;;  %s19502_s16 = inlined_call_operand.vmem [shape: f32[1,512], index: 16, kind: input, shape index: {}]   ;;  %s19503_s17 = inlined_call_operand.hbm [shape: f32[1,512], index: 17, kind: input, shape index: {}]   ;;  %s19504_s18 = inlined_call_operand.vmem [shape: f32[1,32], index: 18, kind: input, shape index: {}]   ;;  %s19505_s19 = inlined_call_operand.hbm [shape: f32[2,1,128], index: 19, kind: output, shape index: {}]  }
   0x1   :  { %20277 = sst [smem:[#allocation377_spill]] %s19486_s0 }
   0x2   :  { %20278 = sst [smem:[#allocation378_spill]] %s19487_s1  ;;  %s20287_s20 = sld [smem:[#allocation377_spill]] }
   0x3   :  { %20279 = sst [smem:[#allocation379_spill]] %s19488_s2 }
   0x4   :  { %20280 = sst [smem:[#allocation380_spill]] %s19489_s3 }
   0x5   :  { %20281 = sst [smem:[#allocation381_spill]] %s19490_s4 }
   0x6   :  { %20282 = sst [smem:[#allocation382_spill]] %s19493_s7 }
   0x7   :  { %20283 = sst [smem:[#allocation383_spill]] %s19494_s8 }
   0x8   :  { %20284 = sst [smem:[#allocation384_spill]] %s19500_s14 }
   0x9   :  { %20285 = sst [smem:[#allocation385_spill]] %s19504_s18 }
   0xa   :  { %20286 = sst [smem:[#allocation386_spill]] %s19505_s19 }
   0xb   :  { %24 = sst [smem:[#allocation3]] %s20287_s20 }
   0xc   :  { %25 = vsyncpa [#allocation5], 0 }
   0xd   :  { %26 = vsyncpa [#allocation8], 0 }
   0xe   :  { %27 = vsyncpa [#allocation11], 0 }
   0xf   :  { %28 = vsyncpa [#allocation6], 0 }
  0x10   :  { %30 = vsyncpa [#allocation6 + $0x1], 0  ;;  %s15234_s21 = smov 0   ;;  %s15236_s1 = smov 0  }
  0x11   :  { %s15238_s22 = smov 0   ;;  %s15240_s2 = smov 0  }
  0x12 LB: > { %20288 = sst [smem:[#allocation18_spill]] %s15099_s21  ;;  %s15255_s23 = sadd.s32 4294967295, %s15111_s2   ;;  %s15111_s2 = sphi %s15240_s2, %s21652_s2   ;;  %s15107_s22 = sphi %s15238_s22, %s21654_s22   ;;  %s15103_s1 = sphi %s15236_s1, %s21656_s1   ;;  %s15099_s21 = sphi %s15234_s21, %s21655_s21  }
  0x13   : > { %20289 = sst [smem:[#allocation19_spill]] %s15107_s22  ;;  %s10491_s24 = sadd.s32 4294967294, %s15111_s2  }
  0x14   : > { %20290 = sst [smem:[#allocation20_spill]] %s15111_s2  ;;  %s15259_s25 = sadd.s32 1, %s15111_s2  }
  0x15   : > { %20291 = sst [smem:[#allocation21_spill]] %s15259_s25  ;;  %s426_s3 = sadd.s32 1, %s15107_s22 }
  0x16   : > { %s423_s26 = ssub.s32 %s15111_s2, %s15259_s25  ;;  %p436_p0 = scmp.ne.s32.totalorder %s15107_s22, %s15103_s1 }
  0x17   : > { %p424_p1 = scmp.eq.s32.totalorder %s423_s26, 0  ;;  %p437_p2 = scmp.eq.s32.totalorder %s15255_s23, 1 }
  0x18   : > { %p442_p3 = scmp.ne.s32.totalorder %s15103_s1, %s15099_s21  ;;  %p443_p4 = scmp.eq.s32.totalorder %s10491_s24, 1 }
  0x19   : > { %s15270_s27 = scalar_select %p424_p1, %s15107_s22, %s426_s3  }
  0x1a   : > { %p15272_p5 = por %p437_p2, %p436_p0  ;;  %p15276_p6 = por %p443_p4, %p442_p3 }
  0x1b   : > { %20292 = sst [smem:[#allocation22_spill]] %s15270_s27  ;;  %p10492_p7 = scmp.ge.s32.totalorder %s15111_s2, 1 }
  0x1c   : > { %s20293_s28 = scalar_select %p15272_p5, 1, 0 }
  0x1d   : > { %s20295_s29 = scalar_select %p15276_p6, 1, 0 }
  0x1e   : > { %20294 = sst [smem:[#allocation23_spill]] %s20293_s28  ;;  %p450_p8 = scmp.lt.s32.totalorder %s15111_s2, 3 }
  0x1f   : > { %20296 = sst [smem:[#allocation24_spill]] %s20295_s29  ;;  %p19515_p9 = scmp.eq.s32.totalorder %s15255_s23, 0 }
  0x20   : > { %p15283_p10 = pnand %p10492_p7, %p450_p8  ;;  %s15117_s30 = smov [#allocation7]  }
  0x21   : > { %s497_s20 = sshll.u32 %s15117_s30, 4  ;;  %s15118_s3 = smov [#allocation10]   ;;  %s15289_s20 = int_to_ptr.vmem [resolvable:$true] %s497_s20 }
  0x22   : > { %s20297_s0 = scalar_select %p15283_p10, 1, 0 }
  0x23   : > { %p14738_p11 = pneg %p15283_p10  ;;  %s523_s26 = sshll.u32 %s15118_s3, 4  ;;  %s15297_s26 = int_to_ptr.vmem [resolvable:$true] %s523_s26 }
  0x24   : > { %s15119_s27 = smov [#allocation4]   ;;  %s14893_s30 = scalar_lea.hbm %s19497_s11, 4096 }
  0x25   : > { %p15293_p12 = pnand %p19515_p9, %p14738_p11  ;;  %s15299_s22 = sshll.u32 %s15119_s27, 4  ;;  %s470_s22 = int_to_ptr.vmem [resolvable:$true] %s15299_s22 }
  0x26   : > { %p14894_p13 = scmp.ne.s32.totalorder %s19497_s11, %s14893_s30  ;;  %p14900_p3 = scmp.lt.u32.totalorder %s14893_s30, %s19497_s11 }
  0x27   : > { %p15309_p0 = pneg %p15293_p12 }
  0x29   : > { %p14896_p1 = pnand %p15309_p0, %p14894_p13 }
  0x2b   : > { %p14897_p2 = pneg %p14896_p1 }
  0x2d   : > { %p14902_p4 = pnand %p14900_p3, %p14897_p2 }
  0x2f   : > { %14905 = shalt.err (!%p14902_p4)
}
  0x30   : > { %s14906_s21 = scalar_lea.vmem %s15289_s20, 4096  ;;  %p14914_p9 = scmp.lt.s32.totalorder %s15289_s20, %s15289_s20 }
  0x31   : > { %p14907_p7 = scmp.ne.s32.totalorder %s15289_s20, %s14906_s21  ;;  %p14915_p6 = scmp.lt.s32.totalorder %s14906_s21, %s14906_s21 }
  0x33   : > { %p14909_p8 = pnand %p14907_p7, %p15309_p0  ;;  %p14916_p13 = por %p14915_p6, %p14914_p9 }
  0x35   : > { %p14910_p11 = pneg %p14909_p8 }
  0x37   : > { %p14917_p1 = pnand %p14916_p13, %p14910_p11 }
  0x39   : > { %14920 = shalt.err (!%p14917_p1)
}
  0x3a   : > { %s19522_s2 = smov 512   ;;  %s15121_s25 = smov 32  }
  0x3b   : > { %14744 = dma.hbm_to_vmem [thread:$0]  (!%p15293_p12), %s19497_s11, 4096, %s15289_s20, [#allocation8], %s19522_s2, %s19522_s2, %s15121_s25  }
  0x3c   : > { %s14921_s21 = scalar_lea.hbm %s19499_s13, 32768 }
  0x3d   : > { %p14922_p6 = scmp.ne.s32.totalorder %s19499_s13, %s14921_s21  ;;  %p14928_p3 = scmp.lt.u32.totalorder %s14921_s21, %s19499_s13 }
  0x3f   : > { %p14924_p9 = pnand %p14922_p6, %p15309_p0 }
  0x41   : > { %p14925_p2 = pneg %p14924_p9 }
  0x43   : > { %p14930_p4 = pnand %p14928_p3, %p14925_p2 }
  0x45   : > { %14933 = shalt.err (!%p14930_p4)
}
  0x46   : > { %s14934_s20 = scalar_lea.vmem %s15297_s26, 32768  ;;  %p14942_p13 = scmp.lt.s32.totalorder %s15297_s26, %s15297_s26 }
  0x47   : > { %p14935_p7 = scmp.ne.s32.totalorder %s15297_s26, %s14934_s20  ;;  %p14943_p1 = scmp.lt.s32.totalorder %s14934_s20, %s14934_s20 }
  0x49   : > { %p14937_p8 = pnand %p14935_p7, %p15309_p0  ;;  %p14944_p6 = por %p14943_p1, %p14942_p13 }
  0x4b   : > { %p14938_p11 = pneg %p14937_p8 }
  0x4d   : > { %p14945_p9 = pnand %p14944_p6, %p14938_p11 }
  0x4f   : > { %14948 = shalt.err (!%p14945_p9)
}
  0x50   : > { %14750 = dma.hbm_to_vmem [thread:$0]  (!%p15293_p12), %s19499_s13, 32768, %s15297_s26, [#allocation11], %s19522_s2, %s19522_s2, %s15121_s25  }
  0x51   : > { %s20300_s4 = sld [smem:[#allocation381_spill]] }
  0x57   : > { %s14949_s29 = scalar_lea.hbm %s20300_s4, 16 }
  0x58   : > { %p14950_p2 = scmp.ne.s32.totalorder %s20300_s4, %s14949_s29  ;;  %p14956_p7 = scmp.lt.u32.totalorder %s14949_s29, %s20300_s4 }
  0x5a   : > { %p14952_p3 = pnand %p14950_p2, %p15309_p0 }
  0x5c   : > { %p14953_p4 = pneg %p14952_p3 }
  0x5e   : > { %p14958_p8 = pnand %p14956_p7, %p14953_p4 }
  0x60   : > { %14961 = shalt.err (!%p14958_p8)
}
  0x61   : > { %s14962_s20 = scalar_lea.vmem %s470_s22, 16  ;;  %s14969_s26 = scalar_lea.vmem %s470_s22, 32 }
  0x62   : > { %p14963_p11 = scmp.ne.s32.totalorder %s470_s22, %s14962_s20  ;;  %p14970_p6 = scmp.lt.s32.totalorder %s470_s22, %s470_s22 }
  0x63   : > { %p14971_p9 = scmp.lt.s32.totalorder %s14969_s26, %s14962_s20 }
  0x64   : > { %p14965_p13 = pnand %p14963_p11, %p15309_p0 }
  0x65   : > { %p14972_p5 = por %p14971_p9, %p14970_p6 }
  0x66   : > { %p14966_p1 = pneg %p14965_p13 }
  0x68   : > { %p14973_p10 = pnand %p14972_p5, %p14966_p1 }
  0x6a   : > { %14976 = shalt.err (!%p14973_p10)
}
  0x6b   : > { %14741 = dma.hbm_to_vmem [thread:$0]  (!%p15293_p12), %s20300_s4, 16, %s470_s22, [#allocation5]  }
  0x6c   : > { %s15122_s18 = smov [#allocation9]   ;;  %s15123_s29 = smov [#allocation12]  }
  0x6d   : > { %s510_s28 = sshll.u32 %s15122_s18, 4  ;;  %s546_s30 = sshll.u32 %s15123_s29, 4  ;;  %s511_s28 = int_to_ptr.vmem [resolvable:$true] %s510_s28  ;;  %s547_s30 = int_to_ptr.vmem [resolvable:$true] %s546_s30 }
  0x6e   : > { %s14977_s21 = scalar_lea.hbm %s19498_s12, 32768 }
  0x6f   : > { %p14978_p5 = scmp.ne.s32.totalorder %s19498_s12, %s14977_s21  ;;  %p14984_p3 = scmp.lt.u32.totalorder %s14977_s21, %s19498_s12 }
  0x71   : > { %p14980_p10 = pnand %p14978_p5, %p15309_p0 }
  0x73   : > { %p14981_p2 = pneg %p14980_p10 }
  0x75   : > { %p14986_p4 = pnand %p14984_p3, %p14981_p2 }
  0x77   : > { %14989 = shalt.err (!%p14986_p4)
}
  0x78   : > { %s14990_s22 = scalar_lea.vmem %s511_s28, 32768  ;;  %p14998_p13 = scmp.lt.s32.totalorder %s511_s28, %s511_s28 }
  0x79   : > { %p14991_p7 = scmp.ne.s32.totalorder %s511_s28, %s14990_s22  ;;  %p14999_p1 = scmp.lt.s32.totalorder %s14990_s22, %s14990_s22 }
  0x7b   : > { %p14993_p8 = pnand %p14991_p7, %p15309_p0  ;;  %p15000_p6 = por %p14999_p1, %p14998_p13 }
  0x7d   : > { %p14994_p11 = pneg %p14993_p8 }
  0x7f   : > { %p15001_p9 = pnand %p15000_p6, %p14994_p11 }
  0x81   : > { %15004 = shalt.err (!%p15001_p9)
}
  0x82   : > { %s20301_s14 = smov 512   ;;  %s15005_s27 = scalar_lea.hbm %s19503_s17, 64 }
  0x83   : > { %14747 = dma.hbm_to_vmem [thread:$0]  (!%p15293_p12), %s19498_s12, 32768, %s511_s28, [#allocation8], %s20301_s14, %s20301_s14, %s15121_s25  }
  0x84   : > { %p15006_p5 = scmp.ne.s32.totalorder %s19503_s17, %s15005_s27  ;;  %p15012_p3 = scmp.lt.u32.totalorder %s15005_s27, %s19503_s17 }
  0x86   : > { %p15008_p10 = pnand %p15006_p5, %p15309_p0 }
  0x88   : > { %p15009_p2 = pneg %p15008_p10 }
  0x8a   : > { %p15014_p4 = pnand %p15012_p3, %p15009_p2 }
  0x8c   : > { %15017 = shalt.err (!%p15014_p4)
}
  0x8d   : > { %s15018_s22 = scalar_lea.vmem %s547_s30, 64  ;;  %p15026_p13 = scmp.lt.s32.totalorder %s547_s30, %s547_s30 }
  0x8e   : > { %p15019_p7 = scmp.ne.s32.totalorder %s547_s30, %s15018_s22  ;;  %p15027_p1 = scmp.lt.s32.totalorder %s15018_s22, %s15018_s22 }
  0x90   : > { %p15021_p8 = pnand %p15019_p7, %p15309_p0  ;;  %p15028_p6 = por %p15027_p1, %p15026_p13 }
  0x92   : > { %p15022_p11 = pneg %p15021_p8 }
  0x94   : > { %p15029_p9 = pnand %p15028_p6, %p15022_p11 }
  0x96   : > { %15032 = shalt.err (!%p15029_p9)
}
  0x97   : > { %14753 = dma.hbm_to_vmem [thread:$0]  (!%p15293_p12), %s19503_s17, 64, %s547_s30, [#allocation11]  }
  0x98   : > { %p20302_p5 = scmp.ne.s32.totalorder %s20297_s0, 0 }
  0x99   : > { %p20303_p10 = scmp.eq.s32.totalorder (!%p20302_p5), %s15255_s23, 0 }
  0x9a   : > { %571 = sbr.rel (%p20302_p5) target bundleno = 7587 (0x1da3), region = 92 }
  0xa1   : > { %15082 = dma.done.wait (%p20303_p10), [#allocation5], 16   ;;  %p20304_p0 = pmov %p20303_p10 }
  0xa3   : > { %15084 = vsyncadd (%p20304_p0), [#allocation5], 4294967280  ;;  %p20305_p2 = pmov %p20304_p0 }
  0xa4   : > { %p20306_p3 = pmov %p20304_p0 }
  0xa5   : > { %15086 = dma.done.wait (%p20305_p2), [#allocation8], 36864  }
  0xa6   : > { %15088 = vsyncadd (%p20306_p3), [#allocation8], 4294930432  ;;  %p20307_p4 = pmov %p20304_p0 }
  0xa7   : > { %p20308_p12 = pmov %p20304_p0 }
  0xa8   : > { %15090 = dma.done.wait (%p20307_p4), [#allocation11], 32832  }
  0xa9   : > { %15092 = vsyncadd (%p20308_p12), [#allocation11], 4294934464  ;;  %s19523_s19 = sand.u32 1, %s15103_s1   ;;  %s10505_s0 = sshll.u32 %s15255_s23, 3  ;;  %v15124_v0 = vmov 0.0  }
  0xaa   : > { %s15433_s24 = sld [smem:[#allocation3]]  ;;  %p641_p7 = scmp.lt.s32.totalorder %s10505_s0, 15 }
  0xab   : > { %s15437_s30 = scalar_lea.vmem [#allocation13], %s19523_s19  ;;  %s20309_s3 = sld [smem:[#allocation378_spill]] }
  0xac   : > { %646 = vst [vmem:[%s15437_s30] sm:$0x1] %v15124_v0  ;;  %s21658_s0 = smov (!%p641_p7, %s10505_s0), 15  ;;  %s15446_s21 = smov 0  }
  0xad   : > { %s10506_s2 = sshll.u32 %s21658_s0, 2 }
  0xb1   : > { %s15444_s27 = scalar_lea.vmem %s20309_s3, %s10506_s2 }
  0xb2 LB: >> { %s19524_s20 = sshll.u32 %s15115_s21, 4  ;;  %s20310_s14 = sshll.u32 %s15255_s23, 7  ;;  %s15115_s21 = sphi %s15446_s21, %s654_s21  }
  0xb3   : >> { %s656_s26 = sadd.s32 %s19524_s20, %s20310_s14 }
  0xb4   : >> { %p10509_p8 = scmp.ge.s32.totalorder %s656_s26, %s15433_s24 }
  0xb6   : >> { %660 = sbr.rel (%p10509_p8) target bundleno = 7558 (0x1d86), region = 123 }
  0xbd   : >> { %s10510_s8 = sshll.u32 %s15115_s21, 2  ;;  %v673_v1 = vlaneseq  ;;  %s20311_s7 = sld [smem:[#allocation382_spill]]  ;;  %vm681_vm0 = vcmask 261120   ;;  %vm763_vm1 = vcmask 130048   ;;  %v803_v18 = vld [vmem:[%s19491_s5 + $0x40] sm:$0xff]  ;;  %v1037_v23 = vld [vmem:[%s19496_s10 + $0x8] sm:$0xff] }
  0xbe   : >> { %s15459_s22 = scalar_lea.vmem %s15444_s27, %s10510_s8  ;;  %s19527_s8 = smov 96   ;;  %11204 = vmatprep.mubr.msk.f32.mxu1 %vm763_vm1, %v803_v18  ;;  %v795_v22 = vld [vmem:[%s19491_s5] sm:$0xff]  ;;  %v1041_v24 = vld [vmem:[%s19496_s10 + $0x28] sm:$0xff]  ;;  %v1039_v25 = vld [vmem:[%s19496_s10 + $0x18] sm:$0xff]  ;;  %vm1068_vm2 = vcmask 523264   ;;  %vm15129_vm3 = vmmov 0  }
  0xbf   : >> { %v15461_v2 = vshrl.u32 %v673_v1, 7  ;;  %v663_v5 = vld [vmem:[%s15459_s22] sm:$0xf]  ;;  %s20314_s0 = sld [smem:[#allocation379_spill]]  ;;  %s19525_s26 = smov 32   ;;  %v1043_v26 = vld [vmem:[%s19496_s10 + $0x38] sm:$0xff]  ;;  %v15527_v32 = vpack.c.bf16 %v1041_v24, %v1037_v23 }
  0xc0   : >> { %v15529_v33 = vpack.c.bf16 %v1043_v26, %v1039_v25  ;;  %v1036_v34 = vld [vmem:[%s19496_s10] sm:$0xff]  ;;  %v1038_v36 = vld [vmem:[%s19496_s10 + $0x10] sm:$0xff]  ;;  %v1045_v38 = vld [vmem:[%s19496_s10 + $0x48] sm:$0xff]  ;;  %s20625_s29 = sld [smem:[#allocation384_spill]]  ;;  %s20665_s2 = sld [smem:[#allocation385_spill]] }
  0xc1   : >> { %v15479_v9 = vsub.s32 0, %v15461_v2  ;;  %20315 = vst [vmem:[#allocation27_spill] sm:$0xff] %v15527_v32  ;;  %v1040_v35 = vld [vmem:[%s19496_s10 + $0x20] sm:$0xff]  ;;  %v1042_v37 = vld [vmem:[%s19496_s10 + $0x30] sm:$0xff]  ;;  %v1049_v39 = vld [vmem:[%s19496_s10 + $0x68] sm:$0xff]  ;;  %s20668_s19 = sld [smem:[#allocation380_spill]] }
  0xc2   : >> { %20316 = vst [vmem:[#allocation28_spill] sm:$0xff] %v15529_v33  ;;  %v1047_v40 = vld [vmem:[%s19496_s10 + $0x58] sm:$0xff]  ;;  %v804_v42 = vld [vmem:[%s19491_s5 + $0x48] sm:$0xff]  ;;  %v805_v43 = vld [vmem:[%s19491_s5 + $0x50] sm:$0xff]  ;;  %v15569_v46 = vpack.c.bf16 %v1040_v35, %v1036_v34  ;;  %v15571_v47 = vpack.c.bf16 %v1042_v37, %v1038_v36  ;;  %v15579_v50 = vpack.c.bf16 %v1049_v39, %v1045_v38  ;;  %v19535_v34 = vmov 0.0   ;;  %s21641_s18 = sshll.u32 %s15115_s21, 4 }
  0xc3   : >> { %v669_v3 = vld [vmem:[%s20311_s7] sm:$0xff]  ;;  %v670_v4 = vld [vmem:[%s20311_s7 + $0x8] sm:$0xff]  ;;  %v671_v7 = vld [vmem:[%s20311_s7 + $0x10] sm:$0xff]  ;;  %v676_v11 = vrot.slane %v663_v5, %v15479_v9 }
  0xc4   : >> { %v15470_v6 = vpack.c.bf16 %v670_v4, %v669_v3  ;;  %v672_v8 = vld [vmem:[%s20311_s7 + $0x18] sm:$0xff]  ;;  %v796_v44 = vld [vmem:[%s19491_s5 + $0x8] sm:$0xff]  ;;  %v797_v45 = vld [vmem:[%s19491_s5 + $0x10] sm:$0xff]  ;;  %20317 = vst [vmem:[#allocation29_spill] sm:$0xff] %v15569_v46 }
  0xc5   : >> { %v15482_v10 = vpack.c.bf16 %v672_v8, %v671_v7  ;;  %780 = vrot.lane.b32.xlu0 %v676_v11, %s19527_s8  ;;  %v664_v12 = vld [vmem:[%s20314_s0] sm:$0xff]  ;;  %v665_v13 = vld [vmem:[%s20314_s0 + $0x8] sm:$0xff]  ;;  %v1051_v41 = vld [vmem:[%s19496_s10 + $0x78] sm:$0xff]  ;;  %20318 = vst [vmem:[#allocation30_spill] sm:$0xff] %v15571_v47  ;;  %s21642_s8 = sld [smem:[#allocation383_spill]] }
  0xc6   : >> { %20312 = vst [vmem:[#allocation25_spill] sm:$0xff] %v15470_v6  ;;  %11380 = vmatprep.subr.bf16.mxu0 %v15470_v6  ;;  %v677_v14 = vsub.f32 %v664_v12, %v676_v11  ;;  %v678_v15 = vsub.f32 %v665_v13, %v676_v11  ;;  %v1044_v48 = vld [vmem:[%s19496_s10 + $0x40] sm:$0xff]  ;;  %20319 = vst [vmem:[#allocation31_spill] sm:$0xff] %v15579_v50  ;;  %v15581_v51 = vpack.c.bf16 %v1051_v41, %v1047_v40  ;;  %v1046_v52 = vld [vmem:[%s19496_s10 + $0x50] sm:$0xff]  ;;  %s20666_s7 = smov %s20665_s2 }
  0xc7   : >> { %20313 = vst [vmem:[#allocation26_spill] sm:$0xff] %v15482_v10  ;;  %11382 = vmatpush3.bf16.msra.mxu0 %v15470_v6  ;;  %v1048_v49 = vld [vmem:[%s19496_s10 + $0x60] sm:$0xff]  ;;  %v1050_v53 = vld [vmem:[%s19496_s10 + $0x70] sm:$0xff]  ;;  %v1053_v54 = vld [vmem:[%s19496_s10 + $0x88] sm:$0xff] }
  0xc8   : >> { %11384 = vmatprep.subr.bf16.mxu0 %v15482_v10  ;;  %v679_v16 = vmul.f32 %v677_v14, %v677_v14  ;;  %v680_v17 = vmul.f32 %v678_v15, %v678_v15  ;;  %20320 = vst [vmem:[#allocation32_spill] sm:$0xff] %v15581_v51  ;;  %v1057_v55 = vld [vmem:[%s19496_s10 + $0xa8] sm:$0xff]  ;;  %v1055_v56 = vld [vmem:[%s19496_s10 + $0x98] sm:$0xff]  ;;  %v807_v59 = vld [vmem:[%s19491_s5 + $0x60] sm:$0xff]  ;;  %v15619_v62 = vpack.c.bf16 %v1048_v49, %v1044_v48 }
  0xc9   : >> { %v1059_v57 = vld [vmem:[%s19496_s10 + $0xb8] sm:$0xff]  ;;  %v799_v61 = vld [vmem:[%s19491_s5 + $0x20] sm:$0xff]  ;;  %v15621_v63 = vpack.c.bf16 %v1050_v53, %v1046_v52  ;;  %v15631_v3 = vpack.c.bf16 %v1057_v55, %v1053_v54  ;;  %v1054_v5 = vld [vmem:[%s19496_s10 + $0x90] sm:$0xff] }
  0xca   : >> { %11185 = vmatprep.mubr.msk.f32.mxu0 %vm681_vm0, %v679_v16  ;;  %v806_v58 = vld [vmem:[%s19491_s5 + $0x58] sm:$0xff]  ;;  %20321 = vst [vmem:[#allocation33_spill] sm:$0xff] %v15619_v62  ;;  %v1052_v0 = vld [vmem:[%s19496_s10 + $0x80] sm:$0xff]  ;;  %v15633_v4 = vpack.c.bf16 %v1059_v57, %v1055_v56  ;;  %v1058_v7 = vld [vmem:[%s19496_s10 + $0xb0] sm:$0xff] }
  0xcb   : >> { %11386 = vmatpush3.bf16.msra.mxu0 %v15482_v10  ;;  %v798_v60 = vld [vmem:[%s19491_s5 + $0x18] sm:$0xff]  ;;  %20322 = vst [vmem:[#allocation34_spill] sm:$0xff] %v15621_v63  ;;  %v1056_v1 = vld [vmem:[%s19496_s10 + $0xa0] sm:$0xff]  ;;  %20323 = vst [vmem:[#allocation35_spill] sm:$0xff] %v15631_v3  ;;  %s10286_s14 = scalar_lea.vmem %s21642_s8, %s21641_s18 }
  0xcc   : >> { %20324 = vst [vmem:[#allocation36_spill] sm:$0xff] %v15633_v4  ;;  %v1061_v8 = vld [vmem:[%s19496_s10 + $0xc8] sm:$0xff]  ;;  %v1063_v12 = vld [vmem:[%s19496_s10 + $0xd8] sm:$0xff]  ;;  %v809_v16 = vld [vmem:[%s19491_s5 + $0x70] sm:$0xff]  ;;  %v15671_v18 = vpack.c.bf16 %v1056_v1, %v1052_v0 }
  0xcd   : >> { %v1065_v11 = vld [vmem:[%s19496_s10 + $0xe8] sm:$0xff]  ;;  %v1067_v13 = vld [vmem:[%s19496_s10 + $0xf8] sm:$0xff]  ;;  %v1064_v23 = vld [vmem:[%s19496_s10 + $0xe0] sm:$0xff] }
  0xce   : >> { %11186 = vmatmul.mubr.msk.f32.vlgmr.msra.gmra.mrb[0].mxu0 %vm681_vm0, %v680_v17  ;;  %v801_v17 = vld [vmem:[%s19491_s5 + $0x30] sm:$0xff]  ;;  %20325 = vst [vmem:[#allocation37_spill] sm:$0xff] %v15671_v18  ;;  %v810_v26 = vld [vmem:[%s19491_s5 + $0x78] sm:$0xff]  ;;  %v1005_v35 = vld [vmem:[%s19495_s9 + $0x8] sm:$0xff] }
  0xcf   : >> { %11192 = vmatprep.mubr.msk.f32.mxu0 %vm763_vm1, %v795_v22  ;;  %v15682_v22 = vpack.c.bf16 %v1067_v13, %v1063_v12  ;;  %v1062_v24 = vld [vmem:[%s19496_s10 + $0xd0] sm:$0xff]  ;;  %v1009_v36 = vld [vmem:[%s19495_s9 + $0x28] sm:$0xff]  ;;  %v1007_v38 = vld [vmem:[%s19495_s9 + $0x18] sm:$0xff] }
  0xd0   : >> { %v1066_v25 = vld [vmem:[%s19496_s10 + $0xf0] sm:$0xff]  ;;  %v15723_v37 = vpack.c.bf16 %v1009_v36, %v1005_v35  ;;  %v1011_v39 = vld [vmem:[%s19495_s9 + $0x38] sm:$0xff]  ;;  %v1004_v48 = vld [vmem:[%s19495_s9] sm:$0xff] }
  0xd1   : >> { %20328 = vst [vmem:[#allocation40_spill] sm:$0xff] %v15682_v22  ;;  %v15732_v40 = vpack.c.bf16 %v1011_v39, %v1007_v38  ;;  %v1008_v49 = vld [vmem:[%s19495_s9 + $0x20] sm:$0xff]  ;;  %v1013_v52 = vld [vmem:[%s19495_s9 + $0x48] sm:$0xff]  ;;  %v1006_v53 = vld [vmem:[%s19495_s9 + $0x10] sm:$0xff] }
  0xd2   : >> { %20331 = vst [vmem:[#allocation43_spill] sm:$0xff] %v15723_v37  ;;  %v1010_v54 = vld [vmem:[%s19495_s9 + $0x30] sm:$0xff]  ;;  %v1017_v55 = vld [vmem:[%s19495_s9 + $0x68] sm:$0xff]  ;;  %v1015_v56 = vld [vmem:[%s19495_s9 + $0x58] sm:$0xff] }
  0xd3   : >> { %20332 = vst [vmem:[#allocation44_spill] sm:$0xff] %v15732_v40  ;;  %v1019_v57 = vld [vmem:[%s19495_s9 + $0x78] sm:$0xff]  ;;  %v15771_v0 = vpack.c.bf16 %v1010_v54, %v1006_v53  ;;  %v1014_v12 = vld [vmem:[%s19495_s9 + $0x50] sm:$0xff] }
  0xd4   : >> { %v1018_v13 = vld [vmem:[%s19495_s9 + $0x70] sm:$0xff] }
  0xd5   : >> { %20335 = vst [vmem:[#allocation47_spill] sm:$0xff] %v15771_v0  ;;  %v1022_v39 = vld [vmem:[%s19495_s9 + $0x90] sm:$0xff] }
 0x137   : >> { %v781_v19 = vpop.permute.xlu0 %780 }
 0x138   : >> { %v783_v20 = vsub.f32 %v677_v14, %v781_v19  ;;  %v784_v21 = vsub.f32 %v678_v15, %v781_v19  ;;  %v15673_v19 = vpack.c.bf16 %v1058_v7, %v1054_v5  ;;  %v15775_v7 = vpack.c.bf16 %v1017_v55, %v1013_v52  ;;  %v1028_v55 = vld [vmem:[%s19495_s9 + $0xc0] sm:$0xff] }
 0x13a   : >> { %789 = vrot.lane.b32.xlu1 %v784_v21, %s19525_s26  ;;  %787 = vrot.lane.b32.xlu0 %v783_v20, %s19525_s26  ;;  %20326 = vst [vmem:[#allocation38_spill] sm:$0xff] %v15673_v19  ;;  %v1060_v20 = vld [vmem:[%s19496_s10 + $0xc0] sm:$0xff]  ;;  %v15680_v21 = vpack.c.bf16 %v1065_v11, %v1061_v8  ;;  %20336 = vst [vmem:[#allocation48_spill] sm:$0xff] %v15775_v7  ;;  %v1021_v8 = vld [vmem:[%s19495_s9 + $0x88] sm:$0xff]  ;;  %v15780_v11 = vpack.c.bf16 %v1019_v57, %v1015_v56  ;;  %s20660_s26 = smov 96  }
 0x13b   : >> { %v1032_v56 = vld [vmem:[%s19495_s9 + $0xe0] sm:$0xff] }
 0x13c   : >> { %20327 = vst [vmem:[#allocation39_spill] sm:$0xff] %v15680_v21  ;;  %20337 = vst [vmem:[#allocation49_spill] sm:$0xff] %v15780_v11 }
 0x1a1   : >> { %v11187_v41 = vpop.f32.mrb[0].mxu0 }
 0x1ac   : >> { %v790_v27 = vpop.permute.xlu1 %789  ;;  %v788_v28 = vpop.permute.xlu0 %787 }
 0x1ad   : >> { %v15520_v29 = vsel %vm681_vm0, %v678_v15, %v790_v27  ;;  %v15523_v30 = vsel %vm681_vm0, %v677_v14, %v788_v28  ;;  %v808_v14 = vld [vmem:[%s19491_s5 + $0x68] sm:$0xff]  ;;  %v802_v27 = vld [vmem:[%s19491_s5 + $0x38] sm:$0xff]  ;;  %v15705_v28 = vpack.c.bf16 %v1064_v23, %v1060_v20 }
 0x1ae   : >> { %v11387_v31 = vpack.c.bf16 %v15520_v29, %v15523_v30  ;;  %v800_v15 = vld [vmem:[%s19491_s5 + $0x28] sm:$0xff] }
 0x1af   : >> { %20329 = vst [vmem:[#allocation41_spill] sm:$0xff] %v15705_v28 }
 0x1b0   : >> { %11388 = vmatprep.subr.bf16.mxu0 %v11387_v31  ;;  %14264 = vmatprep.subr.bf16.mxu1 %v11387_v31 }
 0x1b1   : >> { %11390 = vmatpush3.bf16.msra.mxu0 %v11387_v31  ;;  %14265 = vmatpush3.bf16.msra.mxu1 %v11387_v31  ;;  %v15707_v31 = vpack.c.bf16 %v1066_v25, %v1062_v24  ;;  %v1020_v24 = vld [vmem:[%s19495_s9 + $0x80] sm:$0xff] }
 0x1b2   : >> { %11392 = vmatprep.subr.bf16.mxu0 %v15527_v32  ;;  %11408 = vmatprep.subr.bf16.mxu1 %v15529_v33  ;;  %v1024_v25 = vld [vmem:[%s19495_s9 + $0xa0] sm:$0xff] }
 0x1b3   : >> { %20330 = vst [vmem:[#allocation42_spill] sm:$0xff] %v15707_v31  ;;  %v15848_v53 = vpack.c.bf16 %v1024_v25, %v1020_v24  ;;  %v15881_v25 = vpack.c.bf16 %v1032_v56, %v1028_v55  ;;  %v1657_v55 = vld [vmem:[#allocation9 + $0x10] sm:$0xff] }
 0x1b4   : >> { %11205 = vmatmul.mubr.msk.f32.vlgmr.msra.gmra.mrb[0].mxu1 %vm763_vm1, %v804_v42  ;;  %11193 = vmatmul.mubr.msk.f32.vlgmr.msra.gmra.mrb[2].mxu0 %vm763_vm1, %v796_v44  ;;  %v765_v42 = vsel %vm763_vm1, %v11187_v41, inf  ;;  %v1026_v41 = vld [vmem:[%s19495_s9 + $0xb0] sm:$0xff] }
 0x1b5   : >> { %11207 = vmatprep.mubr.msk.f32.mxu1 %vm763_vm1, %v805_v43  ;;  %11195 = vmatprep.mubr.msk.f32.mxu0 %vm763_vm1, %v797_v45  ;;  %v754_v43 = vpop.f32.mrb[1].mxu0  ;;  %20342 = vst [vmem:[#allocation54_spill] sm:$0xff] %v15848_v53  ;;  %v15851_v54 = vpack.c.bf16 %v1026_v41, %v1022_v39  ;;  %20346 = vst [vmem:[#allocation58_spill] sm:$0xff] %v15881_v25  ;;  %v1661_v56 = vld [vmem:[#allocation9 + $0x30] sm:$0xff] }
 0x1b6   : >> { %11394 = vmatpush1.bf16.msra.mxu0 %v15569_v46  ;;  %11410 = vmatpush1.bf16.msra.mxu1 %v15571_v47  ;;  %v764_v44 = vsel %vm763_vm1, %v754_v43, inf }
 0x1b7   : >> { %11396 = vmatprep.subr.bf16.mxu0 %v15579_v50  ;;  %11412 = vmatprep.subr.bf16.mxu1 %v15581_v51  ;;  %v15737_v45 = vmin.f32 %v764_v44, %v765_v42  ;;  %v1029_v42 = vld [vmem:[%s19495_s9 + $0xc8] sm:$0xff]  ;;  %20343 = vst [vmem:[#allocation55_spill] sm:$0xff] %v15851_v54 }
 0x1b8   : >> { %11208 = vmatmul.mubr.msk.f32.gmra.mrb[2].mxu1 %vm763_vm1, %v806_v58  ;;  %11196 = vmatmul.mubr.msk.f32.gmra.mrb[4].mxu0 %vm763_vm1, %v798_v60  ;;  %v1012_v60 = vld [vmem:[%s19495_s9 + $0x40] sm:$0xff]  ;;  %v1033_v44 = vld [vmem:[%s19495_s9 + $0xe8] sm:$0xff] }
 0x1b9   : >> { %11210 = vmatprep.mubr.msk.f32.mxu1 %vm763_vm1, %v807_v59  ;;  %11198 = vmatprep.mubr.msk.f32.mxu0 %vm763_vm1, %v799_v61  ;;  %20333 = vst [vmem:[#allocation45_spill] sm:$0xff] %v15737_v45  ;;  %v15763_v59 = vpack.c.bf16 %v1008_v49, %v1004_v48  ;;  %v1016_v61 = vld [vmem:[%s19495_s9 + $0x60] sm:$0xff]  ;;  %v1031_v48 = vld [vmem:[%s19495_s9 + $0xd8] sm:$0xff] }
 0x1ba   : >> { %11398 = vmatpush1.bf16.msra.mxu0 %v15619_v62  ;;  %11414 = vmatpush1.bf16.msra.mxu1 %v15621_v63  ;;  %v15804_v23 = vpack.c.bf16 %v1016_v61, %v1012_v60  ;;  %v1035_v49 = vld [vmem:[%s19495_s9 + $0xf8] sm:$0xff]  ;;  %v15863_v60 = vpack.c.bf16 %v1033_v44, %v1029_v42 }
 0x1bb   : >> { %11400 = vmatprep.subr.bf16.mxu0 %v15631_v3  ;;  %11416 = vmatprep.subr.bf16.mxu1 %v15633_v4  ;;  %20334 = vst [vmem:[#allocation46_spill] sm:$0xff] %v15763_v59  ;;  %v15865_v61 = vpack.c.bf16 %v1035_v49, %v1031_v48  ;;  %v1659_v49 = vld [vmem:[#allocation9 + $0x20] sm:$0xff] }
 0x1bc   : >> { %11211 = vmatmul.mubr.msk.f32.gmra.mrb[4].mxu1 %vm763_vm1, %v808_v14  ;;  %11199 = vmatmul.mubr.msk.f32.gmra.mrb[6].mxu0 %vm763_vm1, %v800_v15  ;;  %v1025_v15 = vld [vmem:[%s19495_s9 + $0xa8] sm:$0xff]  ;;  %20338 = vst [vmem:[#allocation50_spill] sm:$0xff] %v15804_v23  ;;  %20344 = vst [vmem:[#allocation56_spill] sm:$0xff] %v15863_v60 }
 0x1bd   : >> { %11213 = vmatprep.mubr.msk.f32.mxu1 %vm763_vm1, %v809_v16  ;;  %11201 = vmatprep.mubr.msk.f32.mxu0 %vm763_vm1, %v801_v17  ;;  %v1023_v16 = vld [vmem:[%s19495_s9 + $0x98] sm:$0xff]  ;;  %v15818_v36 = vpack.c.bf16 %v1025_v15, %v1021_v8  ;;  %20345 = vst [vmem:[#allocation57_spill] sm:$0xff] %v15865_v61  ;;  %v1034_v8 = vld [vmem:[%s19495_s9 + $0xf0] sm:$0xff] }
 0x1be   : >> { %11402 = vmatpush1.bf16.msra.mxu0 %v15671_v18  ;;  %11418 = vmatpush1.bf16.msra.mxu1 %v15673_v19  ;;  %v1027_v17 = vld [vmem:[%s19495_s9 + $0xb8] sm:$0xff]  ;;  %v1660_v15 = vld [vmem:[#allocation9 + $0x28] sm:$0xff] }
 0x1bf   : >> { %11404 = vmatprep.subr.bf16.mxu0 %v15680_v21  ;;  %11420 = vmatprep.subr.bf16.mxu1 %v15682_v22  ;;  %20340 = vst [vmem:[#allocation52_spill] sm:$0xff] %v15818_v36  ;;  %v15821_v38 = vpack.c.bf16 %v1027_v17, %v1023_v16  ;;  %v1658_v16 = vld [vmem:[#allocation9 + $0x18] sm:$0xff] }
 0x1c0   : >> { %11214 = vmatmul.mubr.msk.f32.gmra.mrb[6].mxu1 %vm763_vm1, %v810_v26  ;;  %11202 = vmatmul.mubr.msk.f32.gmra.mrb[8].mxu0 %vm763_vm1, %v802_v27  ;;  %v15813_v26 = vpack.c.bf16 %v1018_v13, %v1014_v12  ;;  %v1656_v13 = vld [vmem:[#allocation9 + $0x8] sm:$0xff]  ;;  %v1662_v17 = vld [vmem:[#allocation9 + $0x38] sm:$0xff] }
 0x1c1   : >> { %1157 = vmatprep.mubr.f32.mxu0 %v19535_v34  ;;  %1270 = vmatprep.mubr.f32.mxu1 %v19535_v34  ;;  %20341 = vst [vmem:[#allocation53_spill] sm:$0xff] %v15821_v38  ;;  %v15891_v44 = vpack.c.bf16 %v1660_v15, %v1656_v13  ;;  %v15893_v48 = vpack.c.bf16 %v1662_v17, %v1658_v16  ;;  %v1663_v16 = vld [vmem:[#allocation9 + $0x40] sm:$0xff] }
 0x1c2   : >> { %11406 = vmatpush1.bf16.msra.mxu0 %v15705_v28  ;;  %11422 = vmatpush1.bf16.msra.mxu1 %v15707_v31  ;;  %20339 = vst [vmem:[#allocation51_spill] sm:$0xff] %v15813_v26  ;;  %v15921_v15 = vpack.c.bf16 %v1661_v56, %v1657_v55  ;;  %v1667_v17 = vld [vmem:[#allocation9 + $0x60] sm:$0xff]  ;;  %v20354_v55 = vmov 0.0  }
 0x1c3   : >> { %11424 = vmatprep.subr.bf16.mxu0 %v15723_v37  ;;  %11440 = vmatprep.subr.bf16.mxu1 %v15732_v40  ;;  %20348 = vst [vmem:[#allocation60_spill] sm:$0xff] %v15891_v44  ;;  %20349 = vst [vmem:[#allocation61_spill] sm:$0xff] %v15893_v48  ;;  %v15935_v56 = vpack.c.bf16 %v1667_v17, %v1663_v16  ;;  %v1686_v16 = vld [vmem:[#allocation9 + $0xf8] sm:$0xff] }
 0x1c4   : >> { %20351 = vst [vmem:[#allocation63_spill] sm:$0xff] %v15921_v15 }
 0x1c5   : >> { %20355 = vst [vmem:[#allocation66_spill] sm:$0xff] %v15935_v56 }
 0x287   : >> { %v11206_v58 = vpop.f32.mrb[0].mxu1  ;;  %v15773_v1 = vpop.f32.mrb[2].mxu0 }
 0x288   : >> { %v965_v5 = vpop.f32.mrb[1].mxu1  ;;  %v15788_v14 = vpop.f32.mrb[3].mxu0 }
 0x289   : >> { %10530 = vmatmul.mubr.msk.f32.vlgmr.msra.gmra.mrb[10].mxu0 %vm1068_vm2, %v965_v5  ;;  %10538 = vmatmul.mubr.msk.f32.vlgmr.msra.gmra.mrb[8].mxu1 %vm1068_vm2, %v965_v5  ;;  %v1030_v5 = vld [vmem:[%s19495_s9 + $0xd0] sm:$0xff] }
 0x28a   : >> { %1163 = vmatprep.mubr.f32.mxu0 %v19535_v34  ;;  %1276 = vmatprep.mubr.f32.mxu1 %v19535_v34  ;;  %v15883_v39 = vpack.c.bf16 %v1034_v8, %v1030_v5  ;;  %v1666_v5 = vld [vmem:[#allocation9 + $0x58] sm:$0xff] }
 0x28b   : >> { %v11209_v20 = vpop.f32.mrb[2].mxu1  ;;  %11426 = vmatpush1.bf16.msra.mxu0 %v15763_v59  ;;  %11442 = vmatpush1.bf16.msra.mxu1 %v15771_v0  ;;  %v15815_v27 = vpop.f32.mrb[4].mxu0  ;;  %v1670_v8 = vld [vmem:[#allocation9 + $0x78] sm:$0xff] }
 0x28c   : >> { %v975_v35 = vpop.f32.mrb[3].mxu1  ;;  %11428 = vmatprep.subr.bf16.mxu0 %v15775_v7  ;;  %11444 = vmatprep.subr.bf16.mxu1 %v15780_v11  ;;  %v15832_v43 = vpop.f32.mrb[5].mxu0  ;;  %20347 = vst [vmem:[#allocation59_spill] sm:$0xff] %v15883_v39 }
 0x28d   : >> { %10531 = vmatmul.mubr.msk.f32.gmra.mrb[12].mxu0 %vm1068_vm2, %v11206_v58  ;;  %10539 = vmatmul.mubr.msk.f32.gmra.mrb[10].mxu1 %vm1068_vm2, %v11206_v58 }
 0x28e   : >> { %1169 = vmatprep.mubr.f32.mxu0 %v19535_v34  ;;  %1282 = vmatprep.mubr.f32.mxu1 %v19535_v34 }
 0x28f   : >> { %v11212_v52 = vpop.f32.mrb[4].mxu1  ;;  %11430 = vmatpush1.bf16.msra.mxu0 %v15804_v23  ;;  %11446 = vmatpush1.bf16.msra.mxu1 %v15813_v26  ;;  %v15859_v57 = vpop.f32.mrb[6].mxu0 }
 0x290   : >> { %v985_v58 = vpop.f32.mrb[5].mxu1  ;;  %11432 = vmatprep.subr.bf16.mxu0 %v15818_v36  ;;  %11448 = vmatprep.subr.bf16.mxu1 %v15821_v38  ;;  %v15873_v12 = vpop.f32.mrb[7].mxu0  ;;  %v1800_v38 = vld [vmem:[#allocation9 + $0x488] sm:$0xff] }
 0x291   : >> { %10532 = vmatmul.mubr.msk.f32.gmra.mrb[14].mxu0 %vm1068_vm2, %v975_v35  ;;  %10540 = vmatmul.mubr.msk.f32.gmra.mrb[12].mxu1 %vm1068_vm2, %v975_v35 }
 0x292   : >> { %1175 = vmatprep.mubr.f32.mxu0 %v19535_v34  ;;  %1288 = vmatprep.mubr.f32.mxu1 %v19535_v34 }
 0x293   : >> { %v11215_v24 = vpop.f32.mrb[6].mxu1  ;;  %11434 = vmatpush1.bf16.msra.mxu0 %v15848_v53  ;;  %11450 = vmatpush1.bf16.msra.mxu1 %v15851_v54  ;;  %v15885_v41 = vpop.f32.mrb[8].mxu0  ;;  %v1797_v53 = vld [vmem:[#allocation9 + $0x470] sm:$0xff] }
 0x294   : >> { %v995_v42 = vpop.f32.mrb[7].mxu1  ;;  %11436 = vmatprep.subr.bf16.mxu0 %v15863_v60  ;;  %11452 = vmatprep.subr.bf16.mxu1 %v15865_v61  ;;  %v15889_v35 = vpop.f32.mrb[9].mxu0  ;;  %v1677_v61 = vld [vmem:[#allocation9 + $0xb0] sm:$0xff]  ;;  %v1680_v60 = vld [vmem:[#allocation9 + $0xc8] sm:$0xff] }
 0x295   : >> { %10533 = vmatmul.mubr.msk.f32.gmra.mrb[16].mxu0 %vm1068_vm2, %v11209_v20  ;;  %10541 = vmatmul.mubr.msk.f32.gmra.mrb[14].mxu1 %vm1068_vm2, %v11209_v20  ;;  %v1655_v20 = vld [vmem:[#allocation9] sm:$0xff] }
 0x296   : >> { %1181 = vmatprep.mubr.f32.mxu0 %v19535_v34  ;;  %1294 = vmatprep.mubr.f32.mxu1 %v19535_v34  ;;  %v15919_v13 = vpack.c.bf16 %v1659_v49, %v1655_v20  ;;  %v1674_v20 = vld [vmem:[#allocation9 + $0x98] sm:$0xff] }
 0x297   : >> { %11438 = vmatpush1.bf16.msra.mxu0 %v15881_v25  ;;  %11454 = vmatpush1.bf16.msra.mxu1 %v15883_v39  ;;  %v1669_v39 = vld [vmem:[#allocation9 + $0x70] sm:$0xff]  ;;  %v1678_v49 = vld [vmem:[#allocation9 + $0xb8] sm:$0xff] }
 0x298   : >> { %11456 = vmatprep.subr.bf16.mxu0 %v15891_v44  ;;  %11584 = vmatprep.subr.bf16.mxu1 %v15893_v48  ;;  %20350 = vst [vmem:[#allocation62_spill] sm:$0xff] %v15919_v13  ;;  %v15925_v48 = vpack.c.bf16 %v1670_v8, %v1666_v5  ;;  %v1665_v44 = vld [vmem:[#allocation9 + $0x50] sm:$0xff]  ;;  %v1675_v5 = vld [vmem:[#allocation9 + $0xa0] sm:$0xff]  ;;  %v15943_v8 = vpack.c.bf16 %v1678_v49, %v1674_v20 }
 0x299   : >> { %10534 = vmatmul.mubr.msk.f32.gmra.mrb[18].mxu0 %vm1068_vm2, %v985_v58  ;;  %10542 = vmatmul.mubr.msk.f32.gmra.mrb[16].mxu1 %vm1068_vm2, %v985_v58  ;;  %v1664_v58 = vld [vmem:[#allocation9 + $0x48] sm:$0xff]  ;;  %v1673_v25 = vld [vmem:[#allocation9 + $0x90] sm:$0xff]  ;;  %v1683_v20 = vld [vmem:[#allocation9 + $0xe0] sm:$0xff] }
 0x29a   : >> { %1187 = vmatprep.mubr.f32.mxu0 %v19535_v34  ;;  %1300 = vmatprep.mubr.f32.mxu1 %v19535_v34  ;;  %20353 = vst [vmem:[#allocation65_spill] sm:$0xff] %v15925_v48  ;;  %20358 = vst [vmem:[#allocation69_spill] sm:$0xff] %v15943_v8  ;;  %v15955_v17 = vpack.c.bf16 %v1677_v61, %v1673_v25  ;;  %v1692_v61 = vld [vmem:[#allocation9 + $0x128] sm:$0xff]  ;;  %v1690_v25 = vld [vmem:[#allocation9 + $0x118] sm:$0xff] }
 0x29c   : >> { %20360 = vst [vmem:[#allocation71_spill] sm:$0xff] %v15955_v17 }
 0x29d   : >> { %10535 = vmatmul.mubr.msk.f32.gmra.mrb[20].mxu0 %vm1068_vm2, %v11212_v52  ;;  %10543 = vmatmul.mubr.msk.f32.gmra.mrb[18].mxu1 %vm1068_vm2, %v11212_v52  ;;  %v1668_v52 = vld [vmem:[#allocation9 + $0x68] sm:$0xff] }
 0x29e   : >> { %1193 = vmatprep.mubr.f32.mxu0 %v19535_v34  ;;  %1306 = vmatprep.mubr.f32.mxu1 %v19535_v34 }
 0x2a1   : >> { %10536 = vmatmul.mubr.msk.f32.gmra.mrb[22].mxu0 %vm1068_vm2, %v995_v42  ;;  %10544 = vmatmul.mubr.msk.f32.gmra.mrb[20].mxu1 %vm1068_vm2, %v995_v42  ;;  %v15923_v42 = vpack.c.bf16 %v1668_v52, %v1664_v58  ;;  %v15937_v58 = vpack.c.bf16 %v1669_v39, %v1665_v44  ;;  %v1671_v52 = vld [vmem:[#allocation9 + $0x80] sm:$0xff]  ;;  %v1684_v39 = vld [vmem:[#allocation9 + $0xe8] sm:$0xff]  ;;  %v1682_v44 = vld [vmem:[#allocation9 + $0xd8] sm:$0xff] }
 0x2a2   : >> { %1199 = vmatprep.mubr.f32.mxu0 %v19535_v34  ;;  %1312 = vmatprep.mubr.f32.mxu1 %v19535_v34  ;;  %v15961_v49 = vpack.c.bf16 %v1686_v16, %v1682_v44  ;;  %v1691_v44 = vld [vmem:[#allocation9 + $0x120] sm:$0xff] }
 0x2a3   : >> { %20352 = vst [vmem:[#allocation64_spill] sm:$0xff] %v15923_v42  ;;  %20356 = vst [vmem:[#allocation67_spill] sm:$0xff] %v15937_v58 }
 0x2a4   : >> { %20362 = vst [vmem:[#allocation73_spill] sm:$0xff] %v15961_v49 }
 0x2a5   : >> { %10537 = vmatmul.mubr.msk.f32.gmra.mrb[24].mxu0 %vm1068_vm2, %v11215_v24  ;;  %10545 = vmatmul.mubr.msk.f32.gmra.mrb[22].mxu1 %vm1068_vm2, %v11215_v24  ;;  %v1672_v24 = vld [vmem:[#allocation9 + $0x88] sm:$0xff] }
 0x2a6   : >> { %1407 = vmatprep.mubr.f32.mxu0 %v19535_v34  ;;  %1520 = vmatprep.mubr.f32.mxu1 %v19535_v34  ;;  %v1676_v34 = vld [vmem:[#allocation9 + $0xa8] sm:$0xff] }
 0x2a9   : >> { %10546 = vmatmul.mubr.msk.f32.vlgmr.msra.gmra.mrb[10].mxu0 %vm1068_vm2, %v15788_v14  ;;  %10554 = vmatmul.mubr.msk.f32.vlgmr.msra.gmra.mrb[8].mxu1 %vm1068_vm2, %v15788_v14  ;;  %v15941_v14 = vpack.c.bf16 %v1676_v34, %v1672_v24  ;;  %v15953_v34 = vpack.c.bf16 %v1675_v5, %v1671_v52  ;;  %v1679_v24 = vld [vmem:[#allocation9 + $0xc0] sm:$0xff]  ;;  %v1694_v52 = vld [vmem:[#allocation9 + $0x138] sm:$0xff] }
 0x2aa   : >> { %1413 = vmatprep.mubr.f32.mxu0 %v20354_v55  ;;  %1526 = vmatprep.mubr.f32.mxu1 %v20354_v55  ;;  %v15979_v16 = vpack.c.bf16 %v1694_v52, %v1690_v25  ;;  %v1699_v25 = vld [vmem:[#allocation9 + $0x160] sm:$0xff] }
 0x2ab   : >> { %11458 = vmatpush1.bf16.msra.mxu0 %v15919_v13  ;;  %11586 = vmatpush1.bf16.msra.mxu1 %v15921_v15  ;;  %20357 = vst [vmem:[#allocation68_spill] sm:$0xff] %v15941_v14  ;;  %20359 = vst [vmem:[#allocation70_spill] sm:$0xff] %v15953_v34  ;;  %v1688_v15 = vld [vmem:[#allocation9 + $0x108] sm:$0xff] }
 0x2ac   : >> { %11460 = vmatprep.subr.bf16.mxu0 %v15923_v42  ;;  %11588 = vmatprep.subr.bf16.mxu1 %v15925_v48  ;;  %v1681_v48 = vld [vmem:[#allocation9 + $0xd0] sm:$0xff]  ;;  %20366 = vst [vmem:[#allocation77_spill] sm:$0xff] %v15979_v16 }
 0x2ad   : >> { %10547 = vmatmul.mubr.msk.f32.gmra.mrb[12].mxu0 %vm1068_vm2, %v15773_v1  ;;  %10555 = vmatmul.mubr.msk.f32.gmra.mrb[10].mxu1 %vm1068_vm2, %v15773_v1  ;;  %v15959_v1 = vpack.c.bf16 %v1684_v39, %v1680_v60  ;;  %v1685_v42 = vld [vmem:[#allocation9 + $0xf0] sm:$0xff]  ;;  %v15971_v60 = vpack.c.bf16 %v1683_v20, %v1679_v24  ;;  %v1687_v39 = vld [vmem:[#allocation9 + $0x100] sm:$0xff]  ;;  %v1702_v24 = vld [vmem:[#allocation9 + $0x178] sm:$0xff] }
 0x2ae   : >> { %1419 = vmatprep.mubr.f32.mxu0 %v20354_v55  ;;  %1532 = vmatprep.mubr.f32.mxu1 %v20354_v55  ;;  %v15973_v5 = vpack.c.bf16 %v1685_v42, %v1681_v48  ;;  %v1700_v48 = vld [vmem:[#allocation9 + $0x168] sm:$0xff]  ;;  %v1698_v42 = vld [vmem:[#allocation9 + $0x158] sm:$0xff] }
 0x2af   : >> { %11462 = vmatpush1.bf16.msra.mxu0 %v15935_v56  ;;  %11590 = vmatpush1.bf16.msra.mxu1 %v15937_v58  ;;  %20361 = vst [vmem:[#allocation72_spill] sm:$0xff] %v15959_v1  ;;  %20363 = vst [vmem:[#allocation74_spill] sm:$0xff] %v15971_v60  ;;  %v1696_v58 = vld [vmem:[#allocation9 + $0x148] sm:$0xff]  ;;  %v15997_v52 = vpack.c.bf16 %v1702_v24, %v1698_v42  ;;  %v1707_v42 = vld [vmem:[#allocation9 + $0x1a0] sm:$0xff] }
 0x2b0   : >> { %11464 = vmatprep.subr.bf16.mxu0 %v15941_v14  ;;  %11592 = vmatprep.subr.bf16.mxu1 %v15943_v8  ;;  %20364 = vst [vmem:[#allocation75_spill] sm:$0xff] %v15973_v5  ;;  %v1689_v8 = vld [vmem:[#allocation9 + $0x110] sm:$0xff] }
 0x2b1   : >> { %10548 = vmatmul.mubr.msk.f32.gmra.mrb[14].mxu0 %vm1068_vm2, %v15832_v43  ;;  %10556 = vmatmul.mubr.msk.f32.gmra.mrb[12].mxu1 %vm1068_vm2, %v15832_v43  ;;  %v15977_v43 = vpack.c.bf16 %v1692_v61, %v1688_v15  ;;  %v1693_v14 = vld [vmem:[#allocation9 + $0x130] sm:$0xff]  ;;  %v15989_v15 = vpack.c.bf16 %v1691_v44, %v1687_v39  ;;  %v1695_v61 = vld [vmem:[#allocation9 + $0x140] sm:$0xff]  ;;  %20370 = vst [vmem:[#allocation81_spill] sm:$0xff] %v15997_v52  ;;  %v1710_v39 = vld [vmem:[#allocation9 + $0x1b8] sm:$0xff] }
 0x2b2   : >> { %1425 = vmatprep.mubr.f32.mxu0 %v20354_v55  ;;  %1538 = vmatprep.mubr.f32.mxu1 %v20354_v55  ;;  %v15991_v20 = vpack.c.bf16 %v1693_v14, %v1689_v8  ;;  %v1708_v14 = vld [vmem:[#allocation9 + $0x1a8] sm:$0xff]  ;;  %v1706_v8 = vld [vmem:[#allocation9 + $0x198] sm:$0xff] }
 0x2b3   : >> { %11466 = vmatpush1.bf16.msra.mxu0 %v15953_v34  ;;  %11594 = vmatpush1.bf16.msra.mxu1 %v15955_v17  ;;  %20365 = vst [vmem:[#allocation76_spill] sm:$0xff] %v15977_v43  ;;  %20367 = vst [vmem:[#allocation78_spill] sm:$0xff] %v15989_v15  ;;  %v1704_v17 = vld [vmem:[#allocation9 + $0x188] sm:$0xff]  ;;  %v16015_v24 = vpack.c.bf16 %v1710_v39, %v1706_v8  ;;  %v1715_v8 = vld [vmem:[#allocation9 + $0x1e0] sm:$0xff] }
 0x2b4   : >> { %11468 = vmatprep.subr.bf16.mxu0 %v15959_v1  ;;  %11596 = vmatprep.subr.bf16.mxu1 %v15961_v49  ;;  %20368 = vst [vmem:[#allocation79_spill] sm:$0xff] %v15991_v20  ;;  %v1697_v49 = vld [vmem:[#allocation9 + $0x150] sm:$0xff] }
 0x2b5   : >> { %10549 = vmatmul.mubr.msk.f32.gmra.mrb[16].mxu0 %vm1068_vm2, %v15815_v27  ;;  %10557 = vmatmul.mubr.msk.f32.gmra.mrb[14].mxu1 %vm1068_vm2, %v15815_v27  ;;  %v15995_v27 = vpack.c.bf16 %v1700_v48, %v1696_v58  ;;  %v1701_v1 = vld [vmem:[#allocation9 + $0x170] sm:$0xff]  ;;  %v16007_v58 = vpack.c.bf16 %v1699_v25, %v1695_v61  ;;  %v1703_v48 = vld [vmem:[#allocation9 + $0x180] sm:$0xff]  ;;  %20374 = vst [vmem:[#allocation85_spill] sm:$0xff] %v16015_v24  ;;  %v1718_v61 = vld [vmem:[#allocation9 + $0x1f8] sm:$0xff] }
 0x2b6   : >> { %1431 = vmatprep.mubr.f32.mxu0 %v20354_v55  ;;  %1544 = vmatprep.mubr.f32.mxu1 %v20354_v55  ;;  %v16009_v44 = vpack.c.bf16 %v1701_v1, %v1697_v49  ;;  %v1716_v1 = vld [vmem:[#allocation9 + $0x1e8] sm:$0xff]  ;;  %v1714_v49 = vld [vmem:[#allocation9 + $0x1d8] sm:$0xff] }
 0x2b7   : >> { %11470 = vmatpush1.bf16.msra.mxu0 %v15971_v60  ;;  %11598 = vmatpush1.bf16.msra.mxu1 %v15973_v5  ;;  %20369 = vst [vmem:[#allocation80_spill] sm:$0xff] %v15995_v27  ;;  %20371 = vst [vmem:[#allocation82_spill] sm:$0xff] %v16007_v58  ;;  %v1712_v5 = vld [vmem:[#allocation9 + $0x1c8] sm:$0xff]  ;;  %v16033_v39 = vpack.c.bf16 %v1718_v61, %v1714_v49  ;;  %v1723_v49 = vld [vmem:[#allocation9 + $0x220] sm:$0xff] }
 0x2b8   : >> { %11472 = vmatprep.subr.bf16.mxu0 %v15977_v43  ;;  %11600 = vmatprep.subr.bf16.mxu1 %v15979_v16  ;;  %20372 = vst [vmem:[#allocation83_spill] sm:$0xff] %v16009_v44  ;;  %v1705_v16 = vld [vmem:[#allocation9 + $0x190] sm:$0xff] }
 0x2b9   : >> { %10550 = vmatmul.mubr.msk.f32.gmra.mrb[18].mxu0 %vm1068_vm2, %v15873_v12  ;;  %10558 = vmatmul.mubr.msk.f32.gmra.mrb[16].mxu1 %vm1068_vm2, %v15873_v12  ;;  %v16013_v12 = vpack.c.bf16 %v1708_v14, %v1704_v17  ;;  %v1709_v43 = vld [vmem:[#allocation9 + $0x1b0] sm:$0xff]  ;;  %v16025_v17 = vpack.c.bf16 %v1707_v42, %v1703_v48  ;;  %v1711_v14 = vld [vmem:[#allocation9 + $0x1c0] sm:$0xff]  ;;  %20378 = vst [vmem:[#allocation89_spill] sm:$0xff] %v16033_v39  ;;  %v1726_v48 = vld [vmem:[#allocation9 + $0x238] sm:$0xff] }
 0x2ba   : >> { %1437 = vmatprep.mubr.f32.mxu0 %v20354_v55  ;;  %1550 = vmatprep.mubr.f32.mxu1 %v20354_v55  ;;  %v16027_v25 = vpack.c.bf16 %v1709_v43, %v1705_v16  ;;  %v1724_v43 = vld [vmem:[#allocation9 + $0x228] sm:$0xff]  ;;  %v1722_v16 = vld [vmem:[#allocation9 + $0x218] sm:$0xff] }
 0x2bb   : >> { %11474 = vmatpush1.bf16.msra.mxu0 %v15989_v15  ;;  %11602 = vmatpush1.bf16.msra.mxu1 %v15991_v20  ;;  %20373 = vst [vmem:[#allocation84_spill] sm:$0xff] %v16013_v12  ;;  %20375 = vst [vmem:[#allocation86_spill] sm:$0xff] %v16025_v17  ;;  %v1720_v20 = vld [vmem:[#allocation9 + $0x208] sm:$0xff]  ;;  %v16051_v61 = vpack.c.bf16 %v1726_v48, %v1722_v16  ;;  %v1731_v16 = vld [vmem:[#allocation9 + $0x260] sm:$0xff] }
 0x2bc   : >> { %11476 = vmatprep.subr.bf16.mxu0 %v15995_v27  ;;  %11604 = vmatprep.subr.bf16.mxu1 %v15997_v52  ;;  %20376 = vst [vmem:[#allocation87_spill] sm:$0xff] %v16027_v25  ;;  %v1713_v52 = vld [vmem:[#allocation9 + $0x1d0] sm:$0xff]  ;;  %v1795_v15 = vld [vmem:[#allocation9 + $0x460] sm:$0xff] }
 0x2bd   : >> { %10551 = vmatmul.mubr.msk.f32.gmra.mrb[20].mxu0 %vm1068_vm2, %v15859_v57  ;;  %10559 = vmatmul.mubr.msk.f32.gmra.mrb[18].mxu1 %vm1068_vm2, %v15859_v57  ;;  %v16031_v57 = vpack.c.bf16 %v1716_v1, %v1712_v5  ;;  %v1717_v27 = vld [vmem:[#allocation9 + $0x1f0] sm:$0xff]  ;;  %v16043_v5 = vpack.c.bf16 %v1715_v8, %v1711_v14  ;;  %v1719_v1 = vld [vmem:[#allocation9 + $0x200] sm:$0xff]  ;;  %20382 = vst [vmem:[#allocation93_spill] sm:$0xff] %v16051_v61  ;;  %v1734_v14 = vld [vmem:[#allocation9 + $0x278] sm:$0xff] }
 0x2be   : >> { %1443 = vmatprep.mubr.f32.mxu0 %v20354_v55  ;;  %1556 = vmatprep.mubr.f32.mxu1 %v20354_v55  ;;  %v16045_v42 = vpack.c.bf16 %v1717_v27, %v1713_v52  ;;  %v1732_v27 = vld [vmem:[#allocation9 + $0x268] sm:$0xff]  ;;  %v1730_v52 = vld [vmem:[#allocation9 + $0x258] sm:$0xff] }
 0x2bf   : >> { %11478 = vmatpush1.bf16.msra.mxu0 %v16007_v58  ;;  %11606 = vmatpush1.bf16.msra.mxu1 %v16009_v44  ;;  %20377 = vst [vmem:[#allocation88_spill] sm:$0xff] %v16031_v57  ;;  %20379 = vst [vmem:[#allocation90_spill] sm:$0xff] %v16043_v5  ;;  %v1728_v44 = vld [vmem:[#allocation9 + $0x248] sm:$0xff] }
 0x2c0   : >> { %11480 = vmatprep.subr.bf16.mxu0 %v16013_v12  ;;  %11608 = vmatprep.subr.bf16.mxu1 %v16015_v24  ;;  %20380 = vst [vmem:[#allocation91_spill] sm:$0xff] %v16045_v42  ;;  %v1721_v24 = vld [vmem:[#allocation9 + $0x210] sm:$0xff]  ;;  %v16065_v48 = vpack.c.bf16 %v1732_v27, %v1728_v44 }
 0x2c1   : >> { %10552 = vmatmul.mubr.msk.f32.gmra.mrb[22].mxu0 %vm1068_vm2, %v15889_v35  ;;  %10560 = vmatmul.mubr.msk.f32.gmra.mrb[20].mxu1 %vm1068_vm2, %v15889_v35  ;;  %v16049_v35 = vpack.c.bf16 %v1724_v43, %v1720_v20  ;;  %v1725_v12 = vld [vmem:[#allocation9 + $0x230] sm:$0xff]  ;;  %v16059_v20 = vpack.c.bf16 %v1723_v49, %v1719_v1  ;;  %v1727_v43 = vld [vmem:[#allocation9 + $0x240] sm:$0xff] }
 0x2c2   : >> { %1449 = vmatprep.mubr.f32.mxu0 %v20354_v55  ;;  %1562 = vmatprep.mubr.f32.mxu1 %v20354_v55  ;;  %v16061_v8 = vpack.c.bf16 %v1725_v12, %v1721_v24  ;;  %20385 = vst [vmem:[#allocation96_spill] sm:$0xff] %v16065_v48  ;;  %v16071_v12 = vpack.c.bf16 %v1731_v16, %v1727_v43  ;;  %v1735_v1 = vld [vmem:[#allocation9 + $0x280] sm:$0xff] }
 0x2c3   : >> { %11482 = vmatpush1.bf16.msra.mxu0 %v16025_v17  ;;  %11610 = vmatpush1.bf16.msra.mxu1 %v16027_v25  ;;  %20381 = vst [vmem:[#allocation92_spill] sm:$0xff] %v16049_v35  ;;  %20383 = vst [vmem:[#allocation94_spill] sm:$0xff] %v16059_v20  ;;  %v1736_v25 = vld [vmem:[#allocation9 + $0x288] sm:$0xff]  ;;  %v1738_v17 = vld [vmem:[#allocation9 + $0x298] sm:$0xff] }
 0x2c4   : >> { %11484 = vmatprep.subr.bf16.mxu0 %v16031_v57  ;;  %11612 = vmatprep.subr.bf16.mxu1 %v16033_v39  ;;  %20384 = vst [vmem:[#allocation95_spill] sm:$0xff] %v16061_v8  ;;  %v1729_v39 = vld [vmem:[#allocation9 + $0x250] sm:$0xff]  ;;  %20387 = vst [vmem:[#allocation98_spill] sm:$0xff] %v16071_v12  ;;  %v1739_v49 = vld [vmem:[#allocation9 + $0x2a0] sm:$0xff] }
 0x2c5   : >> { %10553 = vmatmul.mubr.msk.f32.gmra.mrb[24].mxu0 %vm1068_vm2, %v15885_v41  ;;  %10561 = vmatmul.mubr.msk.f32.gmra.mrb[22].mxu1 %vm1068_vm2, %v15885_v41  ;;  %v16067_v41 = vpack.c.bf16 %v1734_v14, %v1730_v52  ;;  %v1733_v57 = vld [vmem:[#allocation9 + $0x270] sm:$0xff]  ;;  %v1743_v43 = vld [vmem:[#allocation9 + $0x2c0] sm:$0xff] }
 0x2c6   : >> { %v16073_v24 = vpack.c.bf16 %v1733_v57, %v1729_v39  ;;  %v1737_v52 = vld [vmem:[#allocation9 + $0x290] sm:$0xff]  ;;  %v16083_v57 = vpack.c.bf16 %v1739_v49, %v1735_v1  ;;  %v1747_v16 = vld [vmem:[#allocation9 + $0x2e0] sm:$0xff] }
 0x2c7   : >> { %11486 = vmatpush1.bf16.msra.mxu0 %v16043_v5  ;;  %11614 = vmatpush1.bf16.msra.mxu1 %v16045_v42  ;;  %20386 = vst [vmem:[#allocation97_spill] sm:$0xff] %v16067_v41  ;;  %v1740_v5 = vld [vmem:[#allocation9 + $0x2a8] sm:$0xff]  ;;  %v1742_v42 = vld [vmem:[#allocation9 + $0x2b8] sm:$0xff]  ;;  %v1741_v14 = vld [vmem:[#allocation9 + $0x2b0] sm:$0xff]  ;;  %v16095_v1 = vpack.c.bf16 %v1747_v16, %v1743_v43 }
 0x2c8   : >> { %11488 = vmatprep.subr.bf16.mxu0 %v16049_v35  ;;  %11616 = vmatprep.subr.bf16.mxu1 %v16051_v61  ;;  %20388 = vst [vmem:[#allocation99_spill] sm:$0xff] %v16073_v24  ;;  %v16077_v44 = vpack.c.bf16 %v1740_v5, %v1736_v25  ;;  %v16079_v27 = vpack.c.bf16 %v1742_v42, %v1738_v17  ;;  %v1744_v61 = vld [vmem:[#allocation9 + $0x2c8] sm:$0xff]  ;;  %v1746_v35 = vld [vmem:[#allocation9 + $0x2d8] sm:$0xff]  ;;  %20391 = vst [vmem:[#allocation102_spill] sm:$0xff] %v16083_v57 }
 0x2c9   : >> { %v16085_v39 = vpack.c.bf16 %v1741_v14, %v1737_v52  ;;  %v1745_v5 = vld [vmem:[#allocation9 + $0x2d0] sm:$0xff]  ;;  %20395 = vst [vmem:[#allocation106_spill] sm:$0xff] %v16095_v1  ;;  %v1751_v52 = vld [vmem:[#allocation9 + $0x300] sm:$0xff] }
 0x2ca   : >> { %20389 = vst [vmem:[#allocation100_spill] sm:$0xff] %v16077_v44  ;;  %20390 = vst [vmem:[#allocation101_spill] sm:$0xff] %v16079_v27  ;;  %v1749_v42 = vld [vmem:[#allocation9 + $0x2f0] sm:$0xff]  ;;  %v1755_v14 = vld [vmem:[#allocation9 + $0x320] sm:$0xff] }
 0x2cb   : >> { %11490 = vmatpush1.bf16.msra.mxu0 %v16059_v20  ;;  %11618 = vmatpush1.bf16.msra.mxu1 %v16061_v8  ;;  %v1748_v20 = vld [vmem:[#allocation9 + $0x2e8] sm:$0xff]  ;;  %v1750_v8 = vld [vmem:[#allocation9 + $0x2f8] sm:$0xff]  ;;  %20392 = vst [vmem:[#allocation103_spill] sm:$0xff] %v16085_v39  ;;  %v16097_v49 = vpack.c.bf16 %v1749_v42, %v1745_v5  ;;  %v16107_v43 = vpack.c.bf16 %v1755_v14, %v1751_v52  ;;  %v1759_v5 = vld [vmem:[#allocation9 + $0x340] sm:$0xff] }
 0x2cc   : >> { %11492 = vmatprep.subr.bf16.mxu0 %v16065_v48  ;;  %11620 = vmatprep.subr.bf16.mxu1 %v16067_v41  ;;  %v16089_v17 = vpack.c.bf16 %v1748_v20, %v1744_v61  ;;  %v16091_v25 = vpack.c.bf16 %v1750_v8, %v1746_v35  ;;  %v1752_v41 = vld [vmem:[#allocation9 + $0x308] sm:$0xff]  ;;  %v1754_v48 = vld [vmem:[#allocation9 + $0x318] sm:$0xff]  ;;  %v1753_v20 = vld [vmem:[#allocation9 + $0x310] sm:$0xff] }
 0x2cd   : >> { %20396 = vst [vmem:[#allocation107_spill] sm:$0xff] %v16097_v49  ;;  %v1757_v8 = vld [vmem:[#allocation9 + $0x330] sm:$0xff]  ;;  %20399 = vst [vmem:[#allocation110_spill] sm:$0xff] %v16107_v43  ;;  %v1763_v42 = vld [vmem:[#allocation9 + $0x360] sm:$0xff] }
 0x2ce   : >> { %20393 = vst [vmem:[#allocation104_spill] sm:$0xff] %v16089_v17  ;;  %20394 = vst [vmem:[#allocation105_spill] sm:$0xff] %v16091_v25  ;;  %v16109_v16 = vpack.c.bf16 %v1757_v8, %v1753_v20  ;;  %v16119_v52 = vpack.c.bf16 %v1763_v42, %v1759_v5  ;;  %v1767_v20 = vld [vmem:[#allocation9 + $0x380] sm:$0xff]  ;;  %v1773_v8 = vld [vmem:[#allocation9 + $0x3b0] sm:$0xff] }
 0x2cf   : >> { %11494 = vmatpush1.bf16.msra.mxu0 %v16071_v12  ;;  %11622 = vmatpush1.bf16.msra.mxu1 %v16073_v24  ;;  %v1756_v12 = vld [vmem:[#allocation9 + $0x328] sm:$0xff]  ;;  %v1758_v24 = vld [vmem:[#allocation9 + $0x338] sm:$0xff] }
 0x2d0   : >> { %11496 = vmatprep.subr.bf16.mxu0 %v16077_v44  ;;  %11624 = vmatprep.subr.bf16.mxu1 %v16079_v27  ;;  %v16101_v35 = vpack.c.bf16 %v1756_v12, %v1752_v41  ;;  %v16103_v61 = vpack.c.bf16 %v1758_v24, %v1754_v48  ;;  %v1760_v27 = vld [vmem:[#allocation9 + $0x348] sm:$0xff]  ;;  %v1762_v44 = vld [vmem:[#allocation9 + $0x358] sm:$0xff]  ;;  %20400 = vst [vmem:[#allocation111_spill] sm:$0xff] %v16109_v16  ;;  %v1761_v12 = vld [vmem:[#allocation9 + $0x350] sm:$0xff] }
 0x2d1   : >> { %v1765_v24 = vld [vmem:[#allocation9 + $0x370] sm:$0xff]  ;;  %20403 = vst [vmem:[#allocation114_spill] sm:$0xff] %v16119_v52 }
 0x2d2   : >> { %20397 = vst [vmem:[#allocation108_spill] sm:$0xff] %v16101_v35  ;;  %20398 = vst [vmem:[#allocation109_spill] sm:$0xff] %v16103_v61  ;;  %v16121_v14 = vpack.c.bf16 %v1765_v24, %v1761_v12  ;;  %v1782_v12 = vld [vmem:[#allocation9 + $0x3f8] sm:$0xff]  ;;  %v1775_v24 = vld [vmem:[#allocation9 + $0x3c0] sm:$0xff] }
 0x2d3   : >> { %11498 = vmatpush1.bf16.msra.mxu0 %v16083_v57  ;;  %11626 = vmatpush1.bf16.msra.mxu1 %v16085_v39  ;;  %v1764_v57 = vld [vmem:[#allocation9 + $0x368] sm:$0xff]  ;;  %v1766_v39 = vld [vmem:[#allocation9 + $0x378] sm:$0xff] }
 0x2d4   : >> { %11500 = vmatprep.subr.bf16.mxu0 %v16089_v17  ;;  %11628 = vmatprep.subr.bf16.mxu1 %v16091_v25  ;;  %v16113_v48 = vpack.c.bf16 %v1764_v57, %v1760_v27  ;;  %v16115_v41 = vpack.c.bf16 %v1766_v39, %v1762_v44  ;;  %v1768_v25 = vld [vmem:[#allocation9 + $0x388] sm:$0xff]  ;;  %v1770_v17 = vld [vmem:[#allocation9 + $0x398] sm:$0xff]  ;;  %20404 = vst [vmem:[#allocation115_spill] sm:$0xff] %v16121_v14  ;;  %v1771_v57 = vld [vmem:[#allocation9 + $0x3a0] sm:$0xff] }
 0x2d5   : >> { %v1769_v39 = vld [vmem:[#allocation9 + $0x390] sm:$0xff]  ;;  %v16131_v5 = vpack.c.bf16 %v1771_v57, %v1767_v20 }
 0x2d6   : >> { %20401 = vst [vmem:[#allocation112_spill] sm:$0xff] %v16113_v48  ;;  %20402 = vst [vmem:[#allocation113_spill] sm:$0xff] %v16115_v41  ;;  %v16133_v42 = vpack.c.bf16 %v1773_v8, %v1769_v39  ;;  %v1777_v39 = vld [vmem:[#allocation9 + $0x3d0] sm:$0xff] }
 0x2d7   : >> { %11502 = vmatpush1.bf16.msra.mxu0 %v16095_v1  ;;  %11630 = vmatpush1.bf16.msra.mxu1 %v16097_v49  ;;  %v1772_v1 = vld [vmem:[#allocation9 + $0x3a8] sm:$0xff]  ;;  %v1774_v49 = vld [vmem:[#allocation9 + $0x3b8] sm:$0xff]  ;;  %20407 = vst [vmem:[#allocation118_spill] sm:$0xff] %v16131_v5  ;;  %v1781_v8 = vld [vmem:[#allocation9 + $0x3f0] sm:$0xff] }
 0x2d8   : >> { %11504 = vmatprep.subr.bf16.mxu0 %v16101_v35  ;;  %11632 = vmatprep.subr.bf16.mxu1 %v16103_v61  ;;  %v16125_v44 = vpack.c.bf16 %v1772_v1, %v1768_v25  ;;  %v16127_v27 = vpack.c.bf16 %v1774_v49, %v1770_v17  ;;  %20408 = vst [vmem:[#allocation119_spill] sm:$0xff] %v16133_v42  ;;  %v1776_v17 = vld [vmem:[#allocation9 + $0x3c8] sm:$0xff]  ;;  %v1778_v1 = vld [vmem:[#allocation9 + $0x3d8] sm:$0xff] }
 0x2d9   : >> { %v1780_v25 = vld [vmem:[#allocation9 + $0x3e8] sm:$0xff]  ;;  %v16141_v20 = vpack.c.bf16 %v1782_v12, %v1778_v1  ;;  %v1790_v1 = vld [vmem:[#allocation9 + $0x438] sm:$0xff] }
 0x2da   : >> { %20405 = vst [vmem:[#allocation116_spill] sm:$0xff] %v16125_v44  ;;  %20406 = vst [vmem:[#allocation117_spill] sm:$0xff] %v16127_v27  ;;  %v16139_v49 = vpack.c.bf16 %v1780_v25, %v1776_v17  ;;  %v1788_v17 = vld [vmem:[#allocation9 + $0x428] sm:$0xff]  ;;  %v1786_v25 = vld [vmem:[#allocation9 + $0x418] sm:$0xff] }
 0x2db   : >> { %11506 = vmatpush1.bf16.msra.mxu0 %v16107_v43  ;;  %11634 = vmatpush1.bf16.msra.mxu1 %v16109_v16  ;;  %20410 = vst [vmem:[#allocation121_spill] sm:$0xff] %v16141_v20  ;;  %v16160_v12 = vld [vmem:[%s19501_s15] sm:$0xf] }
 0x2dc   : >> { %11508 = vmatprep.subr.bf16.mxu0 %v16113_v48  ;;  %11636 = vmatprep.subr.bf16.mxu1 %v16115_v41  ;;  %20409 = vst [vmem:[#allocation120_spill] sm:$0xff] %v16139_v49  ;;  %v1794_v41 = vld [vmem:[#allocation9 + $0x458] sm:$0xff] }
 0x2dd   : >> { %v1798_v48 = vld [vmem:[#allocation9 + $0x478] sm:$0xff] }
 0x2de   : >> { %v16190_v54 = vpack.c.bf16 %v1798_v48, %v1794_v41 }
 0x2df   : >> { %11510 = vmatpush1.bf16.msra.mxu0 %v16119_v52  ;;  %11638 = vmatpush1.bf16.msra.mxu1 %v16121_v14  ;;  %v1779_v14 = vld [vmem:[#allocation9 + $0x3e0] sm:$0xff]  ;;  %v1796_v52 = vld [vmem:[#allocation9 + $0x468] sm:$0xff] }
 0x2e0   : >> { %11512 = vmatprep.subr.bf16.mxu0 %v16125_v44  ;;  %11640 = vmatprep.subr.bf16.mxu1 %v16127_v27  ;;  %v16143_v57 = vpack.c.bf16 %v1779_v14, %v1775_v24  ;;  %v16146_v27 = vpack.c.bf16 %v1781_v8, %v1777_v39  ;;  %v16153_v14 = vpack.c.bf16 %v1790_v1, %v1786_v25  ;;  %v16163_v24 = vsub.s32 1, %v15461_v2  ;;  %v1783_v25 = vld [vmem:[#allocation9 + $0x400] sm:$0xff] }
 0x2e1   : >> { %v16167_v39 = vrot.slane %v16160_v12, %v15479_v9  ;;  %v1787_v1 = vld [vmem:[#allocation9 + $0x420] sm:$0xff]  ;;  %20418 = vst [vmem:[#allocation129_spill] sm:$0xff] %v16190_v54 }
 0x2e2   : >> { %20411 = vst [vmem:[#allocation122_spill] sm:$0xff] %v16143_v57  ;;  %20412 = vst [vmem:[#allocation123_spill] sm:$0xff] %v16146_v27  ;;  %v16181_v35 = vpack.c.bf16 %v1787_v1, %v1783_v25  ;;  %v1806_v1 = vld [vmem:[#allocation9 + $0x4b8] sm:$0xff] }
 0x2e3   : >> { %11514 = vmatpush1.bf16.msra.mxu0 %v16131_v5  ;;  %11642 = vmatpush1.bf16.msra.mxu1 %v16133_v42  ;;  %v1784_v42 = vld [vmem:[#allocation9 + $0x408] sm:$0xff]  ;;  %20414 = vst [vmem:[#allocation125_spill] sm:$0xff] %v16153_v14 }
 0x2e4   : >> { %11516 = vmatprep.subr.bf16.mxu0 %v16139_v49  ;;  %11644 = vmatprep.subr.bf16.mxu1 %v16141_v20  ;;  %v16151_v5 = vpack.c.bf16 %v1788_v17, %v1784_v42  ;;  %v16171_v42 = vrot.slane %v16160_v12, %v16163_v24  ;;  %v1789_v20 = vld [vmem:[#allocation9 + $0x430] sm:$0xff]  ;;  %v1792_v49 = vld [vmem:[#allocation9 + $0x448] sm:$0xff]  ;;  %20415 = vst [vmem:[#allocation126_spill] sm:$0xff] %v16181_v35 }
 0x2e6   : >> { %20413 = vst [vmem:[#allocation124_spill] sm:$0xff] %v16151_v5 }
 0x2e7   : >> { %11518 = vmatpush1.bf16.msra.mxu0 %v16143_v57  ;;  %11646 = vmatpush1.bf16.msra.mxu1 %v16146_v27  ;;  %v1785_v57 = vld [vmem:[#allocation9 + $0x410] sm:$0xff] }
 0x2e8   : >> { %11520 = vmatprep.subr.bf16.mxu0 %v16151_v5  ;;  %11648 = vmatprep.subr.bf16.mxu1 %v16153_v14  ;;  %v16183_v58 = vpack.c.bf16 %v1789_v20, %v1785_v57  ;;  %v1804_v20 = vld [vmem:[#allocation9 + $0x4a8] sm:$0xff]  ;;  %v1802_v57 = vld [vmem:[#allocation9 + $0x498] sm:$0xff] }
 0x2ea   : >> { %20416 = vst [vmem:[#allocation127_spill] sm:$0xff] %v16183_v58 }
 0x37c   : >> { %v1409_v8 = vpop.f32.mrb[10].mxu0  ;;  %v16173_v17 = vpop.f32.mrb[8].mxu1 }
 0x37d   : >> { %v1591_v14 = vadd.f32 %v16167_v39, %v1409_v8  ;;  %v1411_v5 = vpop.f32.mrb[11].mxu0  ;;  %v16176_v27 = vpop.f32.mrb[9].mxu1  ;;  %v1791_v8 = vld [vmem:[#allocation9 + $0x440] sm:$0xff] }
 0x37e   : >> { %v1592_v44 = vadd.f32 %v16171_v42, %v1411_v5  ;;  %v16188_v5 = vpack.c.bf16 %v1796_v52, %v1792_v49  ;;  %v16197_v41 = vpack.c.bf16 %v1795_v15, %v1791_v8  ;;  %v1801_v15 = vld [vmem:[#allocation9 + $0x490] sm:$0xff] }
 0x37f   : >> { %v1623_v60 = vmax.f32 %v1591_v14, 0.0  ;;  %v1803_v14 = vld [vmem:[#allocation9 + $0x4a0] sm:$0xff]  ;;  %v1805_v8 = vld [vmem:[#allocation9 + $0x4b0] sm:$0xff] }
 0x380   : >> { %v1624_v16 = vmax.f32 %v1592_v44, 0.0  ;;  %v1415_v43 = vpop.f32.mrb[12].mxu0  ;;  %v16179_v61 = vpop.f32.mrb[10].mxu1  ;;  %20417 = vst [vmem:[#allocation128_spill] sm:$0xff] %v16188_v5  ;;  %v1793_v44 = vld [vmem:[#allocation9 + $0x450] sm:$0xff]  ;;  %20419 = vst [vmem:[#allocation130_spill] sm:$0xff] %v16197_v41 }
 0x381   : >> { %v1595_v34 = vadd.f32 %v16167_v39, %v1415_v43  ;;  %v1417_v56 = vpop.f32.mrb[13].mxu0  ;;  %v16186_v13 = vpop.f32.mrb[11].mxu1  ;;  %v16199_v49 = vpack.c.bf16 %v1797_v53, %v1793_v44  ;;  %v1808_v53 = vld [vmem:[#allocation9 + $0x4c8] sm:$0xff] }
 0x382   : >> { %v1596_v25 = vadd.f32 %v16171_v42, %v1417_v56  ;;  %1997 = vmatprep.mubr.f32.mxu0 %v1624_v16  ;;  %2223 = vmatprep.mubr.f32.mxu1 %v1624_v16  ;;  %v1799_v56 = vld [vmem:[#allocation9 + $0x480] sm:$0xff] }
 0x383   : >> { %1998 = vmatmul.mubr.f32.vlgmr.msra.gmra.mrb[26].mxu0 %v1623_v60  ;;  %2224 = vmatmul.mubr.f32.vlgmr.msra.gmra.mrb[24].mxu1 %v1623_v60  ;;  %20420 = vst [vmem:[#allocation131_spill] sm:$0xff] %v16199_v49  ;;  %v1627_v16 = vmax.f32 %v1595_v34, 0.0  ;;  %v16206_v60 = vpack.c.bf16 %v1804_v20, %v1800_v38  ;;  %v1812_v34 = vld [vmem:[#allocation9 + $0x4e8] sm:$0xff] }
 0x384   : >> { %v1628_v43 = vmax.f32 %v1596_v25, 0.0  ;;  %11522 = vmatpush1.bf16.msra.mxu0 %v16181_v35  ;;  %11650 = vmatpush1.bf16.msra.mxu1 %v16183_v58  ;;  %v1421_v52 = vpop.f32.mrb[14].mxu0  ;;  %v16195_v48 = vpop.f32.mrb[12].mxu1  ;;  %v16208_v25 = vpack.c.bf16 %v1806_v1, %v1802_v57  ;;  %v1814_v58 = vld [vmem:[#allocation9 + $0x4f8] sm:$0xff]  ;;  %v16215_v57 = vpack.c.bf16 %v1803_v14, %v1799_v56  ;;  %v16217_v1 = vpack.c.bf16 %v1805_v8, %v1801_v15  ;;  %v1809_v56 = vld [vmem:[#allocation9 + $0x4d0] sm:$0xff]  ;;  %v1816_v15 = vld [vmem:[#allocation9 + $0x508] sm:$0xff] }
 0x385   : >> { %v1599_v36 = vadd.f32 %v16167_v39, %v1421_v52  ;;  %v1423_v26 = vpop.f32.mrb[15].mxu0  ;;  %v16202_v23 = vpop.f32.mrb[13].mxu1  ;;  %11524 = vmatprep.subr.bf16.mxu0 %v16188_v5  ;;  %11652 = vmatprep.subr.bf16.mxu1 %v16190_v54  ;;  %20421 = vst [vmem:[#allocation132_spill] sm:$0xff] %v16206_v60  ;;  %v1810_v52 = vld [vmem:[#allocation9 + $0x4d8] sm:$0xff]  ;;  %v1811_v54 = vld [vmem:[#allocation9 + $0x4e0] sm:$0xff]  ;;  %v1813_v14 = vld [vmem:[#allocation9 + $0x4f0] sm:$0xff] }
 0x386   : >> { %20422 = vst [vmem:[#allocation133_spill] sm:$0xff] %v16208_v25  ;;  %v1600_v44 = vadd.f32 %v16171_v42, %v1423_v26  ;;  %2003 = vmatprep.mubr.f32.mxu0 %v1628_v43  ;;  %2229 = vmatprep.mubr.f32.mxu1 %v1628_v43  ;;  %20423 = vst [vmem:[#allocation134_spill] sm:$0xff] %v16215_v57  ;;  %v1807_v26 = vld [vmem:[#allocation9 + $0x4c0] sm:$0xff] }
 0x387   : >> { %2004 = vmatmul.mubr.f32.gmra.mrb[28].mxu0 %v1627_v16  ;;  %2230 = vmatmul.mubr.f32.gmra.mrb[26].mxu1 %v1627_v16  ;;  %20424 = vst [vmem:[#allocation135_spill] sm:$0xff] %v16217_v1  ;;  %v1631_v43 = vmax.f32 %v1599_v36, 0.0  ;;  %v16224_v16 = vpack.c.bf16 %v1812_v34, %v1808_v53  ;;  %v1820_v36 = vld [vmem:[#allocation9 + $0x528] sm:$0xff]  ;;  %v16233_v34 = vpack.c.bf16 %v1811_v54, %v1807_v26  ;;  %v1817_v54 = vld [vmem:[#allocation9 + $0x510] sm:$0xff] }
 0x388   : >> { %v1632_v35 = vmax.f32 %v1600_v44, 0.0  ;;  %11526 = vmatpush1.bf16.msra.mxu0 %v16197_v41  ;;  %11654 = vmatpush1.bf16.msra.mxu1 %v16199_v49  ;;  %v1427_v38 = vpop.f32.mrb[16].mxu0  ;;  %v16213_v20 = vpop.f32.mrb[14].mxu1  ;;  %v16226_v44 = vpack.c.bf16 %v1814_v58, %v1810_v52  ;;  %v1822_v49 = vld [vmem:[#allocation9 + $0x538] sm:$0xff]  ;;  %v16235_v52 = vpack.c.bf16 %v1813_v14, %v1809_v56  ;;  %v1821_v26 = vld [vmem:[#allocation9 + $0x530] sm:$0xff]  ;;  %v1824_v56 = vld [vmem:[#allocation9 + $0x548] sm:$0xff] }
 0x389   : >> { %v1603_v5 = vadd.f32 %v16167_v39, %v1427_v38  ;;  %v1429_v11 = vpop.f32.mrb[17].mxu0  ;;  %v16220_v7 = vpop.f32.mrb[15].mxu1  ;;  %11528 = vmatprep.subr.bf16.mxu0 %v16206_v60  ;;  %11656 = vmatprep.subr.bf16.mxu1 %v16208_v25  ;;  %20425 = vst [vmem:[#allocation136_spill] sm:$0xff] %v16224_v16  ;;  %v1818_v38 = vld [vmem:[#allocation9 + $0x518] sm:$0xff]  ;;  %20427 = vst [vmem:[#allocation138_spill] sm:$0xff] %v16233_v34  ;;  %v1819_v25 = vld [vmem:[#allocation9 + $0x520] sm:$0xff] }
 0x38a   : >> { %20426 = vst [vmem:[#allocation137_spill] sm:$0xff] %v16226_v44  ;;  %v1604_v8 = vadd.f32 %v16171_v42, %v1429_v11  ;;  %2009 = vmatprep.mubr.f32.mxu0 %v1632_v35  ;;  %2235 = vmatprep.mubr.f32.mxu1 %v1632_v35  ;;  %20428 = vst [vmem:[#allocation139_spill] sm:$0xff] %v16235_v52  ;;  %v1815_v11 = vld [vmem:[#allocation9 + $0x500] sm:$0xff] }
 0x38b   : >> { %2010 = vmatmul.mubr.f32.gmra.mrb[30].mxu0 %v1631_v43  ;;  %2236 = vmatmul.mubr.f32.gmra.mrb[28].mxu1 %v1631_v43  ;;  %v1635_v35 = vmax.f32 %v1603_v5, 0.0  ;;  %v16242_v43 = vpack.c.bf16 %v1820_v36, %v1816_v15  ;;  %v1828_v5 = vld [vmem:[#allocation9 + $0x568] sm:$0xff]  ;;  %v16251_v36 = vpack.c.bf16 %v1819_v25, %v1815_v11  ;;  %v1825_v25 = vld [vmem:[#allocation9 + $0x550] sm:$0xff] }
 0x38c   : >> { %v1636_v41 = vmax.f32 %v1604_v8, 0.0  ;;  %11530 = vmatpush1.bf16.msra.mxu0 %v16215_v57  ;;  %11658 = vmatpush1.bf16.msra.mxu1 %v16217_v1  ;;  %v1433_v53 = vpop.f32.mrb[18].mxu0  ;;  %v16231_v58 = vpop.f32.mrb[16].mxu1  ;;  %v16244_v8 = vpack.c.bf16 %v1822_v49, %v1818_v38  ;;  %v1830_v1 = vld [vmem:[#allocation9 + $0x578] sm:$0xff]  ;;  %v16253_v38 = vpack.c.bf16 %v1821_v26, %v1817_v54  ;;  %v1829_v11 = vld [vmem:[#allocation9 + $0x570] sm:$0xff]  ;;  %v1832_v54 = vld [vmem:[#allocation9 + $0x588] sm:$0xff] }
 0x38d   : >> { %v1607_v60 = vadd.f32 %v16167_v39, %v1433_v53  ;;  %v1435_v0 = vpop.f32.mrb[19].mxu0  ;;  %v16238_v59 = vpop.f32.mrb[17].mxu1  ;;  %11532 = vmatprep.subr.bf16.mxu0 %v16224_v16  ;;  %11660 = vmatprep.subr.bf16.mxu1 %v16226_v44  ;;  %20429 = vst [vmem:[#allocation140_spill] sm:$0xff] %v16242_v43  ;;  %v1826_v53 = vld [vmem:[#allocation9 + $0x558] sm:$0xff]  ;;  %20431 = vst [vmem:[#allocation142_spill] sm:$0xff] %v16251_v36  ;;  %v1827_v44 = vld [vmem:[#allocation9 + $0x560] sm:$0xff] }
 0x38e   : >> { %20430 = vst [vmem:[#allocation141_spill] sm:$0xff] %v16244_v8  ;;  %v1608_v14 = vadd.f32 %v16171_v42, %v1435_v0  ;;  %2015 = vmatprep.mubr.f32.mxu0 %v1636_v41  ;;  %2241 = vmatprep.mubr.f32.mxu1 %v1636_v41  ;;  %20432 = vst [vmem:[#allocation143_spill] sm:$0xff] %v16253_v38  ;;  %v1823_v0 = vld [vmem:[#allocation9 + $0x540] sm:$0xff] }
 0x38f   : >> { %2016 = vmatmul.mubr.f32.gmra.mrb[32].mxu0 %v1635_v35  ;;  %2242 = vmatmul.mubr.f32.gmra.mrb[30].mxu1 %v1635_v35  ;;  %v1639_v41 = vmax.f32 %v1607_v60, 0.0  ;;  %v16260_v35 = vpack.c.bf16 %v1828_v5, %v1824_v56  ;;  %v1836_v60 = vld [vmem:[#allocation9 + $0x5a8] sm:$0xff]  ;;  %v16272_v5 = vpack.c.bf16 %v1827_v44, %v1823_v0  ;;  %v1833_v44 = vld [vmem:[#allocation9 + $0x590] sm:$0xff] }
 0x390   : >> { %v1640_v57 = vmax.f32 %v1608_v14, 0.0  ;;  %11534 = vmatpush1.bf16.msra.mxu0 %v16233_v34  ;;  %11662 = vmatpush1.bf16.msra.mxu1 %v16235_v52  ;;  %v1439_v15 = vpop.f32.mrb[20].mxu0  ;;  %v16249_v49 = vpop.f32.mrb[18].mxu1  ;;  %v16262_v14 = vpack.c.bf16 %v1830_v1, %v1826_v53  ;;  %v1838_v52 = vld [vmem:[#allocation9 + $0x5b8] sm:$0xff]  ;;  %v16266_v34 = vsub.s32 3, %v15461_v2  ;;  %v1835_v53 = vld [vmem:[#allocation9 + $0x5a0] sm:$0xff] }
 0x391   : >> { %v1611_v16 = vadd.f32 %v16167_v39, %v1439_v15  ;;  %v1441_v45 = vpop.f32.mrb[21].mxu0  ;;  %v16256_v40 = vpop.f32.mrb[19].mxu1  ;;  %11536 = vmatprep.subr.bf16.mxu0 %v16242_v43  ;;  %11664 = vmatprep.subr.bf16.mxu1 %v16244_v8  ;;  %20433 = vst [vmem:[#allocation144_spill] sm:$0xff] %v16260_v35  ;;  %v1834_v15 = vld [vmem:[#allocation9 + $0x598] sm:$0xff]  ;;  %20436 = vst [vmem:[#allocation147_spill] sm:$0xff] %v16272_v5  ;;  %v1837_v0 = vld [vmem:[#allocation9 + $0x5b0] sm:$0xff] }
 0x392   : >> { %20434 = vst [vmem:[#allocation145_spill] sm:$0xff] %v16262_v14  ;;  %v1612_v26 = vadd.f32 %v16171_v42, %v1441_v45  ;;  %2021 = vmatprep.mubr.f32.mxu0 %v1640_v57  ;;  %2247 = vmatprep.mubr.f32.mxu1 %v1640_v57  ;;  %20435 = vst [vmem:[#allocation146_spill] sm:$0xff] %v16266_v34  ;;  %v16274_v45 = vpack.c.bf16 %v1829_v11, %v1825_v25  ;;  %v1831_v57 = vld [vmem:[#allocation9 + $0x580] sm:$0xff]  ;;  %v1840_v25 = vld [vmem:[#allocation9 + $0x5c8] sm:$0xff] }
 0x393   : >> { %2022 = vmatmul.mubr.f32.gmra.mrb[34].mxu0 %v1639_v41  ;;  %2248 = vmatmul.mubr.f32.gmra.mrb[32].mxu1 %v1639_v41  ;;  %v1643_v43 = vmax.f32 %v1611_v16, 0.0  ;;  %v16281_v41 = vpack.c.bf16 %v1836_v60, %v1832_v54  ;;  %v1844_v16 = vld [vmem:[#allocation9 + $0x5e8] sm:$0xff] }
 0x394   : >> { %v1644_v8 = vmax.f32 %v1612_v26, 0.0  ;;  %11538 = vmatpush1.bf16.msra.mxu0 %v16251_v36  ;;  %11666 = vmatpush1.bf16.msra.mxu1 %v16253_v38  ;;  %v1445_v1 = vpop.f32.mrb[22].mxu0  ;;  %v16270_v56 = vpop.f32.mrb[20].mxu1  ;;  %20437 = vst [vmem:[#allocation148_spill] sm:$0xff] %v16274_v45  ;;  %v16283_v26 = vpack.c.bf16 %v1838_v52, %v1834_v15  ;;  %v1846_v38 = vld [vmem:[#allocation9 + $0x5f8] sm:$0xff]  ;;  %v16288_v36 = vrot.slane %v16160_v12, %v16266_v34  ;;  %v1839_v15 = vld [vmem:[#allocation9 + $0x5c0] sm:$0xff] }
 0x395   : >> { %v1615_v31 = vadd.f32 %v16167_v39, %v1445_v1  ;;  %v1447_v22 = vpop.f32.mrb[23].mxu0  ;;  %v16277_v19 = vpop.f32.mrb[21].mxu1  ;;  %11540 = vmatprep.subr.bf16.mxu0 %v16260_v35  ;;  %11668 = vmatprep.subr.bf16.mxu1 %v16262_v14  ;;  %20438 = vst [vmem:[#allocation149_spill] sm:$0xff] %v16281_v41  ;;  %v1842_v1 = vld [vmem:[#allocation9 + $0x5d8] sm:$0xff] }
 0x396   : >> { %20439 = vst [vmem:[#allocation150_spill] sm:$0xff] %v16283_v26  ;;  %v1616_v11 = vadd.f32 %v16171_v42, %v1447_v22  ;;  %2027 = vmatprep.mubr.f32.mxu0 %v1644_v8  ;;  %2253 = vmatprep.mubr.f32.mxu1 %v1644_v8  ;;  %v16294_v22 = vpack.c.bf16 %v1835_v53, %v1831_v57  ;;  %v1841_v57 = vld [vmem:[#allocation9 + $0x5d0] sm:$0xff] }
 0x397   : >> { %2028 = vmatmul.mubr.f32.gmra.mrb[36].mxu0 %v1643_v43  ;;  %2254 = vmatmul.mubr.f32.gmra.mrb[34].mxu1 %v1643_v43  ;;  %v16296_v8 = vpack.c.bf16 %v1837_v0, %v1833_v44  ;;  %v1647_v14 = vmax.f32 %v1615_v31, 0.0  ;;  %v16303_v43 = vpack.c.bf16 %v1844_v16, %v1840_v25  ;;  %v1845_v53 = vld [vmem:[#allocation9 + $0x5f0] sm:$0xff]  ;;  %v1848_v31 = vld [vmem:[#allocation9 + $0x608] sm:$0xff]  ;;  %v1594_v0 = vadd.f32 %v16288_v36, %v16176_v27 }
 0x398   : >> { %v1648_v54 = vmax.f32 %v1616_v11, 0.0  ;;  %11542 = vmatpush1.bf16.msra.mxu0 %v16272_v5  ;;  %11670 = vmatpush1.bf16.msra.mxu1 %v16274_v45  ;;  %v1451_v52 = vpop.f32.mrb[24].mxu0  ;;  %v16292_v60 = vpop.f32.mrb[22].mxu1  ;;  %20440 = vst [vmem:[#allocation151_spill] sm:$0xff] %v16294_v22  ;;  %v16305_v11 = vpack.c.bf16 %v1846_v38, %v1842_v1  ;;  %v1843_v45 = vld [vmem:[#allocation9 + $0x5e0] sm:$0xff]  ;;  %v16314_v16 = vpack.c.bf16 %v1845_v53, %v1841_v57  ;;  %v1849_v27 = vld [vmem:[#allocation9 + $0x610] sm:$0xff] }
 0x399   : >> { %v1619_v35 = vadd.f32 %v16167_v39, %v1451_v52  ;;  %v1453_v4 = vpop.f32.mrb[25].mxu0  ;;  %v16299_v63 = vpop.f32.mrb[23].mxu1  ;;  %11544 = vmatprep.subr.bf16.mxu0 %v16281_v41  ;;  %11672 = vmatprep.subr.bf16.mxu1 %v16283_v26  ;;  %20441 = vst [vmem:[#allocation152_spill] sm:$0xff] %v16303_v43  ;;  %v1852_v52 = vld [vmem:[#allocation9 + $0x628] sm:$0xff]  ;;  %v1850_v41 = vld [vmem:[#allocation9 + $0x618] sm:$0xff]  ;;  %v16312_v38 = vpack.c.bf16 %v1843_v45, %v1839_v15  ;;  %v1851_v1 = vld [vmem:[#allocation9 + $0x620] sm:$0xff] }
 0x39a   : >> { %20442 = vst [vmem:[#allocation153_spill] sm:$0xff] %v16305_v11  ;;  %v1620_v44 = vadd.f32 %v16171_v42, %v1453_v4  ;;  %2033 = vmatprep.mubr.f32.mxu0 %v1648_v54  ;;  %2259 = vmatprep.mubr.f32.mxu1 %v1648_v54  ;;  %v1854_v26 = vld [vmem:[#allocation9 + $0x638] sm:$0xff]  ;;  %20444 = vst [vmem:[#allocation155_spill] sm:$0xff] %v16314_v16  ;;  %v1847_v4 = vld [vmem:[#allocation9 + $0x600] sm:$0xff]  ;;  %v1626_v53 = vmax.f32 %v1594_v0, 0.0 }
 0x39b   : >> { %2034 = vmatmul.mubr.f32.gmra.mrb[38].mxu0 %v1647_v14  ;;  %2260 = vmatmul.mubr.f32.gmra.mrb[36].mxu1 %v1647_v14  ;;  %20443 = vst [vmem:[#allocation154_spill] sm:$0xff] %v16312_v38  ;;  %v1651_v54 = vmax.f32 %v1619_v35, 0.0  ;;  %v1853_v14 = vld [vmem:[#allocation9 + $0x630] sm:$0xff]  ;;  %v1856_v5 = vld [vmem:[#allocation9 + $0x648] sm:$0xff]  ;;  %v1858_v15 = vld [vmem:[#allocation9 + $0x658] sm:$0xff]  ;;  %v16324_v35 = vpack.c.bf16 %v1851_v1, %v1847_v4 }
 0x39c   : >> { %v1652_v25 = vmax.f32 %v1620_v44, 0.0  ;;  %11546 = vmatpush1.bf16.msra.mxu0 %v16294_v22  ;;  %11674 = vmatpush1.bf16.msra.mxu1 %v16296_v8  ;;  %v16318_v44 = vpack.c.bf16 %v1852_v52, %v1848_v31  ;;  %v16320_v22 = vpack.c.bf16 %v1854_v26, %v1850_v41  ;;  %v1860_v45 = vld [vmem:[#allocation9 + $0x668] sm:$0xff]  ;;  %v1862_v57 = vld [vmem:[#allocation9 + $0x678] sm:$0xff]  ;;  %v1857_v31 = vld [vmem:[#allocation9 + $0x650] sm:$0xff] }
 0x39d   : >> { %11548 = vmatprep.subr.bf16.mxu0 %v16303_v43  ;;  %11676 = vmatprep.subr.bf16.mxu1 %v16305_v11  ;;  %20447 = vst [vmem:[#allocation158_spill] sm:$0xff] %v16324_v35  ;;  %v16326_v11 = vpack.c.bf16 %v1853_v14, %v1849_v27  ;;  %v1855_v43 = vld [vmem:[#allocation9 + $0x640] sm:$0xff]  ;;  %v16328_v41 = vpack.c.bf16 %v1860_v45, %v1856_v5  ;;  %v1861_v0 = vld [vmem:[#allocation9 + $0x670] sm:$0xff]  ;;  %v1864_v52 = vld [vmem:[#allocation9 + $0x688] sm:$0xff] }
 0x39e   : >> { %2039 = vmatprep.mubr.f32.mxu0 %v1652_v25  ;;  %2265 = vmatprep.mubr.f32.mxu1 %v1652_v25  ;;  %20445 = vst [vmem:[#allocation156_spill] sm:$0xff] %v16318_v44  ;;  %20446 = vst [vmem:[#allocation157_spill] sm:$0xff] %v16320_v22  ;;  %v1859_v25 = vld [vmem:[#allocation9 + $0x660] sm:$0xff]  ;;  %v16330_v26 = vpack.c.bf16 %v1862_v57, %v1858_v15  ;;  %v1866_v4 = vld [vmem:[#allocation9 + $0x698] sm:$0xff]  ;;  %v16338_v5 = vpack.c.bf16 %v1861_v0, %v1857_v31 }
 0x39f   : >> { %2040 = vmatmul.mubr.f32.gmra.mrb[40].mxu0 %v1651_v54  ;;  %2266 = vmatmul.mubr.f32.gmra.mrb[38].mxu1 %v1651_v54  ;;  %20448 = vst [vmem:[#allocation159_spill] sm:$0xff] %v16326_v11  ;;  %20449 = vst [vmem:[#allocation160_spill] sm:$0xff] %v16328_v41  ;;  %v1868_v54 = vld [vmem:[#allocation9 + $0x6a8] sm:$0xff]  ;;  %v1870_v1 = vld [vmem:[#allocation9 + $0x6b8] sm:$0xff]  ;;  %v16336_v27 = vpack.c.bf16 %v1859_v25, %v1855_v43 }
 0x3a0   : >> { %11550 = vmatpush1.bf16.msra.mxu0 %v16312_v38  ;;  %11678 = vmatpush1.bf16.msra.mxu1 %v16314_v16  ;;  %20450 = vst [vmem:[#allocation161_spill] sm:$0xff] %v16330_v26  ;;  %20452 = vst [vmem:[#allocation163_spill] sm:$0xff] %v16338_v5  ;;  %v1863_v14 = vld [vmem:[#allocation9 + $0x680] sm:$0xff]  ;;  %v16342_v15 = vpack.c.bf16 %v1868_v54, %v1864_v52  ;;  %v16344_v57 = vpack.c.bf16 %v1870_v1, %v1866_v4  ;;  %v1874_v16 = vld [vmem:[#allocation9 + $0x6d8] sm:$0xff] }
 0x3a1   : >> { %2110 = vmatprep.mubr.f32.mxu0 %v1626_v53  ;;  %2336 = vmatprep.mubr.f32.mxu1 %v1626_v53  ;;  %20451 = vst [vmem:[#allocation162_spill] sm:$0xff] %v16336_v27  ;;  %v1867_v45 = vld [vmem:[#allocation9 + $0x6a0] sm:$0xff]  ;;  %v1865_v53 = vld [vmem:[#allocation9 + $0x690] sm:$0xff] }
 0x3a2   : >> { %11552 = vmatprep.subr.bf16.mxu0 %v16318_v44  ;;  %11680 = vmatprep.subr.bf16.mxu1 %v16320_v22  ;;  %20453 = vst [vmem:[#allocation164_spill] sm:$0xff] %v16342_v15  ;;  %20454 = vst [vmem:[#allocation165_spill] sm:$0xff] %v16344_v57  ;;  %v1869_v22 = vld [vmem:[#allocation9 + $0x6b0] sm:$0xff]  ;;  %v1872_v44 = vld [vmem:[#allocation9 + $0x6c8] sm:$0xff]  ;;  %v16348_v43 = vpack.c.bf16 %v1867_v45, %v1863_v14 }
 0x3a3   : >> { %v16350_v25 = vpack.c.bf16 %v1869_v22, %v1865_v53  ;;  %v1871_v31 = vld [vmem:[#allocation9 + $0x6c0] sm:$0xff]  ;;  %v1873_v4 = vld [vmem:[#allocation9 + $0x6d0] sm:$0xff] }
 0x3a4   : >> { %11554 = vmatpush1.bf16.msra.mxu0 %v16324_v35  ;;  %11682 = vmatpush1.bf16.msra.mxu1 %v16326_v11  ;;  %v1876_v35 = vld [vmem:[#allocation9 + $0x6e8] sm:$0xff]  ;;  %v1878_v11 = vld [vmem:[#allocation9 + $0x6f8] sm:$0xff]  ;;  %20455 = vst [vmem:[#allocation166_spill] sm:$0xff] %v16348_v43  ;;  %v1875_v0 = vld [vmem:[#allocation9 + $0x6e0] sm:$0xff] }
 0x3a5   : >> { %11556 = vmatprep.subr.bf16.mxu0 %v16328_v41  ;;  %11684 = vmatprep.subr.bf16.mxu1 %v16330_v26  ;;  %20456 = vst [vmem:[#allocation167_spill] sm:$0xff] %v16350_v25  ;;  %v16354_v52 = vpack.c.bf16 %v1876_v35, %v1872_v44  ;;  %v16356_v54 = vpack.c.bf16 %v1878_v11, %v1874_v16  ;;  %v1877_v1 = vld [vmem:[#allocation9 + $0x6f0] sm:$0xff]  ;;  %v1880_v26 = vld [vmem:[#allocation9 + $0x708] sm:$0xff]  ;;  %v1882_v41 = vld [vmem:[#allocation9 + $0x718] sm:$0xff] }
 0x3a6   : >> { %v16360_v22 = vpack.c.bf16 %v1875_v0, %v1871_v31  ;;  %v16362_v14 = vpack.c.bf16 %v1877_v1, %v1873_v4  ;;  %v1879_v45 = vld [vmem:[#allocation9 + $0x700] sm:$0xff]  ;;  %v1881_v44 = vld [vmem:[#allocation9 + $0x710] sm:$0xff] }
 0x3a7   : >> { %20457 = vst [vmem:[#allocation168_spill] sm:$0xff] %v16354_v52  ;;  %20458 = vst [vmem:[#allocation169_spill] sm:$0xff] %v16356_v54  ;;  %v1883_v53 = vld [vmem:[#allocation9 + $0x720] sm:$0xff]  ;;  %v1885_v35 = vld [vmem:[#allocation9 + $0x730] sm:$0xff] }
 0x3a8   : >> { %11558 = vmatpush1.bf16.msra.mxu0 %v16336_v27  ;;  %11686 = vmatpush1.bf16.msra.mxu1 %v16338_v5  ;;  %v1884_v27 = vld [vmem:[#allocation9 + $0x728] sm:$0xff]  ;;  %v1886_v5 = vld [vmem:[#allocation9 + $0x738] sm:$0xff]  ;;  %20459 = vst [vmem:[#allocation170_spill] sm:$0xff] %v16360_v22  ;;  %20460 = vst [vmem:[#allocation171_spill] sm:$0xff] %v16362_v14  ;;  %v16372_v31 = vpack.c.bf16 %v1883_v53, %v1879_v45  ;;  %v16374_v0 = vpack.c.bf16 %v1885_v35, %v1881_v44 }
 0x3a9   : >> { %11560 = vmatprep.subr.bf16.mxu0 %v16342_v15  ;;  %11688 = vmatprep.subr.bf16.mxu1 %v16344_v57  ;;  %v16366_v11 = vpack.c.bf16 %v1884_v27, %v1880_v26  ;;  %v16368_v16 = vpack.c.bf16 %v1886_v5, %v1882_v41  ;;  %v1888_v57 = vld [vmem:[#allocation9 + $0x748] sm:$0xff]  ;;  %v1890_v15 = vld [vmem:[#allocation9 + $0x758] sm:$0xff]  ;;  %v1887_v4 = vld [vmem:[#allocation9 + $0x740] sm:$0xff] }
 0x3aa   : >> { %20463 = vst [vmem:[#allocation174_spill] sm:$0xff] %v16372_v31  ;;  %20464 = vst [vmem:[#allocation175_spill] sm:$0xff] %v16374_v0  ;;  %v1891_v1 = vld [vmem:[#allocation9 + $0x760] sm:$0xff]  ;;  %v1889_v27 = vld [vmem:[#allocation9 + $0x750] sm:$0xff] }
 0x3ab   : >> { %20461 = vst [vmem:[#allocation172_spill] sm:$0xff] %v16366_v11  ;;  %20462 = vst [vmem:[#allocation173_spill] sm:$0xff] %v16368_v16  ;;  %v1893_v5 = vld [vmem:[#allocation9 + $0x770] sm:$0xff]  ;;  %v16384_v45 = vpack.c.bf16 %v1891_v1, %v1887_v4  ;;  %v1895_v44 = vld [vmem:[#allocation9 + $0x780] sm:$0xff] }
 0x3ac   : >> { %11562 = vmatpush1.bf16.msra.mxu0 %v16348_v43  ;;  %11690 = vmatpush1.bf16.msra.mxu1 %v16350_v25  ;;  %v1892_v43 = vld [vmem:[#allocation9 + $0x768] sm:$0xff]  ;;  %v1894_v25 = vld [vmem:[#allocation9 + $0x778] sm:$0xff]  ;;  %v16386_v53 = vpack.c.bf16 %v1893_v5, %v1889_v27  ;;  %v1899_v35 = vld [vmem:[#allocation9 + $0x7a0] sm:$0xff] }
 0x3ad   : >> { %11564 = vmatprep.subr.bf16.mxu0 %v16354_v52  ;;  %11692 = vmatprep.subr.bf16.mxu1 %v16356_v54  ;;  %v16378_v41 = vpack.c.bf16 %v1892_v43, %v1888_v57  ;;  %v16380_v26 = vpack.c.bf16 %v1894_v25, %v1890_v15  ;;  %v1896_v54 = vld [vmem:[#allocation9 + $0x788] sm:$0xff]  ;;  %v1898_v52 = vld [vmem:[#allocation9 + $0x798] sm:$0xff]  ;;  %20467 = vst [vmem:[#allocation178_spill] sm:$0xff] %v16384_v45  ;;  %v16389_v57 = vsub.s32 2, %v15461_v2  ;;  %v1897_v25 = vld [vmem:[#allocation9 + $0x790] sm:$0xff] }
 0x3ae   : >> { %20468 = vst [vmem:[#allocation179_spill] sm:$0xff] %v16386_v53  ;;  %v1908_v4 = vld [vmem:[#allocation9 + $0x7e8] sm:$0xff]  ;;  %v1906_v1 = vld [vmem:[#allocation9 + $0x7d8] sm:$0xff]  ;;  %v16399_v2 = vpack.c.bf16 %v1899_v35, %v1895_v44 }
 0x3af   : >> { %20465 = vst [vmem:[#allocation176_spill] sm:$0xff] %v16378_v41  ;;  %20466 = vst [vmem:[#allocation177_spill] sm:$0xff] %v16380_v26  ;;  %v1910_v27 = vld [vmem:[#allocation9 + $0x7f8] sm:$0xff] }
 0x3b0   : >> { %11566 = vmatpush1.bf16.msra.mxu0 %v16360_v22  ;;  %11694 = vmatpush1.bf16.msra.mxu1 %v16362_v14  ;;  %v1900_v22 = vld [vmem:[#allocation9 + $0x7a8] sm:$0xff]  ;;  %v1902_v14 = vld [vmem:[#allocation9 + $0x7b8] sm:$0xff]  ;;  %20469 = vst [vmem:[#allocation180_spill] sm:$0xff] %v16389_v57  ;;  %20472 = vst [vmem:[#allocation183_spill] sm:$0xff] %v16399_v2 }
 0x3b1   : >> { %11568 = vmatprep.subr.bf16.mxu0 %v16366_v11  ;;  %11696 = vmatprep.subr.bf16.mxu1 %v16368_v16  ;;  %v16393_v15 = vpack.c.bf16 %v1900_v22, %v1896_v54  ;;  %v16395_v43 = vpack.c.bf16 %v1902_v14, %v1898_v52  ;;  %v16405_v54 = vrot.slane %v16160_v12, %v16389_v57  ;;  %v1907_v14 = vld [vmem:[#allocation9 + $0x7e0] sm:$0xff] }
 0x3b2   : >> { %v16411_v22 = vpack.c.bf16 %v1910_v27, %v1906_v1  ;;  %v1610_v27 = vadd.f32 %v16288_v36, %v16238_v59 }
 0x3b3   : >> { %20470 = vst [vmem:[#allocation181_spill] sm:$0xff] %v16393_v15  ;;  %20471 = vst [vmem:[#allocation182_spill] sm:$0xff] %v16395_v43  ;;  %v1593_v12 = vadd.f32 %v16405_v54, %v16173_v17  ;;  %v1613_v59 = vadd.f32 %v16405_v54, %v16249_v49 }
 0x3b4   : >> { %11570 = vmatpush1.bf16.msra.mxu0 %v16372_v31  ;;  %11698 = vmatpush1.bf16.msra.mxu1 %v16374_v0  ;;  %v1901_v31 = vld [vmem:[#allocation9 + $0x7b0] sm:$0xff]  ;;  %v1904_v0 = vld [vmem:[#allocation9 + $0x7c8] sm:$0xff]  ;;  %20474 = vst [vmem:[#allocation185_spill] sm:$0xff] %v16405_v54  ;;  %20476 = vst [vmem:[#allocation187_spill] sm:$0xff] %v16411_v22 }
 0x3b5   : >> { %11572 = vmatprep.subr.bf16.mxu0 %v16378_v41  ;;  %11700 = vmatprep.subr.bf16.mxu1 %v16380_v26  ;;  %v16401_v5 = vpack.c.bf16 %v1901_v31, %v1897_v25  ;;  %v1903_v41 = vld [vmem:[#allocation9 + $0x7c0] sm:$0xff]  ;;  %v16409_v52 = vpack.c.bf16 %v1908_v4, %v1904_v0  ;;  %v1598_v0 = vadd.f32 %v16288_v36, %v16186_v13  ;;  %v1625_v35 = vmax.f32 %v1593_v12, 0.0 }
 0x3b6   : >> { %v16415_v31 = vpack.c.bf16 %v1907_v14, %v1903_v41  ;;  %v1597_v41 = vadd.f32 %v16405_v54, %v16179_v61  ;;  %v1601_v13 = vadd.f32 %v16405_v54, %v16195_v48  ;;  %v1606_v4 = vadd.f32 %v16288_v36, %v16220_v7 }
 0x3b7   : >> { %20473 = vst [vmem:[#allocation184_spill] sm:$0xff] %v16401_v5  ;;  %20475 = vst [vmem:[#allocation186_spill] sm:$0xff] %v16409_v52  ;;  %v1609_v7 = vadd.f32 %v16405_v54, %v16231_v58  ;;  %v1642_v14 = vmax.f32 %v1610_v27, 0.0  ;;  %v1614_v12 = vadd.f32 %v16288_v36, %v16256_v40  ;;  %v1645_v58 = vmax.f32 %v1613_v59, 0.0 }
 0x3b8   : >> { %11574 = vmatpush1.bf16.msra.mxu0 %v16384_v45  ;;  %11702 = vmatpush1.bf16.msra.mxu1 %v16386_v53  ;;  %v1905_v45 = vld [vmem:[#allocation9 + $0x7d0] sm:$0xff]  ;;  %20477 = vst [vmem:[#allocation188_spill] sm:$0xff] %v16415_v31  ;;  %v1629_v17 = vmax.f32 %v1597_v41, 0.0  ;;  %v1633_v61 = vmax.f32 %v1601_v13, 0.0  ;;  %v1638_v1 = vmax.f32 %v1606_v4, 0.0  ;;  %v1617_v40 = vadd.f32 %v16405_v54, %v16270_v56 }
 0x3b9   : >> { %11576 = vmatprep.subr.bf16.mxu0 %v16393_v15  ;;  %11704 = vmatprep.subr.bf16.mxu1 %v16395_v43  ;;  %v1909_v53 = vld [vmem:[#allocation9 + $0x7f0] sm:$0xff] }
 0x3ba   : >> { %v16417_v44 = vpack.c.bf16 %v1909_v53, %v1905_v45  ;;  %v1630_v45 = vmax.f32 %v1598_v0, 0.0  ;;  %v1602_v53 = vadd.f32 %v16288_v36, %v16202_v23  ;;  %v1605_v23 = vadd.f32 %v16405_v54, %v16213_v20 }
 0x3bb   : >> { %v1641_v20 = vmax.f32 %v1609_v7, 0.0  ;;  %v1646_v0 = vmax.f32 %v1614_v12, 0.0  ;;  %v1649_v49 = vmax.f32 %v1617_v40, 0.0 }
 0x3bc   : >> { %11578 = vmatpush1.bf16.msra.mxu0 %v16399_v2  ;;  %11706 = vmatpush1.bf16.msra.mxu1 %v16401_v5  ;;  %20478 = vst [vmem:[#allocation189_spill] sm:$0xff] %v16417_v44  ;;  %v1634_v25 = vmax.f32 %v1602_v53, 0.0  ;;  %v1637_v48 = vmax.f32 %v1605_v23, 0.0 }
 0x3bd   : >> { %11580 = vmatprep.subr.bf16.mxu0 %v16409_v52  ;;  %11708 = vmatprep.subr.bf16.mxu1 %v16411_v22 }
 0x3c0   : >> { %11582 = vmatpush1.bf16.msra.mxu0 %v16415_v31  ;;  %11710 = vmatpush1.bf16.msra.mxu1 %v16417_v44 }
 0x3c3   : >> { %2111 = vmatmul.mubr.f32.vlgmr.msra.gmra.mrb[26].mxu0 %v1625_v35  ;;  %2337 = vmatmul.mubr.f32.vlgmr.msra.gmra.mrb[24].mxu1 %v1625_v35  ;;  %v1618_v35 = vadd.f32 %v16288_v36, %v16277_v19  ;;  %v1621_v19 = vadd.f32 %v16405_v54, %v16292_v60 }
 0x3c4   : >> { %2116 = vmatprep.mubr.f32.mxu0 %v1630_v45  ;;  %2342 = vmatprep.mubr.f32.mxu1 %v1630_v45  ;;  %v1622_v45 = vadd.f32 %v16288_v36, %v16299_v63  ;;  %v1911_v63 = vld [vmem:[%s19502_s16] sm:$0xf] }
 0x3c5   : >> { %v1650_v41 = vmax.f32 %v1618_v35, 0.0  ;;  %v16459_v56 = vrot.slane %v1911_v63, %v15479_v9  ;;  %v16462_v60 = vrot.slane %v1911_v63, %v16389_v57  ;;  %v16465_v13 = vrot.slane %v1911_v63, %v16163_v24 }
 0x3c6   : >> { %v1654_v53 = vmax.f32 %v1622_v45, 0.0 }
 0x3c7   : >> { %2117 = vmatmul.mubr.f32.gmra.mrb[28].mxu0 %v1629_v17  ;;  %2343 = vmatmul.mubr.f32.gmra.mrb[26].mxu1 %v1629_v17  ;;  %v1653_v17 = vmax.f32 %v1621_v19, 0.0  ;;  %20479 = vst [vmem:[#allocation190_spill] sm:$0xff] %v16459_v56  ;;  %20480 = vst [vmem:[#allocation191_spill] sm:$0xff] %v16462_v60 }
 0x3c8   : >> { %2122 = vmatprep.mubr.f32.mxu0 %v1634_v25  ;;  %2348 = vmatprep.mubr.f32.mxu1 %v1634_v25  ;;  %20481 = vst [vmem:[#allocation192_spill] sm:$0xff] %v16465_v13  ;;  %v16468_v25 = vrot.slane %v1911_v63, %v16266_v34 }
 0x3ca   : >> { %20482 = vst [vmem:[#allocation193_spill] sm:$0xff] %v16468_v25 }
 0x3cb   : >> { %2123 = vmatmul.mubr.f32.gmra.mrb[30].mxu0 %v1633_v61  ;;  %2349 = vmatmul.mubr.f32.gmra.mrb[28].mxu1 %v1633_v61 }
 0x3cc   : >> { %2128 = vmatprep.mubr.f32.mxu0 %v1638_v1  ;;  %2354 = vmatprep.mubr.f32.mxu1 %v1638_v1 }
 0x3cf   : >> { %2129 = vmatmul.mubr.f32.gmra.mrb[32].mxu0 %v1637_v48  ;;  %2355 = vmatmul.mubr.f32.gmra.mrb[30].mxu1 %v1637_v48 }
 0x3d0   : >> { %2134 = vmatprep.mubr.f32.mxu0 %v1642_v14  ;;  %2360 = vmatprep.mubr.f32.mxu1 %v1642_v14 }
 0x3d3   : >> { %2135 = vmatmul.mubr.f32.gmra.mrb[34].mxu0 %v1641_v20  ;;  %2361 = vmatmul.mubr.f32.gmra.mrb[32].mxu1 %v1641_v20 }
 0x3d4   : >> { %2140 = vmatprep.mubr.f32.mxu0 %v1646_v0  ;;  %2366 = vmatprep.mubr.f32.mxu1 %v1646_v0 }
 0x3d7   : >> { %2141 = vmatmul.mubr.f32.gmra.mrb[36].mxu0 %v1645_v58  ;;  %2367 = vmatmul.mubr.f32.gmra.mrb[34].mxu1 %v1645_v58 }
 0x3d8   : >> { %2146 = vmatprep.mubr.f32.mxu0 %v1650_v41  ;;  %2372 = vmatprep.mubr.f32.mxu1 %v1650_v41 }
 0x3db   : >> { %2147 = vmatmul.mubr.f32.gmra.mrb[38].mxu0 %v1649_v49  ;;  %2373 = vmatmul.mubr.f32.gmra.mrb[36].mxu1 %v1649_v49 }
 0x3dc   : >> { %2152 = vmatprep.mubr.f32.mxu0 %v1654_v53  ;;  %2378 = vmatprep.mubr.f32.mxu1 %v1654_v53 }
 0x3df   : >> { %2153 = vmatmul.mubr.f32.gmra.mrb[40].mxu0 %v1653_v17  ;;  %2379 = vmatmul.mubr.f32.gmra.mrb[38].mxu1 %v1653_v17 }
 0x3e0   : >> { %2489 = vmatprep.mubr.f32.mxu0 %v20354_v55  ;;  %2566 = vmatprep.mubr.f32.mxu1 %v20354_v55 }
 0x496   : >> { %v2112_v4 = vpop.f32.mrb[26].mxu0  ;;  %v2338_v61 = vpop.f32.mrb[24].mxu1 }
 0x497   : >> { %v2114_v23 = vpop.f32.mrb[27].mxu0  ;;  %v2340_v1 = vpop.f32.mrb[25].mxu1  ;;  %v14268_v27 = vadd.f32 %v2112_v4, %v16459_v56  ;;  %v14284_v48 = vadd.f32 %v2338_v61, %v16462_v60 }
 0x498   : >> { %v14269_v7 = vadd.f32 %v2114_v23, %v16465_v13  ;;  %v14285_v14 = vadd.f32 %v2340_v1, %v16468_v25 }
 0x499   : >> { %v2385_v45 = vmax.f32 %v14268_v27, 0.0  ;;  %v2387_v49 = vmax.f32 %v14284_v48, 0.0 }
 0x49a   : >> { %v2118_v12 = vpop.f32.mrb[28].mxu0  ;;  %v2344_v20 = vpop.f32.mrb[26].mxu1  ;;  %v2386_v17 = vmax.f32 %v14269_v7, 0.0  ;;  %v2388_v63 = vmax.f32 %v14285_v14, 0.0 }
 0x49b   : >> { %v14270_v59 = vadd.f32 %v2118_v12, %v16459_v56  ;;  %v14286_v0 = vadd.f32 %v2344_v20, %v16462_v60  ;;  %v2120_v35 = vpop.f32.mrb[29].mxu0  ;;  %v2346_v58 = vpop.f32.mrb[27].mxu1 }
 0x49c   : >> { %v14271_v40 = vadd.f32 %v2120_v35, %v16465_v13  ;;  %v14287_v41 = vadd.f32 %v2346_v58, %v16468_v25 }
 0x49d   : >> { %v2389_v19 = vmax.f32 %v14270_v59, 0.0  ;;  %v2391_v53 = vmax.f32 %v14286_v0, 0.0 }
 0x49e   : >> { %v2390_v4 = vmax.f32 %v14271_v40, 0.0  ;;  %v2392_v61 = vmax.f32 %v14287_v41, 0.0  ;;  %v2124_v23 = vpop.f32.mrb[30].mxu0  ;;  %v2350_v1 = vpop.f32.mrb[28].mxu1 }
 0x49f   : >> { %v11713_v44 = vpack.c.bf16 %v2389_v19, %v2385_v45  ;;  %v11729_v12 = vpack.c.bf16 %v2391_v53, %v2387_v49  ;;  %v2126_v31 = vpop.f32.mrb[31].mxu0  ;;  %v2352_v20 = vpop.f32.mrb[29].mxu1  ;;  %v14272_v35 = vadd.f32 %v2124_v23, %v16459_v56  ;;  %v14288_v58 = vadd.f32 %v2350_v1, %v16462_v60 }
 0x4a0   : >> { %v11711_v22 = vpack.c.bf16 %v2390_v4, %v2386_v17  ;;  %v11727_v52 = vpack.c.bf16 %v2392_v61, %v2388_v63  ;;  %v14273_v27 = vadd.f32 %v2126_v31, %v16465_v13  ;;  %v14289_v48 = vadd.f32 %v2352_v20, %v16468_v25 }
 0x4a1   : >> { %v2393_v19 = vmax.f32 %v14272_v35, 0.0  ;;  %v2395_v31 = vmax.f32 %v14288_v58, 0.0 }
 0x4a2   : >> { %v2130_v7 = vpop.f32.mrb[32].mxu0  ;;  %v2356_v14 = vpop.f32.mrb[30].mxu1  ;;  %11712 = vmatprep.subr.bf16.mxu0 %v11711_v22  ;;  %11728 = vmatprep.subr.bf16.mxu1 %v11727_v52  ;;  %v2394_v63 = vmax.f32 %v14273_v27, 0.0  ;;  %v2396_v4 = vmax.f32 %v14289_v48, 0.0 }
 0x4a3   : >> { %v14274_v59 = vadd.f32 %v2130_v7, %v16459_v56  ;;  %v14290_v0 = vadd.f32 %v2356_v14, %v16462_v60  ;;  %v2132_v40 = vpop.f32.mrb[33].mxu0  ;;  %v2358_v41 = vpop.f32.mrb[31].mxu1  ;;  %11714 = vmatpush1.bf16.msra.mxu0 %v11713_v44  ;;  %11730 = vmatpush1.bf16.msra.mxu1 %v11729_v12 }
 0x4a4   : >> { %v14275_v45 = vadd.f32 %v2132_v40, %v16465_v13  ;;  %v14291_v49 = vadd.f32 %v2358_v41, %v16468_v25 }
 0x4a5   : >> { %v2397_v53 = vmax.f32 %v14274_v59, 0.0  ;;  %v2399_v17 = vmax.f32 %v14290_v0, 0.0 }
 0x4a6   : >> { %v2398_v22 = vmax.f32 %v14275_v45, 0.0  ;;  %v2400_v52 = vmax.f32 %v14291_v49, 0.0  ;;  %v2136_v61 = vpop.f32.mrb[34].mxu0  ;;  %v2362_v23 = vpop.f32.mrb[32].mxu1 }
 0x4a7   : >> { %v11717_v1 = vpack.c.bf16 %v2397_v53, %v2393_v19  ;;  %v11733_v20 = vpack.c.bf16 %v2399_v17, %v2395_v31  ;;  %v2138_v7 = vpop.f32.mrb[35].mxu0  ;;  %v2364_v14 = vpop.f32.mrb[33].mxu1  ;;  %v14276_v40 = vadd.f32 %v2136_v61, %v16459_v56  ;;  %v14292_v41 = vadd.f32 %v2362_v23, %v16462_v60 }
 0x4a8   : >> { %v11715_v44 = vpack.c.bf16 %v2398_v22, %v2394_v63  ;;  %v11731_v12 = vpack.c.bf16 %v2400_v52, %v2396_v4  ;;  %v14277_v35 = vadd.f32 %v2138_v7, %v16465_v13  ;;  %v14293_v58 = vadd.f32 %v2364_v14, %v16468_v25 }
 0x4a9   : >> { %v2401_v53 = vmax.f32 %v14276_v40, 0.0  ;;  %v2403_v17 = vmax.f32 %v14292_v41, 0.0 }
 0x4aa   : >> { %v2142_v27 = vpop.f32.mrb[36].mxu0  ;;  %v2368_v48 = vpop.f32.mrb[34].mxu1  ;;  %11716 = vmatprep.subr.bf16.mxu0 %v11715_v44  ;;  %11732 = vmatprep.subr.bf16.mxu1 %v11731_v12  ;;  %v2402_v22 = vmax.f32 %v14277_v35, 0.0  ;;  %v2404_v52 = vmax.f32 %v14293_v58, 0.0 }
 0x4ab   : >> { %v14278_v59 = vadd.f32 %v2142_v27, %v16459_v56  ;;  %v14294_v0 = vadd.f32 %v2368_v48, %v16462_v60  ;;  %v2144_v45 = vpop.f32.mrb[37].mxu0  ;;  %v2370_v49 = vpop.f32.mrb[35].mxu1  ;;  %11718 = vmatpush1.bf16.msra.mxu0 %v11717_v1  ;;  %11734 = vmatpush1.bf16.msra.mxu1 %v11733_v20 }
 0x4ac   : >> { %v14279_v19 = vadd.f32 %v2144_v45, %v16465_v13  ;;  %v14295_v31 = vadd.f32 %v2370_v49, %v16468_v25 }
 0x4ad   : >> { %v2405_v63 = vmax.f32 %v14278_v59, 0.0  ;;  %v2407_v4 = vmax.f32 %v14294_v0, 0.0 }
 0x4ae   : >> { %v2406_v61 = vmax.f32 %v14279_v19, 0.0  ;;  %v2408_v23 = vmax.f32 %v14295_v31, 0.0  ;;  %v2148_v7 = vpop.f32.mrb[38].mxu0  ;;  %v2374_v14 = vpop.f32.mrb[36].mxu1 }
 0x4af   : >> { %v11721_v44 = vpack.c.bf16 %v2405_v63, %v2401_v53  ;;  %v11737_v12 = vpack.c.bf16 %v2407_v4, %v2403_v17  ;;  %v2150_v27 = vpop.f32.mrb[39].mxu0  ;;  %v2376_v48 = vpop.f32.mrb[37].mxu1  ;;  %v14280_v45 = vadd.f32 %v2148_v7, %v16459_v56  ;;  %v14296_v49 = vadd.f32 %v2374_v14, %v16462_v60  ;;  %v2612_v63 = vld [vmem:[#allocation10 + $0x8] sm:$0xff]  ;;  %v2614_v7 = vld [vmem:[#allocation10 + $0x18] sm:$0xff] }
 0x4b0   : >> { %v11719_v1 = vpack.c.bf16 %v2406_v61, %v2402_v22  ;;  %v11735_v20 = vpack.c.bf16 %v2408_v23, %v2404_v52  ;;  %v14281_v40 = vadd.f32 %v2150_v27, %v16465_v13  ;;  %v14297_v41 = vadd.f32 %v2376_v48, %v16468_v25  ;;  %v2616_v4 = vld [vmem:[#allocation10 + $0x28] sm:$0xff]  ;;  %v2618_v14 = vld [vmem:[#allocation10 + $0x38] sm:$0xff] }
 0x4b1   : >> { %v2409_v22 = vmax.f32 %v14280_v45, 0.0  ;;  %v2411_v52 = vmax.f32 %v14296_v49, 0.0  ;;  %v2613_v45 = vld [vmem:[#allocation10 + $0x10] sm:$0xff] }
 0x4b2   : >> { %v2154_v35 = vpop.f32.mrb[40].mxu0  ;;  %v2380_v58 = vpop.f32.mrb[38].mxu1  ;;  %11720 = vmatprep.subr.bf16.mxu0 %v11719_v1  ;;  %11736 = vmatprep.subr.bf16.mxu1 %v11735_v20  ;;  %v2410_v27 = vmax.f32 %v14281_v40, 0.0  ;;  %v2412_v48 = vmax.f32 %v14297_v41, 0.0  ;;  %v2617_v49 = vld [vmem:[#allocation10 + $0x30] sm:$0xff]  ;;  %v2622_v40 = vld [vmem:[#allocation10 + $0x58] sm:$0xff] }
 0x4b3   : >> { %v14282_v59 = vadd.f32 %v2154_v35, %v16459_v56  ;;  %v14298_v0 = vadd.f32 %v2380_v58, %v16462_v60  ;;  %v2156_v19 = vpop.f32.mrb[41].mxu0  ;;  %v2382_v31 = vpop.f32.mrb[39].mxu1  ;;  %11722 = vmatpush1.bf16.msra.mxu0 %v11721_v44  ;;  %11738 = vmatpush1.bf16.msra.mxu1 %v11737_v12  ;;  %v16502_v60 = vpack.c.bf16 %v2616_v4, %v2612_v63  ;;  %v2626_v41 = vld [vmem:[#allocation10 + $0x78] sm:$0xff]  ;;  %v2619_v4 = vld [vmem:[#allocation10 + $0x40] sm:$0xff] }
 0x4b4   : >> { %v14283_v53 = vadd.f32 %v2156_v19, %v16465_v13  ;;  %v14299_v17 = vadd.f32 %v2382_v31, %v16468_v25  ;;  %v16504_v19 = vpack.c.bf16 %v2618_v14, %v2614_v7  ;;  %v2611_v31 = vld [vmem:[#allocation10] sm:$0xff]  ;;  %v16513_v63 = vpack.c.bf16 %v2617_v49, %v2613_v45  ;;  %v2625_v7 = vld [vmem:[#allocation10 + $0x70] sm:$0xff]  ;;  %v2628_v14 = vld [vmem:[#allocation10 + $0x88] sm:$0xff] }
 0x4b5   : >> { %v2413_v61 = vmax.f32 %v14282_v59, 0.0  ;;  %v2415_v23 = vmax.f32 %v14298_v0, 0.0  ;;  %20483 = vst [vmem:[#allocation194_spill] sm:$0xff] %v16502_v60  ;;  %v2615_v25 = vld [vmem:[#allocation10 + $0x20] sm:$0xff]  ;;  %v2620_v59 = vld [vmem:[#allocation10 + $0x48] sm:$0xff]  ;;  %v2629_v45 = vld [vmem:[#allocation10 + $0x90] sm:$0xff] }
 0x4b6   : >> { %v2414_v1 = vmax.f32 %v14283_v53, 0.0  ;;  %v2416_v20 = vmax.f32 %v14299_v17, 0.0  ;;  %20484 = vst [vmem:[#allocation195_spill] sm:$0xff] %v16504_v19  ;;  %v2624_v0 = vld [vmem:[#allocation10 + $0x68] sm:$0xff]  ;;  %v2417_v53 = vld [vmem:[%s19492_s6] sm:$0xff]  ;;  %v16511_v17 = vpack.c.bf16 %v2615_v25, %v2611_v31  ;;  %20486 = vst [vmem:[#allocation197_spill] sm:$0xff] %v16513_v63 }
 0x4b7   : >> { %v11725_v35 = vpack.c.bf16 %v2413_v61, %v2409_v22  ;;  %v11741_v58 = vpack.c.bf16 %v2415_v23, %v2411_v52  ;;  %v2623_v22 = vld [vmem:[#allocation10 + $0x60] sm:$0xff]  ;;  %v16515_v52 = vpack.c.bf16 %v2624_v0, %v2620_v59  ;;  %v16517_v61 = vpack.c.bf16 %v2626_v41, %v2622_v40  ;;  %v2621_v23 = vld [vmem:[#allocation10 + $0x50] sm:$0xff]  ;;  %v2636_v59 = vld [vmem:[#allocation10 + $0xc8] sm:$0xff] }
 0x4b8   : >> { %v11723_v44 = vpack.c.bf16 %v2414_v1, %v2410_v27  ;;  %v11739_v12 = vpack.c.bf16 %v2416_v20, %v2412_v48  ;;  %20485 = vst [vmem:[#allocation196_spill] sm:$0xff] %v16511_v17  ;;  %v2632_v27 = vld [vmem:[#allocation10 + $0xa8] sm:$0xff]  ;;  %v2630_v48 = vld [vmem:[#allocation10 + $0x98] sm:$0xff]  ;;  %v16528_v20 = vpack.c.bf16 %v2623_v22, %v2619_v4  ;;  %v2633_v49 = vld [vmem:[#allocation10 + $0xb0] sm:$0xff] }
 0x4b9   : >> { %20487 = vst [vmem:[#allocation198_spill] sm:$0xff] %v16515_v52  ;;  %20488 = vst [vmem:[#allocation199_spill] sm:$0xff] %v16517_v61  ;;  %v2634_v1 = vld [vmem:[#allocation10 + $0xb8] sm:$0xff]  ;;  %v2418_v25 = vld [vmem:[%s19492_s6 + $0x8] sm:$0xff]  ;;  %v16544_v4 = vpack.c.bf16 %v2633_v49, %v2629_v45 }
 0x4ba   : >> { %11724 = vmatprep.subr.bf16.mxu0 %v11723_v44  ;;  %11740 = vmatprep.subr.bf16.mxu1 %v11739_v12  ;;  %20489 = vst [vmem:[#allocation200_spill] sm:$0xff] %v16528_v20  ;;  %v2631_v44 = vld [vmem:[#allocation10 + $0xa0] sm:$0xff]  ;;  %v16534_v12 = vpack.c.bf16 %v2632_v27, %v2628_v14  ;;  %v16536_v31 = vpack.c.bf16 %v2634_v1, %v2630_v48  ;;  %v2640_v0 = vld [vmem:[#allocation10 + $0xe8] sm:$0xff]  ;;  %v2638_v40 = vld [vmem:[#allocation10 + $0xd8] sm:$0xff] }
 0x4bb   : >> { %11726 = vmatpush1.bf16.msra.mxu0 %v11725_v35  ;;  %11742 = vmatpush1.bf16.msra.mxu1 %v11741_v58  ;;  %v16530_v35 = vpack.c.bf16 %v2625_v7, %v2621_v23  ;;  %v2627_v58 = vld [vmem:[#allocation10 + $0x80] sm:$0xff]  ;;  %v2642_v41 = vld [vmem:[#allocation10 + $0xf8] sm:$0xff]  ;;  %20494 = vst [vmem:[#allocation205_spill] sm:$0xff] %v16544_v4  ;;  %v16548_v7 = vpack.c.bf16 %v2640_v0, %v2636_v59  ;;  %v2637_v27 = vld [vmem:[#allocation10 + $0xd0] sm:$0xff] }
 0x4bc   : >> { %11744 = vmatprep.subr.bf16.mxu0 %v16502_v60  ;;  %11872 = vmatprep.subr.bf16.mxu1 %v16504_v19  ;;  %20491 = vst [vmem:[#allocation202_spill] sm:$0xff] %v16534_v12  ;;  %20492 = vst [vmem:[#allocation203_spill] sm:$0xff] %v16536_v31  ;;  %v2635_v22 = vld [vmem:[#allocation10 + $0xc0] sm:$0xff]  ;;  %v16550_v14 = vpack.c.bf16 %v2642_v41, %v2638_v40  ;;  %v2641_v48 = vld [vmem:[#allocation10 + $0xf0] sm:$0xff] }
 0x4bd   : >> { %20490 = vst [vmem:[#allocation201_spill] sm:$0xff] %v16530_v35  ;;  %v2639_v23 = vld [vmem:[#allocation10 + $0xe0] sm:$0xff]  ;;  %20495 = vst [vmem:[#allocation206_spill] sm:$0xff] %v16548_v7  ;;  %v2644_v1 = vld [vmem:[#allocation10 + $0x108] sm:$0xff] }
 0x4be   : >> { %10562 = vmatmul.mubr.msk.f32.vlgmr.msra.gmra.mrb[42].mxu0 %vm1068_vm2, %v2417_v53  ;;  %10564 = vmatmul.mubr.msk.f32.vlgmr.msra.gmra.mrb[40].mxu1 %vm1068_vm2, %v2417_v53  ;;  %v16542_v53 = vpack.c.bf16 %v2631_v44, %v2627_v58  ;;  %20496 = vst [vmem:[#allocation207_spill] sm:$0xff] %v16550_v14  ;;  %v16554_v58 = vpack.c.bf16 %v2639_v23, %v2635_v22  ;;  %v2643_v45 = vld [vmem:[#allocation10 + $0x100] sm:$0xff]  ;;  %v2645_v40 = vld [vmem:[#allocation10 + $0x110] sm:$0xff]  ;;  %v2654_v19 = vld [vmem:[#allocation10 + $0x158] sm:$0xff] }
 0x4bf   : >> { %2495 = vmatprep.mubr.f32.mxu0 %v20354_v55  ;;  %2572 = vmatprep.mubr.f32.mxu1 %v20354_v55  ;;  %v16556_v44 = vpack.c.bf16 %v2641_v48, %v2637_v27  ;;  %v2647_v49 = vld [vmem:[#allocation10 + $0x120] sm:$0xff]  ;;  %v2649_v41 = vld [vmem:[#allocation10 + $0x130] sm:$0xff]  ;;  %v2664_v13 = vld [vmem:[#allocation10 + $0x1a8] sm:$0xff] }
 0x4c0   : >> { %11746 = vmatpush1.bf16.msra.mxu0 %v16511_v17  ;;  %11874 = vmatpush1.bf16.msra.mxu1 %v16513_v63  ;;  %20493 = vst [vmem:[#allocation204_spill] sm:$0xff] %v16542_v53  ;;  %20497 = vst [vmem:[#allocation208_spill] sm:$0xff] %v16554_v58  ;;  %v2656_v63 = vld [vmem:[#allocation10 + $0x168] sm:$0xff]  ;;  %v16566_v22 = vpack.c.bf16 %v2647_v49, %v2643_v45  ;;  %v16568_v23 = vpack.c.bf16 %v2649_v41, %v2645_v40  ;;  %v2651_v27 = vld [vmem:[#allocation10 + $0x140] sm:$0xff] }
 0x4c1   : >> { %11748 = vmatprep.subr.bf16.mxu0 %v16515_v52  ;;  %11876 = vmatprep.subr.bf16.mxu1 %v16517_v61  ;;  %v2646_v61 = vld [vmem:[#allocation10 + $0x118] sm:$0xff]  ;;  %20498 = vst [vmem:[#allocation209_spill] sm:$0xff] %v16556_v44  ;;  %v2655_v48 = vld [vmem:[#allocation10 + $0x160] sm:$0xff] }
 0x4c2   : >> { %10563 = vmatmul.mubr.msk.f32.gmra.mrb[44].mxu0 %vm1068_vm2, %v2418_v25  ;;  %10565 = vmatmul.mubr.msk.f32.gmra.mrb[42].mxu1 %vm1068_vm2, %v2418_v25  ;;  %v2648_v25 = vld [vmem:[#allocation10 + $0x128] sm:$0xff]  ;;  %20501 = vst [vmem:[#allocation212_spill] sm:$0xff] %v16566_v22  ;;  %20502 = vst [vmem:[#allocation213_spill] sm:$0xff] %v16568_v23  ;;  %v2662_v56 = vld [vmem:[#allocation10 + $0x198] sm:$0xff]  ;;  %v16578_v45 = vpack.c.bf16 %v2655_v48, %v2651_v27 }
 0x4c3   : >> { %v16560_v59 = vpack.c.bf16 %v2648_v25, %v2644_v1  ;;  %v2653_v1 = vld [vmem:[#allocation10 + $0x150] sm:$0xff]  ;;  %v2659_v40 = vld [vmem:[#allocation10 + $0x180] sm:$0xff] }
 0x4c4   : >> { %11750 = vmatpush1.bf16.msra.mxu0 %v16528_v20  ;;  %11878 = vmatpush1.bf16.msra.mxu1 %v16530_v35  ;;  %v2650_v35 = vld [vmem:[#allocation10 + $0x138] sm:$0xff]  ;;  %v2657_v25 = vld [vmem:[#allocation10 + $0x170] sm:$0xff]  ;;  %20505 = vst [vmem:[#allocation216_spill] sm:$0xff] %v16578_v45  ;;  %v2663_v41 = vld [vmem:[#allocation10 + $0x1a0] sm:$0xff] }
 0x4c5   : >> { %11752 = vmatprep.subr.bf16.mxu0 %v16534_v12  ;;  %11880 = vmatprep.subr.bf16.mxu1 %v16536_v31  ;;  %20499 = vst [vmem:[#allocation210_spill] sm:$0xff] %v16560_v59  ;;  %v16562_v0 = vpack.c.bf16 %v2650_v35, %v2646_v61  ;;  %v2652_v31 = vld [vmem:[#allocation10 + $0x148] sm:$0xff]  ;;  %v16580_v49 = vpack.c.bf16 %v2657_v25, %v2653_v1  ;;  %v2667_v1 = vld [vmem:[#allocation10 + $0x1c0] sm:$0xff]  ;;  %v2774_v12 = vld [vmem:[#allocation10 + $0x518] sm:$0xff] }
 0x4c6   : >> { %v16572_v61 = vpack.c.bf16 %v2656_v63, %v2652_v31  ;;  %v2661_v31 = vld [vmem:[#allocation10 + $0x190] sm:$0xff]  ;;  %v16590_v27 = vpack.c.bf16 %v2663_v41, %v2659_v40  ;;  %v2671_v25 = vld [vmem:[#allocation10 + $0x1e0] sm:$0xff] }
 0x4c7   : >> { %20500 = vst [vmem:[#allocation211_spill] sm:$0xff] %v16562_v0  ;;  %20506 = vst [vmem:[#allocation217_spill] sm:$0xff] %v16580_v49  ;;  %v16602_v40 = vpack.c.bf16 %v2671_v25, %v2667_v1 }
 0x4c8   : >> { %11754 = vmatpush1.bf16.msra.mxu0 %v16542_v53  ;;  %11882 = vmatpush1.bf16.msra.mxu1 %v16544_v4  ;;  %v2658_v4 = vld [vmem:[#allocation10 + $0x178] sm:$0xff]  ;;  %20503 = vst [vmem:[#allocation214_spill] sm:$0xff] %v16572_v61  ;;  %20509 = vst [vmem:[#allocation220_spill] sm:$0xff] %v16590_v27  ;;  %v2772_v53 = vld [vmem:[#allocation10 + $0x508] sm:$0xff] }
 0x4c9   : >> { %11756 = vmatprep.subr.bf16.mxu0 %v16548_v7  ;;  %11884 = vmatprep.subr.bf16.mxu1 %v16550_v14  ;;  %v16574_v35 = vpack.c.bf16 %v2658_v4, %v2654_v19  ;;  %v2660_v14 = vld [vmem:[#allocation10 + $0x188] sm:$0xff]  ;;  %v2665_v4 = vld [vmem:[#allocation10 + $0x1b0] sm:$0xff]  ;;  %20513 = vst [vmem:[#allocation224_spill] sm:$0xff] %v16602_v40  ;;  %v2770_v7 = vld [vmem:[#allocation10 + $0x4f8] sm:$0xff] }
 0x4ca   : >> { %v16584_v19 = vpack.c.bf16 %v2664_v13, %v2660_v14  ;;  %v16592_v48 = vpack.c.bf16 %v2665_v4, %v2661_v31  ;;  %v2669_v14 = vld [vmem:[#allocation10 + $0x1d0] sm:$0xff]  ;;  %v2675_v31 = vld [vmem:[#allocation10 + $0x200] sm:$0xff] }
 0x4cb   : >> { %20504 = vst [vmem:[#allocation215_spill] sm:$0xff] %v16574_v35  ;;  %v2679_v4 = vld [vmem:[#allocation10 + $0x220] sm:$0xff] }
 0x4cc   : >> { %11758 = vmatpush1.bf16.msra.mxu0 %v16554_v58  ;;  %11886 = vmatpush1.bf16.msra.mxu1 %v16556_v44  ;;  %v2666_v44 = vld [vmem:[#allocation10 + $0x1b8] sm:$0xff]  ;;  %20507 = vst [vmem:[#allocation218_spill] sm:$0xff] %v16584_v19  ;;  %20510 = vst [vmem:[#allocation221_spill] sm:$0xff] %v16592_v48  ;;  %v16614_v1 = vpack.c.bf16 %v2679_v4, %v2675_v31  ;;  %v2761_v58 = vld [vmem:[#allocation10 + $0x4b0] sm:$0xff] }
 0x4cd   : >> { %11760 = vmatprep.subr.bf16.mxu0 %v16560_v59  ;;  %11888 = vmatprep.subr.bf16.mxu1 %v16562_v0  ;;  %v16586_v63 = vpack.c.bf16 %v2666_v44, %v2662_v56  ;;  %v2668_v0 = vld [vmem:[#allocation10 + $0x1c8] sm:$0xff]  ;;  %v2670_v59 = vld [vmem:[#allocation10 + $0x1d8] sm:$0xff]  ;;  %v2673_v44 = vld [vmem:[#allocation10 + $0x1f0] sm:$0xff] }
 0x4ce   : >> { %v16604_v41 = vpack.c.bf16 %v2673_v44, %v2669_v14  ;;  %20517 = vst [vmem:[#allocation228_spill] sm:$0xff] %v16614_v1  ;;  %v2683_v14 = vld [vmem:[#allocation10 + $0x240] sm:$0xff] }
 0x4cf   : >> { %20508 = vst [vmem:[#allocation219_spill] sm:$0xff] %v16586_v63  ;;  %v2687_v44 = vld [vmem:[#allocation10 + $0x260] sm:$0xff] }
 0x4d0   : >> { %11762 = vmatpush1.bf16.msra.mxu0 %v16566_v22  ;;  %11890 = vmatpush1.bf16.msra.mxu1 %v16568_v23  ;;  %v2672_v22 = vld [vmem:[#allocation10 + $0x1e8] sm:$0xff]  ;;  %v2674_v23 = vld [vmem:[#allocation10 + $0x1f8] sm:$0xff]  ;;  %20514 = vst [vmem:[#allocation225_spill] sm:$0xff] %v16604_v41  ;;  %v16626_v31 = vpack.c.bf16 %v2687_v44, %v2683_v14 }
 0x4d1   : >> { %11764 = vmatprep.subr.bf16.mxu0 %v16572_v61  ;;  %11892 = vmatprep.subr.bf16.mxu1 %v16574_v35  ;;  %v16596_v56 = vpack.c.bf16 %v2672_v22, %v2668_v0  ;;  %v16598_v13 = vpack.c.bf16 %v2674_v23, %v2670_v59  ;;  %v2676_v35 = vld [vmem:[#allocation10 + $0x208] sm:$0xff]  ;;  %v2678_v61 = vld [vmem:[#allocation10 + $0x218] sm:$0xff]  ;;  %v2677_v22 = vld [vmem:[#allocation10 + $0x210] sm:$0xff] }
 0x4d2   : >> { %v2681_v23 = vld [vmem:[#allocation10 + $0x230] sm:$0xff]  ;;  %20521 = vst [vmem:[#allocation232_spill] sm:$0xff] %v16626_v31 }
 0x4d3   : >> { %20511 = vst [vmem:[#allocation222_spill] sm:$0xff] %v16596_v56  ;;  %20512 = vst [vmem:[#allocation223_spill] sm:$0xff] %v16598_v13  ;;  %v16616_v25 = vpack.c.bf16 %v2681_v23, %v2677_v22  ;;  %v2691_v22 = vld [vmem:[#allocation10 + $0x280] sm:$0xff] }
 0x4d4   : >> { %11766 = vmatpush1.bf16.msra.mxu0 %v16578_v45  ;;  %11894 = vmatpush1.bf16.msra.mxu1 %v16580_v49  ;;  %v2680_v45 = vld [vmem:[#allocation10 + $0x228] sm:$0xff]  ;;  %v2682_v49 = vld [vmem:[#allocation10 + $0x238] sm:$0xff]  ;;  %v2695_v23 = vld [vmem:[#allocation10 + $0x2a0] sm:$0xff] }
 0x4d5   : >> { %11768 = vmatprep.subr.bf16.mxu0 %v16584_v19  ;;  %11896 = vmatprep.subr.bf16.mxu1 %v16586_v63  ;;  %v16608_v59 = vpack.c.bf16 %v2680_v45, %v2676_v35  ;;  %v16610_v0 = vpack.c.bf16 %v2682_v49, %v2678_v61  ;;  %v2684_v63 = vld [vmem:[#allocation10 + $0x248] sm:$0xff]  ;;  %v2686_v19 = vld [vmem:[#allocation10 + $0x258] sm:$0xff]  ;;  %20518 = vst [vmem:[#allocation229_spill] sm:$0xff] %v16616_v25  ;;  %v2685_v45 = vld [vmem:[#allocation10 + $0x250] sm:$0xff] }
 0x4d6   : >> { %v2689_v49 = vld [vmem:[#allocation10 + $0x270] sm:$0xff]  ;;  %v16638_v14 = vpack.c.bf16 %v2695_v23, %v2691_v22 }
 0x4d7   : >> { %20515 = vst [vmem:[#allocation226_spill] sm:$0xff] %v16608_v59  ;;  %20516 = vst [vmem:[#allocation227_spill] sm:$0xff] %v16610_v0  ;;  %v16628_v4 = vpack.c.bf16 %v2689_v49, %v2685_v45  ;;  %v2699_v45 = vld [vmem:[#allocation10 + $0x2c0] sm:$0xff] }
 0x4d8   : >> { %11770 = vmatpush1.bf16.msra.mxu0 %v16590_v27  ;;  %11898 = vmatpush1.bf16.msra.mxu1 %v16592_v48  ;;  %v2688_v27 = vld [vmem:[#allocation10 + $0x268] sm:$0xff]  ;;  %v2690_v48 = vld [vmem:[#allocation10 + $0x278] sm:$0xff]  ;;  %20525 = vst [vmem:[#allocation236_spill] sm:$0xff] %v16638_v14  ;;  %v2703_v49 = vld [vmem:[#allocation10 + $0x2e0] sm:$0xff] }
 0x4d9   : >> { %11772 = vmatprep.subr.bf16.mxu0 %v16596_v56  ;;  %11900 = vmatprep.subr.bf16.mxu1 %v16598_v13  ;;  %v16620_v61 = vpack.c.bf16 %v2688_v27, %v2684_v63  ;;  %v16622_v35 = vpack.c.bf16 %v2690_v48, %v2686_v19  ;;  %v2692_v13 = vld [vmem:[#allocation10 + $0x288] sm:$0xff]  ;;  %v2694_v56 = vld [vmem:[#allocation10 + $0x298] sm:$0xff]  ;;  %20522 = vst [vmem:[#allocation233_spill] sm:$0xff] %v16628_v4  ;;  %v2693_v27 = vld [vmem:[#allocation10 + $0x290] sm:$0xff] }
 0x4da   : >> { %v2697_v48 = vld [vmem:[#allocation10 + $0x2b0] sm:$0xff]  ;;  %v16650_v22 = vpack.c.bf16 %v2703_v49, %v2699_v45 }
 0x4db   : >> { %20519 = vst [vmem:[#allocation230_spill] sm:$0xff] %v16620_v61  ;;  %20520 = vst [vmem:[#allocation231_spill] sm:$0xff] %v16622_v35  ;;  %v16640_v44 = vpack.c.bf16 %v2697_v48, %v2693_v27  ;;  %v2707_v27 = vld [vmem:[#allocation10 + $0x300] sm:$0xff] }
 0x4dc   : >> { %11774 = vmatpush1.bf16.msra.mxu0 %v16602_v40  ;;  %11902 = vmatpush1.bf16.msra.mxu1 %v16604_v41  ;;  %v2696_v40 = vld [vmem:[#allocation10 + $0x2a8] sm:$0xff]  ;;  %v2698_v41 = vld [vmem:[#allocation10 + $0x2b8] sm:$0xff]  ;;  %20529 = vst [vmem:[#allocation240_spill] sm:$0xff] %v16650_v22  ;;  %v2711_v48 = vld [vmem:[#allocation10 + $0x320] sm:$0xff] }
 0x4dd   : >> { %11776 = vmatprep.subr.bf16.mxu0 %v16608_v59  ;;  %11904 = vmatprep.subr.bf16.mxu1 %v16610_v0  ;;  %v16632_v19 = vpack.c.bf16 %v2696_v40, %v2692_v13  ;;  %v16634_v63 = vpack.c.bf16 %v2698_v41, %v2694_v56  ;;  %v2700_v0 = vld [vmem:[#allocation10 + $0x2c8] sm:$0xff]  ;;  %v2702_v59 = vld [vmem:[#allocation10 + $0x2d8] sm:$0xff]  ;;  %20526 = vst [vmem:[#allocation237_spill] sm:$0xff] %v16640_v44  ;;  %v2701_v40 = vld [vmem:[#allocation10 + $0x2d0] sm:$0xff] }
 0x4de   : >> { %v2705_v41 = vld [vmem:[#allocation10 + $0x2f0] sm:$0xff]  ;;  %v16662_v45 = vpack.c.bf16 %v2711_v48, %v2707_v27 }
 0x4df   : >> { %20523 = vst [vmem:[#allocation234_spill] sm:$0xff] %v16632_v19  ;;  %20524 = vst [vmem:[#allocation235_spill] sm:$0xff] %v16634_v63  ;;  %v16652_v23 = vpack.c.bf16 %v2705_v41, %v2701_v40  ;;  %v2715_v40 = vld [vmem:[#allocation10 + $0x340] sm:$0xff] }
 0x4e0   : >> { %11778 = vmatpush1.bf16.msra.mxu0 %v16614_v1  ;;  %11906 = vmatpush1.bf16.msra.mxu1 %v16616_v25  ;;  %v2704_v1 = vld [vmem:[#allocation10 + $0x2e8] sm:$0xff]  ;;  %v2706_v25 = vld [vmem:[#allocation10 + $0x2f8] sm:$0xff]  ;;  %20533 = vst [vmem:[#allocation244_spill] sm:$0xff] %v16662_v45  ;;  %v2719_v41 = vld [vmem:[#allocation10 + $0x360] sm:$0xff] }
 0x4e1   : >> { %11780 = vmatprep.subr.bf16.mxu0 %v16620_v61  ;;  %11908 = vmatprep.subr.bf16.mxu1 %v16622_v35  ;;  %v16644_v56 = vpack.c.bf16 %v2704_v1, %v2700_v0  ;;  %v16646_v13 = vpack.c.bf16 %v2706_v25, %v2702_v59  ;;  %v2708_v35 = vld [vmem:[#allocation10 + $0x308] sm:$0xff]  ;;  %v2710_v61 = vld [vmem:[#allocation10 + $0x318] sm:$0xff]  ;;  %20530 = vst [vmem:[#allocation241_spill] sm:$0xff] %v16652_v23  ;;  %v2709_v1 = vld [vmem:[#allocation10 + $0x310] sm:$0xff] }
 0x4e2   : >> { %v2713_v25 = vld [vmem:[#allocation10 + $0x330] sm:$0xff]  ;;  %v16674_v27 = vpack.c.bf16 %v2719_v41, %v2715_v40 }
 0x4e3   : >> { %20527 = vst [vmem:[#allocation238_spill] sm:$0xff] %v16644_v56  ;;  %20528 = vst [vmem:[#allocation239_spill] sm:$0xff] %v16646_v13  ;;  %v16664_v49 = vpack.c.bf16 %v2713_v25, %v2709_v1  ;;  %v2723_v1 = vld [vmem:[#allocation10 + $0x380] sm:$0xff] }
 0x4e4   : >> { %11782 = vmatpush1.bf16.msra.mxu0 %v16626_v31  ;;  %11910 = vmatpush1.bf16.msra.mxu1 %v16628_v4  ;;  %v2712_v31 = vld [vmem:[#allocation10 + $0x328] sm:$0xff]  ;;  %v2714_v4 = vld [vmem:[#allocation10 + $0x338] sm:$0xff]  ;;  %20537 = vst [vmem:[#allocation248_spill] sm:$0xff] %v16674_v27  ;;  %v2727_v25 = vld [vmem:[#allocation10 + $0x3a0] sm:$0xff] }
 0x4e5   : >> { %11784 = vmatprep.subr.bf16.mxu0 %v16632_v19  ;;  %11912 = vmatprep.subr.bf16.mxu1 %v16634_v63  ;;  %v16656_v59 = vpack.c.bf16 %v2712_v31, %v2708_v35  ;;  %v16658_v0 = vpack.c.bf16 %v2714_v4, %v2710_v61  ;;  %v2716_v63 = vld [vmem:[#allocation10 + $0x348] sm:$0xff]  ;;  %v2718_v19 = vld [vmem:[#allocation10 + $0x358] sm:$0xff]  ;;  %20534 = vst [vmem:[#allocation245_spill] sm:$0xff] %v16664_v49  ;;  %v2717_v31 = vld [vmem:[#allocation10 + $0x350] sm:$0xff] }
 0x4e6   : >> { %v2721_v4 = vld [vmem:[#allocation10 + $0x370] sm:$0xff]  ;;  %v16686_v40 = vpack.c.bf16 %v2727_v25, %v2723_v1 }
 0x4e7   : >> { %20531 = vst [vmem:[#allocation242_spill] sm:$0xff] %v16656_v59  ;;  %20532 = vst [vmem:[#allocation243_spill] sm:$0xff] %v16658_v0  ;;  %v16676_v48 = vpack.c.bf16 %v2721_v4, %v2717_v31  ;;  %v2731_v31 = vld [vmem:[#allocation10 + $0x3c0] sm:$0xff]  ;;  %v2737_v4 = vld [vmem:[#allocation10 + $0x3f0] sm:$0xff] }
 0x4e8   : >> { %11786 = vmatpush1.bf16.msra.mxu0 %v16638_v14  ;;  %11914 = vmatpush1.bf16.msra.mxu1 %v16640_v44  ;;  %v2720_v14 = vld [vmem:[#allocation10 + $0x368] sm:$0xff]  ;;  %v2722_v44 = vld [vmem:[#allocation10 + $0x378] sm:$0xff]  ;;  %20541 = vst [vmem:[#allocation252_spill] sm:$0xff] %v16686_v40 }
 0x4e9   : >> { %11788 = vmatprep.subr.bf16.mxu0 %v16644_v56  ;;  %11916 = vmatprep.subr.bf16.mxu1 %v16646_v13  ;;  %v16668_v61 = vpack.c.bf16 %v2720_v14, %v2716_v63  ;;  %v16670_v35 = vpack.c.bf16 %v2722_v44, %v2718_v19  ;;  %v2724_v13 = vld [vmem:[#allocation10 + $0x388] sm:$0xff]  ;;  %v2726_v56 = vld [vmem:[#allocation10 + $0x398] sm:$0xff]  ;;  %20538 = vst [vmem:[#allocation249_spill] sm:$0xff] %v16676_v48  ;;  %v2725_v14 = vld [vmem:[#allocation10 + $0x390] sm:$0xff] }
 0x4ea   : >> { %v2729_v44 = vld [vmem:[#allocation10 + $0x3b0] sm:$0xff] }
 0x4eb   : >> { %20535 = vst [vmem:[#allocation246_spill] sm:$0xff] %v16668_v61  ;;  %20536 = vst [vmem:[#allocation247_spill] sm:$0xff] %v16670_v35  ;;  %v16688_v41 = vpack.c.bf16 %v2729_v44, %v2725_v14  ;;  %v2746_v14 = vld [vmem:[#allocation10 + $0x438] sm:$0xff] }
 0x4ec   : >> { %11790 = vmatpush1.bf16.msra.mxu0 %v16650_v22  ;;  %11918 = vmatpush1.bf16.msra.mxu1 %v16652_v23  ;;  %v2728_v22 = vld [vmem:[#allocation10 + $0x3a8] sm:$0xff]  ;;  %v2730_v23 = vld [vmem:[#allocation10 + $0x3b8] sm:$0xff] }
 0x4ed   : >> { %11792 = vmatprep.subr.bf16.mxu0 %v16656_v59  ;;  %11920 = vmatprep.subr.bf16.mxu1 %v16658_v0  ;;  %v16680_v19 = vpack.c.bf16 %v2728_v22, %v2724_v13  ;;  %v16682_v63 = vpack.c.bf16 %v2730_v23, %v2726_v56  ;;  %v2732_v0 = vld [vmem:[#allocation10 + $0x3c8] sm:$0xff]  ;;  %v2734_v59 = vld [vmem:[#allocation10 + $0x3d8] sm:$0xff]  ;;  %20542 = vst [vmem:[#allocation253_spill] sm:$0xff] %v16688_v41  ;;  %v2735_v22 = vld [vmem:[#allocation10 + $0x3e0] sm:$0xff] }
 0x4ee   : >> { %v2733_v23 = vld [vmem:[#allocation10 + $0x3d0] sm:$0xff]  ;;  %v16698_v1 = vpack.c.bf16 %v2735_v22, %v2731_v31  ;;  %v2739_v31 = vld [vmem:[#allocation10 + $0x400] sm:$0xff] }
 0x4ef   : >> { %20539 = vst [vmem:[#allocation250_spill] sm:$0xff] %v16680_v19  ;;  %20540 = vst [vmem:[#allocation251_spill] sm:$0xff] %v16682_v63  ;;  %v16700_v25 = vpack.c.bf16 %v2737_v4, %v2733_v23  ;;  %v2743_v22 = vld [vmem:[#allocation10 + $0x420] sm:$0xff]  ;;  %v2741_v23 = vld [vmem:[#allocation10 + $0x410] sm:$0xff] }
 0x4f0   : >> { %11794 = vmatpush1.bf16.msra.mxu0 %v16662_v45  ;;  %11922 = vmatpush1.bf16.msra.mxu1 %v16664_v49  ;;  %v2736_v45 = vld [vmem:[#allocation10 + $0x3e8] sm:$0xff]  ;;  %v2738_v49 = vld [vmem:[#allocation10 + $0x3f8] sm:$0xff]  ;;  %20545 = vst [vmem:[#allocation256_spill] sm:$0xff] %v16698_v1  ;;  %v2745_v4 = vld [vmem:[#allocation10 + $0x430] sm:$0xff] }
 0x4f1   : >> { %11796 = vmatprep.subr.bf16.mxu0 %v16668_v61  ;;  %11924 = vmatprep.subr.bf16.mxu1 %v16670_v35  ;;  %v16692_v56 = vpack.c.bf16 %v2736_v45, %v2732_v0  ;;  %v16694_v13 = vpack.c.bf16 %v2738_v49, %v2734_v59  ;;  %20546 = vst [vmem:[#allocation257_spill] sm:$0xff] %v16700_v25  ;;  %v2740_v59 = vld [vmem:[#allocation10 + $0x408] sm:$0xff]  ;;  %v2742_v45 = vld [vmem:[#allocation10 + $0x418] sm:$0xff] }
 0x4f2   : >> { %v2744_v0 = vld [vmem:[#allocation10 + $0x428] sm:$0xff]  ;;  %v16708_v44 = vpack.c.bf16 %v2746_v14, %v2742_v45  ;;  %v16712_v35 = vpack.c.bf16 %v2743_v22, %v2739_v31  ;;  %v2751_v45 = vld [vmem:[#allocation10 + $0x460] sm:$0xff]  ;;  %v2758_v31 = vld [vmem:[#allocation10 + $0x498] sm:$0xff] }
 0x4f3   : >> { %20543 = vst [vmem:[#allocation254_spill] sm:$0xff] %v16692_v56  ;;  %20544 = vst [vmem:[#allocation255_spill] sm:$0xff] %v16694_v13  ;;  %v16706_v49 = vpack.c.bf16 %v2744_v0, %v2740_v59  ;;  %v16714_v59 = vpack.c.bf16 %v2745_v4, %v2741_v23  ;;  %v2747_v0 = vld [vmem:[#allocation10 + $0x440] sm:$0xff]  ;;  %v2760_v61 = vld [vmem:[#allocation10 + $0x4a8] sm:$0xff] }
 0x4f4   : >> { %11798 = vmatpush1.bf16.msra.mxu0 %v16674_v27  ;;  %11926 = vmatpush1.bf16.msra.mxu1 %v16676_v48  ;;  %20548 = vst [vmem:[#allocation259_spill] sm:$0xff] %v16708_v44  ;;  %20549 = vst [vmem:[#allocation260_spill] sm:$0xff] %v16712_v35  ;;  %v2762_v22 = vld [vmem:[#allocation10 + $0x4b8] sm:$0xff]  ;;  %v16724_v23 = vpack.c.bf16 %v2751_v45, %v2747_v0 }
 0x4f5   : >> { %11800 = vmatprep.subr.bf16.mxu0 %v16680_v19  ;;  %11928 = vmatprep.subr.bf16.mxu1 %v16682_v63  ;;  %20547 = vst [vmem:[#allocation258_spill] sm:$0xff] %v16706_v49  ;;  %v2750_v63 = vld [vmem:[#allocation10 + $0x458] sm:$0xff]  ;;  %20550 = vst [vmem:[#allocation261_spill] sm:$0xff] %v16714_v59  ;;  %v2756_v19 = vld [vmem:[#allocation10 + $0x488] sm:$0xff] }
 0x4f6   : >> { %20553 = vst [vmem:[#allocation264_spill] sm:$0xff] %v16724_v23 }
 0x4f8   : >> { %11802 = vmatpush1.bf16.msra.mxu0 %v16686_v40  ;;  %11930 = vmatpush1.bf16.msra.mxu1 %v16688_v41  ;;  %v2752_v41 = vld [vmem:[#allocation10 + $0x468] sm:$0xff]  ;;  %v2753_v40 = vld [vmem:[#allocation10 + $0x470] sm:$0xff] }
 0x4f9   : >> { %11804 = vmatprep.subr.bf16.mxu0 %v16692_v56  ;;  %11932 = vmatprep.subr.bf16.mxu1 %v16694_v13  ;;  %v2748_v13 = vld [vmem:[#allocation10 + $0x448] sm:$0xff]  ;;  %v2749_v56 = vld [vmem:[#allocation10 + $0x450] sm:$0xff] }
 0x4fc   : >> { %11806 = vmatpush1.bf16.msra.mxu0 %v16698_v1  ;;  %11934 = vmatpush1.bf16.msra.mxu1 %v16700_v25  ;;  %v2754_v25 = vld [vmem:[#allocation10 + $0x478] sm:$0xff]  ;;  %v16718_v1 = vpack.c.bf16 %v2752_v41, %v2748_v13  ;;  %v16726_v41 = vpack.c.bf16 %v2753_v40, %v2749_v56  ;;  %v2759_v13 = vld [vmem:[#allocation10 + $0x4a0] sm:$0xff]  ;;  %v2768_v40 = vld [vmem:[#allocation10 + $0x4e8] sm:$0xff] }
 0x4fd   : >> { %11808 = vmatprep.subr.bf16.mxu0 %v16706_v49  ;;  %11936 = vmatprep.subr.bf16.mxu1 %v16708_v44  ;;  %v16720_v44 = vpack.c.bf16 %v2754_v25, %v2750_v63  ;;  %v2755_v63 = vld [vmem:[#allocation10 + $0x480] sm:$0xff]  ;;  %v2766_v56 = vld [vmem:[#allocation10 + $0x4d8] sm:$0xff] }
 0x4fe   : >> { %20551 = vst [vmem:[#allocation262_spill] sm:$0xff] %v16718_v1  ;;  %20554 = vst [vmem:[#allocation265_spill] sm:$0xff] %v16726_v41 }
 0x4ff   : >> { %20552 = vst [vmem:[#allocation263_spill] sm:$0xff] %v16720_v44 }
 0x591   : >> { %v2491_v48 = vpop.f32.mrb[42].mxu0  ;;  %v16716_v14 = vpop.f32.mrb[40].mxu1 }
 0x592   : >> { %v2493_v49 = vpop.f32.mrb[43].mxu0  ;;  %v2570_v27 = vpop.f32.mrb[41].mxu1 }
 0x593   : >> { %2931 = vmatprep.mubr.f32.mxu0 %v2493_v49  ;;  %3085 = vmatprep.mubr.f32.mxu1 %v2493_v49  ;;  %v16732_v49 = vpack.c.bf16 %v2760_v61, %v2756_v19  ;;  %v16740_v61 = vpack.c.bf16 %v2759_v13, %v2755_v63  ;;  %v2775_v63 = vld [vmem:[#allocation10 + $0x520] sm:$0xff] }
 0x594   : >> { %2932 = vmatmul.mubr.f32.vlgmr.msra.gmra.mrb[46].mxu0 %v2491_v48  ;;  %3086 = vmatmul.mubr.f32.vlgmr.msra.gmra.mrb[44].mxu1 %v2491_v48  ;;  %v16734_v48 = vpack.c.bf16 %v2762_v22, %v2758_v31  ;;  %v2763_v31 = vld [vmem:[#allocation10 + $0x4c0] sm:$0xff] }
 0x595   : >> { %11810 = vmatpush1.bf16.msra.mxu0 %v16712_v35  ;;  %11938 = vmatpush1.bf16.msra.mxu1 %v16714_v59  ;;  %v2497_v25 = vpop.f32.mrb[44].mxu0  ;;  %v16728_v4 = vpop.f32.mrb[42].mxu1  ;;  %20555 = vst [vmem:[#allocation266_spill] sm:$0xff] %v16732_v49  ;;  %v2757_v35 = vld [vmem:[#allocation10 + $0x490] sm:$0xff]  ;;  %v2764_v59 = vld [vmem:[#allocation10 + $0x4c8] sm:$0xff]  ;;  %20557 = vst [vmem:[#allocation268_spill] sm:$0xff] %v16740_v61 }
 0x596   : >> { %11812 = vmatprep.subr.bf16.mxu0 %v16718_v1  ;;  %11940 = vmatprep.subr.bf16.mxu1 %v16720_v44  ;;  %20556 = vst [vmem:[#allocation267_spill] sm:$0xff] %v16734_v48  ;;  %v2499_v0 = vpop.f32.mrb[45].mxu0  ;;  %v16736_v45 = vpop.f32.mrb[43].mxu1  ;;  %v16742_v19 = vpack.c.bf16 %v2761_v58, %v2757_v35  ;;  %v2767_v22 = vld [vmem:[#allocation10 + $0x4e0] sm:$0xff]  ;;  %v16746_v44 = vpack.c.bf16 %v2768_v40, %v2764_v59  ;;  %v2773_v40 = vld [vmem:[#allocation10 + $0x510] sm:$0xff] }
 0x597   : >> { %2937 = vmatprep.mubr.f32.mxu0 %v2499_v0  ;;  %3091 = vmatprep.mubr.f32.mxu1 %v2499_v0  ;;  %v16748_v1 = vpack.c.bf16 %v2770_v7, %v2766_v56  ;;  %v2765_v0 = vld [vmem:[#allocation10 + $0x4d0] sm:$0xff]  ;;  %v16752_v58 = vpack.c.bf16 %v2767_v22, %v2763_v31  ;;  %v2771_v59 = vld [vmem:[#allocation10 + $0x500] sm:$0xff]  ;;  %v2780_v56 = vld [vmem:[#allocation10 + $0x548] sm:$0xff] }
 0x598   : >> { %2938 = vmatmul.mubr.f32.gmra.mrb[48].mxu0 %v2497_v25  ;;  %3092 = vmatmul.mubr.f32.gmra.mrb[46].mxu1 %v2497_v25  ;;  %20558 = vst [vmem:[#allocation269_spill] sm:$0xff] %v16742_v19  ;;  %20559 = vst [vmem:[#allocation270_spill] sm:$0xff] %v16746_v44  ;;  %v2769_v25 = vld [vmem:[#allocation10 + $0x4f0] sm:$0xff]  ;;  %v16764_v31 = vpack.c.bf16 %v2775_v63, %v2771_v59 }
 0x599   : >> { %11814 = vmatpush1.bf16.msra.mxu0 %v16724_v23  ;;  %11942 = vmatpush1.bf16.msra.mxu1 %v16726_v41  ;;  %20560 = vst [vmem:[#allocation271_spill] sm:$0xff] %v16748_v1  ;;  %v2776_v23 = vld [vmem:[#allocation10 + $0x528] sm:$0xff]  ;;  %v2778_v41 = vld [vmem:[#allocation10 + $0x538] sm:$0xff]  ;;  %20561 = vst [vmem:[#allocation272_spill] sm:$0xff] %v16752_v58  ;;  %v16754_v35 = vpack.c.bf16 %v2769_v25, %v2765_v0 }
 0x59a   : >> { %11816 = vmatprep.subr.bf16.mxu0 %v16732_v49  ;;  %11944 = vmatprep.subr.bf16.mxu1 %v16734_v48  ;;  %v16758_v7 = vpack.c.bf16 %v2776_v23, %v2772_v53  ;;  %v16760_v13 = vpack.c.bf16 %v2778_v41, %v2774_v12  ;;  %v2782_v48 = vld [vmem:[#allocation10 + $0x558] sm:$0xff]  ;;  %20565 = vst [vmem:[#allocation276_spill] sm:$0xff] %v16764_v31  ;;  %v2779_v0 = vld [vmem:[#allocation10 + $0x540] sm:$0xff]  ;;  %v2781_v23 = vld [vmem:[#allocation10 + $0x550] sm:$0xff] }
 0x59b   : >> { %3008 = vmatprep.mubr.f32.mxu0 %v2570_v27  ;;  %3162 = vmatprep.mubr.f32.mxu1 %v2570_v27  ;;  %20562 = vst [vmem:[#allocation273_spill] sm:$0xff] %v16754_v35  ;;  %v2777_v27 = vld [vmem:[#allocation10 + $0x530] sm:$0xff]  ;;  %v2783_v25 = vld [vmem:[#allocation10 + $0x560] sm:$0xff] }
 0x59c   : >> { %20563 = vst [vmem:[#allocation274_spill] sm:$0xff] %v16758_v7  ;;  %20564 = vst [vmem:[#allocation275_spill] sm:$0xff] %v16760_v13  ;;  %v16766_v22 = vpack.c.bf16 %v2777_v27, %v2773_v40  ;;  %v2785_v41 = vld [vmem:[#allocation10 + $0x570] sm:$0xff]  ;;  %v16776_v59 = vpack.c.bf16 %v2783_v25, %v2779_v0  ;;  %v2787_v40 = vld [vmem:[#allocation10 + $0x580] sm:$0xff] }
 0x59d   : >> { %11818 = vmatpush1.bf16.msra.mxu0 %v16740_v61  ;;  %11946 = vmatpush1.bf16.msra.mxu1 %v16742_v19  ;;  %v2784_v61 = vld [vmem:[#allocation10 + $0x568] sm:$0xff]  ;;  %v2786_v19 = vld [vmem:[#allocation10 + $0x578] sm:$0xff]  ;;  %v16778_v63 = vpack.c.bf16 %v2785_v41, %v2781_v23  ;;  %v2791_v27 = vld [vmem:[#allocation10 + $0x5a0] sm:$0xff] }
 0x59e   : >> { %11820 = vmatprep.subr.bf16.mxu0 %v16746_v44  ;;  %11948 = vmatprep.subr.bf16.mxu1 %v16748_v1  ;;  %20566 = vst [vmem:[#allocation277_spill] sm:$0xff] %v16766_v22  ;;  %v16770_v12 = vpack.c.bf16 %v2784_v61, %v2780_v56  ;;  %v16772_v53 = vpack.c.bf16 %v2786_v19, %v2782_v48  ;;  %v2788_v1 = vld [vmem:[#allocation10 + $0x588] sm:$0xff]  ;;  %v2790_v44 = vld [vmem:[#allocation10 + $0x598] sm:$0xff]  ;;  %20569 = vst [vmem:[#allocation280_spill] sm:$0xff] %v16776_v59 }
 0x59f   : >> { %20570 = vst [vmem:[#allocation281_spill] sm:$0xff] %v16778_v63  ;;  %v2789_v19 = vld [vmem:[#allocation10 + $0x590] sm:$0xff]  ;;  %v16788_v0 = vpack.c.bf16 %v2791_v27, %v2787_v40  ;;  %v2795_v23 = vld [vmem:[#allocation10 + $0x5c0] sm:$0xff] }
 0x5a0   : >> { %20567 = vst [vmem:[#allocation278_spill] sm:$0xff] %v16770_v12  ;;  %20568 = vst [vmem:[#allocation279_spill] sm:$0xff] %v16772_v53  ;;  %v2793_v56 = vld [vmem:[#allocation10 + $0x5b0] sm:$0xff]  ;;  %v2799_v41 = vld [vmem:[#allocation10 + $0x5e0] sm:$0xff] }
 0x5a1   : >> { %11822 = vmatpush1.bf16.msra.mxu0 %v16752_v58  ;;  %11950 = vmatpush1.bf16.msra.mxu1 %v16754_v35  ;;  %v2792_v58 = vld [vmem:[#allocation10 + $0x5a8] sm:$0xff]  ;;  %v2794_v35 = vld [vmem:[#allocation10 + $0x5b8] sm:$0xff]  ;;  %20573 = vst [vmem:[#allocation284_spill] sm:$0xff] %v16788_v0  ;;  %v16790_v25 = vpack.c.bf16 %v2793_v56, %v2789_v19  ;;  %v16800_v40 = vpack.c.bf16 %v2799_v41, %v2795_v23  ;;  %v2803_v19 = vld [vmem:[#allocation10 + $0x600] sm:$0xff] }
 0x5a2   : >> { %11824 = vmatprep.subr.bf16.mxu0 %v16758_v7  ;;  %11952 = vmatprep.subr.bf16.mxu1 %v16760_v13  ;;  %v16782_v48 = vpack.c.bf16 %v2792_v58, %v2788_v1  ;;  %v16784_v61 = vpack.c.bf16 %v2794_v35, %v2790_v44  ;;  %v2796_v13 = vld [vmem:[#allocation10 + $0x5c8] sm:$0xff]  ;;  %v2798_v7 = vld [vmem:[#allocation10 + $0x5d8] sm:$0xff]  ;;  %v2797_v58 = vld [vmem:[#allocation10 + $0x5d0] sm:$0xff] }
 0x5a3   : >> { %20574 = vst [vmem:[#allocation285_spill] sm:$0xff] %v16790_v25  ;;  %v2801_v35 = vld [vmem:[#allocation10 + $0x5f0] sm:$0xff]  ;;  %20577 = vst [vmem:[#allocation288_spill] sm:$0xff] %v16800_v40  ;;  %v2807_v56 = vld [vmem:[#allocation10 + $0x620] sm:$0xff] }
 0x5a4   : >> { %20571 = vst [vmem:[#allocation282_spill] sm:$0xff] %v16782_v48  ;;  %20572 = vst [vmem:[#allocation283_spill] sm:$0xff] %v16784_v61  ;;  %v16802_v27 = vpack.c.bf16 %v2801_v35, %v2797_v58  ;;  %v16812_v23 = vpack.c.bf16 %v2807_v56, %v2803_v19  ;;  %v2811_v58 = vld [vmem:[#allocation10 + $0x640] sm:$0xff] }
 0x5a5   : >> { %11826 = vmatpush1.bf16.msra.mxu0 %v16764_v31  ;;  %11954 = vmatpush1.bf16.msra.mxu1 %v16766_v22  ;;  %v2800_v31 = vld [vmem:[#allocation10 + $0x5e8] sm:$0xff]  ;;  %v2802_v22 = vld [vmem:[#allocation10 + $0x5f8] sm:$0xff]  ;;  %v2815_v35 = vld [vmem:[#allocation10 + $0x660] sm:$0xff] }
 0x5a6   : >> { %11828 = vmatprep.subr.bf16.mxu0 %v16770_v12  ;;  %11956 = vmatprep.subr.bf16.mxu1 %v16772_v53  ;;  %v16794_v1 = vpack.c.bf16 %v2800_v31, %v2796_v13  ;;  %v16796_v44 = vpack.c.bf16 %v2802_v22, %v2798_v7  ;;  %v2804_v53 = vld [vmem:[#allocation10 + $0x608] sm:$0xff]  ;;  %v2806_v12 = vld [vmem:[#allocation10 + $0x618] sm:$0xff]  ;;  %20578 = vst [vmem:[#allocation289_spill] sm:$0xff] %v16802_v27  ;;  %v2805_v31 = vld [vmem:[#allocation10 + $0x610] sm:$0xff] }
 0x5a7   : >> { %v2809_v22 = vld [vmem:[#allocation10 + $0x630] sm:$0xff]  ;;  %20581 = vst [vmem:[#allocation292_spill] sm:$0xff] %v16812_v23  ;;  %v16824_v19 = vpack.c.bf16 %v2815_v35, %v2811_v58 }
 0x5a8   : >> { %20575 = vst [vmem:[#allocation286_spill] sm:$0xff] %v16794_v1  ;;  %20576 = vst [vmem:[#allocation287_spill] sm:$0xff] %v16796_v44  ;;  %v16814_v41 = vpack.c.bf16 %v2809_v22, %v2805_v31  ;;  %v2819_v31 = vld [vmem:[#allocation10 + $0x680] sm:$0xff] }
 0x5a9   : >> { %11830 = vmatpush1.bf16.msra.mxu0 %v16776_v59  ;;  %11958 = vmatpush1.bf16.msra.mxu1 %v16778_v63  ;;  %v2808_v59 = vld [vmem:[#allocation10 + $0x628] sm:$0xff]  ;;  %v2810_v63 = vld [vmem:[#allocation10 + $0x638] sm:$0xff]  ;;  %20585 = vst [vmem:[#allocation296_spill] sm:$0xff] %v16824_v19  ;;  %v2823_v22 = vld [vmem:[#allocation10 + $0x6a0] sm:$0xff] }
 0x5aa   : >> { %11832 = vmatprep.subr.bf16.mxu0 %v16782_v48  ;;  %11960 = vmatprep.subr.bf16.mxu1 %v16784_v61  ;;  %v16806_v7 = vpack.c.bf16 %v2808_v59, %v2804_v53  ;;  %v16808_v13 = vpack.c.bf16 %v2810_v63, %v2806_v12  ;;  %v2812_v61 = vld [vmem:[#allocation10 + $0x648] sm:$0xff]  ;;  %v2814_v48 = vld [vmem:[#allocation10 + $0x658] sm:$0xff]  ;;  %20582 = vst [vmem:[#allocation293_spill] sm:$0xff] %v16814_v41  ;;  %v2813_v59 = vld [vmem:[#allocation10 + $0x650] sm:$0xff] }
 0x5ab   : >> { %v2817_v63 = vld [vmem:[#allocation10 + $0x670] sm:$0xff]  ;;  %v16836_v58 = vpack.c.bf16 %v2823_v22, %v2819_v31 }
 0x5ac   : >> { %20579 = vst [vmem:[#allocation290_spill] sm:$0xff] %v16806_v7  ;;  %20580 = vst [vmem:[#allocation291_spill] sm:$0xff] %v16808_v13  ;;  %v16826_v56 = vpack.c.bf16 %v2817_v63, %v2813_v59  ;;  %v2827_v59 = vld [vmem:[#allocation10 + $0x6c0] sm:$0xff] }
 0x5ad   : >> { %11834 = vmatpush1.bf16.msra.mxu0 %v16788_v0  ;;  %11962 = vmatpush1.bf16.msra.mxu1 %v16790_v25  ;;  %v2816_v0 = vld [vmem:[#allocation10 + $0x668] sm:$0xff]  ;;  %v2818_v25 = vld [vmem:[#allocation10 + $0x678] sm:$0xff]  ;;  %20589 = vst [vmem:[#allocation300_spill] sm:$0xff] %v16836_v58  ;;  %v2831_v63 = vld [vmem:[#allocation10 + $0x6e0] sm:$0xff] }
 0x5ae   : >> { %11836 = vmatprep.subr.bf16.mxu0 %v16794_v1  ;;  %11964 = vmatprep.subr.bf16.mxu1 %v16796_v44  ;;  %v16818_v12 = vpack.c.bf16 %v2816_v0, %v2812_v61  ;;  %v16820_v53 = vpack.c.bf16 %v2818_v25, %v2814_v48  ;;  %v2820_v44 = vld [vmem:[#allocation10 + $0x688] sm:$0xff]  ;;  %v2822_v1 = vld [vmem:[#allocation10 + $0x698] sm:$0xff]  ;;  %20586 = vst [vmem:[#allocation297_spill] sm:$0xff] %v16826_v56  ;;  %v2821_v0 = vld [vmem:[#allocation10 + $0x690] sm:$0xff] }
 0x5af   : >> { %v2825_v25 = vld [vmem:[#allocation10 + $0x6b0] sm:$0xff]  ;;  %v16848_v31 = vpack.c.bf16 %v2831_v63, %v2827_v59 }
 0x5b0   : >> { %20583 = vst [vmem:[#allocation294_spill] sm:$0xff] %v16818_v12  ;;  %20584 = vst [vmem:[#allocation295_spill] sm:$0xff] %v16820_v53  ;;  %v16838_v35 = vpack.c.bf16 %v2825_v25, %v2821_v0  ;;  %v2835_v0 = vld [vmem:[#allocation10 + $0x700] sm:$0xff] }
 0x5b1   : >> { %11838 = vmatpush1.bf16.msra.mxu0 %v16800_v40  ;;  %11966 = vmatpush1.bf16.msra.mxu1 %v16802_v27  ;;  %v2824_v40 = vld [vmem:[#allocation10 + $0x6a8] sm:$0xff]  ;;  %v2826_v27 = vld [vmem:[#allocation10 + $0x6b8] sm:$0xff]  ;;  %20593 = vst [vmem:[#allocation304_spill] sm:$0xff] %v16848_v31  ;;  %v2839_v25 = vld [vmem:[#allocation10 + $0x720] sm:$0xff] }
 0x5b2   : >> { %11840 = vmatprep.subr.bf16.mxu0 %v16806_v7  ;;  %11968 = vmatprep.subr.bf16.mxu1 %v16808_v13  ;;  %v16830_v48 = vpack.c.bf16 %v2824_v40, %v2820_v44  ;;  %v16832_v61 = vpack.c.bf16 %v2826_v27, %v2822_v1  ;;  %v2828_v13 = vld [vmem:[#allocation10 + $0x6c8] sm:$0xff]  ;;  %v2830_v7 = vld [vmem:[#allocation10 + $0x6d8] sm:$0xff]  ;;  %20590 = vst [vmem:[#allocation301_spill] sm:$0xff] %v16838_v35  ;;  %v2829_v40 = vld [vmem:[#allocation10 + $0x6d0] sm:$0xff] }
 0x5b3   : >> { %v2833_v27 = vld [vmem:[#allocation10 + $0x6f0] sm:$0xff]  ;;  %v16860_v59 = vpack.c.bf16 %v2839_v25, %v2835_v0 }
 0x5b4   : >> { %20587 = vst [vmem:[#allocation298_spill] sm:$0xff] %v16830_v48  ;;  %20588 = vst [vmem:[#allocation299_spill] sm:$0xff] %v16832_v61  ;;  %v16850_v22 = vpack.c.bf16 %v2833_v27, %v2829_v40  ;;  %v2843_v40 = vld [vmem:[#allocation10 + $0x740] sm:$0xff] }
 0x5b5   : >> { %11842 = vmatpush1.bf16.msra.mxu0 %v16812_v23  ;;  %11970 = vmatpush1.bf16.msra.mxu1 %v16814_v41  ;;  %v2832_v23 = vld [vmem:[#allocation10 + $0x6e8] sm:$0xff]  ;;  %v2834_v41 = vld [vmem:[#allocation10 + $0x6f8] sm:$0xff]  ;;  %20597 = vst [vmem:[#allocation308_spill] sm:$0xff] %v16860_v59  ;;  %v2847_v27 = vld [vmem:[#allocation10 + $0x760] sm:$0xff] }
 0x5b6   : >> { %11844 = vmatprep.subr.bf16.mxu0 %v16818_v12  ;;  %11972 = vmatprep.subr.bf16.mxu1 %v16820_v53  ;;  %v16842_v1 = vpack.c.bf16 %v2832_v23, %v2828_v13  ;;  %v16844_v44 = vpack.c.bf16 %v2834_v41, %v2830_v7  ;;  %v2836_v53 = vld [vmem:[#allocation10 + $0x708] sm:$0xff]  ;;  %v2838_v12 = vld [vmem:[#allocation10 + $0x718] sm:$0xff]  ;;  %20594 = vst [vmem:[#allocation305_spill] sm:$0xff] %v16850_v22  ;;  %v2837_v23 = vld [vmem:[#allocation10 + $0x710] sm:$0xff] }
 0x5b7   : >> { %v2841_v41 = vld [vmem:[#allocation10 + $0x730] sm:$0xff]  ;;  %v16872_v0 = vpack.c.bf16 %v2847_v27, %v2843_v40 }
 0x5b8   : >> { %20591 = vst [vmem:[#allocation302_spill] sm:$0xff] %v16842_v1  ;;  %20592 = vst [vmem:[#allocation303_spill] sm:$0xff] %v16844_v44  ;;  %v16862_v63 = vpack.c.bf16 %v2841_v41, %v2837_v23  ;;  %v2851_v23 = vld [vmem:[#allocation10 + $0x780] sm:$0xff] }
 0x5b9   : >> { %11846 = vmatpush1.bf16.msra.mxu0 %v16824_v19  ;;  %11974 = vmatpush1.bf16.msra.mxu1 %v16826_v56  ;;  %v2840_v19 = vld [vmem:[#allocation10 + $0x728] sm:$0xff]  ;;  %v2842_v56 = vld [vmem:[#allocation10 + $0x738] sm:$0xff]  ;;  %20601 = vst [vmem:[#allocation312_spill] sm:$0xff] %v16872_v0  ;;  %v2855_v41 = vld [vmem:[#allocation10 + $0x7a0] sm:$0xff] }
 0x5ba   : >> { %11848 = vmatprep.subr.bf16.mxu0 %v16830_v48  ;;  %11976 = vmatprep.subr.bf16.mxu1 %v16832_v61  ;;  %v16854_v7 = vpack.c.bf16 %v2840_v19, %v2836_v53  ;;  %v16856_v13 = vpack.c.bf16 %v2842_v56, %v2838_v12  ;;  %v2844_v61 = vld [vmem:[#allocation10 + $0x748] sm:$0xff]  ;;  %v2846_v48 = vld [vmem:[#allocation10 + $0x758] sm:$0xff]  ;;  %20598 = vst [vmem:[#allocation309_spill] sm:$0xff] %v16862_v63  ;;  %v2845_v19 = vld [vmem:[#allocation10 + $0x750] sm:$0xff] }
 0x5bb   : >> { %v2849_v56 = vld [vmem:[#allocation10 + $0x770] sm:$0xff]  ;;  %v16884_v40 = vpack.c.bf16 %v2855_v41, %v2851_v23 }
 0x5bc   : >> { %20595 = vst [vmem:[#allocation306_spill] sm:$0xff] %v16854_v7  ;;  %20596 = vst [vmem:[#allocation307_spill] sm:$0xff] %v16856_v13  ;;  %v16874_v25 = vpack.c.bf16 %v2849_v56, %v2845_v19  ;;  %v2859_v19 = vld [vmem:[#allocation10 + $0x7c0] sm:$0xff] }
 0x5bd   : >> { %11850 = vmatpush1.bf16.msra.mxu0 %v16836_v58  ;;  %11978 = vmatpush1.bf16.msra.mxu1 %v16838_v35  ;;  %v2848_v58 = vld [vmem:[#allocation10 + $0x768] sm:$0xff]  ;;  %v2850_v35 = vld [vmem:[#allocation10 + $0x778] sm:$0xff]  ;;  %20605 = vst [vmem:[#allocation316_spill] sm:$0xff] %v16884_v40  ;;  %v2863_v56 = vld [vmem:[#allocation10 + $0x7e0] sm:$0xff] }
 0x5be   : >> { %11852 = vmatprep.subr.bf16.mxu0 %v16842_v1  ;;  %11980 = vmatprep.subr.bf16.mxu1 %v16844_v44  ;;  %v16866_v12 = vpack.c.bf16 %v2848_v58, %v2844_v61  ;;  %v16868_v53 = vpack.c.bf16 %v2850_v35, %v2846_v48  ;;  %v2852_v44 = vld [vmem:[#allocation10 + $0x788] sm:$0xff]  ;;  %v2854_v1 = vld [vmem:[#allocation10 + $0x798] sm:$0xff]  ;;  %20602 = vst [vmem:[#allocation313_spill] sm:$0xff] %v16874_v25  ;;  %v2853_v58 = vld [vmem:[#allocation10 + $0x790] sm:$0xff] }
 0x5bf   : >> { %v2857_v35 = vld [vmem:[#allocation10 + $0x7b0] sm:$0xff]  ;;  %v16896_v23 = vpack.c.bf16 %v2863_v56, %v2859_v19 }
 0x5c0   : >> { %20599 = vst [vmem:[#allocation310_spill] sm:$0xff] %v16866_v12  ;;  %20600 = vst [vmem:[#allocation311_spill] sm:$0xff] %v16868_v53  ;;  %v16886_v27 = vpack.c.bf16 %v2857_v35, %v2853_v58  ;;  %v2579_v58 = vld [vmem:[#allocation7] sm:$0xff] }
 0x5c1   : >> { %11854 = vmatpush1.bf16.msra.mxu0 %v16848_v31  ;;  %11982 = vmatpush1.bf16.msra.mxu1 %v16850_v22  ;;  %v2856_v31 = vld [vmem:[#allocation10 + $0x7a8] sm:$0xff]  ;;  %v2858_v22 = vld [vmem:[#allocation10 + $0x7b8] sm:$0xff]  ;;  %20609 = vst [vmem:[#allocation320_spill] sm:$0xff] %v16896_v23  ;;  %v2583_v35 = vld [vmem:[#allocation7 + $0x20] sm:$0xff] }
 0x5c2   : >> { %11856 = vmatprep.subr.bf16.mxu0 %v16854_v7  ;;  %11984 = vmatprep.subr.bf16.mxu1 %v16856_v13  ;;  %v16878_v48 = vpack.c.bf16 %v2856_v31, %v2852_v44  ;;  %v16880_v61 = vpack.c.bf16 %v2858_v22, %v2854_v1  ;;  %v2860_v13 = vld [vmem:[#allocation10 + $0x7c8] sm:$0xff]  ;;  %v2862_v7 = vld [vmem:[#allocation10 + $0x7d8] sm:$0xff]  ;;  %20606 = vst [vmem:[#allocation317_spill] sm:$0xff] %v16886_v27  ;;  %v2861_v31 = vld [vmem:[#allocation10 + $0x7d0] sm:$0xff] }
 0x5c3   : >> { %v2865_v22 = vld [vmem:[#allocation10 + $0x7f0] sm:$0xff]  ;;  %v16908_v19 = vpack.c.bf16 %v2583_v35, %v2579_v58 }
 0x5c4   : >> { %20603 = vst [vmem:[#allocation314_spill] sm:$0xff] %v16878_v48  ;;  %20604 = vst [vmem:[#allocation315_spill] sm:$0xff] %v16880_v61  ;;  %v16898_v41 = vpack.c.bf16 %v2865_v22, %v2861_v31  ;;  %v2587_v31 = vld [vmem:[#allocation7 + $0x40] sm:$0xff] }
 0x5c5   : >> { %11858 = vmatpush1.bf16.msra.mxu0 %v16860_v59  ;;  %11986 = vmatpush1.bf16.msra.mxu1 %v16862_v63  ;;  %v2864_v59 = vld [vmem:[#allocation10 + $0x7e8] sm:$0xff]  ;;  %v2866_v63 = vld [vmem:[#allocation10 + $0x7f8] sm:$0xff]  ;;  %20613 = vst [vmem:[#allocation324_spill] sm:$0xff] %v16908_v19  ;;  %v2591_v22 = vld [vmem:[#allocation7 + $0x60] sm:$0xff] }
 0x5c6   : >> { %11860 = vmatprep.subr.bf16.mxu0 %v16866_v12  ;;  %11988 = vmatprep.subr.bf16.mxu1 %v16868_v53  ;;  %v16890_v1 = vpack.c.bf16 %v2864_v59, %v2860_v13  ;;  %v16892_v44 = vpack.c.bf16 %v2866_v63, %v2862_v7  ;;  %v2580_v53 = vld [vmem:[#allocation7 + $0x8] sm:$0xff]  ;;  %v2582_v12 = vld [vmem:[#allocation7 + $0x18] sm:$0xff]  ;;  %20610 = vst [vmem:[#allocation321_spill] sm:$0xff] %v16898_v41  ;;  %v2581_v59 = vld [vmem:[#allocation7 + $0x10] sm:$0xff] }
 0x5c7   : >> { %v2585_v63 = vld [vmem:[#allocation7 + $0x30] sm:$0xff]  ;;  %v16922_v58 = vpack.c.bf16 %v2591_v22, %v2587_v31  ;;  %v2608_v31 = vld [vmem:[#allocation7 + $0xe8] sm:$0xff]  ;;  %v2606_v22 = vld [vmem:[#allocation7 + $0xd8] sm:$0xff] }
 0x5c8   : >> { %20607 = vst [vmem:[#allocation318_spill] sm:$0xff] %v16890_v1  ;;  %20608 = vst [vmem:[#allocation319_spill] sm:$0xff] %v16892_v44  ;;  %v16910_v56 = vpack.c.bf16 %v2585_v63, %v2581_v59  ;;  %v2597_v59 = vld [vmem:[#allocation7 + $0x90] sm:$0xff]  ;;  %v2604_v63 = vld [vmem:[#allocation7 + $0xc8] sm:$0xff] }
 0x5c9   : >> { %11862 = vmatpush1.bf16.msra.mxu0 %v16872_v0  ;;  %11990 = vmatpush1.bf16.msra.mxu1 %v16874_v25  ;;  %v2584_v0 = vld [vmem:[#allocation7 + $0x28] sm:$0xff]  ;;  %v2586_v25 = vld [vmem:[#allocation7 + $0x38] sm:$0xff]  ;;  %20617 = vst [vmem:[#allocation328_spill] sm:$0xff] %v16922_v58 }
 0x5ca   : >> { %11864 = vmatprep.subr.bf16.mxu0 %v16878_v48  ;;  %11992 = vmatprep.subr.bf16.mxu1 %v16880_v61  ;;  %v16902_v7 = vpack.c.bf16 %v2584_v0, %v2580_v53  ;;  %v16904_v13 = vpack.c.bf16 %v2586_v25, %v2582_v12  ;;  %v2588_v61 = vld [vmem:[#allocation7 + $0x48] sm:$0xff]  ;;  %v2590_v48 = vld [vmem:[#allocation7 + $0x58] sm:$0xff]  ;;  %20614 = vst [vmem:[#allocation325_spill] sm:$0xff] %v16910_v56  ;;  %v2589_v0 = vld [vmem:[#allocation7 + $0x50] sm:$0xff] }
 0x5cb   : >> { %v2593_v25 = vld [vmem:[#allocation7 + $0x70] sm:$0xff] }
 0x5cc   : >> { %20611 = vst [vmem:[#allocation322_spill] sm:$0xff] %v16902_v7  ;;  %20612 = vst [vmem:[#allocation323_spill] sm:$0xff] %v16904_v13 }
 0x5cd   : >> { %11866 = vmatpush1.bf16.msra.mxu0 %v16884_v40  ;;  %11994 = vmatpush1.bf16.msra.mxu1 %v16886_v27  ;;  %v2592_v40 = vld [vmem:[#allocation7 + $0x68] sm:$0xff]  ;;  %v2594_v27 = vld [vmem:[#allocation7 + $0x78] sm:$0xff] }
 0x5ce   : >> { %11868 = vmatprep.subr.bf16.mxu0 %v16890_v1  ;;  %11996 = vmatprep.subr.bf16.mxu1 %v16892_v44  ;;  %v16914_v12 = vpack.c.bf16 %v2592_v40, %v2588_v61  ;;  %v16916_v53 = vpack.c.bf16 %v2594_v27, %v2590_v48  ;;  %v2596_v44 = vld [vmem:[#allocation7 + $0x88] sm:$0xff]  ;;  %v2598_v1 = vld [vmem:[#allocation7 + $0x98] sm:$0xff]  ;;  %v16924_v61 = vpack.c.bf16 %v2593_v25, %v2589_v0  ;;  %v2595_v48 = vld [vmem:[#allocation7 + $0x80] sm:$0xff] }
 0x5cf   : >> { %v2599_v40 = vld [vmem:[#allocation7 + $0xa0] sm:$0xff]  ;;  %v2610_v0 = vld [vmem:[#allocation7 + $0xf8] sm:$0xff] }
 0x5d0   : >> { %20615 = vst [vmem:[#allocation326_spill] sm:$0xff] %v16914_v12  ;;  %20616 = vst [vmem:[#allocation327_spill] sm:$0xff] %v16916_v53  ;;  %v16946_v25 = vpack.c.bf16 %v2610_v0, %v2606_v22  ;;  %v3373_v0 = vld [vmem:[%s20625_s29] sm:$0xff] }
 0x5d1   : >> { %11870 = vmatpush1.bf16.msra.mxu0 %v16896_v23  ;;  %11998 = vmatpush1.bf16.msra.mxu1 %v16898_v41  ;;  %v2600_v23 = vld [vmem:[#allocation7 + $0xa8] sm:$0xff]  ;;  %v2602_v41 = vld [vmem:[#allocation7 + $0xb8] sm:$0xff]  ;;  %20618 = vst [vmem:[#allocation329_spill] sm:$0xff] %v16924_v61 }
 0x5d2   : >> { %12000 = vmatprep.subr.bf16.mxu0 %v16902_v7  ;;  %12016 = vmatprep.subr.bf16.mxu1 %v16904_v13  ;;  %v16928_v27 = vpack.c.bf16 %v2600_v23, %v2596_v44  ;;  %v16930_v35 = vpack.c.bf16 %v2602_v41, %v2598_v1  ;;  %v16938_v1 = vpack.c.bf16 %v2599_v40, %v2595_v48  ;;  %v2603_v23 = vld [vmem:[#allocation7 + $0xc0] sm:$0xff] }
 0x5d3   : >> { %v2607_v41 = vld [vmem:[#allocation7 + $0xe0] sm:$0xff]  ;;  %20624 = vst [vmem:[#allocation335_spill] sm:$0xff] %v16946_v25 }
 0x5d4   : >> { %3009 = vmatmul.mubr.f32.vlgmr.msra.gmra.mrb[46].mxu0 %v16716_v14  ;;  %3163 = vmatmul.mubr.f32.vlgmr.msra.gmra.mrb[44].mxu1 %v16716_v14  ;;  %20619 = vst [vmem:[#allocation330_spill] sm:$0xff] %v16928_v27  ;;  %20620 = vst [vmem:[#allocation331_spill] sm:$0xff] %v16930_v35  ;;  %v2601_v14 = vld [vmem:[#allocation7 + $0xb0] sm:$0xff]  ;;  %v3390_v48 = vld [vmem:[%s20625_s29 + $0x88] sm:$0xff] }
 0x5d5   : >> { %12002 = vmatpush1.bf16.msra.mxu0 %v16908_v19  ;;  %12018 = vmatpush1.bf16.msra.mxu1 %v16910_v56  ;;  %20621 = vst [vmem:[#allocation332_spill] sm:$0xff] %v16938_v1  ;;  %v16940_v44 = vpack.c.bf16 %v2601_v14, %v2597_v59  ;;  %v3421_v40 = vld [vmem:[%s20625_s29 + $0x180] sm:$0xff]  ;;  %v3422_v59 = vld [vmem:[%s20625_s29 + $0x188] sm:$0xff]  ;;  %v16964_v14 = vpack.c.bf16 %v2607_v41, %v2603_v23  ;;  %v3392_v41 = vld [vmem:[%s20625_s29 + $0x98] sm:$0xff] }
 0x5d6   : >> { %12004 = vmatprep.subr.bf16.mxu0 %v16914_v12  ;;  %12020 = vmatprep.subr.bf16.mxu1 %v16916_v53  ;;  %v2605_v53 = vld [vmem:[#allocation7 + $0xd0] sm:$0xff]  ;;  %v16972_v22 = vpack.c.bf16 %v3422_v59, %v3421_v40  ;;  %v3406_v23 = vld [vmem:[%s20625_s29 + $0x108] sm:$0xff] }
 0x5d7   : >> { %3014 = vmatprep.mubr.f32.mxu0 %v16736_v45  ;;  %3168 = vmatprep.mubr.f32.mxu1 %v16736_v45  ;;  %20622 = vst [vmem:[#allocation333_spill] sm:$0xff] %v16940_v44  ;;  %v16944_v45 = vpack.c.bf16 %v2608_v31, %v2604_v63  ;;  %20626 = vst [vmem:[#allocation336_spill] sm:$0xff] %v16964_v14 }
 0x5d8   : >> { %3015 = vmatmul.mubr.f32.gmra.mrb[48].mxu0 %v16728_v4  ;;  %3169 = vmatmul.mubr.f32.gmra.mrb[46].mxu1 %v16728_v4  ;;  %v2609_v4 = vld [vmem:[#allocation7 + $0xf0] sm:$0xff]  ;;  %20629 = vst [vmem:[#allocation339_spill] sm:$0xff] %v16972_v22 }
 0x5d9   : >> { %12006 = vmatpush1.bf16.msra.mxu0 %v16922_v58  ;;  %12022 = vmatpush1.bf16.msra.mxu1 %v16924_v61  ;;  %20623 = vst [vmem:[#allocation334_spill] sm:$0xff] %v16944_v45  ;;  %v3389_v61 = vld [vmem:[%s20625_s29 + $0x80] sm:$0xff]  ;;  %v16966_v63 = vpack.c.bf16 %v2609_v4, %v2605_v53  ;;  %v3423_v4 = vld [vmem:[%s20625_s29 + $0x190] sm:$0xff] }
 0x5da   : >> { %12008 = vmatprep.subr.bf16.mxu0 %v16928_v27  ;;  %12024 = vmatprep.subr.bf16.mxu1 %v16930_v35  ;;  %v16970_v31 = vpack.c.bf16 %v3390_v48, %v3389_v61  ;;  %v3405_v53 = vld [vmem:[%s20625_s29 + $0x100] sm:$0xff]  ;;  %v3391_v61 = vld [vmem:[%s20625_s29 + $0x90] sm:$0xff]  ;;  %v3424_v48 = vld [vmem:[%s20625_s29 + $0x198] sm:$0xff] }
 0x5db   : >> { %3245 = vmatprep.mubr.f32.mxu0 %v20354_v55  ;;  %3322 = vmatprep.mubr.f32.mxu1 %v20354_v55  ;;  %20627 = vst [vmem:[#allocation337_spill] sm:$0xff] %v16966_v63  ;;  %v17004_v59 = vpack.c.bf16 %v3406_v23, %v3405_v53  ;;  %v3394_v53 = vld [vmem:[%s20625_s29 + $0xa8] sm:$0xff]  ;;  %v3425_v23 = vld [vmem:[%s20625_s29 + $0x1a0] sm:$0xff] }
 0x5dc   : >> { %20628 = vst [vmem:[#allocation338_spill] sm:$0xff] %v16970_v31 }
 0x5dd   : >> { %12010 = vmatpush1.bf16.msra.mxu0 %v16938_v1  ;;  %12026 = vmatpush1.bf16.msra.mxu1 %v16940_v44  ;;  %v3374_v44 = vld [vmem:[%s20625_s29 + $0x8] sm:$0xff]  ;;  %20631 = vst [vmem:[#allocation341_spill] sm:$0xff] %v17004_v59  ;;  %v17012_v1 = vpack.c.bf16 %v3392_v41, %v3391_v61 }
 0x5de   : >> { %12012 = vmatprep.subr.bf16.mxu0 %v16944_v45  ;;  %12028 = vmatprep.subr.bf16.mxu1 %v16946_v25  ;;  %v17002_v40 = vpack.c.bf16 %v3374_v44, %v3373_v0  ;;  %v3375_v25 = vld [vmem:[%s20625_s29 + $0x10] sm:$0xff]  ;;  %v3376_v45 = vld [vmem:[%s20625_s29 + $0x18] sm:$0xff]  ;;  %v3393_v0 = vld [vmem:[%s20625_s29 + $0xa0] sm:$0xff] }
 0x5df   : >> { %20632 = vst [vmem:[#allocation342_spill] sm:$0xff] %v17012_v1  ;;  %v3408_v44 = vld [vmem:[%s20625_s29 + $0x118] sm:$0xff]  ;;  %v3426_v61 = vld [vmem:[%s20625_s29 + $0x1a8] sm:$0xff] }
 0x5e0   : >> { %20630 = vst [vmem:[#allocation340_spill] sm:$0xff] %v17002_v40 }
 0x5e1   : >> { %12014 = vmatpush1.bf16.msra.mxu0 %v16964_v14  ;;  %12030 = vmatpush1.bf16.msra.mxu1 %v16966_v63  ;;  %v17014_v14 = vpack.c.bf16 %v3424_v48, %v3423_v4  ;;  %v3377_v4 = vld [vmem:[%s20625_s29 + $0x20] sm:$0xff]  ;;  %v3378_v48 = vld [vmem:[%s20625_s29 + $0x28] sm:$0xff] }
 0x5e2   : >> { %12032 = vmatprep.subr.bf16.mxu0 %v16970_v31  ;;  %12064 = vmatprep.subr.bf16.mxu1 %v16972_v22  ;;  %v3407_v22 = vld [vmem:[%s20625_s29 + $0x110] sm:$0xff]  ;;  %v17054_v31 = vpack.c.bf16 %v3394_v53, %v3393_v0  ;;  %v3428_v53 = vld [vmem:[%s20625_s29 + $0x1b8] sm:$0xff] }
 0x5e3   : >> { %20633 = vst [vmem:[#allocation343_spill] sm:$0xff] %v17014_v14  ;;  %v17044_v41 = vpack.c.bf16 %v3408_v44, %v3407_v22  ;;  %v3395_v22 = vld [vmem:[%s20625_s29 + $0xb0] sm:$0xff]  ;;  %v3396_v44 = vld [vmem:[%s20625_s29 + $0xb8] sm:$0xff] }
 0x5e4   : >> { %10566 = vmatmul.mubr.msk.f32.vlgmr.msra.gmra.mrb[46].mxu0 %vm1068_vm2, %v15523_v30  ;;  %10568 = vmatmul.mubr.msk.f32.vlgmr.msra.gmra.mrb[44].mxu1 %vm1068_vm2, %v15523_v30  ;;  %v17042_v30 = vpack.c.bf16 %v3376_v45, %v3375_v25  ;;  %20636 = vst [vmem:[#allocation346_spill] sm:$0xff] %v17054_v31  ;;  %v3409_v45 = vld [vmem:[%s20625_s29 + $0x120] sm:$0xff]  ;;  %v3410_v25 = vld [vmem:[%s20625_s29 + $0x128] sm:$0xff]  ;;  %v3427_v0 = vld [vmem:[%s20625_s29 + $0x1b0] sm:$0xff] }
 0x5e5   : >> { %3251 = vmatprep.mubr.f32.mxu0 %v20354_v55  ;;  %3328 = vmatprep.mubr.f32.mxu1 %v20354_v55  ;;  %20635 = vst [vmem:[#allocation345_spill] sm:$0xff] %v17044_v41 }
 0x5e6   : >> { %12034 = vmatpush3.bf16.msra.mxu0 %v17002_v40  ;;  %12066 = vmatpush3.bf16.msra.mxu1 %v17004_v59  ;;  %20634 = vst [vmem:[#allocation344_spill] sm:$0xff] %v17042_v30  ;;  %v17056_v40 = vpack.c.bf16 %v3426_v61, %v3425_v23  ;;  %v17082_v23 = vpack.c.bf16 %v3378_v48, %v3377_v4  ;;  %v3411_v4 = vld [vmem:[%s20625_s29 + $0x130] sm:$0xff]  ;;  %v3412_v48 = vld [vmem:[%s20625_s29 + $0x138] sm:$0xff] }
 0x5e7   : >> { %12036 = vmatprep.subr.bf16.mxu0 %v17012_v1  ;;  %12068 = vmatprep.subr.bf16.mxu1 %v17014_v14  ;;  %v17084_v61 = vpack.c.bf16 %v3410_v25, %v3409_v45  ;;  %v3380_v14 = vld [vmem:[%s20625_s29 + $0x38] sm:$0xff]  ;;  %v17094_v1 = vpack.c.bf16 %v3396_v44, %v3395_v22  ;;  %v3397_v45 = vld [vmem:[%s20625_s29 + $0xc0] sm:$0xff]  ;;  %v3398_v25 = vld [vmem:[%s20625_s29 + $0xc8] sm:$0xff] }
 0x5e8   : >> { %20637 = vst [vmem:[#allocation347_spill] sm:$0xff] %v17056_v40  ;;  %10567 = vmatmul.mubr.msk.f32.gmra.mrb[48].mxu0 %vm1068_vm2, %v15520_v29  ;;  %10569 = vmatmul.mubr.msk.f32.gmra.mrb[46].mxu1 %vm1068_vm2, %v15520_v29  ;;  %20638 = vst [vmem:[#allocation348_spill] sm:$0xff] %v17082_v23  ;;  %v3379_v29 = vld [vmem:[%s20625_s29 + $0x30] sm:$0xff]  ;;  %v3429_v22 = vld [vmem:[%s20625_s29 + $0x1c0] sm:$0xff] }
 0x5e9   : >> { %20639 = vst [vmem:[#allocation349_spill] sm:$0xff] %v17084_v61  ;;  %20640 = vst [vmem:[#allocation350_spill] sm:$0xff] %v17094_v1  ;;  %v3430_v44 = vld [vmem:[%s20625_s29 + $0x1c8] sm:$0xff] }
 0x5ea   : >> { %12038 = vmatpush3.bf16.msra.mxu0 %v17042_v30  ;;  %12070 = vmatpush3.bf16.msra.mxu1 %v17044_v41  ;;  %v17096_v30 = vpack.c.bf16 %v3428_v53, %v3427_v0  ;;  %v17118_v0 = vpack.c.bf16 %v3380_v14, %v3379_v29  ;;  %v17120_v53 = vpack.c.bf16 %v3412_v48, %v3411_v4  ;;  %v3413_v14 = vld [vmem:[%s20625_s29 + $0x140] sm:$0xff]  ;;  %v3414_v29 = vld [vmem:[%s20625_s29 + $0x148] sm:$0xff]  ;;  %v3399_v4 = vld [vmem:[%s20625_s29 + $0xd0] sm:$0xff] }
 0x5eb   : >> { %12040 = vmatprep.subr.bf16.mxu0 %v17054_v31  ;;  %12072 = vmatprep.subr.bf16.mxu1 %v17056_v40  ;;  %v3381_v40 = vld [vmem:[%s20625_s29 + $0x40] sm:$0xff]  ;;  %v3382_v31 = vld [vmem:[%s20625_s29 + $0x48] sm:$0xff]  ;;  %v17130_v41 = vpack.c.bf16 %v3398_v25, %v3397_v45  ;;  %v3400_v48 = vld [vmem:[%s20625_s29 + $0xd8] sm:$0xff] }
 0x5ec   : >> { %20641 = vst [vmem:[#allocation351_spill] sm:$0xff] %v17096_v30  ;;  %20642 = vst [vmem:[#allocation352_spill] sm:$0xff] %v17118_v0  ;;  %v3431_v45 = vld [vmem:[%s20625_s29 + $0x1d0] sm:$0xff]  ;;  %v3432_v25 = vld [vmem:[%s20625_s29 + $0x1d8] sm:$0xff] }
 0x5ed   : >> { %20643 = vst [vmem:[#allocation353_spill] sm:$0xff] %v17120_v53  ;;  %20644 = vst [vmem:[#allocation354_spill] sm:$0xff] %v17130_v41 }
 0x5ee   : >> { %12042 = vmatpush3.bf16.msra.mxu0 %v17082_v23  ;;  %12074 = vmatpush3.bf16.msra.mxu1 %v17084_v61  ;;  %v17132_v23 = vpack.c.bf16 %v3430_v44, %v3429_v22  ;;  %v17154_v22 = vpack.c.bf16 %v3382_v31, %v3381_v40  ;;  %v17156_v44 = vpack.c.bf16 %v3414_v29, %v3413_v14  ;;  %v3415_v31 = vld [vmem:[%s20625_s29 + $0x150] sm:$0xff]  ;;  %v3416_v40 = vld [vmem:[%s20625_s29 + $0x158] sm:$0xff]  ;;  %v3401_v14 = vld [vmem:[%s20625_s29 + $0xe0] sm:$0xff] }
 0x5ef   : >> { %12044 = vmatprep.subr.bf16.mxu0 %v17094_v1  ;;  %12076 = vmatprep.subr.bf16.mxu1 %v17096_v30  ;;  %v3383_v30 = vld [vmem:[%s20625_s29 + $0x50] sm:$0xff]  ;;  %v3384_v1 = vld [vmem:[%s20625_s29 + $0x58] sm:$0xff]  ;;  %v17166_v61 = vpack.c.bf16 %v3400_v48, %v3399_v4  ;;  %v3402_v29 = vld [vmem:[%s20625_s29 + $0xe8] sm:$0xff] }
 0x5f0   : >> { %20645 = vst [vmem:[#allocation355_spill] sm:$0xff] %v17132_v23  ;;  %20646 = vst [vmem:[#allocation356_spill] sm:$0xff] %v17154_v22  ;;  %v3433_v4 = vld [vmem:[%s20625_s29 + $0x1e0] sm:$0xff]  ;;  %v3434_v48 = vld [vmem:[%s20625_s29 + $0x1e8] sm:$0xff] }
 0x5f1   : >> { %20647 = vst [vmem:[#allocation357_spill] sm:$0xff] %v17156_v44  ;;  %20648 = vst [vmem:[#allocation358_spill] sm:$0xff] %v17166_v61 }
 0x5f2   : >> { %12046 = vmatpush3.bf16.msra.mxu0 %v17118_v0  ;;  %12078 = vmatpush3.bf16.msra.mxu1 %v17120_v53  ;;  %v17168_v0 = vpack.c.bf16 %v3432_v25, %v3431_v45  ;;  %v17190_v45 = vpack.c.bf16 %v3384_v1, %v3383_v30  ;;  %v17192_v25 = vpack.c.bf16 %v3416_v40, %v3415_v31  ;;  %v3385_v1 = vld [vmem:[%s20625_s29 + $0x60] sm:$0xff]  ;;  %v3386_v30 = vld [vmem:[%s20625_s29 + $0x68] sm:$0xff] }
 0x5f3   : >> { %12048 = vmatprep.subr.bf16.mxu0 %v17130_v41  ;;  %12080 = vmatprep.subr.bf16.mxu1 %v17132_v23  ;;  %v17196_v23 = vpack.c.bf16 %v3402_v29, %v3401_v14  ;;  %v17198_v41 = vpack.c.bf16 %v3434_v48, %v3433_v4  ;;  %v3417_v31 = vld [vmem:[%s20625_s29 + $0x160] sm:$0xff]  ;;  %v17213_v40 = vpack.c.bf16 %v3386_v30, %v3385_v1  ;;  %v3418_v14 = vld [vmem:[%s20625_s29 + $0x168] sm:$0xff]  ;;  %v3403_v4 = vld [vmem:[%s20625_s29 + $0xf0] sm:$0xff] }
 0x5f4   : >> { %20649 = vst [vmem:[#allocation359_spill] sm:$0xff] %v17168_v0  ;;  %20650 = vst [vmem:[#allocation360_spill] sm:$0xff] %v17190_v45  ;;  %v17218_v29 = vpack.c.bf16 %v3418_v14, %v3417_v31  ;;  %v3404_v48 = vld [vmem:[%s20625_s29 + $0xf8] sm:$0xff]  ;;  %v3435_v1 = vld [vmem:[%s20625_s29 + $0x1f0] sm:$0xff] }
 0x5f5   : >> { %20651 = vst [vmem:[#allocation361_spill] sm:$0xff] %v17192_v25  ;;  %20652 = vst [vmem:[#allocation362_spill] sm:$0xff] %v17196_v23  ;;  %v17231_v30 = vpack.c.bf16 %v3404_v48, %v3403_v4  ;;  %v3436_v31 = vld [vmem:[%s20625_s29 + $0x1f8] sm:$0xff]  ;;  %v3387_v14 = vld [vmem:[%s20625_s29 + $0x70] sm:$0xff] }
 0x5f6   : >> { %12050 = vmatpush3.bf16.msra.mxu0 %v17154_v22  ;;  %12082 = vmatpush3.bf16.msra.mxu1 %v17156_v44  ;;  %20653 = vst [vmem:[#allocation363_spill] sm:$0xff] %v17198_v41  ;;  %20654 = vst [vmem:[#allocation364_spill] sm:$0xff] %v17213_v40  ;;  %v3419_v4 = vld [vmem:[%s20625_s29 + $0x170] sm:$0xff]  ;;  %v3420_v48 = vld [vmem:[%s20625_s29 + $0x178] sm:$0xff] }
 0x5f7   : >> { %12052 = vmatprep.subr.bf16.mxu0 %v17166_v61  ;;  %12084 = vmatprep.subr.bf16.mxu1 %v17168_v0  ;;  %20655 = vst [vmem:[#allocation365_spill] sm:$0xff] %v17218_v29  ;;  %20656 = vst [vmem:[#allocation366_spill] sm:$0xff] %v17231_v30 }
 0x5fa   : >> { %12054 = vmatpush3.bf16.msra.mxu0 %v17190_v45  ;;  %12086 = vmatpush3.bf16.msra.mxu1 %v17192_v25 }
 0x5fb   : >> { %12056 = vmatprep.subr.bf16.mxu0 %v17196_v23  ;;  %12088 = vmatprep.subr.bf16.mxu1 %v17198_v41  ;;  %v17242_v41 = vpack.c.bf16 %v3436_v31, %v3435_v1  ;;  %v3335_v31 = vld [vmem:[#allocation12] sm:$0xf] }
 0x5fd   : >> { %20657 = vst [vmem:[#allocation367_spill] sm:$0xff] %v17242_v41 }
 0x5fe   : >> { %12058 = vmatpush3.bf16.msra.mxu0 %v17213_v40  ;;  %12090 = vmatpush3.bf16.msra.mxu1 %v17218_v29  ;;  %v3388_v40 = vld [vmem:[%s20625_s29 + $0x78] sm:$0xff]  ;;  %v17253_v29 = vpack.c.bf16 %v3420_v48, %v3419_v4  ;;  %v17269_v4 = vrot.slane %v3335_v31, %v16389_v57  ;;  %v17272_v48 = vrot.slane %v3335_v31, %v16163_v24 }
 0x5ff   : >> { %v17244_v23 = vpack.c.bf16 %v3388_v40, %v3387_v14  ;;  %12060 = vmatprep.subr.bf16.mxu0 %v17231_v30  ;;  %12092 = vmatprep.subr.bf16.mxu1 %v17242_v41  ;;  %v14822_v40 = vld [vmem:[%s15459_s22] sm:$0xf]  ;;  %v17266_v14 = vrot.slane %v3335_v31, %v15479_v9 }
 0x600   : >> { %20659 = vst [vmem:[#allocation369_spill] sm:$0xff] %v17253_v29  ;;  %v17261_v1 = vrot.slane %v14822_v40, %v16163_v24  ;;  %20662 = vst [vmem:[#allocation371_spill] sm:$0xff] %v17269_v4 }
 0x601   : >> { %20658 = vst [vmem:[#allocation368_spill] sm:$0xff] %v17244_v23  ;;  %20661 = vst [vmem:[#allocation370_spill] sm:$0xff] %v17266_v14 }
 0x602   : >> { %12062 = vmatpush3.bf16.msra.mxu0 %v17244_v23  ;;  %12094 = vmatpush3.bf16.msra.mxu1 %v17253_v29  ;;  %20663 = vst [vmem:[#allocation372_spill] sm:$0xff] %v17272_v48  ;;  %v17275_v29 = vrot.slane %v3335_v31, %v16266_v34 }
 0x603   : >> { %12111 = vmatprep.subr.bf16.mxu1 %v15527_v32  ;;  %3780 = vrot.lane.b32.xlu1 %v17261_v1, %s20660_s26 }
 0x604   : >> { %20664 = vst [vmem:[#allocation373_spill] sm:$0xff] %v17275_v29 }
 0x6b7   : >> { %v3247_v32 = vpop.f32.mrb[46].mxu0  ;;  %v3324_v23 = vpop.f32.mrb[44].mxu1 }
 0x6b8   : >> { %v3357_v40 = vadd.f32 %v17266_v14, %v3247_v32  ;;  %v3359_v41 = vadd.f32 %v17269_v4, %v3324_v23  ;;  %v3249_v30 = vpop.f32.mrb[47].mxu0  ;;  %v3326_v25 = vpop.f32.mrb[45].mxu1 }
 0x6b9   : >> { %v3358_v9 = vadd.f32 %v17272_v48, %v3249_v30  ;;  %v3360_v45 = vadd.f32 %v17275_v29, %v3326_v25 }
 0x6ba   : >> { %v3365_v44 = vmax.f32 %v3357_v40, 0.0  ;;  %v3367_v22 = vmax.f32 %v3359_v41, 0.0 }
 0x6bb   : >> { %v3366_v57 = vmax.f32 %v3358_v9, 0.0  ;;  %v3368_v0 = vmax.f32 %v3360_v45, 0.0  ;;  %v3253_v61 = vpop.f32.mrb[48].mxu0  ;;  %v3330_v24 = vpop.f32.mrb[46].mxu1 }
 0x6bc   : >> { %v3361_v31 = vadd.f32 %v17266_v14, %v3253_v61  ;;  %v3363_v34 = vadd.f32 %v17269_v4, %v3330_v24  ;;  %v3255_v53 = vpop.f32.mrb[49].mxu0  ;;  %v3332_v32 = vpop.f32.mrb[47].mxu1  ;;  %v10570_v61 = vld [vmem:[%s20665_s2] ss:$0 sm:$0xff]  ;;  %s20670_s2 = smov 32  }
 0x6bd   : >> { %v3362_v23 = vadd.f32 %v17272_v48, %v3255_v53  ;;  %v3364_v59 = vadd.f32 %v17275_v29, %v3332_v32  ;;  %3508 = vmatprep.mubr.f32.mxu0 %v3366_v57  ;;  %3583 = vmatprep.mubr.f32.mxu1 %v3368_v0 }
 0x6be   : >> { %3509 = vmatmul.mubr.f32.vlgmr.msra.gmra.mrb[50].mxu0 %v3365_v44  ;;  %3584 = vmatmul.mubr.f32.vlgmr.msra.gmra.mrb[48].mxu1 %v3367_v22  ;;  %v3369_v30 = vmax.f32 %v3361_v31, 0.0  ;;  %v3371_v41 = vmax.f32 %v3363_v34, 0.0  ;;  %v20146_v34 = vmov 0.0|0.0  }
 0x6bf   : >> { %v3370_v25 = vmax.f32 %v3362_v23, 0.0  ;;  %v3372_v45 = vmax.f32 %v3364_v59, 0.0  ;;  %12113 = vmatpush1.bf16.msra.mxu1 %v15569_v46  ;;  %12095 = vmatprep.subr.bf16.mxu0 %v20146_v34 }
 0x6c0   : >> { %12115 = vmatprep.subr.bf16.mxu1 %v15579_v50 }
 0x6c1   : >> { %3513 = vmatprep.mubr.f32.mxu0 %v3370_v25  ;;  %3588 = vmatprep.mubr.f32.mxu1 %v3372_v45 }
 0x6c2   : >> { %3514 = vmatmul.mubr.f32.gmra.mrb[52].mxu0 %v3369_v30  ;;  %3589 = vmatmul.mubr.f32.gmra.mrb[50].mxu1 %v3371_v41  ;;  %v14823_v30 = vld [vmem:[%s20314_s0] sm:$0xff] }
 0x6c3   : >> { %12117 = vmatpush1.bf16.msra.mxu1 %v15619_v62  ;;  %4028 = vmatprep.mubr.f32.mxu1 %v20354_v55 }
 0x6c4   : >> { %12119 = vmatprep.subr.bf16.mxu1 %v15631_v3  ;;  %11220 = vmatprep.mubr.msk.f32.mxu0 %vm15129_vm3, %v20354_v55 }
 0x6c7   : >> { %12121 = vmatpush1.bf16.msra.mxu1 %v15671_v18 }
 0x6c8   : >> { %12123 = vmatprep.subr.bf16.mxu1 %v15680_v21 }
 0x6cb   : >> { %12125 = vmatpush1.bf16.msra.mxu1 %v15705_v28 }
 0x6cc   : >> { %12143 = vmatprep.subr.bf16.mxu1 %v15723_v37 }
 0x791   : >> { %v10813_v57 = vpop.f32.mrb[50].mxu0  ;;  %v10851_v59 = vpop.f32.mrb[48].mxu1 }
 0x792   : >> { %v10814_v0 = vpop.f32.mrb[51].mxu0  ;;  %v10852_v53 = vpop.f32.mrb[49].mxu1 }
 0x793   : >> { %v10815_v22 = vadd.f32 %v10814_v0, %v10813_v57  ;;  %v10853_v44 = vadd.f32 %v10852_v53, %v10851_v59  ;;  %v666_v57 = vld [vmem:[%s20668_s19] sm:$0xff]  ;;  %v3781_v59 = vpop.permute.xlu1 %3780 }
 0x795   : >> { %v3511_v40 = vadd.f32 %v10815_v22, %v10570_v61  ;;  %v10816_v9 = vpop.f32.mrb[52].mxu0  ;;  %v10854_v24 = vpop.f32.mrb[50].mxu1  ;;  %v667_v22 = vld [vmem:[%s20668_s19 + $0x8] sm:$0xff] }
 0x796   : >> { %v10817_v31 = vpop.f32.mrb[53].mxu0  ;;  %v10855_v32 = vpop.f32.mrb[51].mxu1 }
 0x797   : >> { %v3586_v23 = vadd.f32 %v10853_v44, %v3511_v40  ;;  %v10818_v25 = vadd.f32 %v10817_v31, %v10816_v9  ;;  %v10856_v45 = vadd.f32 %v10855_v32, %v10854_v24  ;;  %v14824_v40 = vld [vmem:[%s20314_s0 + $0x8] sm:$0xff] }
 0x799   : >> { %v17303_v41 = vadd.f32 %v14823_v30, %v3586_v23  ;;  %v3516_v34 = vadd.f32 %v10818_v25, %v10570_v61 }
 0x79b   : >> { %20667 = vst [vmem:[#allocation374_spill] sm:$0xff] %v17303_v41  ;;  %v3591_v0 = vadd.f32 %v10856_v45, %v3516_v34  ;;  %v3679_v53 = vsub.f32 %v17303_v41, %v17261_v1  ;;  %v3596_v44 = vsub.f32 %v17303_v41, %v666_v57  ;;  %v668_v45 = vld [vmem:[#allocation4] sm:$0x1] }
 0x79c   : >> { %v14825_v57 = vld [vmem:[%s19491_s5] sm:$0xff] }
 0x79d   : >> { %v17317_v61 = vadd.f32 %v14824_v40, %v3591_v0  ;;  %v3783_v9 = vsub.f32 %v3679_v53, %v3781_v59  ;;  %v3598_v32 = vmul.f32 %v3596_v44, %v3596_v44  ;;  %v3681_v30 = vmul.f32 %v3679_v53, %v3679_v53 }
 0x79f   : >> { %20669 = vst [vmem:[#allocation375_spill] sm:$0xff] %v17317_v61  ;;  %v3597_v24 = vsub.f32 %v17317_v61, %v667_v22  ;;  %v3680_v34 = vsub.f32 %v17317_v61, %v17261_v1  ;;  %3787 = vrot.lane.b32.xlu0 %v3783_v9, %s20670_s2  ;;  %v14826_v9 = vld [vmem:[%s19491_s5 + $0x8] sm:$0xff] }
 0x7a1   : >> { %v3784_v31 = vsub.f32 %v3680_v34, %v3781_v59  ;;  %v3599_v23 = vmul.f32 %v3597_v24, %v3597_v24  ;;  %v3682_v1 = vmul.f32 %v3680_v34, %v3680_v34  ;;  %v14828_v24 = vld [vmem:[%s19491_s5 + $0x18] sm:$0xff] }
 0x7a3   : >> { %3789 = vrot.lane.b32.xlu1 %v3784_v31, %s20670_s2  ;;  %v12096_v25 = vpack.c.bf16 %v3599_v23, %v3598_v32  ;;  %v20671_v31 = vld [vmem:[#allocation34_spill] sm:$0xff]  ;;  %v20672_v32 = vld [vmem:[#allocation36_spill] sm:$0xff]  ;;  %v14830_v23 = vld [vmem:[%s19491_s5 + $0x28] sm:$0xff] }
 0x7a5   : >> { %12097 = vmatpush3.bf16.msra.mxu0 %v12096_v25  ;;  %v14831_v25 = vld [vmem:[%s19491_s5 + $0x30] sm:$0xff] }
 0x7a6   : >> { %12099 = vmatprep.subr.bf16.mxu0 %v15470_v6 }
 0x7a8   : >> { %11221 = vmatmul.mubr.msk.f32.vlgmr.msra.gmra.mrb[54].mxu0 %vm763_vm1, %v668_v45  ;;  %v20673_v45 = vld [vmem:[#allocation38_spill] sm:$0xff] }
 0x7a9   : >> { %12101 = vmatpush3.bf16.msra.mxu0 %v15470_v6  ;;  %11231 = vmatprep.mubr.msk.f32.mxu0 %vm681_vm0, %v3681_v30  ;;  %v20674_v30 = vld [vmem:[#allocation40_spill] sm:$0xff] }
 0x7aa   : >> { %12103 = vmatprep.subr.bf16.mxu0 %v15482_v10 }
 0x7ad   : >> { %12105 = vmatpush3.bf16.msra.mxu0 %v15482_v10 }
 0x7b0   : >> { %11232 = vmatmul.mubr.msk.f32.vlgmr.msra.gmra.mrb[56].mxu0 %vm681_vm0, %v3682_v1  ;;  %v14832_v1 = vld [vmem:[%s19491_s5 + $0x38] sm:$0xff] }
 0x7b1   : >> { %11238 = vmatprep.mubr.msk.f32.mxu0 %vm763_vm1, %v14825_v57  ;;  %v14833_v57 = vld [vmem:[%s19491_s5 + $0x40] sm:$0xff] }
 0x811   : >> { %v3788_v59 = vpop.permute.xlu0 %3787 }
 0x812   : >> { %v17336_v22 = vsel %vm681_vm0, %v3679_v53, %v3788_v59  ;;  %v14827_v53 = vld [vmem:[%s19491_s5 + $0x10] sm:$0xff] }
 0x813   : >> { %v20675_v59 = vld [vmem:[#allocation42_spill] sm:$0xff] }
 0x815   : >> { %v3790_v0 = vpop.permute.xlu1 %3789 }
 0x816   : >> { %v17339_v44 = vsel %vm681_vm0, %v3680_v34, %v3790_v0  ;;  %v14829_v34 = vld [vmem:[%s19491_s5 + $0x20] sm:$0xff] }
 0x817   : >> { %v12106_v40 = vpack.c.bf16 %v17339_v44, %v17336_v22  ;;  %v20676_v0 = vld [vmem:[#allocation44_spill] sm:$0xff] }
 0x819   : >> { %12107 = vmatprep.subr.bf16.mxu0 %v12106_v40 }
 0x81a   : >> { %12109 = vmatpush3.bf16.msra.mxu0 %v12106_v40  ;;  %v14834_v40 = vld [vmem:[%s19491_s5 + $0x48] sm:$0xff] }
 0x81b   : >> { %12127 = vmatprep.subr.bf16.mxu0 %v15529_v33 }
 0x81d   : >> { %11239 = vmatmul.mubr.msk.f32.vlgmr.msra.gmra.mrb[58].mxu0 %vm763_vm1, %v14826_v9  ;;  %v14835_v9 = vld [vmem:[%s19491_s5 + $0x50] sm:$0xff] }
 0x81e   : >> { %11241 = vmatprep.mubr.msk.f32.mxu0 %vm763_vm1, %v14827_v53  ;;  %12129 = vmatpush1.bf16.msra.mxu0 %v15571_v47  ;;  %v14836_v53 = vld [vmem:[%s19491_s5 + $0x58] sm:$0xff] }
 0x81f   : >> { %12131 = vmatprep.subr.bf16.mxu0 %v15581_v51 }
 0x821   : >> { %11242 = vmatmul.mubr.msk.f32.gmra.mrb[60].mxu0 %vm763_vm1, %v14828_v24  ;;  %v14837_v24 = vld [vmem:[%s19491_s5 + $0x60] sm:$0xff] }
 0x822   : >> { %11244 = vmatprep.mubr.msk.f32.mxu0 %vm763_vm1, %v14829_v34  ;;  %12133 = vmatpush1.bf16.msra.mxu0 %v20671_v31  ;;  %v14838_v34 = vld [vmem:[%s19491_s5 + $0x68] sm:$0xff] }
 0x823   : >> { %12135 = vmatprep.subr.bf16.mxu0 %v20672_v32 }
 0x825   : >> { %11245 = vmatmul.mubr.msk.f32.gmra.mrb[62].mxu0 %vm763_vm1, %v14830_v23  ;;  %v14839_v23 = vld [vmem:[%s19491_s5 + $0x70] sm:$0xff] }
 0x826   : >> { %11247 = vmatprep.mubr.msk.f32.mxu0 %vm763_vm1, %v14831_v25  ;;  %12137 = vmatpush1.bf16.msra.mxu0 %v20673_v45  ;;  %v14840_v25 = vld [vmem:[%s19491_s5 + $0x78] sm:$0xff] }
 0x827   : >> { %12139 = vmatprep.subr.bf16.mxu0 %v20674_v30 }
 0x829   : >> { %11248 = vmatmul.mubr.msk.f32.gmra.mrb[64].mxu0 %vm763_vm1, %v14832_v1  ;;  %v20677_v1 = vld [vmem:[#allocation45_spill] sm:$0xff] }
 0x82a   : >> { %11250 = vmatprep.mubr.msk.f32.mxu0 %vm763_vm1, %v14833_v57  ;;  %12141 = vmatpush1.bf16.msra.mxu0 %v20675_v59  ;;  %v767_v57 = vrot.slane %v20677_v1, 4 }
 0x82b   : >> { %12159 = vmatprep.subr.bf16.mxu0 %v20676_v0 }
 0x82d   : >> { %11251 = vmatmul.mubr.msk.f32.gmra.mrb[66].mxu0 %vm763_vm1, %v14834_v40  ;;  %v768_v40 = vmin.f32 %v20677_v1, %v767_v57 }
 0x82e   : >> { %11253 = vmatprep.mubr.msk.f32.mxu0 %vm763_vm1, %v14835_v9 }
 0x831   : >> { %11254 = vmatmul.mubr.msk.f32.gmra.mrb[68].mxu0 %vm763_vm1, %v14836_v53 }
 0x832   : >> { %11256 = vmatprep.mubr.msk.f32.mxu0 %vm763_vm1, %v14837_v24  ;;  %v769_v24 = vrot.slane %v768_v40, 2 }
 0x835   : >> { %11257 = vmatmul.mubr.msk.f32.gmra.mrb[70].mxu0 %vm763_vm1, %v14838_v34  ;;  %v770_v34 = vmin.f32 %v768_v40, %v769_v24 }
 0x836   : >> { %11259 = vmatprep.mubr.msk.f32.mxu0 %vm763_vm1, %v14839_v23 }
 0x837   : >> { %v771_v45 = vrot.slane %v770_v34, 1 }
 0x839   : >> { %11260 = vmatmul.mubr.msk.f32.gmra.mrb[72].mxu0 %vm763_vm1, %v14840_v25  ;;  %v772_v31 = vmin.f32 %v770_v34, %v771_v45 }
 0x83a   : >> { %4141 = vmatprep.mubr.f32.mxu0 %v20354_v55 }
 0x83b   : >> { %v773_v33 = vsub.f32 0.0025, %v772_v31  ;;  %v10513_v10 = vadd.f32 -0.0625, %v772_v31 }
 0x87b   : >> { %v17415_v9 = vpop.f32.mrb[54].mxu0 }
 0x87c   : >> { %20678 = vst [vmem:[#allocation45_spill] sm:$0xff] %v17415_v9  ;;  %v11222_v53 = vpop.f32.mrb[55].mxu0  ;;  %v774_v9 = vmax.f32 %v773_v33, 0.0 }
 0x87d   : >> { %v777_v53 = vmax.f32 %v10513_v10, 0.0 }
 0x87f   : >> { %v778_v61 = vadd.f32 %v777_v53, %v774_v9  ;;  %v20681_v9 = vld [vmem:[#allocation47_spill] sm:$0xff] }
 0x880   : >> { %v20685_v53 = vld [vmem:[#allocation51_spill] sm:$0xff] }
 0x883   : >> { %v11233_v0 = vpop.f32.mrb[56].mxu0 }
 0x884   : >> { %v3765_v23 = vsel %vm763_vm1, %v11233_v0, inf  ;;  %v3755_v59 = vpop.f32.mrb[57].mxu0 }
 0x885   : >> { %v3764_v30 = vsel %vm763_vm1, %v3755_v59, inf }
 0x886   : >> { %v3766_v32 = vmin.f32 %v3764_v30, %v3765_v23  ;;  %v20682_v23 = vld [vmem:[#allocation48_spill] sm:$0xff] }
 0x888   : >> { %v3767_v25 = vrot.slane %v3766_v32, 4 }
 0x88a   : >> { %v3768_v51 = vmin.f32 %v3766_v32, %v3767_v25  ;;  %v20683_v25 = vld [vmem:[#allocation49_spill] sm:$0xff] }
 0x88c   : >> { %v3769_v47 = vrot.slane %v3768_v51, 2 }
 0x88e   : >> { %v3770_v1 = vmin.f32 %v3768_v51, %v3769_v47 }
 0x890   : >> { %v3771_v57 = vrot.slane %v3770_v1, 1 }
 0x892   : >> { %v3772_v6 = vmin.f32 %v3770_v1, %v3771_v57  ;;  %v20684_v57 = vld [vmem:[#allocation50_spill] sm:$0xff] }
 0x894   : >> { %v3773_v40 = vsub.f32 0.0025, %v3772_v6  ;;  %v10574_v24 = vadd.f32 -0.0625, %v3772_v6 }
 0x896   : >> { %v3774_v0 = vmax.f32 %v3773_v40, 0.0  ;;  %v3777_v37 = vmax.f32 %v10574_v24, 0.0  ;;  %v20686_v24 = vld [vmem:[#allocation52_spill] sm:$0xff] }
 0x898   : >> { %v3775_v41 = vadd.f32 %v3774_v0, %v778_v61  ;;  %v20687_v0 = vld [vmem:[#allocation53_spill] sm:$0xff] }
 0x89a   : >> { %v17419_v59 = vadd.f32 %v3777_v37, %v3775_v41  ;;  %v20680_v41 = vld [vmem:[#allocation46_spill] sm:$0xff] }
 0x89c   : >> { %20679 = vst [vmem:[#allocation376_spill] sm:$0xff] %v17419_v59 }
 0x8f0   : >> { %v17421_v30 = vpop.f32.mrb[58].mxu0 }
 0x8f1   : >> { %v17423_v45 = vpop.f32.mrb[59].mxu0 }
 0x8f4   : >> { %v17425_v32 = vpop.f32.mrb[60].mxu0 }
 0x8f5   : >> { %v17427_v31 = vpop.f32.mrb[61].mxu0 }
 0x8f8   : >> { %v17429_v47 = vpop.f32.mrb[62].mxu0 }
 0x8f9   : >> { %v17431_v10 = vpop.f32.mrb[63].mxu0 }
 0x8fc   : >> { %v17433_v33 = vpop.f32.mrb[64].mxu0 }
 0x8fd   : >> { %v17435_v6 = vpop.f32.mrb[65].mxu0 }
 0x900   : >> { %v11252_v51 = vpop.f32.mrb[66].mxu0 }
 0x901   : >> { %v3901_v61 = vpop.f32.mrb[67].mxu0 }
 0x902   : >> { %10591 = vmatmul.mubr.msk.f32.vlgmr.msra.gmra.mrb[52].mxu1 %vm1068_vm2, %v3901_v61  ;;  %10599 = vmatmul.mubr.msk.f32.vlgmr.msra.gmra.mrb[74].mxu0 %vm1068_vm2, %v3901_v61  ;;  %v20688_v61 = vld [vmem:[#allocation54_spill] sm:$0xff] }
 0x903   : >> { %4034 = vmatprep.mubr.f32.mxu1 %v20354_v55  ;;  %4147 = vmatprep.mubr.f32.mxu0 %v20354_v55 }
 0x904   : >> { %v11255_v37 = vpop.f32.mrb[68].mxu0  ;;  %12145 = vmatpush1.bf16.msra.mxu1 %v20680_v41  ;;  %12161 = vmatpush1.bf16.msra.mxu0 %v20681_v9 }
 0x905   : >> { %v3911_v34 = vpop.f32.mrb[69].mxu0  ;;  %12147 = vmatprep.subr.bf16.mxu1 %v20682_v23  ;;  %12163 = vmatprep.subr.bf16.mxu0 %v20683_v25  ;;  %v20689_v25 = vld [vmem:[#allocation55_spill] sm:$0xff]  ;;  %v20691_v23 = vld [vmem:[#allocation57_spill] sm:$0xff] }
 0x906   : >> { %10592 = vmatmul.mubr.msk.f32.gmra.mrb[54].mxu1 %vm1068_vm2, %v11252_v51  ;;  %10600 = vmatmul.mubr.msk.f32.gmra.mrb[76].mxu0 %vm1068_vm2, %v11252_v51 }
 0x907   : >> { %4040 = vmatprep.mubr.f32.mxu1 %v20354_v55  ;;  %4153 = vmatprep.mubr.f32.mxu0 %v20354_v55 }
 0x908   : >> { %v11258_v1 = vpop.f32.mrb[70].mxu0  ;;  %12149 = vmatpush1.bf16.msra.mxu1 %v20684_v57  ;;  %12165 = vmatpush1.bf16.msra.mxu0 %v20685_v53  ;;  %v20690_v53 = vld [vmem:[#allocation56_spill] sm:$0xff] }
 0x909   : >> { %v3921_v40 = vpop.f32.mrb[71].mxu0  ;;  %12151 = vmatprep.subr.bf16.mxu1 %v20686_v24  ;;  %12167 = vmatprep.subr.bf16.mxu0 %v20687_v0  ;;  %v20693_v0 = vld [vmem:[#allocation59_spill] sm:$0xff] }
 0x90a   : >> { %10593 = vmatmul.mubr.msk.f32.gmra.mrb[56].mxu1 %vm1068_vm2, %v3911_v34  ;;  %10601 = vmatmul.mubr.msk.f32.gmra.mrb[78].mxu0 %vm1068_vm2, %v3911_v34  ;;  %v20692_v34 = vld [vmem:[#allocation58_spill] sm:$0xff] }
 0x90b   : >> { %4046 = vmatprep.mubr.f32.mxu1 %v20354_v55  ;;  %4159 = vmatprep.mubr.f32.mxu0 %v20354_v55 }
 0x90c   : >> { %v11261_v51 = vpop.f32.mrb[72].mxu0  ;;  %12153 = vmatpush1.bf16.msra.mxu1 %v20688_v61  ;;  %12169 = vmatpush1.bf16.msra.mxu0 %v20689_v25  ;;  %v20694_v61 = vld [vmem:[#allocation60_spill] sm:$0xff]  ;;  %v20695_v25 = vld [vmem:[#allocation61_spill] sm:$0xff] }
 0x90d   : >> { %v3931_v57 = vpop.f32.mrb[73].mxu0  ;;  %12155 = vmatprep.subr.bf16.mxu1 %v20690_v53  ;;  %12171 = vmatprep.subr.bf16.mxu0 %v20691_v23  ;;  %v20762_v53 = vld [vmem:[#allocation128_spill] sm:$0xff] }
 0x90e   : >> { %10594 = vmatmul.mubr.msk.f32.gmra.mrb[58].mxu1 %vm1068_vm2, %v11255_v37  ;;  %10602 = vmatmul.mubr.msk.f32.gmra.mrb[80].mxu0 %vm1068_vm2, %v11255_v37  ;;  %v20696_v37 = vld [vmem:[#allocation62_spill] sm:$0xff] }
 0x90f   : >> { %4052 = vmatprep.mubr.f32.mxu1 %v20354_v55  ;;  %4165 = vmatprep.mubr.f32.mxu0 %v20354_v55 }
 0x910   : >> { %12157 = vmatpush1.bf16.msra.mxu1 %v20692_v34  ;;  %12173 = vmatpush1.bf16.msra.mxu0 %v20693_v0 }
 0x911   : >> { %12175 = vmatprep.subr.bf16.mxu1 %v20694_v61  ;;  %12303 = vmatprep.subr.bf16.mxu0 %v20695_v25  ;;  %v20760_v61 = vld [vmem:[#allocation126_spill] sm:$0xff] }
 0x912   : >> { %10595 = vmatmul.mubr.msk.f32.gmra.mrb[60].mxu1 %vm1068_vm2, %v3921_v40  ;;  %10603 = vmatmul.mubr.msk.f32.gmra.mrb[82].mxu0 %vm1068_vm2, %v3921_v40  ;;  %v20699_v40 = vld [vmem:[#allocation65_spill] sm:$0xff] }
 0x913   : >> { %4058 = vmatprep.mubr.f32.mxu1 %v20354_v55  ;;  %4171 = vmatprep.mubr.f32.mxu0 %v20354_v55 }
 0x916   : >> { %10596 = vmatmul.mubr.msk.f32.gmra.mrb[62].mxu1 %vm1068_vm2, %v11258_v1  ;;  %10604 = vmatmul.mubr.msk.f32.gmra.mrb[84].mxu0 %vm1068_vm2, %v11258_v1  ;;  %v20697_v1 = vld [vmem:[#allocation63_spill] sm:$0xff] }
 0x917   : >> { %4064 = vmatprep.mubr.f32.mxu1 %v20354_v55  ;;  %4177 = vmatprep.mubr.f32.mxu0 %v20354_v55 }
 0x91a   : >> { %10597 = vmatmul.mubr.msk.f32.gmra.mrb[64].mxu1 %vm1068_vm2, %v3931_v57  ;;  %10605 = vmatmul.mubr.msk.f32.gmra.mrb[86].mxu0 %vm1068_vm2, %v3931_v57  ;;  %v20698_v57 = vld [vmem:[#allocation64_spill] sm:$0xff] }
 0x91b   : >> { %4070 = vmatprep.mubr.f32.mxu1 %v20354_v55  ;;  %4183 = vmatprep.mubr.f32.mxu0 %v20354_v55 }
 0x91e   : >> { %10598 = vmatmul.mubr.msk.f32.gmra.mrb[66].mxu1 %vm1068_vm2, %v11261_v51  ;;  %10606 = vmatmul.mubr.msk.f32.gmra.mrb[88].mxu0 %vm1068_vm2, %v11261_v51  ;;  %v20701_v51 = vld [vmem:[#allocation67_spill] sm:$0xff] }
 0x91f   : >> { %4278 = vmatprep.mubr.f32.mxu1 %v20354_v55  ;;  %4391 = vmatprep.mubr.f32.mxu0 %v20354_v55 }
 0x922   : >> { %10607 = vmatmul.mubr.msk.f32.vlgmr.msra.gmra.mrb[52].mxu1 %vm1068_vm2, %v17423_v45  ;;  %10615 = vmatmul.mubr.msk.f32.vlgmr.msra.gmra.mrb[74].mxu0 %vm1068_vm2, %v17423_v45  ;;  %v20700_v45 = vld [vmem:[#allocation66_spill] sm:$0xff] }
 0x923   : >> { %4284 = vmatprep.mubr.f32.mxu1 %v20354_v55  ;;  %4397 = vmatprep.mubr.f32.mxu0 %v20354_v55 }
 0x924   : >> { %12177 = vmatpush1.bf16.msra.mxu1 %v20696_v37  ;;  %12305 = vmatpush1.bf16.msra.mxu0 %v20697_v1  ;;  %v20702_v37 = vld [vmem:[#allocation68_spill] sm:$0xff]  ;;  %v20703_v1 = vld [vmem:[#allocation69_spill] sm:$0xff] }
 0x925   : >> { %12179 = vmatprep.subr.bf16.mxu1 %v20698_v57  ;;  %12307 = vmatprep.subr.bf16.mxu0 %v20699_v40  ;;  %v20705_v40 = vld [vmem:[#allocation71_spill] sm:$0xff] }
 0x926   : >> { %10608 = vmatmul.mubr.msk.f32.gmra.mrb[54].mxu1 %vm1068_vm2, %v17421_v30  ;;  %10616 = vmatmul.mubr.msk.f32.gmra.mrb[76].mxu0 %vm1068_vm2, %v17421_v30  ;;  %v20704_v30 = vld [vmem:[#allocation70_spill] sm:$0xff] }
 0x927   : >> { %4290 = vmatprep.mubr.f32.mxu1 %v20354_v55  ;;  %4403 = vmatprep.mubr.f32.mxu0 %v20354_v55 }
 0x928   : >> { %12181 = vmatpush1.bf16.msra.mxu1 %v20700_v45  ;;  %12309 = vmatpush1.bf16.msra.mxu0 %v20701_v51  ;;  %v20706_v45 = vld [vmem:[#allocation72_spill] sm:$0xff]  ;;  %v20707_v51 = vld [vmem:[#allocation73_spill] sm:$0xff] }
 0x929   : >> { %12183 = vmatprep.subr.bf16.mxu1 %v20702_v37  ;;  %12311 = vmatprep.subr.bf16.mxu0 %v20703_v1  ;;  %v20709_v1 = vld [vmem:[#allocation75_spill] sm:$0xff] }
 0x92a   : >> { %10609 = vmatmul.mubr.msk.f32.gmra.mrb[56].mxu1 %vm1068_vm2, %v17427_v31  ;;  %10617 = vmatmul.mubr.msk.f32.gmra.mrb[78].mxu0 %vm1068_vm2, %v17427_v31  ;;  %v20708_v31 = vld [vmem:[#allocation74_spill] sm:$0xff] }
 0x92b   : >> { %4296 = vmatprep.mubr.f32.mxu1 %v20354_v55  ;;  %4409 = vmatprep.mubr.f32.mxu0 %v20354_v55 }
 0x92c   : >> { %12185 = vmatpush1.bf16.msra.mxu1 %v20704_v30  ;;  %12313 = vmatpush1.bf16.msra.mxu0 %v20705_v40  ;;  %v20710_v30 = vld [vmem:[#allocation76_spill] sm:$0xff]  ;;  %v20711_v40 = vld [vmem:[#allocation77_spill] sm:$0xff] }
 0x92d   : >> { %12187 = vmatprep.subr.bf16.mxu1 %v20706_v45  ;;  %12315 = vmatprep.subr.bf16.mxu0 %v20707_v51  ;;  %v20713_v51 = vld [vmem:[#allocation79_spill] sm:$0xff] }
 0x92e   : >> { %10610 = vmatmul.mubr.msk.f32.gmra.mrb[58].mxu1 %vm1068_vm2, %v17425_v32  ;;  %10618 = vmatmul.mubr.msk.f32.gmra.mrb[80].mxu0 %vm1068_vm2, %v17425_v32  ;;  %v20712_v32 = vld [vmem:[#allocation78_spill] sm:$0xff]  ;;  %v20733_v45 = vld [vmem:[#allocation99_spill] sm:$0xff] }
 0x92f   : >> { %4302 = vmatprep.mubr.f32.mxu1 %v20354_v55  ;;  %4415 = vmatprep.mubr.f32.mxu0 %v20354_v55 }
 0x930   : >> { %12189 = vmatpush1.bf16.msra.mxu1 %v20708_v31  ;;  %12317 = vmatpush1.bf16.msra.mxu0 %v20709_v1  ;;  %v20714_v31 = vld [vmem:[#allocation80_spill] sm:$0xff]  ;;  %v20715_v1 = vld [vmem:[#allocation81_spill] sm:$0xff] }
 0x931   : >> { %12191 = vmatprep.subr.bf16.mxu1 %v20710_v30  ;;  %12319 = vmatprep.subr.bf16.mxu0 %v20711_v40  ;;  %v20717_v40 = vld [vmem:[#allocation83_spill] sm:$0xff]  ;;  %v20732_v30 = vld [vmem:[#allocation98_spill] sm:$0xff] }
 0x932   : >> { %10611 = vmatmul.mubr.msk.f32.gmra.mrb[60].mxu1 %vm1068_vm2, %v17431_v10  ;;  %10619 = vmatmul.mubr.msk.f32.gmra.mrb[82].mxu0 %vm1068_vm2, %v17431_v10  ;;  %v20716_v10 = vld [vmem:[#allocation82_spill] sm:$0xff] }
 0x933   : >> { %4308 = vmatprep.mubr.f32.mxu1 %v20354_v55  ;;  %4421 = vmatprep.mubr.f32.mxu0 %v20354_v55 }
 0x934   : >> { %12193 = vmatpush1.bf16.msra.mxu1 %v20712_v32  ;;  %12321 = vmatpush1.bf16.msra.mxu0 %v20713_v51  ;;  %v20718_v32 = vld [vmem:[#allocation84_spill] sm:$0xff]  ;;  %v20719_v51 = vld [vmem:[#allocation85_spill] sm:$0xff] }
 0x935   : >> { %12195 = vmatprep.subr.bf16.mxu1 %v20714_v31  ;;  %12323 = vmatprep.subr.bf16.mxu0 %v20715_v1  ;;  %v20721_v1 = vld [vmem:[#allocation87_spill] sm:$0xff]  ;;  %v20727_v31 = vld [vmem:[#allocation93_spill] sm:$0xff] }
 0x936   : >> { %10612 = vmatmul.mubr.msk.f32.gmra.mrb[62].mxu1 %vm1068_vm2, %v17429_v47  ;;  %10620 = vmatmul.mubr.msk.f32.gmra.mrb[84].mxu0 %vm1068_vm2, %v17429_v47  ;;  %v20720_v47 = vld [vmem:[#allocation86_spill] sm:$0xff] }
 0x937   : >> { %4314 = vmatprep.mubr.f32.mxu1 %v20354_v55  ;;  %4427 = vmatprep.mubr.f32.mxu0 %v20354_v55 }
 0x938   : >> { %12197 = vmatpush1.bf16.msra.mxu1 %v20716_v10  ;;  %12325 = vmatpush1.bf16.msra.mxu0 %v20717_v40  ;;  %v20722_v10 = vld [vmem:[#allocation88_spill] sm:$0xff]  ;;  %v20723_v40 = vld [vmem:[#allocation89_spill] sm:$0xff] }
 0x939   : >> { %12199 = vmatprep.subr.bf16.mxu1 %v20718_v32  ;;  %12327 = vmatprep.subr.bf16.mxu0 %v20719_v51  ;;  %v20724_v51 = vld [vmem:[#allocation90_spill] sm:$0xff]  ;;  %v20726_v32 = vld [vmem:[#allocation92_spill] sm:$0xff] }
 0x93a   : >> { %10613 = vmatmul.mubr.msk.f32.gmra.mrb[64].mxu1 %vm1068_vm2, %v17435_v6  ;;  %10621 = vmatmul.mubr.msk.f32.gmra.mrb[86].mxu0 %vm1068_vm2, %v17435_v6  ;;  %v20725_v6 = vld [vmem:[#allocation91_spill] sm:$0xff] }
 0x93b   : >> { %4320 = vmatprep.mubr.f32.mxu1 %v20354_v55  ;;  %4433 = vmatprep.mubr.f32.mxu0 %v20354_v55 }
 0x93c   : >> { %12201 = vmatpush1.bf16.msra.mxu1 %v20720_v47  ;;  %12329 = vmatpush1.bf16.msra.mxu0 %v20721_v1  ;;  %v20728_v47 = vld [vmem:[#allocation94_spill] sm:$0xff]  ;;  %v20729_v1 = vld [vmem:[#allocation95_spill] sm:$0xff] }
 0x93d   : >> { %12203 = vmatprep.subr.bf16.mxu1 %v20722_v10  ;;  %12331 = vmatprep.subr.bf16.mxu0 %v20723_v40  ;;  %v20730_v10 = vld [vmem:[#allocation96_spill] sm:$0xff]  ;;  %v20731_v40 = vld [vmem:[#allocation97_spill] sm:$0xff] }
 0x93e   : >> { %10614 = vmatmul.mubr.msk.f32.gmra.mrb[66].mxu1 %vm1068_vm2, %v17433_v33  ;;  %10622 = vmatmul.mubr.msk.f32.gmra.mrb[88].mxu0 %vm1068_vm2, %v17433_v33  ;;  %v20734_v33 = vld [vmem:[#allocation100_spill] sm:$0xff] }
 0x940   : >> { %12205 = vmatpush1.bf16.msra.mxu1 %v20724_v51  ;;  %12333 = vmatpush1.bf16.msra.mxu0 %v20725_v6  ;;  %v20735_v51 = vld [vmem:[#allocation101_spill] sm:$0xff]  ;;  %v20736_v6 = vld [vmem:[#allocation102_spill] sm:$0xff] }
 0x941   : >> { %12207 = vmatprep.subr.bf16.mxu1 %v20726_v32  ;;  %12335 = vmatprep.subr.bf16.mxu0 %v20727_v31  ;;  %v20737_v32 = vld [vmem:[#allocation103_spill] sm:$0xff]  ;;  %v20738_v31 = vld [vmem:[#allocation104_spill] sm:$0xff] }
 0x944   : >> { %12209 = vmatpush1.bf16.msra.mxu1 %v20728_v47  ;;  %12337 = vmatpush1.bf16.msra.mxu0 %v20729_v1  ;;  %v20739_v47 = vld [vmem:[#allocation105_spill] sm:$0xff]  ;;  %v20740_v1 = vld [vmem:[#allocation106_spill] sm:$0xff] }
 0x945   : >> { %12211 = vmatprep.subr.bf16.mxu1 %v20730_v10  ;;  %12339 = vmatprep.subr.bf16.mxu0 %v20731_v40  ;;  %v20741_v10 = vld [vmem:[#allocation107_spill] sm:$0xff]  ;;  %v20742_v40 = vld [vmem:[#allocation108_spill] sm:$0xff] }
 0x948   : >> { %12213 = vmatpush1.bf16.msra.mxu1 %v20732_v30  ;;  %12341 = vmatpush1.bf16.msra.mxu0 %v20733_v45  ;;  %v20743_v30 = vld [vmem:[#allocation109_spill] sm:$0xff]  ;;  %v20744_v45 = vld [vmem:[#allocation110_spill] sm:$0xff] }
 0x949   : >> { %12215 = vmatprep.subr.bf16.mxu1 %v20734_v33  ;;  %12343 = vmatprep.subr.bf16.mxu0 %v20735_v51  ;;  %v20745_v33 = vld [vmem:[#allocation111_spill] sm:$0xff]  ;;  %v20746_v51 = vld [vmem:[#allocation112_spill] sm:$0xff] }
 0x94c   : >> { %12217 = vmatpush1.bf16.msra.mxu1 %v20736_v6  ;;  %12345 = vmatpush1.bf16.msra.mxu0 %v20737_v32  ;;  %v20747_v6 = vld [vmem:[#allocation113_spill] sm:$0xff]  ;;  %v20748_v32 = vld [vmem:[#allocation114_spill] sm:$0xff] }
 0x94d   : >> { %12219 = vmatprep.subr.bf16.mxu1 %v20738_v31  ;;  %12347 = vmatprep.subr.bf16.mxu0 %v20739_v47  ;;  %v20749_v31 = vld [vmem:[#allocation115_spill] sm:$0xff]  ;;  %v20750_v47 = vld [vmem:[#allocation116_spill] sm:$0xff] }
 0x950   : >> { %12221 = vmatpush1.bf16.msra.mxu1 %v20740_v1  ;;  %12349 = vmatpush1.bf16.msra.mxu0 %v20741_v10  ;;  %v20751_v1 = vld [vmem:[#allocation117_spill] sm:$0xff]  ;;  %v20752_v10 = vld [vmem:[#allocation118_spill] sm:$0xff] }
 0x951   : >> { %12223 = vmatprep.subr.bf16.mxu1 %v20742_v40  ;;  %12351 = vmatprep.subr.bf16.mxu0 %v20743_v30  ;;  %v20753_v40 = vld [vmem:[#allocation119_spill] sm:$0xff]  ;;  %v20754_v30 = vld [vmem:[#allocation120_spill] sm:$0xff] }
 0x954   : >> { %12225 = vmatpush1.bf16.msra.mxu1 %v20744_v45  ;;  %12353 = vmatpush1.bf16.msra.mxu0 %v20745_v33  ;;  %v20755_v45 = vld [vmem:[#allocation121_spill] sm:$0xff]  ;;  %v20756_v33 = vld [vmem:[#allocation122_spill] sm:$0xff] }
 0x955   : >> { %12227 = vmatprep.subr.bf16.mxu1 %v20746_v51  ;;  %12355 = vmatprep.subr.bf16.mxu0 %v20747_v6  ;;  %v20757_v51 = vld [vmem:[#allocation123_spill] sm:$0xff]  ;;  %v20758_v6 = vld [vmem:[#allocation124_spill] sm:$0xff] }
 0x958   : >> { %12229 = vmatpush1.bf16.msra.mxu1 %v20748_v32  ;;  %12357 = vmatpush1.bf16.msra.mxu0 %v20749_v31  ;;  %v20759_v32 = vld [vmem:[#allocation125_spill] sm:$0xff] }
 0x959   : >> { %12231 = vmatprep.subr.bf16.mxu1 %v20750_v47  ;;  %12359 = vmatprep.subr.bf16.mxu0 %v20751_v1 }
 0x95c   : >> { %12233 = vmatpush1.bf16.msra.mxu1 %v20752_v10  ;;  %12361 = vmatpush1.bf16.msra.mxu0 %v20753_v40 }
 0x95d   : >> { %12235 = vmatprep.subr.bf16.mxu1 %v20754_v30  ;;  %12363 = vmatprep.subr.bf16.mxu0 %v20755_v45 }
 0x960   : >> { %12237 = vmatpush1.bf16.msra.mxu1 %v20756_v33  ;;  %12365 = vmatpush1.bf16.msra.mxu0 %v20757_v51 }
 0x961   : >> { %12239 = vmatprep.subr.bf16.mxu1 %v20758_v6  ;;  %12367 = vmatprep.subr.bf16.mxu0 %v20759_v32 }
 0x9f5   : >> { %v4280_v31 = vpop.f32.mrb[52].mxu1  ;;  %v17595_v47 = vpop.f32.mrb[74].mxu0 }
 0x9f6   : >> { %v4440_v1 = vadd.f32 %v4280_v31, %v16167_v39  ;;  %v4282_v10 = vpop.f32.mrb[53].mxu1  ;;  %v17598_v37 = vpop.f32.mrb[75].mxu0 }
 0x9f7   : >> { %v4441_v30 = vadd.f32 %v4282_v10, %v16171_v42  ;;  %v20761_v10 = vld [vmem:[#allocation127_spill] sm:$0xff] }
 0x9f8   : >> { %v4472_v33 = vmax.f32 %v4440_v1, 0.0 }
 0x9f9   : >> { %v4473_v40 = vmax.f32 %v4441_v30, 0.0  ;;  %v4286_v45 = vpop.f32.mrb[54].mxu1  ;;  %v17601_v57 = vpop.f32.mrb[76].mxu0 }
 0x9fa   : >> { %v4444_v51 = vadd.f32 %v4286_v45, %v16167_v39  ;;  %v4288_v6 = vpop.f32.mrb[55].mxu1  ;;  %v17604_v25 = vpop.f32.mrb[77].mxu0 }
 0x9fb   : >> { %v4445_v32 = vadd.f32 %v4288_v6, %v16171_v42  ;;  %4568 = vmatprep.mubr.f32.mxu1 %v4473_v40  ;;  %4794 = vmatprep.mubr.f32.mxu0 %v4473_v40  ;;  %v20763_v6 = vld [vmem:[#allocation129_spill] sm:$0xff] }
 0x9fc   : >> { %4569 = vmatmul.mubr.f32.vlgmr.msra.gmra.mrb[68].mxu1 %v4472_v33  ;;  %4795 = vmatmul.mubr.f32.vlgmr.msra.gmra.mrb[90].mxu0 %v4472_v33  ;;  %v4476_v1 = vmax.f32 %v4444_v51, 0.0  ;;  %v20764_v33 = vld [vmem:[#allocation130_spill] sm:$0xff] }
 0x9fd   : >> { %v4477_v31 = vmax.f32 %v4445_v32, 0.0  ;;  %12241 = vmatpush1.bf16.msra.mxu1 %v20760_v61  ;;  %12369 = vmatpush1.bf16.msra.mxu0 %v20761_v10  ;;  %v4292_v30 = vpop.f32.mrb[56].mxu1  ;;  %v17609_v0 = vpop.f32.mrb[78].mxu0  ;;  %v20765_v10 = vld [vmem:[#allocation131_spill] sm:$0xff] }
 0x9fe   : >> { %v4448_v45 = vadd.f32 %v4292_v30, %v16167_v39  ;;  %v4294_v34 = vpop.f32.mrb[57].mxu1  ;;  %v17612_v23 = vpop.f32.mrb[79].mxu0  ;;  %12243 = vmatprep.subr.bf16.mxu1 %v20762_v53  ;;  %12371 = vmatprep.subr.bf16.mxu0 %v20763_v6  ;;  %v20766_v6 = vld [vmem:[#allocation132_spill] sm:$0xff] }
 0x9ff   : >> { %v4449_v40 = vadd.f32 %v4294_v34, %v16171_v42  ;;  %4574 = vmatprep.mubr.f32.mxu1 %v4477_v31  ;;  %4800 = vmatprep.mubr.f32.mxu0 %v4477_v31  ;;  %v20767_v34 = vld [vmem:[#allocation133_spill] sm:$0xff] }
 0xa00   : >> { %4575 = vmatmul.mubr.f32.gmra.mrb[70].mxu1 %v4476_v1  ;;  %4801 = vmatmul.mubr.f32.gmra.mrb[92].mxu0 %v4476_v1  ;;  %v4480_v61 = vmax.f32 %v4448_v45, 0.0 }
 0xa01   : >> { %v4481_v32 = vmax.f32 %v4449_v40, 0.0  ;;  %12245 = vmatpush1.bf16.msra.mxu1 %v20764_v33  ;;  %12373 = vmatpush1.bf16.msra.mxu0 %v20765_v10  ;;  %v4298_v51 = vpop.f32.mrb[58].mxu1  ;;  %v17619_v30 = vpop.f32.mrb[80].mxu0  ;;  %v20768_v40 = vld [vmem:[#allocation134_spill] sm:$0xff]  ;;  %v20769_v10 = vld [vmem:[#allocation135_spill] sm:$0xff] }
 0xa02   : >> { %v4452_v24 = vadd.f32 %v4298_v51, %v16167_v39  ;;  %v4300_v53 = vpop.f32.mrb[59].mxu1  ;;  %v17622_v9 = vpop.f32.mrb[81].mxu0  ;;  %12247 = vmatprep.subr.bf16.mxu1 %v20766_v6  ;;  %12375 = vmatprep.subr.bf16.mxu0 %v20767_v34  ;;  %v20770_v34 = vld [vmem:[#allocation136_spill] sm:$0xff] }
 0xa03   : >> { %v4453_v31 = vadd.f32 %v4300_v53, %v16171_v42  ;;  %4580 = vmatprep.mubr.f32.mxu1 %v4481_v32  ;;  %4806 = vmatprep.mubr.f32.mxu0 %v4481_v32  ;;  %v20771_v53 = vld [vmem:[#allocation137_spill] sm:$0xff] }
 0xa04   : >> { %4581 = vmatmul.mubr.f32.gmra.mrb[72].mxu1 %v4480_v61  ;;  %4807 = vmatmul.mubr.f32.gmra.mrb[94].mxu0 %v4480_v61  ;;  %v4484_v33 = vmax.f32 %v4452_v24, 0.0 }
 0xa05   : >> { %v4485_v1 = vmax.f32 %v4453_v31, 0.0  ;;  %12249 = vmatpush1.bf16.msra.mxu1 %v20768_v40  ;;  %12377 = vmatpush1.bf16.msra.mxu0 %v20769_v10  ;;  %v4304_v45 = vpop.f32.mrb[60].mxu1  ;;  %v17629_v51 = vpop.f32.mrb[82].mxu0  ;;  %v20772_v31 = vld [vmem:[#allocation138_spill] sm:$0xff]  ;;  %v20773_v10 = vld [vmem:[#allocation139_spill] sm:$0xff] }
 0xa06   : >> { %v4456_v41 = vadd.f32 %v4304_v45, %v16167_v39  ;;  %v4306_v6 = vpop.f32.mrb[61].mxu1  ;;  %v17632_v59 = vpop.f32.mrb[83].mxu0  ;;  %12251 = vmatprep.subr.bf16.mxu1 %v20770_v34  ;;  %12379 = vmatprep.subr.bf16.mxu0 %v20771_v53  ;;  %v20774_v53 = vld [vmem:[#allocation140_spill] sm:$0xff] }
 0xa07   : >> { %v4457_v61 = vadd.f32 %v4306_v6, %v16171_v42  ;;  %4586 = vmatprep.mubr.f32.mxu1 %v4485_v1  ;;  %4812 = vmatprep.mubr.f32.mxu0 %v4485_v1  ;;  %v20775_v6 = vld [vmem:[#allocation141_spill] sm:$0xff] }
 0xa08   : >> { %4587 = vmatmul.mubr.f32.gmra.mrb[74].mxu1 %v4484_v33  ;;  %4813 = vmatmul.mubr.f32.gmra.mrb[96].mxu0 %v4484_v33  ;;  %v4488_v40 = vmax.f32 %v4456_v41, 0.0 }
 0xa09   : >> { %v4489_v32 = vmax.f32 %v4457_v61, 0.0  ;;  %12253 = vmatpush1.bf16.msra.mxu1 %v20772_v31  ;;  %12381 = vmatpush1.bf16.msra.mxu0 %v20773_v10  ;;  %v4310_v24 = vpop.f32.mrb[62].mxu1  ;;  %v17639_v45 = vpop.f32.mrb[84].mxu0  ;;  %v20776_v61 = vld [vmem:[#allocation142_spill] sm:$0xff]  ;;  %v20777_v10 = vld [vmem:[#allocation143_spill] sm:$0xff] }
 0xa0a   : >> { %v4460_v28 = vadd.f32 %v4310_v24, %v16167_v39  ;;  %v4312_v34 = vpop.f32.mrb[63].mxu1  ;;  %v17642_v21 = vpop.f32.mrb[85].mxu0  ;;  %12255 = vmatprep.subr.bf16.mxu1 %v20774_v53  ;;  %12383 = vmatprep.subr.bf16.mxu0 %v20775_v6  ;;  %v20778_v6 = vld [vmem:[#allocation144_spill] sm:$0xff] }
 0xa0b   : >> { %v4461_v33 = vadd.f32 %v4312_v34, %v16171_v42  ;;  %4592 = vmatprep.mubr.f32.mxu1 %v4489_v32  ;;  %4818 = vmatprep.mubr.f32.mxu0 %v4489_v32  ;;  %v20779_v34 = vld [vmem:[#allocation145_spill] sm:$0xff] }
 0xa0c   : >> { %4593 = vmatmul.mubr.f32.gmra.mrb[76].mxu1 %v4488_v40  ;;  %4819 = vmatmul.mubr.f32.gmra.mrb[98].mxu0 %v4488_v40  ;;  %v4492_v31 = vmax.f32 %v4460_v28, 0.0 }
 0xa0d   : >> { %v4493_v1 = vmax.f32 %v4461_v33, 0.0  ;;  %12257 = vmatpush1.bf16.msra.mxu1 %v20776_v61  ;;  %12385 = vmatpush1.bf16.msra.mxu0 %v20777_v10  ;;  %v4316_v41 = vpop.f32.mrb[64].mxu1  ;;  %v17649_v24 = vpop.f32.mrb[86].mxu0  ;;  %v20780_v33 = vld [vmem:[#allocation147_spill] sm:$0xff]  ;;  %v20781_v10 = vld [vmem:[#allocation148_spill] sm:$0xff] }
 0xa0e   : >> { %v4464_v18 = vadd.f32 %v4316_v41, %v16167_v39  ;;  %v4318_v53 = vpop.f32.mrb[65].mxu1  ;;  %v17652_v3 = vpop.f32.mrb[87].mxu0  ;;  %12259 = vmatprep.subr.bf16.mxu1 %v20778_v6  ;;  %12387 = vmatprep.subr.bf16.mxu0 %v20779_v34  ;;  %v20782_v34 = vld [vmem:[#allocation149_spill] sm:$0xff] }
 0xa0f   : >> { %v4465_v40 = vadd.f32 %v4318_v53, %v16171_v42  ;;  %4598 = vmatprep.mubr.f32.mxu1 %v4493_v1  ;;  %4824 = vmatprep.mubr.f32.mxu0 %v4493_v1  ;;  %v20783_v53 = vld [vmem:[#allocation150_spill] sm:$0xff]  ;;  %v4443_v1 = vadd.f32 %v17598_v37, %v16288_v36  ;;  %v20787_v37 = vld [vmem:[#allocation155_spill] sm:$0xff] }
 0xa10   : >> { %4599 = vmatmul.mubr.f32.gmra.mrb[78].mxu1 %v4492_v31  ;;  %4825 = vmatmul.mubr.f32.gmra.mrb[100].mxu0 %v4492_v31  ;;  %v4496_v61 = vmax.f32 %v4464_v18, 0.0  ;;  %v20784_v18 = vld [vmem:[#allocation151_spill] sm:$0xff] }
 0xa11   : >> { %v4497_v32 = vmax.f32 %v4465_v40, 0.0  ;;  %12261 = vmatpush1.bf16.msra.mxu1 %v20780_v33  ;;  %12389 = vmatpush1.bf16.msra.mxu0 %v20781_v10  ;;  %v4322_v28 = vpop.f32.mrb[66].mxu1  ;;  %v17659_v41 = vpop.f32.mrb[88].mxu0  ;;  %v20785_v10 = vld [vmem:[#allocation152_spill] sm:$0xff] }
 0xa12   : >> { %v4468_v62 = vadd.f32 %v4322_v28, %v16167_v39  ;;  %v4324_v6 = vpop.f32.mrb[67].mxu1  ;;  %v17662_v50 = vpop.f32.mrb[89].mxu0  ;;  %12263 = vmatprep.subr.bf16.mxu1 %v20782_v34  ;;  %12391 = vmatprep.subr.bf16.mxu0 %v20783_v53  ;;  %v20786_v34 = vld [vmem:[#allocation153_spill] sm:$0xff] }
 0xa13   : >> { %v4469_v31 = vadd.f32 %v4324_v6, %v16171_v42  ;;  %4604 = vmatprep.mubr.f32.mxu1 %v4497_v32  ;;  %4830 = vmatprep.mubr.f32.mxu0 %v4497_v32  ;;  %v4475_v6 = vmax.f32 %v4443_v1, 0.0  ;;  %v20789_v32 = vld [vmem:[#allocation157_spill] sm:$0xff]  ;;  %v20794_v1 = vld [vmem:[#allocation162_spill] sm:$0xff] }
 0xa14   : >> { %4605 = vmatmul.mubr.f32.gmra.mrb[80].mxu1 %v4496_v61  ;;  %4831 = vmatmul.mubr.f32.gmra.mrb[102].mxu0 %v4496_v61  ;;  %v4500_v28 = vmax.f32 %v4468_v62, 0.0  ;;  %v20788_v61 = vld [vmem:[#allocation156_spill] sm:$0xff]  ;;  %v20790_v62 = vld [vmem:[#allocation158_spill] sm:$0xff] }
 0xa15   : >> { %v4501_v40 = vmax.f32 %v4469_v31, 0.0  ;;  %12265 = vmatpush1.bf16.msra.mxu1 %v20784_v18  ;;  %12393 = vmatpush1.bf16.msra.mxu0 %v16296_v8  ;;  %v20791_v31 = vld [vmem:[#allocation159_spill] sm:$0xff] }
 0xa16   : >> { %12267 = vmatprep.subr.bf16.mxu1 %v20785_v10  ;;  %12395 = vmatprep.subr.bf16.mxu0 %v20786_v34  ;;  %v20792_v34 = vld [vmem:[#allocation160_spill] sm:$0xff] }
 0xa17   : >> { %4610 = vmatprep.mubr.f32.mxu1 %v4501_v40  ;;  %4836 = vmatprep.mubr.f32.mxu0 %v4501_v40  ;;  %v20793_v40 = vld [vmem:[#allocation161_spill] sm:$0xff] }
 0xa18   : >> { %4611 = vmatmul.mubr.f32.gmra.mrb[82].mxu1 %v4500_v28  ;;  %4837 = vmatmul.mubr.f32.gmra.mrb[104].mxu0 %v4500_v28  ;;  %v20795_v28 = vld [vmem:[#allocation163_spill] sm:$0xff] }
 0xa19   : >> { %12269 = vmatpush1.bf16.msra.mxu1 %v16312_v38  ;;  %12397 = vmatpush1.bf16.msra.mxu0 %v20787_v37  ;;  %v20796_v38 = vld [vmem:[#allocation164_spill] sm:$0xff]  ;;  %v20797_v37 = vld [vmem:[#allocation165_spill] sm:$0xff] }
 0xa1a   : >> { %4681 = vmatprep.mubr.f32.mxu1 %v4475_v6  ;;  %4907 = vmatprep.mubr.f32.mxu0 %v4475_v6  ;;  %v20798_v6 = vld [vmem:[#allocation166_spill] sm:$0xff] }
 0xa1b   : >> { %12271 = vmatprep.subr.bf16.mxu1 %v20788_v61  ;;  %12399 = vmatprep.subr.bf16.mxu0 %v20789_v32  ;;  %v20799_v61 = vld [vmem:[#allocation167_spill] sm:$0xff]  ;;  %v20800_v32 = vld [vmem:[#allocation168_spill] sm:$0xff] }
 0xa1d   : >> { %12273 = vmatpush1.bf16.msra.mxu1 %v20790_v62  ;;  %12401 = vmatpush1.bf16.msra.mxu0 %v20791_v31  ;;  %v20801_v62 = vld [vmem:[#allocation169_spill] sm:$0xff]  ;;  %v20802_v31 = vld [vmem:[#allocation170_spill] sm:$0xff] }
 0xa1e   : >> { %12275 = vmatprep.subr.bf16.mxu1 %v20792_v34  ;;  %12403 = vmatprep.subr.bf16.mxu0 %v20793_v40  ;;  %v20803_v34 = vld [vmem:[#allocation171_spill] sm:$0xff] }
 0xa21   : >> { %12277 = vmatpush1.bf16.msra.mxu1 %v20794_v1  ;;  %12405 = vmatpush1.bf16.msra.mxu0 %v20795_v28  ;;  %v20804_v28 = vld [vmem:[#allocation174_spill] sm:$0xff] }
 0xa22   : >> { %12279 = vmatprep.subr.bf16.mxu1 %v20796_v38  ;;  %12407 = vmatprep.subr.bf16.mxu0 %v20797_v37  ;;  %v20805_v38 = vld [vmem:[#allocation175_spill] sm:$0xff]  ;;  %v20806_v37 = vld [vmem:[#allocation176_spill] sm:$0xff] }
 0xa25   : >> { %12281 = vmatpush1.bf16.msra.mxu1 %v20798_v6  ;;  %12409 = vmatpush1.bf16.msra.mxu0 %v20799_v61  ;;  %v20807_v61 = vld [vmem:[#allocation178_spill] sm:$0xff] }
 0xa26   : >> { %12283 = vmatprep.subr.bf16.mxu1 %v20800_v32  ;;  %12411 = vmatprep.subr.bf16.mxu0 %v20801_v62  ;;  %v20808_v32 = vld [vmem:[#allocation179_spill] sm:$0xff] }
 0xa29   : >> { %12285 = vmatpush1.bf16.msra.mxu1 %v20802_v31  ;;  %12413 = vmatpush1.bf16.msra.mxu0 %v20803_v34 }
 0xa2a   : >> { %12287 = vmatprep.subr.bf16.mxu1 %v16366_v11  ;;  %12415 = vmatprep.subr.bf16.mxu0 %v16368_v16 }
 0xa2d   : >> { %12289 = vmatpush1.bf16.msra.mxu1 %v20804_v28  ;;  %12417 = vmatpush1.bf16.msra.mxu0 %v20805_v38  ;;  %v4442_v28 = vadd.f32 %v17595_v47, %v16405_v54  ;;  %v20809_v38 = vld [vmem:[#allocation186_spill] sm:$0xff]  ;;  %v4451_v47 = vadd.f32 %v17612_v23, %v16288_v36 }
 0xa2e   : >> { %12291 = vmatprep.subr.bf16.mxu1 %v20806_v37  ;;  %12419 = vmatprep.subr.bf16.mxu0 %v16380_v26  ;;  %v20810_v37 = vld [vmem:[#allocation187_spill] sm:$0xff]  ;;  %v20811_v26 = vld [vmem:[#allocation188_spill] sm:$0xff] }
 0xa31   : >> { %12293 = vmatpush1.bf16.msra.mxu1 %v20807_v61  ;;  %12421 = vmatpush1.bf16.msra.mxu0 %v20808_v32  ;;  %v4447_v61 = vadd.f32 %v17604_v25, %v16288_v36  ;;  %v20812_v32 = vld [vmem:[#allocation189_spill] sm:$0xff]  ;;  %v4450_v25 = vadd.f32 %v17609_v0, %v16405_v54  ;;  %v20813_v0 = vld [vmem:[#allocation202_spill] sm:$0xff] }
 0xa32   : >> { %12295 = vmatprep.subr.bf16.mxu1 %v16393_v15  ;;  %12423 = vmatprep.subr.bf16.mxu0 %v16395_v43  ;;  %v4474_v15 = vmax.f32 %v4442_v28, 0.0  ;;  %v4483_v28 = vmax.f32 %v4451_v47, 0.0 }
 0xa33   : >> { %v4482_v23 = vmax.f32 %v4450_v25, 0.0  ;;  %v20815_v25 = vld [vmem:[#allocation206_spill] sm:$0xff] }
 0xa35   : >> { %12297 = vmatpush1.bf16.msra.mxu1 %v16399_v2  ;;  %12425 = vmatpush1.bf16.msra.mxu0 %v16401_v5  ;;  %v4446_v2 = vadd.f32 %v17601_v57, %v16405_v54  ;;  %v4479_v5 = vmax.f32 %v4447_v61, 0.0  ;;  %v4455_v57 = vadd.f32 %v17622_v9, %v16288_v36  ;;  %v20814_v61 = vld [vmem:[#allocation204_spill] sm:$0xff] }
 0xa36   : >> { %12299 = vmatprep.subr.bf16.mxu1 %v20809_v38  ;;  %12427 = vmatprep.subr.bf16.mxu0 %v20810_v37 }
 0xa37   : >> { %v4478_v37 = vmax.f32 %v4446_v2, 0.0  ;;  %v4487_v2 = vmax.f32 %v4455_v57, 0.0  ;;  %v20816_v57 = vld [vmem:[#allocation208_spill] sm:$0xff] }
 0xa39   : >> { %12301 = vmatpush1.bf16.msra.mxu1 %v20811_v26  ;;  %12429 = vmatpush1.bf16.msra.mxu0 %v20812_v32 }
 0xa3a   : >> { %12463 = vmatprep.subr.bf16.mxu0 %v16502_v60 }
 0xa3c   : >> { %4682 = vmatmul.mubr.f32.vlgmr.msra.gmra.mrb[68].mxu1 %v4474_v15  ;;  %4908 = vmatmul.mubr.f32.vlgmr.msra.gmra.mrb[90].mxu0 %v4474_v15  ;;  %v4454_v15 = vadd.f32 %v17619_v30, %v16405_v54  ;;  %v4463_v30 = vadd.f32 %v17642_v21, %v16288_v36 }
 0xa3d   : >> { %4687 = vmatprep.mubr.f32.mxu1 %v4479_v5  ;;  %4913 = vmatprep.mubr.f32.mxu0 %v4479_v5  ;;  %v4459_v5 = vadd.f32 %v17632_v59, %v16288_v36 }
 0xa3e   : >> { %12465 = vmatpush1.bf16.msra.mxu0 %v16511_v17  ;;  %v4486_v9 = vmax.f32 %v4454_v15, 0.0  ;;  %v20817_v15 = vld [vmem:[#allocation210_spill] sm:$0xff] }
 0xa3f   : >> { %12467 = vmatprep.subr.bf16.mxu0 %v16515_v52  ;;  %v4491_v47 = vmax.f32 %v4459_v5, 0.0  ;;  %v20818_v5 = vld [vmem:[#allocation212_spill] sm:$0xff] }
 0xa40   : >> { %4688 = vmatmul.mubr.f32.gmra.mrb[70].mxu1 %v4478_v37  ;;  %4914 = vmatmul.mubr.f32.gmra.mrb[92].mxu0 %v4478_v37  ;;  %v4458_v37 = vadd.f32 %v17629_v51, %v16405_v54  ;;  %v4467_v51 = vadd.f32 %v17652_v3, %v16288_v36 }
 0xa41   : >> { %4693 = vmatprep.mubr.f32.mxu1 %v4483_v28  ;;  %4919 = vmatprep.mubr.f32.mxu0 %v4483_v28  ;;  %v4462_v28 = vadd.f32 %v17639_v45, %v16405_v54  ;;  %v4471_v45 = vadd.f32 %v17662_v50, %v16288_v36 }
 0xa42   : >> { %12469 = vmatpush1.bf16.msra.mxu0 %v16528_v20  ;;  %v4490_v59 = vmax.f32 %v4458_v37, 0.0  ;;  %v20819_v37 = vld [vmem:[#allocation214_spill] sm:$0xff] }
 0xa43   : >> { %12471 = vmatprep.subr.bf16.mxu0 %v20813_v0  ;;  %v4494_v21 = vmax.f32 %v4462_v28, 0.0  ;;  %v20822_v28 = vld [vmem:[#allocation220_spill] sm:$0xff] }
 0xa44   : >> { %4694 = vmatmul.mubr.f32.gmra.mrb[72].mxu1 %v4482_v23  ;;  %4920 = vmatmul.mubr.f32.gmra.mrb[94].mxu0 %v4482_v23  ;;  %v4495_v23 = vmax.f32 %v4463_v30, 0.0  ;;  %v20820_v30 = vld [vmem:[#allocation216_spill] sm:$0xff] }
 0xa45   : >> { %4699 = vmatprep.mubr.f32.mxu1 %v4487_v2  ;;  %4925 = vmatprep.mubr.f32.mxu0 %v4487_v2  ;;  %v4466_v2 = vadd.f32 %v17649_v24, %v16405_v54  ;;  %v20821_v24 = vld [vmem:[#allocation218_spill] sm:$0xff] }
 0xa46   : >> { %12473 = vmatpush1.bf16.msra.mxu0 %v20814_v61 }
 0xa47   : >> { %12475 = vmatprep.subr.bf16.mxu0 %v20815_v25  ;;  %v4498_v3 = vmax.f32 %v4466_v2, 0.0  ;;  %v20827_v2 = vld [vmem:[#allocation230_spill] sm:$0xff] }
 0xa48   : >> { %4700 = vmatmul.mubr.f32.gmra.mrb[74].mxu1 %v4486_v9  ;;  %4926 = vmatmul.mubr.f32.gmra.mrb[96].mxu0 %v4486_v9  ;;  %v4499_v9 = vmax.f32 %v4467_v51, 0.0  ;;  %v20824_v51 = vld [vmem:[#allocation224_spill] sm:$0xff] }
 0xa49   : >> { %4705 = vmatprep.mubr.f32.mxu1 %v4491_v47  ;;  %4931 = vmatprep.mubr.f32.mxu0 %v4491_v47  ;;  %v4470_v47 = vadd.f32 %v17659_v41, %v16405_v54  ;;  %v20825_v41 = vld [vmem:[#allocation226_spill] sm:$0xff] }
 0xa4a   : >> { %12477 = vmatpush1.bf16.msra.mxu0 %v20816_v57 }
 0xa4b   : >> { %12479 = vmatprep.subr.bf16.mxu0 %v20817_v15  ;;  %v4502_v50 = vmax.f32 %v4470_v47, 0.0  ;;  %v20831_v47 = vld [vmem:[#allocation238_spill] sm:$0xff] }
 0xa4c   : >> { %4706 = vmatmul.mubr.f32.gmra.mrb[76].mxu1 %v4490_v59  ;;  %4932 = vmatmul.mubr.f32.gmra.mrb[98].mxu0 %v4490_v59  ;;  %v4503_v59 = vmax.f32 %v4471_v45, 0.0  ;;  %v20829_v45 = vld [vmem:[#allocation234_spill] sm:$0xff] }
 0xa4d   : >> { %4711 = vmatprep.mubr.f32.mxu1 %v4495_v23  ;;  %4937 = vmatprep.mubr.f32.mxu0 %v4495_v23  ;;  %v20823_v23 = vld [vmem:[#allocation222_spill] sm:$0xff] }
 0xa4e   : >> { %12481 = vmatpush1.bf16.msra.mxu0 %v20818_v5  ;;  %v20845_v5 = vld [vmem:[#allocation193_spill] sm:$0xff] }
 0xa4f   : >> { %12483 = vmatprep.subr.bf16.mxu0 %v20819_v37  ;;  %v20844_v37 = vld [vmem:[#allocation192_spill] sm:$0xff] }
 0xa50   : >> { %4712 = vmatmul.mubr.f32.gmra.mrb[78].mxu1 %v4494_v21  ;;  %4938 = vmatmul.mubr.f32.gmra.mrb[100].mxu0 %v4494_v21  ;;  %v20826_v21 = vld [vmem:[#allocation228_spill] sm:$0xff] }
 0xa51   : >> { %4717 = vmatprep.mubr.f32.mxu1 %v4499_v9  ;;  %4943 = vmatprep.mubr.f32.mxu0 %v4499_v9  ;;  %v20828_v9 = vld [vmem:[#allocation232_spill] sm:$0xff] }
 0xa52   : >> { %12485 = vmatpush1.bf16.msra.mxu0 %v20820_v30  ;;  %v20843_v30 = vld [vmem:[#allocation191_spill] sm:$0xff] }
 0xa53   : >> { %12487 = vmatprep.subr.bf16.mxu0 %v20821_v24  ;;  %v20842_v24 = vld [vmem:[#allocation190_spill] sm:$0xff] }
 0xa54   : >> { %4718 = vmatmul.mubr.f32.gmra.mrb[80].mxu1 %v4498_v3  ;;  %4944 = vmatmul.mubr.f32.gmra.mrb[102].mxu0 %v4498_v3  ;;  %v20830_v3 = vld [vmem:[#allocation236_spill] sm:$0xff] }
 0xa55   : >> { %4723 = vmatprep.mubr.f32.mxu1 %v4503_v59  ;;  %4949 = vmatprep.mubr.f32.mxu0 %v4503_v59  ;;  %v20832_v59 = vld [vmem:[#allocation240_spill] sm:$0xff] }
 0xa56   : >> { %12489 = vmatpush1.bf16.msra.mxu0 %v20822_v28 }
 0xa57   : >> { %12491 = vmatprep.subr.bf16.mxu0 %v20823_v23  ;;  %v20834_v23 = vld [vmem:[#allocation244_spill] sm:$0xff] }
 0xa58   : >> { %4724 = vmatmul.mubr.f32.gmra.mrb[82].mxu1 %v4502_v50  ;;  %4950 = vmatmul.mubr.f32.gmra.mrb[104].mxu0 %v4502_v50  ;;  %v20833_v50 = vld [vmem:[#allocation242_spill] sm:$0xff] }
 0xa59   : >> { %5052 = vmatprep.mubr.f32.mxu1 %v20354_v55 }
 0xa5a   : >> { %12493 = vmatpush1.bf16.msra.mxu0 %v20824_v51  ;;  %v20835_v51 = vld [vmem:[#allocation246_spill] sm:$0xff] }
 0xa5b   : >> { %12495 = vmatprep.subr.bf16.mxu0 %v20825_v41  ;;  %v20836_v41 = vld [vmem:[#allocation248_spill] sm:$0xff] }
 0xa5e   : >> { %12497 = vmatpush1.bf16.msra.mxu0 %v20826_v21  ;;  %v20837_v21 = vld [vmem:[#allocation250_spill] sm:$0xff] }
 0xa5f   : >> { %12499 = vmatprep.subr.bf16.mxu0 %v20827_v2  ;;  %v20838_v2 = vld [vmem:[#allocation252_spill] sm:$0xff] }
 0xa62   : >> { %12501 = vmatpush1.bf16.msra.mxu0 %v20828_v9  ;;  %v20839_v9 = vld [vmem:[#allocation254_spill] sm:$0xff] }
 0xa63   : >> { %12503 = vmatprep.subr.bf16.mxu0 %v20829_v45  ;;  %v20840_v45 = vld [vmem:[#allocation256_spill] sm:$0xff] }
 0xa66   : >> { %12505 = vmatpush1.bf16.msra.mxu0 %v20830_v3  ;;  %v20841_v3 = vld [vmem:[#allocation258_spill] sm:$0xff] }
 0xa67   : >> { %12507 = vmatprep.subr.bf16.mxu0 %v20831_v47 }
 0xa6a   : >> { %12509 = vmatpush1.bf16.msra.mxu0 %v20832_v59 }
 0xa6b   : >> { %12511 = vmatprep.subr.bf16.mxu0 %v20833_v50 }
 0xa6e   : >> { %12513 = vmatpush1.bf16.msra.mxu0 %v20834_v23 }
 0xa6f   : >> { %12515 = vmatprep.subr.bf16.mxu0 %v20835_v51 }
 0xa72   : >> { %12517 = vmatpush1.bf16.msra.mxu0 %v20836_v41 }
 0xa73   : >> { %12519 = vmatprep.subr.bf16.mxu0 %v20837_v21 }
 0xa76   : >> { %12521 = vmatpush1.bf16.msra.mxu0 %v20838_v2 }
 0xa77   : >> { %12523 = vmatprep.subr.bf16.mxu0 %v20839_v9 }
 0xa7a   : >> { %12525 = vmatpush1.bf16.msra.mxu0 %v20840_v45 }
 0xa7b   : >> { %12527 = vmatprep.subr.bf16.mxu0 %v20841_v3 }
 0xb0f   : >> { %v4683_v47 = vpop.f32.mrb[68].mxu1  ;;  %v4909_v59 = vpop.f32.mrb[90].mxu0 }
 0xb10   : >> { %v4685_v28 = vpop.f32.mrb[69].mxu1  ;;  %v4911_v50 = vpop.f32.mrb[91].mxu0  ;;  %v14300_v23 = vadd.f32 %v4683_v47, %v20842_v24  ;;  %v14316_v51 = vadd.f32 %v4909_v59, %v20843_v30 }
 0xb11   : >> { %v14301_v41 = vadd.f32 %v4685_v28, %v20844_v37  ;;  %v14317_v21 = vadd.f32 %v4911_v50, %v20845_v5 }
 0xb12   : >> { %v4956_v0 = vmax.f32 %v14300_v23, 0.0  ;;  %v4958_v47 = vmax.f32 %v14316_v51, 0.0 }
 0xb13   : >> { %v4689_v15 = vpop.f32.mrb[70].mxu1  ;;  %v4915_v2 = vpop.f32.mrb[92].mxu0  ;;  %v4957_v52 = vmax.f32 %v14301_v41, 0.0  ;;  %v4959_v28 = vmax.f32 %v14317_v21, 0.0 }
 0xb14   : >> { %v14302_v9 = vadd.f32 %v4689_v15, %v20842_v24  ;;  %v14318_v45 = vadd.f32 %v4915_v2, %v20843_v30  ;;  %v4691_v57 = vpop.f32.mrb[71].mxu1  ;;  %v4917_v3 = vpop.f32.mrb[93].mxu0 }
 0xb15   : >> { %v14303_v25 = vadd.f32 %v4691_v57, %v20844_v37  ;;  %v14319_v61 = vadd.f32 %v4917_v3, %v20845_v5 }
 0xb16   : >> { %v4960_v20 = vmax.f32 %v14302_v9, 0.0  ;;  %v4962_v59 = vmax.f32 %v14318_v45, 0.0 }
 0xb17   : >> { %v4961_v17 = vmax.f32 %v14303_v25, 0.0  ;;  %v4963_v50 = vmax.f32 %v14319_v61, 0.0  ;;  %v4695_v60 = vpop.f32.mrb[72].mxu1  ;;  %v4921_v32 = vpop.f32.mrb[94].mxu0 }
 0xb18   : >> { %v12432_v26 = vpack.c.bf16 %v4960_v20, %v4956_v0  ;;  %v17779_v15 = vpack.c.bf16 %v4962_v59, %v4958_v47  ;;  %v4697_v2 = vpop.f32.mrb[73].mxu1  ;;  %v4923_v38 = vpop.f32.mrb[95].mxu0  ;;  %v14304_v57 = vadd.f32 %v4695_v60, %v20842_v24  ;;  %v14320_v23 = vadd.f32 %v4921_v32, %v20843_v30 }
 0xb19   : >> { %v12430_v54 = vpack.c.bf16 %v4961_v17, %v4957_v52  ;;  %v17781_v43 = vpack.c.bf16 %v4963_v50, %v4959_v28  ;;  %v14305_v51 = vadd.f32 %v4697_v2, %v20844_v37  ;;  %v14321_v41 = vadd.f32 %v4923_v38, %v20845_v5 }
 0xb1a   : >> { %v4964_v52 = vmax.f32 %v14304_v57, 0.0  ;;  %v4966_v32 = vmax.f32 %v14320_v23, 0.0 }
 0xb1b   : >> { %v4701_v25 = vpop.f32.mrb[74].mxu1  ;;  %v4927_v61 = vpop.f32.mrb[96].mxu0  ;;  %12431 = vmatprep.subr.bf16.mxu1 %v12430_v54  ;;  %v4965_v47 = vmax.f32 %v14305_v51, 0.0  ;;  %v4967_v38 = vmax.f32 %v14321_v41, 0.0 }
 0xb1c   : >> { %v14306_v20 = vadd.f32 %v4701_v25, %v20842_v24  ;;  %v14322_v0 = vadd.f32 %v4927_v61, %v20843_v30  ;;  %v4703_v21 = vpop.f32.mrb[75].mxu1  ;;  %v4929_v9 = vpop.f32.mrb[97].mxu0  ;;  %12433 = vmatpush1.bf16.msra.mxu1 %v12432_v26 }
 0xb1d   : >> { %v14307_v17 = vadd.f32 %v4703_v21, %v20844_v37  ;;  %v14323_v60 = vadd.f32 %v4929_v9, %v20845_v5 }
 0xb1e   : >> { %v4968_v45 = vmax.f32 %v14306_v20, 0.0  ;;  %v4970_v3 = vmax.f32 %v14322_v0, 0.0 }
 0xb1f   : >> { %v4969_v59 = vmax.f32 %v14307_v17, 0.0  ;;  %v4971_v28 = vmax.f32 %v14323_v60, 0.0  ;;  %v4707_v54 = vpop.f32.mrb[76].mxu1  ;;  %v4933_v50 = vpop.f32.mrb[98].mxu0 }
 0xb20   : >> { %v12436_v2 = vpack.c.bf16 %v4968_v45, %v4964_v52  ;;  %v17791_v25 = vpack.c.bf16 %v4970_v3, %v4966_v32  ;;  %v4709_v61 = vpop.f32.mrb[77].mxu1  ;;  %v4935_v16 = vpop.f32.mrb[99].mxu0  ;;  %v14308_v21 = vadd.f32 %v4707_v54, %v20842_v24  ;;  %v14324_v57 = vadd.f32 %v4933_v50, %v20843_v30 }
 0xb21   : >> { %v12434_v26 = vpack.c.bf16 %v4969_v59, %v4965_v47  ;;  %v17793_v11 = vpack.c.bf16 %v4971_v28, %v4967_v38  ;;  %v14309_v23 = vadd.f32 %v4709_v61, %v20844_v37  ;;  %v14325_v51 = vadd.f32 %v4935_v16, %v20845_v5 }
 0xb22   : >> { %v4972_v45 = vmax.f32 %v14308_v21, 0.0  ;;  %v4974_v3 = vmax.f32 %v14324_v57, 0.0 }
 0xb23   : >> { %v4713_v41 = vpop.f32.mrb[78].mxu1  ;;  %v4939_v20 = vpop.f32.mrb[100].mxu0  ;;  %12435 = vmatprep.subr.bf16.mxu1 %v12434_v26  ;;  %v4973_v59 = vmax.f32 %v14309_v23, 0.0  ;;  %v4975_v16 = vmax.f32 %v14325_v51, 0.0 }
 0xb24   : >> { %v14310_v0 = vadd.f32 %v4713_v41, %v20842_v24  ;;  %v14326_v9 = vadd.f32 %v4939_v20, %v20843_v30  ;;  %v4715_v17 = vpop.f32.mrb[79].mxu1  ;;  %v4941_v60 = vpop.f32.mrb[101].mxu0  ;;  %12437 = vmatpush1.bf16.msra.mxu1 %v12436_v2 }
 0xb25   : >> { %v14311_v52 = vadd.f32 %v4715_v17, %v20844_v37  ;;  %v14327_v32 = vadd.f32 %v4941_v60, %v20845_v5 }
 0xb26   : >> { %v4976_v47 = vmax.f32 %v14310_v0, 0.0  ;;  %v4978_v38 = vmax.f32 %v14326_v9, 0.0 }
 0xb27   : >> { %v4977_v28 = vmax.f32 %v14311_v52, 0.0  ;;  %v4979_v54 = vmax.f32 %v14327_v32, 0.0  ;;  %v4719_v50 = vpop.f32.mrb[80].mxu1  ;;  %v4945_v61 = vpop.f32.mrb[102].mxu0 }
 0xb28   : >> { %v12440_v26 = vpack.c.bf16 %v4976_v47, %v4972_v45  ;;  %v12456_v41 = vpack.c.bf16 %v4978_v38, %v4974_v3  ;;  %v4721_v20 = vpop.f32.mrb[81].mxu1  ;;  %v4947_v34 = vpop.f32.mrb[103].mxu0  ;;  %v14312_v17 = vadd.f32 %v4719_v50, %v20842_v24  ;;  %v14328_v60 = vadd.f32 %v4945_v61, %v20843_v30 }
 0xb29   : >> { %v12438_v31 = vpack.c.bf16 %v4977_v28, %v4973_v59  ;;  %v12454_v2 = vpack.c.bf16 %v4979_v54, %v4975_v16  ;;  %v14313_v21 = vadd.f32 %v4721_v20, %v20844_v37  ;;  %v14329_v57 = vadd.f32 %v4947_v34, %v20845_v5 }
 0xb2a   : >> { %v4980_v47 = vmax.f32 %v14312_v17, 0.0  ;;  %v4982_v38 = vmax.f32 %v14328_v60, 0.0  ;;  %v14842_v17 = vld [vmem:[%s19492_s6 + $0x8] sm:$0xff] }
 0xb2b   : >> { %v4725_v23 = vpop.f32.mrb[82].mxu1  ;;  %v4951_v51 = vpop.f32.mrb[104].mxu0  ;;  %12439 = vmatprep.subr.bf16.mxu1 %v12438_v31  ;;  %v4981_v28 = vmax.f32 %v14313_v21, 0.0  ;;  %v4983_v34 = vmax.f32 %v14329_v57, 0.0  ;;  %v20849_v60 = vld [vmem:[#allocation201_spill] sm:$0xff]  ;;  %v20854_v57 = vld [vmem:[#allocation211_spill] sm:$0xff] }
 0xb2c   : >> { %v14314_v0 = vadd.f32 %v4725_v23, %v20842_v24  ;;  %v14330_v9 = vadd.f32 %v4951_v51, %v20843_v30  ;;  %v4727_v52 = vpop.f32.mrb[83].mxu1  ;;  %v4953_v32 = vpop.f32.mrb[105].mxu0  ;;  %12441 = vmatpush1.bf16.msra.mxu1 %v12440_v26  ;;  %v14841_v26 = vld [vmem:[%s19492_s6] sm:$0xff]  ;;  %v20853_v21 = vld [vmem:[#allocation209_spill] sm:$0xff] }
 0xb2d   : >> { %v14315_v45 = vadd.f32 %v4727_v52, %v20844_v37  ;;  %v14331_v3 = vadd.f32 %v4953_v32, %v20845_v5  ;;  %v20855_v51 = vld [vmem:[#allocation213_spill] sm:$0xff]  ;;  %v20858_v52 = vld [vmem:[#allocation219_spill] sm:$0xff] }
 0xb2e   : >> { %v4984_v59 = vmax.f32 %v14314_v0, 0.0  ;;  %v4986_v16 = vmax.f32 %v14330_v9, 0.0  ;;  %v20856_v0 = vld [vmem:[#allocation215_spill] sm:$0xff]  ;;  %v20857_v9 = vld [vmem:[#allocation217_spill] sm:$0xff] }
 0xb2f   : >> { %v4985_v54 = vmax.f32 %v14315_v45, 0.0  ;;  %v4987_v50 = vmax.f32 %v14331_v3, 0.0  ;;  %v20859_v32 = vld [vmem:[#allocation221_spill] sm:$0xff]  ;;  %v20860_v45 = vld [vmem:[#allocation223_spill] sm:$0xff] }
 0xb30   : >> { %v12444_v31 = vpack.c.bf16 %v4984_v59, %v4980_v47  ;;  %v12460_v61 = vpack.c.bf16 %v4986_v16, %v4982_v38  ;;  %v20861_v3 = vld [vmem:[#allocation225_spill] sm:$0xff]  ;;  %v20862_v47 = vld [vmem:[#allocation227_spill] sm:$0xff] }
 0xb31   : >> { %v12442_v20 = vpack.c.bf16 %v4985_v54, %v4981_v28  ;;  %v12458_v23 = vpack.c.bf16 %v4987_v50, %v4983_v34  ;;  %v20863_v38 = vld [vmem:[#allocation229_spill] sm:$0xff]  ;;  %v20864_v59 = vld [vmem:[#allocation231_spill] sm:$0xff] }
 0xb32   : >> { %v20865_v16 = vld [vmem:[#allocation233_spill] sm:$0xff]  ;;  %v20866_v28 = vld [vmem:[#allocation235_spill] sm:$0xff] }
 0xb33   : >> { %12443 = vmatprep.subr.bf16.mxu1 %v12442_v20  ;;  %v20867_v34 = vld [vmem:[#allocation237_spill] sm:$0xff]  ;;  %v20868_v54 = vld [vmem:[#allocation239_spill] sm:$0xff] }
 0xb34   : >> { %12445 = vmatpush1.bf16.msra.mxu1 %v12444_v31  ;;  %v20869_v50 = vld [vmem:[#allocation241_spill] sm:$0xff]  ;;  %v20870_v31 = vld [vmem:[#allocation243_spill] sm:$0xff] }
 0xb35   : >> { %12447 = vmatprep.subr.bf16.mxu1 %v17781_v43  ;;  %v20846_v43 = vld [vmem:[#allocation195_spill] sm:$0xff] }
 0xb36   : >> { %v20872_v20 = vld [vmem:[#allocation247_spill] sm:$0xff] }
 0xb37   : >> { %10623 = vmatmul.mubr.msk.f32.vlgmr.msra.gmra.mrb[84].mxu1 %vm1068_vm2, %v14841_v26 }
 0xb38   : >> { %12449 = vmatpush1.bf16.msra.mxu1 %v17779_v15  ;;  %5058 = vmatprep.mubr.f32.mxu1 %v20354_v55  ;;  %v20848_v15 = vld [vmem:[#allocation199_spill] sm:$0xff] }
 0xb39   : >> { %12451 = vmatprep.subr.bf16.mxu1 %v17793_v11  ;;  %v20847_v11 = vld [vmem:[#allocation197_spill] sm:$0xff] }
 0xb3b   : >> { %10624 = vmatmul.mubr.msk.f32.gmra.mrb[86].mxu1 %vm1068_vm2, %v14842_v17 }
 0xb3c   : >> { %12453 = vmatpush1.bf16.msra.mxu1 %v17791_v25  ;;  %5129 = vmatprep.mubr.f32.mxu1 %v20354_v55  ;;  %v20850_v25 = vld [vmem:[#allocation203_spill] sm:$0xff] }
 0xb3d   : >> { %12455 = vmatprep.subr.bf16.mxu1 %v12454_v2  ;;  %v20851_v2 = vld [vmem:[#allocation205_spill] sm:$0xff] }
 0xb40   : >> { %12457 = vmatpush1.bf16.msra.mxu1 %v12456_v41  ;;  %v20852_v41 = vld [vmem:[#allocation207_spill] sm:$0xff] }
 0xb41   : >> { %12459 = vmatprep.subr.bf16.mxu1 %v12458_v23  ;;  %v20873_v23 = vld [vmem:[#allocation249_spill] sm:$0xff] }
 0xb44   : >> { %12461 = vmatpush1.bf16.msra.mxu1 %v12460_v61  ;;  %v20871_v61 = vld [vmem:[#allocation245_spill] sm:$0xff] }
 0xb45   : >> { %12591 = vmatprep.subr.bf16.mxu1 %v20846_v43 }
 0xb47   : >> { %10625 = vmatmul.mubr.msk.f32.vlgmr.msra.gmra.mrb[88].mxu1 %vm1068_vm2, %v14841_v26  ;;  %v20874_v26 = vld [vmem:[#allocation251_spill] sm:$0xff] }
 0xb48   : >> { %5135 = vmatprep.mubr.f32.mxu1 %v20354_v55  ;;  %12593 = vmatpush1.bf16.msra.mxu1 %v20847_v11 }
 0xb49   : >> { %12595 = vmatprep.subr.bf16.mxu1 %v20848_v15 }
 0xb4b   : >> { %10626 = vmatmul.mubr.msk.f32.gmra.mrb[90].mxu1 %vm1068_vm2, %v14842_v17  ;;  %v20875_v17 = vld [vmem:[#allocation253_spill] sm:$0xff] }
 0xb4c   : >> { %12597 = vmatpush1.bf16.msra.mxu1 %v20849_v60 }
 0xb4d   : >> { %12599 = vmatprep.subr.bf16.mxu1 %v20850_v25 }
 0xb50   : >> { %12601 = vmatpush1.bf16.msra.mxu1 %v20851_v2 }
 0xb51   : >> { %12603 = vmatprep.subr.bf16.mxu1 %v20852_v41 }
 0xb54   : >> { %12605 = vmatpush1.bf16.msra.mxu1 %v20853_v21 }
 0xb55   : >> { %12607 = vmatprep.subr.bf16.mxu1 %v20854_v57 }
 0xb58   : >> { %12609 = vmatpush1.bf16.msra.mxu1 %v20855_v51 }
 0xb59   : >> { %12611 = vmatprep.subr.bf16.mxu1 %v20856_v0 }
 0xb5c   : >> { %12613 = vmatpush1.bf16.msra.mxu1 %v20857_v9 }
 0xb5d   : >> { %12615 = vmatprep.subr.bf16.mxu1 %v20858_v52 }
 0xb60   : >> { %12617 = vmatpush1.bf16.msra.mxu1 %v20859_v32 }
 0xb61   : >> { %12619 = vmatprep.subr.bf16.mxu1 %v20860_v45 }
 0xb64   : >> { %12621 = vmatpush1.bf16.msra.mxu1 %v20861_v3 }
 0xb65   : >> { %12623 = vmatprep.subr.bf16.mxu1 %v20862_v47 }
 0xb68   : >> { %12625 = vmatpush1.bf16.msra.mxu1 %v20863_v38  ;;  %v20908_v38 = vld [vmem:[#allocation290_spill] sm:$0xff] }
 0xb69   : >> { %12627 = vmatprep.subr.bf16.mxu1 %v20864_v59  ;;  %v20902_v59 = vld [vmem:[#allocation284_spill] sm:$0xff] }
 0xb6c   : >> { %12629 = vmatpush1.bf16.msra.mxu1 %v20865_v16  ;;  %v20876_v16 = vld [vmem:[#allocation255_spill] sm:$0xff] }
 0xb6d   : >> { %12631 = vmatprep.subr.bf16.mxu1 %v20866_v28  ;;  %v20877_v28 = vld [vmem:[#allocation257_spill] sm:$0xff] }
 0xb70   : >> { %12633 = vmatpush1.bf16.msra.mxu1 %v20867_v34  ;;  %v20878_v34 = vld [vmem:[#allocation259_spill] sm:$0xff] }
 0xb71   : >> { %12635 = vmatprep.subr.bf16.mxu1 %v20868_v54 }
 0xb74   : >> { %12637 = vmatpush1.bf16.msra.mxu1 %v20869_v50 }
 0xb75   : >> { %12639 = vmatprep.subr.bf16.mxu1 %v20870_v31  ;;  %v20898_v31 = vld [vmem:[#allocation280_spill] sm:$0xff] }
 0xb78   : >> { %12641 = vmatpush1.bf16.msra.mxu1 %v20871_v61  ;;  %v20879_v61 = vld [vmem:[#allocation260_spill] sm:$0xff] }
 0xb79   : >> { %12643 = vmatprep.subr.bf16.mxu1 %v20872_v20  ;;  %v20880_v20 = vld [vmem:[#allocation261_spill] sm:$0xff] }
 0xb7c   : >> { %12645 = vmatpush1.bf16.msra.mxu1 %v20873_v23 }
 0xb7d   : >> { %12647 = vmatprep.subr.bf16.mxu1 %v20874_v26  ;;  %v20881_v26 = vld [vmem:[#allocation262_spill] sm:$0xff] }
 0xb80   : >> { %12649 = vmatpush1.bf16.msra.mxu1 %v20875_v17  ;;  %v20882_v17 = vld [vmem:[#allocation263_spill] sm:$0xff] }
 0xb81   : >> { %12651 = vmatprep.subr.bf16.mxu1 %v20876_v16 }
 0xb84   : >> { %12653 = vmatpush1.bf16.msra.mxu1 %v20877_v28  ;;  %v20884_v28 = vld [vmem:[#allocation265_spill] sm:$0xff] }
 0xb85   : >> { %12655 = vmatprep.subr.bf16.mxu1 %v20878_v34  ;;  %v20883_v34 = vld [vmem:[#allocation264_spill] sm:$0xff] }
 0xc0a   : >> { %v5054_v54 = vpop.f32.mrb[84].mxu1 }
 0xc0b   : >> { %v5056_v50 = vpop.f32.mrb[85].mxu1 }
 0xc0c   : >> { %5206 = vmatprep.mubr.f32.mxu0 %v5056_v50  ;;  %5360 = vmatprep.mubr.f32.mxu1 %v5056_v50  ;;  %v20886_v50 = vld [vmem:[#allocation268_spill] sm:$0xff] }
 0xc0d   : >> { %5207 = vmatmul.mubr.f32.vlgmr.msra.gmra.mrb[106].mxu0 %v5054_v54  ;;  %5361 = vmatmul.mubr.f32.vlgmr.msra.gmra.mrb[92].mxu1 %v5054_v54  ;;  %v20885_v54 = vld [vmem:[#allocation267_spill] sm:$0xff] }
 0xc0e   : >> { %12529 = vmatpush1.bf16.msra.mxu0 %v20879_v61  ;;  %12657 = vmatpush1.bf16.msra.mxu1 %v20880_v20  ;;  %v5060_v23 = vpop.f32.mrb[86].mxu1  ;;  %v20887_v20 = vld [vmem:[#allocation269_spill] sm:$0xff]  ;;  %v20890_v61 = vld [vmem:[#allocation272_spill] sm:$0xff] }
 0xc0f   : >> { %12531 = vmatprep.subr.bf16.mxu0 %v20881_v26  ;;  %12659 = vmatprep.subr.bf16.mxu1 %v20882_v17  ;;  %v5062_v16 = vpop.f32.mrb[87].mxu1  ;;  %v20888_v26 = vld [vmem:[#allocation270_spill] sm:$0xff]  ;;  %v20889_v17 = vld [vmem:[#allocation271_spill] sm:$0xff] }
 0xc10   : >> { %5212 = vmatprep.mubr.f32.mxu0 %v5062_v16  ;;  %5366 = vmatprep.mubr.f32.mxu1 %v5062_v16  ;;  %v20891_v16 = vld [vmem:[#allocation273_spill] sm:$0xff] }
 0xc11   : >> { %5213 = vmatmul.mubr.f32.gmra.mrb[108].mxu0 %v5060_v23  ;;  %5367 = vmatmul.mubr.f32.gmra.mrb[94].mxu1 %v5060_v23 }
 0xc12   : >> { %12533 = vmatpush1.bf16.msra.mxu0 %v20883_v34  ;;  %12661 = vmatpush1.bf16.msra.mxu1 %v20884_v28  ;;  %v20892_v34 = vld [vmem:[#allocation274_spill] sm:$0xff]  ;;  %v20893_v28 = vld [vmem:[#allocation275_spill] sm:$0xff] }
 0xc13   : >> { %12535 = vmatprep.subr.bf16.mxu0 %v16732_v49  ;;  %12663 = vmatprep.subr.bf16.mxu1 %v20885_v54  ;;  %v20894_v54 = vld [vmem:[#allocation276_spill] sm:$0xff] }
 0xc16   : >> { %12537 = vmatpush1.bf16.msra.mxu0 %v20886_v50  ;;  %12665 = vmatpush1.bf16.msra.mxu1 %v20887_v20  ;;  %v20895_v50 = vld [vmem:[#allocation277_spill] sm:$0xff] }
 0xc17   : >> { %12539 = vmatprep.subr.bf16.mxu0 %v20888_v26  ;;  %12667 = vmatprep.subr.bf16.mxu1 %v20889_v17  ;;  %v20896_v26 = vld [vmem:[#allocation278_spill] sm:$0xff]  ;;  %v20897_v17 = vld [vmem:[#allocation279_spill] sm:$0xff] }
 0xc1a   : >> { %12541 = vmatpush1.bf16.msra.mxu0 %v20890_v61  ;;  %12669 = vmatpush1.bf16.msra.mxu1 %v20891_v16  ;;  %v5131_v23 = vpop.f32.mrb[88].mxu1  ;;  %v20899_v16 = vld [vmem:[#allocation281_spill] sm:$0xff] }
 0xc1b   : >> { %12543 = vmatprep.subr.bf16.mxu0 %v20892_v34  ;;  %12671 = vmatprep.subr.bf16.mxu1 %v20893_v28  ;;  %v5133_v49 = vpop.f32.mrb[89].mxu1  ;;  %v20900_v34 = vld [vmem:[#allocation282_spill] sm:$0xff]  ;;  %v20901_v28 = vld [vmem:[#allocation283_spill] sm:$0xff] }
 0xc1c   : >> { %5283 = vmatprep.mubr.f32.mxu0 %v5133_v49  ;;  %5437 = vmatprep.mubr.f32.mxu1 %v5133_v49  ;;  %v20903_v49 = vld [vmem:[#allocation285_spill] sm:$0xff] }
 0xc1e   : >> { %12545 = vmatpush1.bf16.msra.mxu0 %v20894_v54  ;;  %12673 = vmatpush1.bf16.msra.mxu1 %v20895_v50  ;;  %v5137_v20 = vpop.f32.mrb[90].mxu1  ;;  %v20904_v54 = vld [vmem:[#allocation286_spill] sm:$0xff]  ;;  %v20905_v50 = vld [vmem:[#allocation287_spill] sm:$0xff] }
 0xc1f   : >> { %12547 = vmatprep.subr.bf16.mxu0 %v20896_v26  ;;  %12675 = vmatprep.subr.bf16.mxu1 %v20897_v17  ;;  %v5139_v61 = vpop.f32.mrb[91].mxu1  ;;  %v20906_v26 = vld [vmem:[#allocation288_spill] sm:$0xff]  ;;  %v20907_v17 = vld [vmem:[#allocation289_spill] sm:$0xff] }
 0xc22   : >> { %12549 = vmatpush1.bf16.msra.mxu0 %v20898_v31  ;;  %12677 = vmatpush1.bf16.msra.mxu1 %v20899_v16  ;;  %v20909_v31 = vld [vmem:[#allocation291_spill] sm:$0xff]  ;;  %v20910_v16 = vld [vmem:[#allocation292_spill] sm:$0xff] }
 0xc23   : >> { %12551 = vmatprep.subr.bf16.mxu0 %v20900_v34  ;;  %12679 = vmatprep.subr.bf16.mxu1 %v20901_v28  ;;  %v20911_v34 = vld [vmem:[#allocation293_spill] sm:$0xff]  ;;  %v20912_v28 = vld [vmem:[#allocation294_spill] sm:$0xff] }
 0xc26   : >> { %12553 = vmatpush1.bf16.msra.mxu0 %v20902_v59  ;;  %12681 = vmatpush1.bf16.msra.mxu1 %v20903_v49  ;;  %v20913_v59 = vld [vmem:[#allocation295_spill] sm:$0xff]  ;;  %v20914_v49 = vld [vmem:[#allocation296_spill] sm:$0xff] }
 0xc27   : >> { %12555 = vmatprep.subr.bf16.mxu0 %v20904_v54  ;;  %12683 = vmatprep.subr.bf16.mxu1 %v20905_v50  ;;  %v20915_v54 = vld [vmem:[#allocation297_spill] sm:$0xff]  ;;  %v20916_v50 = vld [vmem:[#allocation298_spill] sm:$0xff] }
 0xc2a   : >> { %12557 = vmatpush1.bf16.msra.mxu0 %v20906_v26  ;;  %12685 = vmatpush1.bf16.msra.mxu1 %v20907_v17  ;;  %v20917_v26 = vld [vmem:[#allocation299_spill] sm:$0xff]  ;;  %v20918_v17 = vld [vmem:[#allocation300_spill] sm:$0xff] }
 0xc2b   : >> { %12559 = vmatprep.subr.bf16.mxu0 %v20908_v38  ;;  %12687 = vmatprep.subr.bf16.mxu1 %v20909_v31  ;;  %v20919_v38 = vld [vmem:[#allocation301_spill] sm:$0xff]  ;;  %v20920_v31 = vld [vmem:[#allocation302_spill] sm:$0xff] }
 0xc2e   : >> { %12561 = vmatpush1.bf16.msra.mxu0 %v20910_v16  ;;  %12689 = vmatpush1.bf16.msra.mxu1 %v20911_v34  ;;  %v20921_v16 = vld [vmem:[#allocation303_spill] sm:$0xff]  ;;  %v20922_v34 = vld [vmem:[#allocation304_spill] sm:$0xff] }
 0xc2f   : >> { %12563 = vmatprep.subr.bf16.mxu0 %v20912_v28  ;;  %12691 = vmatprep.subr.bf16.mxu1 %v20913_v59  ;;  %v20923_v28 = vld [vmem:[#allocation305_spill] sm:$0xff]  ;;  %v20924_v59 = vld [vmem:[#allocation306_spill] sm:$0xff] }
 0xc32   : >> { %12565 = vmatpush1.bf16.msra.mxu0 %v20914_v49  ;;  %12693 = vmatpush1.bf16.msra.mxu1 %v20915_v54  ;;  %v20925_v49 = vld [vmem:[#allocation307_spill] sm:$0xff]  ;;  %v20926_v54 = vld [vmem:[#allocation308_spill] sm:$0xff] }
 0xc33   : >> { %12567 = vmatprep.subr.bf16.mxu0 %v20916_v50  ;;  %12695 = vmatprep.subr.bf16.mxu1 %v20917_v26  ;;  %v20927_v50 = vld [vmem:[#allocation309_spill] sm:$0xff]  ;;  %v20928_v26 = vld [vmem:[#allocation310_spill] sm:$0xff] }
 0xc36   : >> { %12569 = vmatpush1.bf16.msra.mxu0 %v20918_v17  ;;  %12697 = vmatpush1.bf16.msra.mxu1 %v20919_v38  ;;  %v20929_v17 = vld [vmem:[#allocation311_spill] sm:$0xff]  ;;  %v20930_v38 = vld [vmem:[#allocation312_spill] sm:$0xff] }
 0xc37   : >> { %12571 = vmatprep.subr.bf16.mxu0 %v20920_v31  ;;  %12699 = vmatprep.subr.bf16.mxu1 %v20921_v16  ;;  %v20931_v31 = vld [vmem:[#allocation313_spill] sm:$0xff]  ;;  %v20932_v16 = vld [vmem:[#allocation314_spill] sm:$0xff] }
 0xc3a   : >> { %12573 = vmatpush1.bf16.msra.mxu0 %v20922_v34  ;;  %12701 = vmatpush1.bf16.msra.mxu1 %v20923_v28  ;;  %v20933_v34 = vld [vmem:[#allocation315_spill] sm:$0xff]  ;;  %v20934_v28 = vld [vmem:[#allocation316_spill] sm:$0xff] }
 0xc3b   : >> { %12575 = vmatprep.subr.bf16.mxu0 %v20924_v59  ;;  %12703 = vmatprep.subr.bf16.mxu1 %v20925_v49  ;;  %v20935_v59 = vld [vmem:[#allocation317_spill] sm:$0xff]  ;;  %v20936_v49 = vld [vmem:[#allocation318_spill] sm:$0xff] }
 0xc3e   : >> { %12577 = vmatpush1.bf16.msra.mxu0 %v20926_v54  ;;  %12705 = vmatpush1.bf16.msra.mxu1 %v20927_v50  ;;  %v20937_v54 = vld [vmem:[#allocation319_spill] sm:$0xff]  ;;  %v20938_v50 = vld [vmem:[#allocation320_spill] sm:$0xff] }
 0xc3f   : >> { %12579 = vmatprep.subr.bf16.mxu0 %v20928_v26  ;;  %12707 = vmatprep.subr.bf16.mxu1 %v20929_v17  ;;  %v20939_v26 = vld [vmem:[#allocation321_spill] sm:$0xff] }
 0xc42   : >> { %12581 = vmatpush1.bf16.msra.mxu0 %v20930_v38  ;;  %12709 = vmatpush1.bf16.msra.mxu1 %v20931_v31 }
 0xc43   : >> { %12583 = vmatprep.subr.bf16.mxu0 %v20932_v16  ;;  %12711 = vmatprep.subr.bf16.mxu1 %v20933_v34 }
 0xc46   : >> { %12585 = vmatpush1.bf16.msra.mxu0 %v20934_v28  ;;  %12713 = vmatpush1.bf16.msra.mxu1 %v20935_v59  ;;  %v20940_v59 = vld [vmem:[#allocation327_spill] sm:$0xff] }
 0xc47   : >> { %12587 = vmatprep.subr.bf16.mxu0 %v20936_v49  ;;  %12715 = vmatprep.subr.bf16.mxu1 %v20937_v54 }
 0xc4a   : >> { %12589 = vmatpush1.bf16.msra.mxu0 %v20938_v50  ;;  %12717 = vmatpush1.bf16.msra.mxu1 %v20939_v26  ;;  %v20941_v26 = vld [vmem:[#allocation329_spill] sm:$0xff] }
 0xc4b   : >> { %12719 = vmatprep.subr.bf16.mxu0 %v16902_v7  ;;  %12735 = vmatprep.subr.bf16.mxu1 %v16904_v13 }
 0xc4d   : >> { %5284 = vmatmul.mubr.f32.vlgmr.msra.gmra.mrb[106].mxu0 %v5131_v23  ;;  %5438 = vmatmul.mubr.f32.vlgmr.msra.gmra.mrb[92].mxu1 %v5131_v23  ;;  %v20942_v23 = vld [vmem:[#allocation332_spill] sm:$0xff] }
 0xc4e   : >> { %12721 = vmatpush1.bf16.msra.mxu0 %v16908_v19  ;;  %12737 = vmatpush1.bf16.msra.mxu1 %v16910_v56 }
 0xc4f   : >> { %12723 = vmatprep.subr.bf16.mxu0 %v16914_v12  ;;  %12739 = vmatprep.subr.bf16.mxu1 %v20940_v59  ;;  %v20943_v12 = vld [vmem:[#allocation333_spill] sm:$0xff]  ;;  %v20944_v59 = vld [vmem:[#allocation334_spill] sm:$0xff] }
 0xc50   : >> { %5289 = vmatprep.mubr.f32.mxu0 %v5139_v61  ;;  %5443 = vmatprep.mubr.f32.mxu1 %v5139_v61  ;;  %v20945_v61 = vld [vmem:[#allocation335_spill] sm:$0xff] }
 0xc51   : >> { %5290 = vmatmul.mubr.f32.gmra.mrb[108].mxu0 %v5137_v20  ;;  %5444 = vmatmul.mubr.f32.gmra.mrb[94].mxu1 %v5137_v20  ;;  %v20946_v20 = vld [vmem:[#allocation336_spill] sm:$0xff] }
 0xc52   : >> { %12725 = vmatpush1.bf16.msra.mxu0 %v16922_v58  ;;  %12741 = vmatpush1.bf16.msra.mxu1 %v20941_v26  ;;  %v20947_v26 = vld [vmem:[#allocation338_spill] sm:$0xff] }
 0xc53   : >> { %12727 = vmatprep.subr.bf16.mxu0 %v16928_v27  ;;  %12743 = vmatprep.subr.bf16.mxu1 %v16930_v35  ;;  %v20948_v27 = vld [vmem:[#allocation339_spill] sm:$0xff]  ;;  %v20962_v35 = vld [vmem:[#allocation353_spill] sm:$0xff] }
 0xc54   : >> { %5520 = vmatprep.mubr.f32.mxu0 %v20354_v55  ;;  %5597 = vmatprep.mubr.f32.mxu1 %v20354_v55 }
 0xc56   : >> { %12729 = vmatpush1.bf16.msra.mxu0 %v20942_v23  ;;  %12745 = vmatpush1.bf16.msra.mxu1 %v20943_v12  ;;  %v20956_v12 = vld [vmem:[#allocation347_spill] sm:$0xff]  ;;  %v20961_v23 = vld [vmem:[#allocation352_spill] sm:$0xff] }
 0xc57   : >> { %12731 = vmatprep.subr.bf16.mxu0 %v20944_v59  ;;  %12747 = vmatprep.subr.bf16.mxu1 %v20945_v61  ;;  %v20949_v59 = vld [vmem:[#allocation340_spill] sm:$0xff]  ;;  %v20950_v61 = vld [vmem:[#allocation341_spill] sm:$0xff] }
 0xc5a   : >> { %12733 = vmatpush1.bf16.msra.mxu0 %v20946_v20  ;;  %12749 = vmatpush1.bf16.msra.mxu1 %v16966_v63  ;;  %v20951_v20 = vld [vmem:[#allocation342_spill] sm:$0xff]  ;;  %v20952_v63 = vld [vmem:[#allocation343_spill] sm:$0xff] }
 0xc5b   : >> { %12751 = vmatprep.subr.bf16.mxu0 %v20947_v26  ;;  %12783 = vmatprep.subr.bf16.mxu1 %v20948_v27  ;;  %v20953_v27 = vld [vmem:[#allocation344_spill] sm:$0xff]  ;;  %v20955_v26 = vld [vmem:[#allocation346_spill] sm:$0xff] }
 0xc5d   : >> { %10627 = vmatmul.mubr.msk.f32.vlgmr.msra.gmra.mrb[106].mxu0 %vm1068_vm2, %v17336_v22  ;;  %10629 = vmatmul.mubr.msk.f32.vlgmr.msra.gmra.mrb[92].mxu1 %vm1068_vm2, %v17336_v22  ;;  %v20954_v22 = vld [vmem:[#allocation345_spill] sm:$0xff] }
 0xc5e   : >> { %5526 = vmatprep.mubr.f32.mxu0 %v20354_v55  ;;  %5603 = vmatprep.mubr.f32.mxu1 %v20354_v55 }
 0xc5f   : >> { %12753 = vmatpush3.bf16.msra.mxu0 %v20949_v59  ;;  %12785 = vmatpush3.bf16.msra.mxu1 %v20950_v61  ;;  %v20957_v59 = vld [vmem:[#allocation348_spill] sm:$0xff]  ;;  %v20958_v61 = vld [vmem:[#allocation349_spill] sm:$0xff] }
 0xc60   : >> { %12755 = vmatprep.subr.bf16.mxu0 %v20951_v20  ;;  %12787 = vmatprep.subr.bf16.mxu1 %v20952_v63  ;;  %v20959_v20 = vld [vmem:[#allocation350_spill] sm:$0xff]  ;;  %v20960_v63 = vld [vmem:[#allocation351_spill] sm:$0xff] }
 0xc61   : >> { %10628 = vmatmul.mubr.msk.f32.gmra.mrb[108].mxu0 %vm1068_vm2, %v17339_v44  ;;  %10630 = vmatmul.mubr.msk.f32.gmra.mrb[94].mxu1 %vm1068_vm2, %v17339_v44  ;;  %v20963_v44 = vld [vmem:[#allocation354_spill] sm:$0xff] }
 0xc63   : >> { %12757 = vmatpush3.bf16.msra.mxu0 %v20953_v27  ;;  %12789 = vmatpush3.bf16.msra.mxu1 %v20954_v22  ;;  %v20964_v27 = vld [vmem:[#allocation355_spill] sm:$0xff]  ;;  %v20965_v22 = vld [vmem:[#allocation356_spill] sm:$0xff] }
 0xc64   : >> { %12759 = vmatprep.subr.bf16.mxu0 %v20955_v26  ;;  %12791 = vmatprep.subr.bf16.mxu1 %v20956_v12  ;;  %v20966_v26 = vld [vmem:[#allocation357_spill] sm:$0xff]  ;;  %v20976_v12 = vld [vmem:[#allocation367_spill] sm:$0xff] }
 0xc67   : >> { %12761 = vmatpush3.bf16.msra.mxu0 %v20957_v59  ;;  %12793 = vmatpush3.bf16.msra.mxu1 %v20958_v61  ;;  %v20967_v59 = vld [vmem:[#allocation358_spill] sm:$0xff]  ;;  %v20968_v61 = vld [vmem:[#allocation359_spill] sm:$0xff] }
 0xc68   : >> { %12763 = vmatprep.subr.bf16.mxu0 %v20959_v20  ;;  %12795 = vmatprep.subr.bf16.mxu1 %v20960_v63  ;;  %v20969_v20 = vld [vmem:[#allocation360_spill] sm:$0xff]  ;;  %v20970_v63 = vld [vmem:[#allocation361_spill] sm:$0xff] }
 0xc6b   : >> { %12765 = vmatpush3.bf16.msra.mxu0 %v20961_v23  ;;  %12797 = vmatpush3.bf16.msra.mxu1 %v20962_v35  ;;  %v20971_v23 = vld [vmem:[#allocation362_spill] sm:$0xff]  ;;  %v20972_v35 = vld [vmem:[#allocation363_spill] sm:$0xff] }
 0xc6c   : >> { %12767 = vmatprep.subr.bf16.mxu0 %v20963_v44  ;;  %12799 = vmatprep.subr.bf16.mxu1 %v20964_v27  ;;  %v20973_v44 = vld [vmem:[#allocation364_spill] sm:$0xff]  ;;  %v20974_v27 = vld [vmem:[#allocation365_spill] sm:$0xff] }
 0xc6f   : >> { %12769 = vmatpush3.bf16.msra.mxu0 %v20965_v22  ;;  %12801 = vmatpush3.bf16.msra.mxu1 %v20966_v26  ;;  %v20975_v22 = vld [vmem:[#allocation366_spill] sm:$0xff]  ;;  %v20977_v26 = vld [vmem:[#allocation368_spill] sm:$0xff] }
 0xc70   : >> { %12771 = vmatprep.subr.bf16.mxu0 %v20967_v59  ;;  %12803 = vmatprep.subr.bf16.mxu1 %v20968_v61  ;;  %v20978_v59 = vld [vmem:[#allocation369_spill] sm:$0xff]  ;;  %v20979_v61 = vmov 0.0|0.0  }
 0xc73   : >> { %12773 = vmatpush3.bf16.msra.mxu0 %v20969_v20  ;;  %12805 = vmatpush3.bf16.msra.mxu1 %v20970_v63  ;;  %v20980_v20 = vld [vmem:[#allocation27_spill] sm:$0xff]  ;;  %v14843_v63 = vld [vmem:[%s15459_s22] sm:$0xf] }
 0xc74   : >> { %12775 = vmatprep.subr.bf16.mxu0 %v20971_v23  ;;  %12807 = vmatprep.subr.bf16.mxu1 %v20972_v35  ;;  %v20981_v23 = vld [vmem:[#allocation180_spill] sm:$0xff] }
 0xc75   : >> { %v17987_v58 = vrot.slane %v14843_v63, %v20981_v23 }
 0xc77   : >> { %12777 = vmatpush3.bf16.msra.mxu0 %v20973_v44  ;;  %12809 = vmatpush3.bf16.msra.mxu1 %v20974_v27 }
 0xc78   : >> { %12779 = vmatprep.subr.bf16.mxu0 %v20975_v22  ;;  %12811 = vmatprep.subr.bf16.mxu1 %v20976_v12 }
 0xc79   : >> { %5959 = vrot.lane.b32.xlu0 %v17987_v58, %s20660_s26 }
 0xc7b   : >> { %12781 = vmatpush3.bf16.msra.mxu0 %v20977_v26  ;;  %12813 = vmatpush3.bf16.msra.mxu1 %v20978_v59 }
 0xc7c   : >> { %12814 = vmatprep.subr.bf16.mxu0 %v20979_v61  ;;  %12830 = vmatprep.subr.bf16.mxu1 %v20980_v20 }
 0xd30   : >> { %v5522_v27 = vpop.f32.mrb[106].mxu0  ;;  %v5599_v44 = vpop.f32.mrb[92].mxu1 }
 0xd31   : >> { %v5610_v22 = vadd.f32 %v5522_v27, %v17266_v14  ;;  %v5612_v12 = vadd.f32 %v5599_v44, %v17269_v4  ;;  %v5524_v26 = vpop.f32.mrb[107].mxu0  ;;  %v5601_v35 = vpop.f32.mrb[93].mxu1 }
 0xd32   : >> { %v5611_v59 = vadd.f32 %v5524_v26, %v17272_v48  ;;  %v5613_v61 = vadd.f32 %v5601_v35, %v17275_v29 }
 0xd33   : >> { %v5618_v23 = vmax.f32 %v5610_v22, 0.0  ;;  %v5620_v13 = vmax.f32 %v5612_v12, 0.0 }
 0xd34   : >> { %v5619_v20 = vmax.f32 %v5611_v59, 0.0  ;;  %v5621_v56 = vmax.f32 %v5613_v61, 0.0  ;;  %v5528_v19 = vpop.f32.mrb[108].mxu0  ;;  %v5605_v63 = vpop.f32.mrb[94].mxu1  ;;  %v20982_v61 = vld [vmem:[#allocation31_spill] sm:$0xff] }
 0xd35   : >> { %v5614_v7 = vadd.f32 %v5528_v19, %v17266_v14  ;;  %v5616_v50 = vadd.f32 %v5605_v63, %v17269_v4  ;;  %v5530_v54 = vpop.f32.mrb[109].mxu0  ;;  %v5607_v27 = vpop.f32.mrb[95].mxu1  ;;  %v20983_v19 = vld [vmem:[#allocation33_spill] sm:$0xff] }
 0xd36   : >> { %v5615_v44 = vadd.f32 %v5530_v54, %v17272_v48  ;;  %v5617_v49 = vadd.f32 %v5607_v27, %v17275_v29  ;;  %5690 = vmatprep.mubr.f32.mxu0 %v5619_v20  ;;  %5765 = vmatprep.mubr.f32.mxu1 %v5621_v56  ;;  %v20984_v56 = vld [vmem:[#allocation35_spill] sm:$0xff]  ;;  %v21021_v4 = vld [vmem:[#allocation57_spill] sm:$0xff] }
 0xd37   : >> { %5691 = vmatmul.mubr.f32.vlgmr.msra.gmra.mrb[110].mxu0 %v5618_v23  ;;  %5766 = vmatmul.mubr.f32.vlgmr.msra.gmra.mrb[96].mxu1 %v5620_v13  ;;  %v5622_v26 = vmax.f32 %v5614_v7, 0.0  ;;  %v5624_v12 = vmax.f32 %v5616_v50, 0.0  ;;  %v20985_v13 = vld [vmem:[#allocation37_spill] sm:$0xff]  ;;  %v20986_v54 = vld [vmem:[#allocation39_spill] sm:$0xff] }
 0xd38   : >> { %v5623_v35 = vmax.f32 %v5615_v44, 0.0  ;;  %v5625_v59 = vmax.f32 %v5617_v49, 0.0  ;;  %12832 = vmatpush1.bf16.msra.mxu1 %v15569_v46  ;;  %v20987_v7 = vld [vmem:[#allocation41_spill] sm:$0xff]  ;;  %v20988_v50 = vld [vmem:[#allocation43_spill] sm:$0xff]  ;;  %v14844_v44 = vld [vmem:[%s20666_s7] ss:$0 sm:$0xff]  ;;  %v5960_v46 = vpop.permute.xlu0 %5959 }
 0xd39   : >> { %12834 = vmatprep.subr.bf16.mxu1 %v20982_v61 }
 0xd3a   : >> { %5695 = vmatprep.mubr.f32.mxu0 %v5623_v35  ;;  %5770 = vmatprep.mubr.f32.mxu1 %v5625_v59 }
 0xd3b   : >> { %5696 = vmatmul.mubr.f32.gmra.mrb[112].mxu0 %v5622_v26  ;;  %5771 = vmatmul.mubr.f32.gmra.mrb[98].mxu1 %v5624_v12 }
 0xd3c   : >> { %11266 = vmatprep.mubr.msk.f32.mxu0 %vm15129_vm3, %v20354_v55  ;;  %12836 = vmatpush1.bf16.msra.mxu1 %v20983_v19  ;;  %v20989_v19 = vld [vmem:[#allocation374_spill] sm:$0xff] }
 0xd3d   : >> { %12838 = vmatprep.subr.bf16.mxu1 %v20984_v56  ;;  %6207 = vmatprep.mubr.f32.mxu1 %v20354_v55 }
 0xd40   : >> { %12840 = vmatpush1.bf16.msra.mxu1 %v20985_v13 }
 0xd41   : >> { %12842 = vmatprep.subr.bf16.mxu1 %v20986_v54 }
 0xd44   : >> { %12844 = vmatpush1.bf16.msra.mxu1 %v20987_v7 }
 0xd45   : >> { %12862 = vmatprep.subr.bf16.mxu1 %v20988_v50 }
 0xe0a   : >> { %v10916_v49 = vpop.f32.mrb[110].mxu0  ;;  %v10954_v20 = vpop.f32.mrb[96].mxu1 }
 0xe0b   : >> { %v10917_v22 = vpop.f32.mrb[111].mxu0  ;;  %v10955_v63 = vpop.f32.mrb[97].mxu1 }
 0xe0c   : >> { %v10918_v23 = vadd.f32 %v10917_v22, %v10916_v49  ;;  %v10956_v27 = vadd.f32 %v10955_v63, %v10954_v20  ;;  %v14845_v20 = vld [vmem:[%s20668_s19] sm:$0xff]  ;;  %v20991_v63 = vld [vmem:[#allocation375_spill] sm:$0xff] }
 0xe0e   : >> { %v5693_v35 = vadd.f32 %v14844_v44, %v10918_v23  ;;  %v10919_v59 = vpop.f32.mrb[112].mxu0  ;;  %v10957_v26 = vpop.f32.mrb[98].mxu1 }
 0xe0f   : >> { %v10920_v12 = vpop.f32.mrb[113].mxu0  ;;  %v10958_v13 = vpop.f32.mrb[99].mxu1 }
 0xe10   : >> { %v5768_v54 = vadd.f32 %v10956_v27, %v5693_v35  ;;  %v10921_v56 = vadd.f32 %v10920_v12, %v10919_v59  ;;  %v10959_v7 = vadd.f32 %v10958_v13, %v10957_v26  ;;  %v14847_v59 = vld [vmem:[#allocation4] sm:$0x1] }
 0xe11   : >> { %v14848_v26 = vld [vmem:[%s19491_s5] sm:$0xff] }
 0xe12   : >> { %v18014_v50 = vadd.f32 %v5768_v54, %v20989_v19  ;;  %v5698_v61 = vadd.f32 %v14844_v44, %v10921_v56  ;;  %v14846_v19 = vld [vmem:[%s20668_s19 + $0x8] sm:$0xff] }
 0xe14   : >> { %20990 = vst [vmem:[#allocation147_spill] sm:$0xff] %v18014_v50  ;;  %v5773_v29 = vadd.f32 %v10959_v7, %v5698_v61  ;;  %v5858_v49 = vsub.f32 %v18014_v50, %v17987_v58  ;;  %v5778_v22 = vsub.f32 %v18014_v50, %v14845_v20 }
 0xe16   : >> { %v18023_v23 = vadd.f32 %v5773_v29, %v20991_v63  ;;  %v5962_v27 = vsub.f32 %v5858_v49, %v5960_v46  ;;  %v5780_v54 = vmul.f32 %v5778_v22, %v5778_v22  ;;  %v20993_v29 = vld [vmem:[#allocation25_spill] sm:$0xff]  ;;  %v5860_v35 = vmul.f32 %v5858_v49, %v5858_v49 }
 0xe18   : >> { %20992 = vst [vmem:[#allocation150_spill] sm:$0xff] %v18023_v23  ;;  %v5779_v56 = vsub.f32 %v18023_v23, %v14846_v19  ;;  %v5859_v61 = vsub.f32 %v18023_v23, %v17987_v58  ;;  %5966 = vrot.lane.b32.xlu1 %v5962_v27, %s20670_s2  ;;  %v20994_v58 = vld [vmem:[#allocation26_spill] sm:$0xff]  ;;  %v20997_v19 = vld [vmem:[#allocation28_spill] sm:$0xff] }
 0xe1a   : >> { %v5963_v13 = vsub.f32 %v5859_v61, %v5960_v46  ;;  %v5781_v7 = vmul.f32 %v5779_v56, %v5779_v56  ;;  %v5861_v46 = vmul.f32 %v5859_v61, %v5859_v61  ;;  %v14849_v56 = vld [vmem:[%s19491_s5 + $0x8] sm:$0xff] }
 0xe1c   : >> { %5968 = vrot.lane.b32.xlu0 %v5963_v13, %s20670_s2  ;;  %v12815_v44 = vpack.c.bf16 %v5781_v7, %v5780_v54  ;;  %v20999_v13 = vld [vmem:[#allocation32_spill] sm:$0xff]  ;;  %v14851_v54 = vld [vmem:[%s19491_s5 + $0x18] sm:$0xff] }
 0xe1d   : >> { %v14852_v7 = vld [vmem:[%s19491_s5 + $0x20] sm:$0xff] }
 0xe1e   : >> { %12816 = vmatpush3.bf16.msra.mxu0 %v12815_v44  ;;  %v21000_v44 = vld [vmem:[#allocation34_spill] sm:$0xff] }
 0xe1f   : >> { %12818 = vmatprep.subr.bf16.mxu0 %v20993_v29 }
 0xe21   : >> { %11267 = vmatmul.mubr.msk.f32.vlgmr.msra.gmra.mrb[114].mxu0 %vm763_vm1, %v14847_v59  ;;  %v14853_v59 = vld [vmem:[%s19491_s5 + $0x28] sm:$0xff] }
 0xe22   : >> { %12820 = vmatpush3.bf16.msra.mxu0 %v20993_v29  ;;  %11277 = vmatprep.mubr.msk.f32.mxu0 %vm681_vm0, %v5860_v35  ;;  %v21001_v35 = vld [vmem:[#allocation36_spill] sm:$0xff] }
 0xe23   : >> { %12822 = vmatprep.subr.bf16.mxu0 %v20994_v58 }
 0xe26   : >> { %12824 = vmatpush3.bf16.msra.mxu0 %v20994_v58 }
 0xe29   : >> { %11278 = vmatmul.mubr.msk.f32.vlgmr.msra.gmra.mrb[116].mxu0 %vm681_vm0, %v5861_v46  ;;  %v14854_v46 = vld [vmem:[%s19491_s5 + $0x30] sm:$0xff] }
 0xe2a   : >> { %11284 = vmatprep.mubr.msk.f32.mxu0 %vm763_vm1, %v14848_v26  ;;  %v21002_v26 = vld [vmem:[#allocation38_spill] sm:$0xff] }
 0xe8a   : >> { %v5967_v12 = vpop.permute.xlu1 %5966 }
 0xe8b   : >> { %v18045_v22 = vsel %vm681_vm0, %v5858_v49, %v5967_v12  ;;  %v14850_v49 = vld [vmem:[%s19491_s5 + $0x10] sm:$0xff]  ;;  %v21003_v12 = vld [vmem:[#allocation40_spill] sm:$0xff] }
 0xe8c   : >> { %20995 = vst [vmem:[#allocation151_spill] sm:$0xff] %v18045_v22 }
 0xe8e   : >> { %v5969_v20 = vpop.permute.xlu0 %5968 }
 0xe8f   : >> { %v18048_v63 = vsel %vm681_vm0, %v5859_v61, %v5969_v20  ;;  %v20998_v61 = vld [vmem:[#allocation30_spill] sm:$0xff]  ;;  %v14855_v20 = vld [vmem:[%s19491_s5 + $0x38] sm:$0xff] }
 0xe90   : >> { %20996 = vst [vmem:[#allocation152_spill] sm:$0xff] %v18048_v63  ;;  %v12825_v27 = vpack.c.bf16 %v18048_v63, %v18045_v22 }
 0xe92   : >> { %12826 = vmatprep.subr.bf16.mxu0 %v12825_v27 }
 0xe93   : >> { %12828 = vmatpush3.bf16.msra.mxu0 %v12825_v27  ;;  %v14856_v27 = vld [vmem:[%s19491_s5 + $0x40] sm:$0xff] }
 0xe94   : >> { %12846 = vmatprep.subr.bf16.mxu0 %v20997_v19 }
 0xe96   : >> { %11285 = vmatmul.mubr.msk.f32.vlgmr.msra.gmra.mrb[118].mxu0 %vm763_vm1, %v14849_v56  ;;  %v21004_v56 = vld [vmem:[#allocation42_spill] sm:$0xff] }
 0xe97   : >> { %11287 = vmatprep.mubr.msk.f32.mxu0 %vm763_vm1, %v14850_v49  ;;  %12848 = vmatpush1.bf16.msra.mxu0 %v20998_v61  ;;  %v21005_v49 = vld [vmem:[#allocation44_spill] sm:$0xff] }
 0xe98   : >> { %12850 = vmatprep.subr.bf16.mxu0 %v20999_v13 }
 0xe9a   : >> { %11288 = vmatmul.mubr.msk.f32.gmra.mrb[120].mxu0 %vm763_vm1, %v14851_v54  ;;  %v14857_v54 = vld [vmem:[%s19491_s5 + $0x48] sm:$0xff] }
 0xe9b   : >> { %11290 = vmatprep.mubr.msk.f32.mxu0 %vm763_vm1, %v14852_v7  ;;  %12852 = vmatpush1.bf16.msra.mxu0 %v21000_v44  ;;  %v14858_v7 = vld [vmem:[%s19491_s5 + $0x50] sm:$0xff] }
 0xe9c   : >> { %12854 = vmatprep.subr.bf16.mxu0 %v21001_v35 }
 0xe9e   : >> { %11291 = vmatmul.mubr.msk.f32.gmra.mrb[122].mxu0 %vm763_vm1, %v14853_v59  ;;  %v14859_v59 = vld [vmem:[%s19491_s5 + $0x58] sm:$0xff] }
 0xe9f   : >> { %11293 = vmatprep.mubr.msk.f32.mxu0 %vm763_vm1, %v14854_v46  ;;  %12856 = vmatpush1.bf16.msra.mxu0 %v21002_v26  ;;  %v14860_v46 = vld [vmem:[%s19491_s5 + $0x60] sm:$0xff] }
 0xea0   : >> { %12858 = vmatprep.subr.bf16.mxu0 %v21003_v12 }
 0xea2   : >> { %11294 = vmatmul.mubr.msk.f32.gmra.mrb[124].mxu0 %vm763_vm1, %v14855_v20  ;;  %v14861_v20 = vld [vmem:[%s19491_s5 + $0x68] sm:$0xff] }
 0xea3   : >> { %11296 = vmatprep.mubr.msk.f32.mxu0 %vm763_vm1, %v14856_v27  ;;  %12860 = vmatpush1.bf16.msra.mxu0 %v21004_v56  ;;  %v14862_v27 = vld [vmem:[%s19491_s5 + $0x70] sm:$0xff] }
 0xea4   : >> { %12878 = vmatprep.subr.bf16.mxu0 %v21005_v49 }
 0xea6   : >> { %11297 = vmatmul.mubr.msk.f32.gmra.mrb[126].mxu0 %vm763_vm1, %v14857_v54  ;;  %v14863_v54 = vld [vmem:[%s19491_s5 + $0x78] sm:$0xff] }
 0xea7   : >> { %11299 = vmatprep.mubr.msk.f32.mxu0 %vm763_vm1, %v14858_v7 }
 0xeaa   : >> { %11300 = vmatmul.mubr.msk.f32.gmra.mrb[128].mxu0 %vm763_vm1, %v14859_v59  ;;  %v21006_v59 = vld [vmem:[#allocation45_spill] sm:$0xff] }
 0xeab   : >> { %11302 = vmatprep.mubr.msk.f32.mxu0 %vm763_vm1, %v14860_v46  ;;  %v3673_v46 = vmul.f32 0.25, %v21006_v59 }
 0xeae   : >> { %11303 = vmatmul.mubr.msk.f32.gmra.mrb[130].mxu0 %vm763_vm1, %v14861_v20 }
 0xeaf   : >> { %11305 = vmatprep.mubr.msk.f32.mxu0 %vm763_vm1, %v14862_v27 }
 0xeb2   : >> { %11306 = vmatmul.mubr.msk.f32.gmra.mrb[132].mxu0 %vm763_vm1, %v14863_v54 }
 0xeb3   : >> { %6320 = vmatprep.mubr.f32.mxu0 %v20354_v55 }
 0xef4   : >> { %v5848_v7 = vpop.f32.mrb[114].mxu0 }
 0xef5   : >> { %v5852_v49 = vmul.f32 0.5, %v5848_v7  ;;  %v11268_v56 = vpop.f32.mrb[115].mxu0  ;;  %v21008_v7 = vld [vmem:[#allocation376_spill] sm:$0xff] }
 0xef7   : >> { %v18123_v20 = vadd.f32 %v5852_v49, %v3673_v46 }
 0xef9   : >> { %21007 = vst [vmem:[#allocation180_spill] sm:$0xff] %v18123_v20 }
 0xefc   : >> { %v11279_v12 = vpop.f32.mrb[116].mxu0 }
 0xefd   : >> { %v5944_v26 = vsel %vm763_vm1, %v11279_v12, inf  ;;  %v5934_v35 = vpop.f32.mrb[117].mxu0 }
 0xefe   : >> { %v5943_v27 = vsel %vm763_vm1, %v5934_v35, inf }
 0xeff   : >> { %v5945_v44 = vmin.f32 %v5943_v27, %v5944_v26  ;;  %v21011_v27 = vld [vmem:[#allocation47_spill] sm:$0xff] }
 0xf01   : >> { %v5946_v13 = vrot.slane %v5945_v44, 4 }
 0xf03   : >> { %v5947_v61 = vmin.f32 %v5945_v44, %v5946_v13  ;;  %v21010_v44 = vld [vmem:[#allocation46_spill] sm:$0xff] }
 0xf05   : >> { %v5948_v19 = vrot.slane %v5947_v61, 2 }
 0xf07   : >> { %v5949_v54 = vmin.f32 %v5947_v61, %v5948_v19 }
 0xf09   : >> { %v5950_v23 = vrot.slane %v5949_v54, 1 }
 0xf0b   : >> { %v5951_v50 = vmin.f32 %v5949_v54, %v5950_v23 }
 0xf0d   : >> { %v5952_v58 = vsub.f32 0.0025, %v5951_v50  ;;  %v10634_v48 = vadd.f32 -0.0625, %v5951_v50 }
 0xf0f   : >> { %v5953_v59 = vmax.f32 %v5952_v58, 0.0  ;;  %v5956_v49 = vmax.f32 %v10634_v48, 0.0 }
 0xf11   : >> { %v5954_v56 = vadd.f32 %v5953_v59, %v21008_v7  ;;  %v21012_v59 = vld [vmem:[#allocation48_spill] sm:$0xff]  ;;  %v21013_v7 = vld [vmem:[#allocation49_spill] sm:$0xff] }
 0xf13   : >> { %v18128_v46 = vadd.f32 %v5956_v49, %v5954_v56  ;;  %v21014_v49 = vld [vmem:[#allocation50_spill] sm:$0xff] }
 0xf15   : >> { %21009 = vst [vmem:[#allocation374_spill] sm:$0xff] %v18128_v46  ;;  %v21017_v46 = vld [vmem:[#allocation53_spill] sm:$0xff] }
 0xf69   : >> { %v18130_v20 = vpop.f32.mrb[118].mxu0 }
 0xf6a   : >> { %v18132_v12 = vpop.f32.mrb[119].mxu0 }
 0xf6d   : >> { %v18134_v35 = vpop.f32.mrb[120].mxu0 }
 0xf6e   : >> { %v18136_v26 = vpop.f32.mrb[121].mxu0 }
 0xf71   : >> { %v18138_v13 = vpop.f32.mrb[122].mxu0 }
 0xf72   : >> { %v18140_v19 = vpop.f32.mrb[123].mxu0 }
 0xf75   : >> { %v18142_v23 = vpop.f32.mrb[124].mxu0 }
 0xf76   : >> { %v18144_v50 = vpop.f32.mrb[125].mxu0 }
 0xf79   : >> { %v11298_v58 = vpop.f32.mrb[126].mxu0 }
 0xf7a   : >> { %v6080_v48 = vpop.f32.mrb[127].mxu0 }
 0xf7b   : >> { %10651 = vmatmul.mubr.msk.f32.vlgmr.msra.gmra.mrb[100].mxu1 %vm1068_vm2, %v6080_v48  ;;  %10659 = vmatmul.mubr.msk.f32.vlgmr.msra.gmra.mrb[134].mxu0 %vm1068_vm2, %v6080_v48  ;;  %v21015_v48 = vld [vmem:[#allocation51_spill] sm:$0xff] }
 0xf7c   : >> { %6213 = vmatprep.mubr.f32.mxu1 %v20354_v55  ;;  %6326 = vmatprep.mubr.f32.mxu0 %v20354_v55 }
 0xf7d   : >> { %v11301_v61 = vpop.f32.mrb[128].mxu0  ;;  %12864 = vmatpush1.bf16.msra.mxu1 %v21010_v44  ;;  %12880 = vmatpush1.bf16.msra.mxu0 %v21011_v27  ;;  %v21016_v27 = vld [vmem:[#allocation52_spill] sm:$0xff] }
 0xf7e   : >> { %v6090_v54 = vpop.f32.mrb[129].mxu0  ;;  %12866 = vmatprep.subr.bf16.mxu1 %v21012_v59  ;;  %12882 = vmatprep.subr.bf16.mxu0 %v21013_v7  ;;  %v21018_v7 = vld [vmem:[#allocation54_spill] sm:$0xff]  ;;  %v21019_v59 = vld [vmem:[#allocation55_spill] sm:$0xff] }
 0xf7f   : >> { %10652 = vmatmul.mubr.msk.f32.gmra.mrb[102].mxu1 %vm1068_vm2, %v11298_v58  ;;  %10660 = vmatmul.mubr.msk.f32.gmra.mrb[136].mxu0 %vm1068_vm2, %v11298_v58 }
 0xf80   : >> { %6219 = vmatprep.mubr.f32.mxu1 %v20354_v55  ;;  %6332 = vmatprep.mubr.f32.mxu0 %v20354_v55 }
 0xf81   : >> { %v11304_v56 = vpop.f32.mrb[130].mxu0  ;;  %12868 = vmatpush1.bf16.msra.mxu1 %v21014_v49  ;;  %12884 = vmatpush1.bf16.msra.mxu0 %v21015_v48  ;;  %v21020_v48 = vld [vmem:[#allocation56_spill] sm:$0xff] }
 0xf82   : >> { %v6100_v44 = vpop.f32.mrb[131].mxu0  ;;  %12870 = vmatprep.subr.bf16.mxu1 %v21016_v27  ;;  %12886 = vmatprep.subr.bf16.mxu0 %v21017_v46  ;;  %v21023_v46 = vld [vmem:[#allocation59_spill] sm:$0xff] }
 0xf83   : >> { %10653 = vmatmul.mubr.msk.f32.gmra.mrb[104].mxu1 %vm1068_vm2, %v6090_v54  ;;  %10661 = vmatmul.mubr.msk.f32.gmra.mrb[138].mxu0 %vm1068_vm2, %v6090_v54  ;;  %v21022_v54 = vld [vmem:[#allocation58_spill] sm:$0xff] }
 0xf84   : >> { %6225 = vmatprep.mubr.f32.mxu1 %v20354_v55  ;;  %6338 = vmatprep.mubr.f32.mxu0 %v20354_v55 }
 0xf85   : >> { %v11307_v58 = vpop.f32.mrb[132].mxu0  ;;  %12872 = vmatpush1.bf16.msra.mxu1 %v21018_v7  ;;  %12888 = vmatpush1.bf16.msra.mxu0 %v21019_v59  ;;  %v21024_v7 = vld [vmem:[#allocation60_spill] sm:$0xff]  ;;  %v21025_v59 = vld [vmem:[#allocation61_spill] sm:$0xff] }
 0xf86   : >> { %v6110_v49 = vpop.f32.mrb[133].mxu0  ;;  %12874 = vmatprep.subr.bf16.mxu1 %v21020_v48  ;;  %12890 = vmatprep.subr.bf16.mxu0 %v21021_v4  ;;  %v21092_v48 = vld [vmem:[#allocation128_spill] sm:$0xff] }
 0xf87   : >> { %10654 = vmatmul.mubr.msk.f32.gmra.mrb[106].mxu1 %vm1068_vm2, %v11301_v61  ;;  %10662 = vmatmul.mubr.msk.f32.gmra.mrb[140].mxu0 %vm1068_vm2, %v11301_v61  ;;  %v21026_v61 = vld [vmem:[#allocation62_spill] sm:$0xff] }
 0xf88   : >> { %6231 = vmatprep.mubr.f32.mxu1 %v20354_v55  ;;  %6344 = vmatprep.mubr.f32.mxu0 %v20354_v55 }
 0xf89   : >> { %12876 = vmatpush1.bf16.msra.mxu1 %v21022_v54  ;;  %12892 = vmatpush1.bf16.msra.mxu0 %v21023_v46 }
 0xf8a   : >> { %12894 = vmatprep.subr.bf16.mxu1 %v21024_v7  ;;  %13022 = vmatprep.subr.bf16.mxu0 %v21025_v59  ;;  %v21090_v7 = vld [vmem:[#allocation126_spill] sm:$0xff] }
 0xf8b   : >> { %10655 = vmatmul.mubr.msk.f32.gmra.mrb[108].mxu1 %vm1068_vm2, %v6100_v44  ;;  %10663 = vmatmul.mubr.msk.f32.gmra.mrb[142].mxu0 %vm1068_vm2, %v6100_v44  ;;  %v21027_v44 = vld [vmem:[#allocation63_spill] sm:$0xff] }
 0xf8c   : >> { %6237 = vmatprep.mubr.f32.mxu1 %v20354_v55  ;;  %6350 = vmatprep.mubr.f32.mxu0 %v20354_v55 }
 0xf8f   : >> { %10656 = vmatmul.mubr.msk.f32.gmra.mrb[110].mxu1 %vm1068_vm2, %v11304_v56  ;;  %10664 = vmatmul.mubr.msk.f32.gmra.mrb[144].mxu0 %vm1068_vm2, %v11304_v56  ;;  %v21028_v56 = vld [vmem:[#allocation64_spill] sm:$0xff] }
 0xf90   : >> { %6243 = vmatprep.mubr.f32.mxu1 %v20354_v55  ;;  %6356 = vmatprep.mubr.f32.mxu0 %v20354_v55 }
 0xf93   : >> { %10657 = vmatmul.mubr.msk.f32.gmra.mrb[112].mxu1 %vm1068_vm2, %v6110_v49  ;;  %10665 = vmatmul.mubr.msk.f32.gmra.mrb[146].mxu0 %vm1068_vm2, %v6110_v49  ;;  %v21029_v49 = vld [vmem:[#allocation65_spill] sm:$0xff] }
 0xf94   : >> { %6249 = vmatprep.mubr.f32.mxu1 %v20354_v55  ;;  %6362 = vmatprep.mubr.f32.mxu0 %v20354_v55 }
 0xf97   : >> { %10658 = vmatmul.mubr.msk.f32.gmra.mrb[114].mxu1 %vm1068_vm2, %v11307_v58  ;;  %10666 = vmatmul.mubr.msk.f32.gmra.mrb[148].mxu0 %vm1068_vm2, %v11307_v58  ;;  %v21031_v58 = vld [vmem:[#allocation67_spill] sm:$0xff] }
 0xf98   : >> { %6457 = vmatprep.mubr.f32.mxu1 %v20354_v55  ;;  %6570 = vmatprep.mubr.f32.mxu0 %v20354_v55 }
 0xf9b   : >> { %10667 = vmatmul.mubr.msk.f32.vlgmr.msra.gmra.mrb[100].mxu1 %vm1068_vm2, %v18132_v12  ;;  %10675 = vmatmul.mubr.msk.f32.vlgmr.msra.gmra.mrb[134].mxu0 %vm1068_vm2, %v18132_v12  ;;  %v21030_v12 = vld [vmem:[#allocation66_spill] sm:$0xff] }
 0xf9c   : >> { %6463 = vmatprep.mubr.f32.mxu1 %v20354_v55  ;;  %6576 = vmatprep.mubr.f32.mxu0 %v20354_v55 }
 0xf9d   : >> { %12896 = vmatpush1.bf16.msra.mxu1 %v21026_v61  ;;  %13024 = vmatpush1.bf16.msra.mxu0 %v21027_v44  ;;  %v21032_v61 = vld [vmem:[#allocation68_spill] sm:$0xff]  ;;  %v21033_v44 = vld [vmem:[#allocation69_spill] sm:$0xff] }
 0xf9e   : >> { %12898 = vmatprep.subr.bf16.mxu1 %v21028_v56  ;;  %13026 = vmatprep.subr.bf16.mxu0 %v21029_v49  ;;  %v21035_v49 = vld [vmem:[#allocation71_spill] sm:$0xff] }
 0xf9f   : >> { %10668 = vmatmul.mubr.msk.f32.gmra.mrb[102].mxu1 %vm1068_vm2, %v18130_v20  ;;  %10676 = vmatmul.mubr.msk.f32.gmra.mrb[136].mxu0 %vm1068_vm2, %v18130_v20  ;;  %v21034_v20 = vld [vmem:[#allocation70_spill] sm:$0xff] }
 0xfa0   : >> { %6469 = vmatprep.mubr.f32.mxu1 %v20354_v55  ;;  %6582 = vmatprep.mubr.f32.mxu0 %v20354_v55 }
 0xfa1   : >> { %12900 = vmatpush1.bf16.msra.mxu1 %v21030_v12  ;;  %13028 = vmatpush1.bf16.msra.mxu0 %v21031_v58  ;;  %v21036_v12 = vld [vmem:[#allocation72_spill] sm:$0xff]  ;;  %v21037_v58 = vld [vmem:[#allocation73_spill] sm:$0xff] }
 0xfa2   : >> { %12902 = vmatprep.subr.bf16.mxu1 %v21032_v61  ;;  %13030 = vmatprep.subr.bf16.mxu0 %v21033_v44  ;;  %v21039_v44 = vld [vmem:[#allocation75_spill] sm:$0xff] }
 0xfa3   : >> { %10669 = vmatmul.mubr.msk.f32.gmra.mrb[104].mxu1 %vm1068_vm2, %v18136_v26  ;;  %10677 = vmatmul.mubr.msk.f32.gmra.mrb[138].mxu0 %vm1068_vm2, %v18136_v26  ;;  %v21038_v26 = vld [vmem:[#allocation74_spill] sm:$0xff] }
 0xfa4   : >> { %6475 = vmatprep.mubr.f32.mxu1 %v20354_v55  ;;  %6588 = vmatprep.mubr.f32.mxu0 %v20354_v55 }
 0xfa5   : >> { %12904 = vmatpush1.bf16.msra.mxu1 %v21034_v20  ;;  %13032 = vmatpush1.bf16.msra.mxu0 %v21035_v49  ;;  %v21040_v20 = vld [vmem:[#allocation76_spill] sm:$0xff]  ;;  %v21041_v49 = vld [vmem:[#allocation77_spill] sm:$0xff] }
 0xfa6   : >> { %12906 = vmatprep.subr.bf16.mxu1 %v21036_v12  ;;  %13034 = vmatprep.subr.bf16.mxu0 %v21037_v58  ;;  %v21043_v58 = vld [vmem:[#allocation79_spill] sm:$0xff] }
 0xfa7   : >> { %10670 = vmatmul.mubr.msk.f32.gmra.mrb[106].mxu1 %vm1068_vm2, %v18134_v35  ;;  %10678 = vmatmul.mubr.msk.f32.gmra.mrb[140].mxu0 %vm1068_vm2, %v18134_v35  ;;  %v21042_v35 = vld [vmem:[#allocation78_spill] sm:$0xff]  ;;  %v21063_v12 = vld [vmem:[#allocation99_spill] sm:$0xff] }
 0xfa8   : >> { %6481 = vmatprep.mubr.f32.mxu1 %v20354_v55  ;;  %6594 = vmatprep.mubr.f32.mxu0 %v20354_v55 }
 0xfa9   : >> { %12908 = vmatpush1.bf16.msra.mxu1 %v21038_v26  ;;  %13036 = vmatpush1.bf16.msra.mxu0 %v21039_v44  ;;  %v21044_v26 = vld [vmem:[#allocation80_spill] sm:$0xff]  ;;  %v21045_v44 = vld [vmem:[#allocation81_spill] sm:$0xff] }
 0xfaa   : >> { %12910 = vmatprep.subr.bf16.mxu1 %v21040_v20  ;;  %13038 = vmatprep.subr.bf16.mxu0 %v21041_v49  ;;  %v21047_v49 = vld [vmem:[#allocation83_spill] sm:$0xff]  ;;  %v21062_v20 = vld [vmem:[#allocation98_spill] sm:$0xff] }
 0xfab   : >> { %10671 = vmatmul.mubr.msk.f32.gmra.mrb[108].mxu1 %vm1068_vm2, %v18140_v19  ;;  %10679 = vmatmul.mubr.msk.f32.gmra.mrb[142].mxu0 %vm1068_vm2, %v18140_v19  ;;  %v21046_v19 = vld [vmem:[#allocation82_spill] sm:$0xff] }
 0xfac   : >> { %6487 = vmatprep.mubr.f32.mxu1 %v20354_v55  ;;  %6600 = vmatprep.mubr.f32.mxu0 %v20354_v55 }
 0xfad   : >> { %12912 = vmatpush1.bf16.msra.mxu1 %v21042_v35  ;;  %13040 = vmatpush1.bf16.msra.mxu0 %v21043_v58  ;;  %v21048_v35 = vld [vmem:[#allocation84_spill] sm:$0xff]  ;;  %v21049_v58 = vld [vmem:[#allocation85_spill] sm:$0xff] }
 0xfae   : >> { %12914 = vmatprep.subr.bf16.mxu1 %v21044_v26  ;;  %13042 = vmatprep.subr.bf16.mxu0 %v21045_v44  ;;  %v21051_v44 = vld [vmem:[#allocation87_spill] sm:$0xff]  ;;  %v21057_v26 = vld [vmem:[#allocation93_spill] sm:$0xff] }
 0xfaf   : >> { %10672 = vmatmul.mubr.msk.f32.gmra.mrb[110].mxu1 %vm1068_vm2, %v18138_v13  ;;  %10680 = vmatmul.mubr.msk.f32.gmra.mrb[144].mxu0 %vm1068_vm2, %v18138_v13  ;;  %v21050_v13 = vld [vmem:[#allocation86_spill] sm:$0xff] }
 0xfb0   : >> { %6493 = vmatprep.mubr.f32.mxu1 %v20354_v55  ;;  %6606 = vmatprep.mubr.f32.mxu0 %v20354_v55 }
 0xfb1   : >> { %12916 = vmatpush1.bf16.msra.mxu1 %v21046_v19  ;;  %13044 = vmatpush1.bf16.msra.mxu0 %v21047_v49  ;;  %v21052_v19 = vld [vmem:[#allocation88_spill] sm:$0xff]  ;;  %v21053_v49 = vld [vmem:[#allocation89_spill] sm:$0xff] }
 0xfb2   : >> { %12918 = vmatprep.subr.bf16.mxu1 %v21048_v35  ;;  %13046 = vmatprep.subr.bf16.mxu0 %v21049_v58  ;;  %v21054_v58 = vld [vmem:[#allocation90_spill] sm:$0xff]  ;;  %v21056_v35 = vld [vmem:[#allocation92_spill] sm:$0xff] }
 0xfb3   : >> { %10673 = vmatmul.mubr.msk.f32.gmra.mrb[112].mxu1 %vm1068_vm2, %v18144_v50  ;;  %10681 = vmatmul.mubr.msk.f32.gmra.mrb[146].mxu0 %vm1068_vm2, %v18144_v50  ;;  %v21055_v50 = vld [vmem:[#allocation91_spill] sm:$0xff] }
 0xfb4   : >> { %6499 = vmatprep.mubr.f32.mxu1 %v20354_v55  ;;  %6612 = vmatprep.mubr.f32.mxu0 %v20354_v55 }
 0xfb5   : >> { %12920 = vmatpush1.bf16.msra.mxu1 %v21050_v13  ;;  %13048 = vmatpush1.bf16.msra.mxu0 %v21051_v44  ;;  %v21058_v13 = vld [vmem:[#allocation94_spill] sm:$0xff]  ;;  %v21059_v44 = vld [vmem:[#allocation95_spill] sm:$0xff] }
 0xfb6   : >> { %12922 = vmatprep.subr.bf16.mxu1 %v21052_v19  ;;  %13050 = vmatprep.subr.bf16.mxu0 %v21053_v49  ;;  %v21060_v19 = vld [vmem:[#allocation96_spill] sm:$0xff]  ;;  %v21061_v49 = vld [vmem:[#allocation97_spill] sm:$0xff] }
 0xfb7   : >> { %10674 = vmatmul.mubr.msk.f32.gmra.mrb[114].mxu1 %vm1068_vm2, %v18142_v23  ;;  %10682 = vmatmul.mubr.msk.f32.gmra.mrb[148].mxu0 %vm1068_vm2, %v18142_v23  ;;  %v21064_v23 = vld [vmem:[#allocation100_spill] sm:$0xff] }
 0xfb9   : >> { %12924 = vmatpush1.bf16.msra.mxu1 %v21054_v58  ;;  %13052 = vmatpush1.bf16.msra.mxu0 %v21055_v50  ;;  %v21065_v58 = vld [vmem:[#allocation101_spill] sm:$0xff]  ;;  %v21066_v50 = vld [vmem:[#allocation102_spill] sm:$0xff] }
 0xfba   : >> { %12926 = vmatprep.subr.bf16.mxu1 %v21056_v35  ;;  %13054 = vmatprep.subr.bf16.mxu0 %v21057_v26  ;;  %v21067_v35 = vld [vmem:[#allocation103_spill] sm:$0xff]  ;;  %v21068_v26 = vld [vmem:[#allocation104_spill] sm:$0xff] }
 0xfbd   : >> { %12928 = vmatpush1.bf16.msra.mxu1 %v21058_v13  ;;  %13056 = vmatpush1.bf16.msra.mxu0 %v21059_v44  ;;  %v21069_v13 = vld [vmem:[#allocation105_spill] sm:$0xff]  ;;  %v21070_v44 = vld [vmem:[#allocation106_spill] sm:$0xff] }
 0xfbe   : >> { %12930 = vmatprep.subr.bf16.mxu1 %v21060_v19  ;;  %13058 = vmatprep.subr.bf16.mxu0 %v21061_v49  ;;  %v21071_v19 = vld [vmem:[#allocation107_spill] sm:$0xff]  ;;  %v21072_v49 = vld [vmem:[#allocation108_spill] sm:$0xff] }
 0xfc1   : >> { %12932 = vmatpush1.bf16.msra.mxu1 %v21062_v20  ;;  %13060 = vmatpush1.bf16.msra.mxu0 %v21063_v12  ;;  %v21073_v20 = vld [vmem:[#allocation109_spill] sm:$0xff]  ;;  %v21074_v12 = vld [vmem:[#allocation110_spill] sm:$0xff] }
 0xfc2   : >> { %12934 = vmatprep.subr.bf16.mxu1 %v21064_v23  ;;  %13062 = vmatprep.subr.bf16.mxu0 %v21065_v58  ;;  %v21075_v23 = vld [vmem:[#allocation111_spill] sm:$0xff]  ;;  %v21076_v58 = vld [vmem:[#allocation112_spill] sm:$0xff] }
 0xfc5   : >> { %12936 = vmatpush1.bf16.msra.mxu1 %v21066_v50  ;;  %13064 = vmatpush1.bf16.msra.mxu0 %v21067_v35  ;;  %v21077_v50 = vld [vmem:[#allocation113_spill] sm:$0xff]  ;;  %v21078_v35 = vld [vmem:[#allocation114_spill] sm:$0xff] }
 0xfc6   : >> { %12938 = vmatprep.subr.bf16.mxu1 %v21068_v26  ;;  %13066 = vmatprep.subr.bf16.mxu0 %v21069_v13  ;;  %v21079_v26 = vld [vmem:[#allocation115_spill] sm:$0xff]  ;;  %v21080_v13 = vld [vmem:[#allocation116_spill] sm:$0xff] }
 0xfc9   : >> { %12940 = vmatpush1.bf16.msra.mxu1 %v21070_v44  ;;  %13068 = vmatpush1.bf16.msra.mxu0 %v21071_v19  ;;  %v21081_v44 = vld [vmem:[#allocation117_spill] sm:$0xff]  ;;  %v21082_v19 = vld [vmem:[#allocation118_spill] sm:$0xff] }
 0xfca   : >> { %12942 = vmatprep.subr.bf16.mxu1 %v21072_v49  ;;  %13070 = vmatprep.subr.bf16.mxu0 %v21073_v20  ;;  %v21083_v49 = vld [vmem:[#allocation119_spill] sm:$0xff]  ;;  %v21084_v20 = vld [vmem:[#allocation120_spill] sm:$0xff] }
 0xfcd   : >> { %12944 = vmatpush1.bf16.msra.mxu1 %v21074_v12  ;;  %13072 = vmatpush1.bf16.msra.mxu0 %v21075_v23  ;;  %v21085_v12 = vld [vmem:[#allocation121_spill] sm:$0xff]  ;;  %v21086_v23 = vld [vmem:[#allocation122_spill] sm:$0xff] }
 0xfce   : >> { %12946 = vmatprep.subr.bf16.mxu1 %v21076_v58  ;;  %13074 = vmatprep.subr.bf16.mxu0 %v21077_v50  ;;  %v21087_v58 = vld [vmem:[#allocation123_spill] sm:$0xff]  ;;  %v21088_v50 = vld [vmem:[#allocation124_spill] sm:$0xff] }
 0xfd1   : >> { %12948 = vmatpush1.bf16.msra.mxu1 %v21078_v35  ;;  %13076 = vmatpush1.bf16.msra.mxu0 %v21079_v26  ;;  %v21089_v35 = vld [vmem:[#allocation125_spill] sm:$0xff] }
 0xfd2   : >> { %12950 = vmatprep.subr.bf16.mxu1 %v21080_v13  ;;  %13078 = vmatprep.subr.bf16.mxu0 %v21081_v44 }
 0xfd5   : >> { %12952 = vmatpush1.bf16.msra.mxu1 %v21082_v19  ;;  %13080 = vmatpush1.bf16.msra.mxu0 %v21083_v49 }
 0xfd6   : >> { %12954 = vmatprep.subr.bf16.mxu1 %v21084_v20  ;;  %13082 = vmatprep.subr.bf16.mxu0 %v21085_v12 }
 0xfd9   : >> { %12956 = vmatpush1.bf16.msra.mxu1 %v21086_v23  ;;  %13084 = vmatpush1.bf16.msra.mxu0 %v21087_v58 }
 0xfda   : >> { %12958 = vmatprep.subr.bf16.mxu1 %v21088_v50  ;;  %13086 = vmatprep.subr.bf16.mxu0 %v21089_v35 }
0x106e   : >> { %v6459_v26 = vpop.f32.mrb[100].mxu1  ;;  %v18304_v13 = vpop.f32.mrb[134].mxu0 }
0x106f   : >> { %v6619_v44 = vadd.f32 %v6459_v26, %v16167_v39  ;;  %v6461_v19 = vpop.f32.mrb[101].mxu1  ;;  %v18307_v61 = vpop.f32.mrb[135].mxu0 }
0x1070   : >> { %v6620_v20 = vadd.f32 %v6461_v19, %v16171_v42  ;;  %v21091_v19 = vld [vmem:[#allocation127_spill] sm:$0xff] }
0x1071   : >> { %v6651_v23 = vmax.f32 %v6619_v44, 0.0 }
0x1072   : >> { %v6652_v49 = vmax.f32 %v6620_v20, 0.0  ;;  %v6465_v12 = vpop.f32.mrb[102].mxu1  ;;  %v18310_v56 = vpop.f32.mrb[136].mxu0 }
0x1073   : >> { %v6623_v58 = vadd.f32 %v6465_v12, %v16167_v39  ;;  %v6467_v50 = vpop.f32.mrb[103].mxu1  ;;  %v18313_v59 = vpop.f32.mrb[137].mxu0 }
0x1074   : >> { %v6624_v35 = vadd.f32 %v6467_v50, %v16171_v42  ;;  %6747 = vmatprep.mubr.f32.mxu1 %v6652_v49  ;;  %6973 = vmatprep.mubr.f32.mxu0 %v6652_v49  ;;  %v21093_v50 = vld [vmem:[#allocation129_spill] sm:$0xff] }
0x1075   : >> { %6748 = vmatmul.mubr.f32.vlgmr.msra.gmra.mrb[116].mxu1 %v6651_v23  ;;  %6974 = vmatmul.mubr.f32.vlgmr.msra.gmra.mrb[150].mxu0 %v6651_v23  ;;  %v6655_v44 = vmax.f32 %v6623_v58, 0.0  ;;  %v21094_v23 = vld [vmem:[#allocation130_spill] sm:$0xff] }
0x1076   : >> { %v6656_v26 = vmax.f32 %v6624_v35, 0.0  ;;  %12960 = vmatpush1.bf16.msra.mxu1 %v21090_v7  ;;  %13088 = vmatpush1.bf16.msra.mxu0 %v21091_v19  ;;  %v6471_v20 = vpop.f32.mrb[104].mxu1  ;;  %v18318_v46 = vpop.f32.mrb[138].mxu0  ;;  %v21095_v19 = vld [vmem:[#allocation131_spill] sm:$0xff] }
0x1077   : >> { %v6627_v12 = vadd.f32 %v6471_v20, %v16167_v39  ;;  %v6473_v54 = vpop.f32.mrb[105].mxu1  ;;  %v18321_v4 = vpop.f32.mrb[139].mxu0  ;;  %12962 = vmatprep.subr.bf16.mxu1 %v21092_v48  ;;  %13090 = vmatprep.subr.bf16.mxu0 %v21093_v50  ;;  %v21096_v50 = vld [vmem:[#allocation132_spill] sm:$0xff] }
0x1078   : >> { %v6628_v49 = vadd.f32 %v6473_v54, %v16171_v42  ;;  %6753 = vmatprep.mubr.f32.mxu1 %v6656_v26  ;;  %6979 = vmatprep.mubr.f32.mxu0 %v6656_v26  ;;  %v21097_v54 = vld [vmem:[#allocation133_spill] sm:$0xff] }
0x1079   : >> { %6754 = vmatmul.mubr.f32.gmra.mrb[118].mxu1 %v6655_v44  ;;  %6980 = vmatmul.mubr.f32.gmra.mrb[152].mxu0 %v6655_v44  ;;  %v6659_v7 = vmax.f32 %v6627_v12, 0.0 }
0x107a   : >> { %v6660_v35 = vmax.f32 %v6628_v49, 0.0  ;;  %12964 = vmatpush1.bf16.msra.mxu1 %v21094_v23  ;;  %13092 = vmatpush1.bf16.msra.mxu0 %v21095_v19  ;;  %v6477_v58 = vpop.f32.mrb[106].mxu1  ;;  %v18328_v20 = vpop.f32.mrb[140].mxu0  ;;  %v21098_v49 = vld [vmem:[#allocation134_spill] sm:$0xff]  ;;  %v21099_v19 = vld [vmem:[#allocation135_spill] sm:$0xff] }
0x107b   : >> { %v6631_v27 = vadd.f32 %v6477_v58, %v16167_v39  ;;  %v6479_v48 = vpop.f32.mrb[107].mxu1  ;;  %v18331_v14 = vpop.f32.mrb[141].mxu0  ;;  %12966 = vmatprep.subr.bf16.mxu1 %v21096_v50  ;;  %13094 = vmatprep.subr.bf16.mxu0 %v21097_v54  ;;  %v21100_v54 = vld [vmem:[#allocation136_spill] sm:$0xff] }
0x107c   : >> { %v6632_v26 = vadd.f32 %v6479_v48, %v16171_v42  ;;  %6759 = vmatprep.mubr.f32.mxu1 %v6660_v35  ;;  %6985 = vmatprep.mubr.f32.mxu0 %v6660_v35  ;;  %v21101_v48 = vld [vmem:[#allocation137_spill] sm:$0xff] }
0x107d   : >> { %6760 = vmatmul.mubr.f32.gmra.mrb[120].mxu1 %v6659_v7  ;;  %6986 = vmatmul.mubr.f32.gmra.mrb[154].mxu0 %v6659_v7  ;;  %v6663_v23 = vmax.f32 %v6631_v27, 0.0 }
0x107e   : >> { %v6664_v44 = vmax.f32 %v6632_v26, 0.0  ;;  %12968 = vmatpush1.bf16.msra.mxu1 %v21098_v49  ;;  %13096 = vmatpush1.bf16.msra.mxu0 %v21099_v19  ;;  %v6483_v12 = vpop.f32.mrb[108].mxu1  ;;  %v18338_v58 = vpop.f32.mrb[142].mxu0  ;;  %v21102_v26 = vld [vmem:[#allocation138_spill] sm:$0xff]  ;;  %v21103_v19 = vld [vmem:[#allocation139_spill] sm:$0xff] }
0x107f   : >> { %v6635_v29 = vadd.f32 %v6483_v12, %v16167_v39  ;;  %v6485_v50 = vpop.f32.mrb[109].mxu1  ;;  %v18341_v63 = vpop.f32.mrb[143].mxu0  ;;  %12970 = vmatprep.subr.bf16.mxu1 %v21100_v54  ;;  %13098 = vmatprep.subr.bf16.mxu0 %v21101_v48  ;;  %v21104_v48 = vld [vmem:[#allocation140_spill] sm:$0xff] }
0x1080   : >> { %v6636_v7 = vadd.f32 %v6485_v50, %v16171_v42  ;;  %6765 = vmatprep.mubr.f32.mxu1 %v6664_v44  ;;  %6991 = vmatprep.mubr.f32.mxu0 %v6664_v44  ;;  %v21105_v50 = vld [vmem:[#allocation141_spill] sm:$0xff] }
0x1081   : >> { %6766 = vmatmul.mubr.f32.gmra.mrb[122].mxu1 %v6663_v23  ;;  %6992 = vmatmul.mubr.f32.gmra.mrb[156].mxu0 %v6663_v23  ;;  %v6667_v49 = vmax.f32 %v6635_v29, 0.0 }
0x1082   : >> { %v6668_v35 = vmax.f32 %v6636_v7, 0.0  ;;  %12972 = vmatpush1.bf16.msra.mxu1 %v21102_v26  ;;  %13100 = vmatpush1.bf16.msra.mxu0 %v21103_v19  ;;  %v6489_v27 = vpop.f32.mrb[110].mxu1  ;;  %v18348_v12 = vpop.f32.mrb[144].mxu0  ;;  %v21106_v7 = vld [vmem:[#allocation142_spill] sm:$0xff]  ;;  %v21107_v19 = vld [vmem:[#allocation143_spill] sm:$0xff] }
0x1083   : >> { %v6639_v22 = vadd.f32 %v6489_v27, %v16167_v39  ;;  %v6491_v54 = vpop.f32.mrb[111].mxu1  ;;  %v18351_v28 = vpop.f32.mrb[145].mxu0  ;;  %12974 = vmatprep.subr.bf16.mxu1 %v21104_v48  ;;  %13102 = vmatprep.subr.bf16.mxu0 %v21105_v50  ;;  %v21108_v50 = vld [vmem:[#allocation144_spill] sm:$0xff] }
0x1084   : >> { %v6640_v23 = vadd.f32 %v6491_v54, %v16171_v42  ;;  %6771 = vmatprep.mubr.f32.mxu1 %v6668_v35  ;;  %6997 = vmatprep.mubr.f32.mxu0 %v6668_v35  ;;  %v21109_v54 = vld [vmem:[#allocation145_spill] sm:$0xff] }
0x1085   : >> { %6772 = vmatmul.mubr.f32.gmra.mrb[124].mxu1 %v6667_v49  ;;  %6998 = vmatmul.mubr.f32.gmra.mrb[158].mxu0 %v6667_v49  ;;  %v6671_v26 = vmax.f32 %v6639_v22, 0.0 }
0x1086   : >> { %v6672_v44 = vmax.f32 %v6640_v23, 0.0  ;;  %12976 = vmatpush1.bf16.msra.mxu1 %v21106_v7  ;;  %13104 = vmatpush1.bf16.msra.mxu0 %v21107_v19  ;;  %v6495_v29 = vpop.f32.mrb[112].mxu1  ;;  %v18358_v27 = vpop.f32.mrb[146].mxu0  ;;  %v21110_v23 = vld [vmem:[#allocation148_spill] sm:$0xff] }
0x1087   : >> { %v6643_v34 = vadd.f32 %v6495_v29, %v16167_v39  ;;  %v6497_v48 = vpop.f32.mrb[113].mxu1  ;;  %v18361_v16 = vpop.f32.mrb[147].mxu0  ;;  %12978 = vmatprep.subr.bf16.mxu1 %v21108_v50  ;;  %13106 = vmatprep.subr.bf16.mxu0 %v21109_v54  ;;  %v21111_v54 = vld [vmem:[#allocation149_spill] sm:$0xff] }
0x1088   : >> { %v6644_v49 = vadd.f32 %v6497_v48, %v16171_v42  ;;  %6777 = vmatprep.mubr.f32.mxu1 %v6672_v44  ;;  %7003 = vmatprep.mubr.f32.mxu0 %v6672_v44 }
0x1089   : >> { %6778 = vmatmul.mubr.f32.gmra.mrb[126].mxu1 %v6671_v26  ;;  %7004 = vmatmul.mubr.f32.gmra.mrb[160].mxu0 %v6671_v26  ;;  %v6675_v19 = vmax.f32 %v6643_v34, 0.0  ;;  %v6622_v26 = vadd.f32 %v18307_v61, %v16288_v36  ;;  %v21114_v61 = vld [vmem:[#allocation155_spill] sm:$0xff] }
0x108a   : >> { %v6676_v35 = vmax.f32 %v6644_v49, 0.0  ;;  %12980 = vmatpush1.bf16.msra.mxu1 %v20780_v33  ;;  %13108 = vmatpush1.bf16.msra.mxu0 %v21110_v23  ;;  %v6501_v22 = vpop.f32.mrb[114].mxu1  ;;  %v18368_v29 = vpop.f32.mrb[148].mxu0  ;;  %v21112_v49 = vld [vmem:[#allocation153_spill] sm:$0xff] }
0x108b   : >> { %v6647_v7 = vadd.f32 %v6501_v22, %v16167_v39  ;;  %v6503_v50 = vpop.f32.mrb[115].mxu1  ;;  %v18371_v31 = vpop.f32.mrb[149].mxu0  ;;  %12982 = vmatprep.subr.bf16.mxu1 %v21111_v54  ;;  %13110 = vmatprep.subr.bf16.mxu0 %v20783_v53  ;;  %v21116_v22 = vld [vmem:[#allocation157_spill] sm:$0xff] }
0x108c   : >> { %v6648_v48 = vadd.f32 %v6503_v50, %v16171_v42  ;;  %6783 = vmatprep.mubr.f32.mxu1 %v6676_v35  ;;  %7009 = vmatprep.mubr.f32.mxu0 %v6676_v35  ;;  %v6654_v50 = vmax.f32 %v6622_v26, 0.0  ;;  %v21113_v35 = vld [vmem:[#allocation154_spill] sm:$0xff]  ;;  %v21120_v26 = vld [vmem:[#allocation163_spill] sm:$0xff] }
0x108d   : >> { %6784 = vmatmul.mubr.f32.gmra.mrb[128].mxu1 %v6675_v19  ;;  %7010 = vmatmul.mubr.f32.gmra.mrb[162].mxu0 %v6675_v19  ;;  %v6679_v34 = vmax.f32 %v6647_v7, 0.0  ;;  %v21115_v19 = vld [vmem:[#allocation156_spill] sm:$0xff]  ;;  %v21117_v7 = vld [vmem:[#allocation158_spill] sm:$0xff] }
0x108e   : >> { %v6680_v44 = vmax.f32 %v6648_v48, 0.0  ;;  %12984 = vmatpush1.bf16.msra.mxu1 %v20784_v18  ;;  %13112 = vmatpush1.bf16.msra.mxu0 %v16296_v8  ;;  %v21118_v48 = vld [vmem:[#allocation159_spill] sm:$0xff] }
0x108f   : >> { %12986 = vmatprep.subr.bf16.mxu1 %v20785_v10  ;;  %13114 = vmatprep.subr.bf16.mxu0 %v21112_v49  ;;  %v21119_v49 = vld [vmem:[#allocation160_spill] sm:$0xff] }
0x1090   : >> { %6789 = vmatprep.mubr.f32.mxu1 %v6680_v44  ;;  %7015 = vmatprep.mubr.f32.mxu0 %v6680_v44  ;;  %v21121_v44 = vld [vmem:[#allocation164_spill] sm:$0xff] }
0x1091   : >> { %6790 = vmatmul.mubr.f32.gmra.mrb[130].mxu1 %v6679_v34  ;;  %7016 = vmatmul.mubr.f32.gmra.mrb[164].mxu0 %v6679_v34  ;;  %v21122_v34 = vld [vmem:[#allocation165_spill] sm:$0xff] }
0x1092   : >> { %12988 = vmatpush1.bf16.msra.mxu1 %v21113_v35  ;;  %13116 = vmatpush1.bf16.msra.mxu0 %v21114_v61 }
0x1093   : >> { %6860 = vmatprep.mubr.f32.mxu1 %v6654_v50  ;;  %7086 = vmatprep.mubr.f32.mxu0 %v6654_v50  ;;  %v21123_v50 = vld [vmem:[#allocation167_spill] sm:$0xff] }
0x1094   : >> { %12990 = vmatprep.subr.bf16.mxu1 %v21115_v19  ;;  %13118 = vmatprep.subr.bf16.mxu0 %v21116_v22  ;;  %v21124_v22 = vld [vmem:[#allocation168_spill] sm:$0xff] }
0x1096   : >> { %12992 = vmatpush1.bf16.msra.mxu1 %v21117_v7  ;;  %13120 = vmatpush1.bf16.msra.mxu0 %v21118_v48  ;;  %v21125_v48 = vld [vmem:[#allocation170_spill] sm:$0xff] }
0x1097   : >> { %12994 = vmatprep.subr.bf16.mxu1 %v21119_v49  ;;  %13122 = vmatprep.subr.bf16.mxu0 %v20793_v40  ;;  %v21126_v49 = vld [vmem:[#allocation171_spill] sm:$0xff]  ;;  %v21127_v40 = vld [vmem:[#allocation172_spill] sm:$0xff] }
0x109a   : >> { %12996 = vmatpush1.bf16.msra.mxu1 %v20794_v1  ;;  %13124 = vmatpush1.bf16.msra.mxu0 %v21120_v26  ;;  %v21128_v1 = vld [vmem:[#allocation173_spill] sm:$0xff]  ;;  %v21129_v26 = vld [vmem:[#allocation174_spill] sm:$0xff] }
0x109b   : >> { %12998 = vmatprep.subr.bf16.mxu1 %v21121_v44  ;;  %13126 = vmatprep.subr.bf16.mxu0 %v21122_v34  ;;  %v21130_v44 = vld [vmem:[#allocation175_spill] sm:$0xff]  ;;  %v21131_v34 = vld [vmem:[#allocation176_spill] sm:$0xff] }
0x109e   : >> { %13000 = vmatpush1.bf16.msra.mxu1 %v20798_v6  ;;  %13128 = vmatpush1.bf16.msra.mxu0 %v21123_v50  ;;  %v21132_v6 = vld [vmem:[#allocation177_spill] sm:$0xff]  ;;  %v21133_v50 = vld [vmem:[#allocation178_spill] sm:$0xff] }
0x109f   : >> { %13002 = vmatprep.subr.bf16.mxu1 %v21124_v22  ;;  %13130 = vmatprep.subr.bf16.mxu0 %v20801_v62  ;;  %v21134_v22 = vld [vmem:[#allocation179_spill] sm:$0xff]  ;;  %v21135_v62 = vld [vmem:[#allocation181_spill] sm:$0xff] }
0x10a2   : >> { %13004 = vmatpush1.bf16.msra.mxu1 %v21125_v48  ;;  %13132 = vmatpush1.bf16.msra.mxu0 %v21126_v49  ;;  %v21136_v48 = vld [vmem:[#allocation182_spill] sm:$0xff]  ;;  %v21137_v49 = vld [vmem:[#allocation183_spill] sm:$0xff] }
0x10a3   : >> { %13006 = vmatprep.subr.bf16.mxu1 %v21127_v40  ;;  %13134 = vmatprep.subr.bf16.mxu0 %v21128_v1  ;;  %v21138_v40 = vld [vmem:[#allocation184_spill] sm:$0xff]  ;;  %v21139_v1 = vld [vmem:[#allocation185_spill] sm:$0xff] }
0x10a6   : >> { %13008 = vmatpush1.bf16.msra.mxu1 %v21129_v26  ;;  %13136 = vmatpush1.bf16.msra.mxu0 %v21130_v44  ;;  %v6621_v26 = vadd.f32 %v18304_v13, %v21139_v1  ;;  %v21140_v44 = vld [vmem:[#allocation186_spill] sm:$0xff] }
0x10a7   : >> { %13010 = vmatprep.subr.bf16.mxu1 %v21131_v34  ;;  %13138 = vmatprep.subr.bf16.mxu0 %v21132_v6  ;;  %v21141_v34 = vld [vmem:[#allocation187_spill] sm:$0xff]  ;;  %v21142_v6 = vld [vmem:[#allocation188_spill] sm:$0xff] }
0x10aa   : >> { %13012 = vmatpush1.bf16.msra.mxu1 %v21133_v50  ;;  %13140 = vmatpush1.bf16.msra.mxu0 %v21134_v22  ;;  %v6626_v50 = vadd.f32 %v18313_v59, %v16288_v36  ;;  %v21143_v22 = vld [vmem:[#allocation189_spill] sm:$0xff]  ;;  %v6629_v59 = vadd.f32 %v18318_v46, %v21139_v1 }
0x10ab   : >> { %13014 = vmatprep.subr.bf16.mxu1 %v21135_v62  ;;  %13142 = vmatprep.subr.bf16.mxu0 %v21136_v48  ;;  %v6653_v62 = vmax.f32 %v6621_v26, 0.0 }
0x10ac   : >> { %v6658_v48 = vmax.f32 %v6626_v50, 0.0  ;;  %v6650_v50 = vadd.f32 %v18371_v31, %v16288_v36 }
0x10ae   : >> { %13016 = vmatpush1.bf16.msra.mxu1 %v21137_v49  ;;  %13144 = vmatpush1.bf16.msra.mxu0 %v21138_v40  ;;  %v6625_v49 = vadd.f32 %v18310_v56, %v21139_v1  ;;  %v6630_v40 = vadd.f32 %v18321_v4, %v16288_v36  ;;  %v6661_v56 = vmax.f32 %v6629_v59, 0.0  ;;  %v6633_v4 = vadd.f32 %v18328_v20, %v21139_v1 }
0x10af   : >> { %13018 = vmatprep.subr.bf16.mxu1 %v21140_v44  ;;  %13146 = vmatprep.subr.bf16.mxu0 %v21141_v34 }
0x10b0   : >> { %v6657_v13 = vmax.f32 %v6625_v49, 0.0  ;;  %v6662_v34 = vmax.f32 %v6630_v40, 0.0  ;;  %v6665_v40 = vmax.f32 %v6633_v4, 0.0  ;;  %v6642_v49 = vadd.f32 %v18351_v28, %v16288_v36 }
0x10b1   : >> { %v6645_v28 = vadd.f32 %v18358_v27, %v21139_v1 }
0x10b2   : >> { %13020 = vmatpush1.bf16.msra.mxu1 %v21142_v6  ;;  %13148 = vmatpush1.bf16.msra.mxu0 %v21143_v22  ;;  %v6634_v22 = vadd.f32 %v18331_v14, %v16288_v36  ;;  %v6637_v14 = vadd.f32 %v18338_v58, %v21139_v1 }
0x10b4   : >> { %v6666_v26 = vmax.f32 %v6634_v22, 0.0  ;;  %v6669_v20 = vmax.f32 %v6637_v14, 0.0  ;;  %v6674_v22 = vmax.f32 %v6642_v49, 0.0 }
0x10b5   : >> { %6861 = vmatmul.mubr.f32.vlgmr.msra.gmra.mrb[116].mxu1 %v6653_v62  ;;  %7087 = vmatmul.mubr.f32.vlgmr.msra.gmra.mrb[150].mxu0 %v6653_v62  ;;  %v6638_v62 = vadd.f32 %v18341_v63, %v16288_v36  ;;  %v6641_v63 = vadd.f32 %v18348_v12, %v21139_v1  ;;  %v6677_v12 = vmax.f32 %v6645_v28, 0.0 }
0x10b6   : >> { %6866 = vmatprep.mubr.f32.mxu1 %v6658_v48  ;;  %7092 = vmatprep.mubr.f32.mxu0 %v6658_v48  ;;  %v6646_v48 = vadd.f32 %v18361_v16, %v16288_v36  ;;  %v6649_v16 = vadd.f32 %v18368_v29, %v21139_v1 }
0x10b7   : >> { %v6670_v46 = vmax.f32 %v6638_v62, 0.0  ;;  %v6673_v58 = vmax.f32 %v6641_v63, 0.0 }
0x10b8   : >> { %v6681_v59 = vmax.f32 %v6649_v16, 0.0 }
0x10b9   : >> { %6867 = vmatmul.mubr.f32.gmra.mrb[118].mxu1 %v6657_v13  ;;  %7093 = vmatmul.mubr.f32.gmra.mrb[152].mxu0 %v6657_v13  ;;  %v6682_v13 = vmax.f32 %v6650_v50, 0.0 }
0x10ba   : >> { %6872 = vmatprep.mubr.f32.mxu1 %v6662_v34  ;;  %7098 = vmatprep.mubr.f32.mxu0 %v6662_v34  ;;  %v6678_v34 = vmax.f32 %v6646_v48, 0.0 }
0x10bd   : >> { %6873 = vmatmul.mubr.f32.gmra.mrb[120].mxu1 %v6661_v56  ;;  %7099 = vmatmul.mubr.f32.gmra.mrb[154].mxu0 %v6661_v56 }
0x10be   : >> { %6878 = vmatprep.mubr.f32.mxu1 %v6666_v26  ;;  %7104 = vmatprep.mubr.f32.mxu0 %v6666_v26 }
0x10c1   : >> { %6879 = vmatmul.mubr.f32.gmra.mrb[122].mxu1 %v6665_v40  ;;  %7105 = vmatmul.mubr.f32.gmra.mrb[156].mxu0 %v6665_v40 }
0x10c2   : >> { %6884 = vmatprep.mubr.f32.mxu1 %v6670_v46  ;;  %7110 = vmatprep.mubr.f32.mxu0 %v6670_v46 }
0x10c5   : >> { %6885 = vmatmul.mubr.f32.gmra.mrb[124].mxu1 %v6669_v20  ;;  %7111 = vmatmul.mubr.f32.gmra.mrb[158].mxu0 %v6669_v20 }
0x10c6   : >> { %6890 = vmatprep.mubr.f32.mxu1 %v6674_v22  ;;  %7116 = vmatprep.mubr.f32.mxu0 %v6674_v22 }
0x10c9   : >> { %6891 = vmatmul.mubr.f32.gmra.mrb[126].mxu1 %v6673_v58  ;;  %7117 = vmatmul.mubr.f32.gmra.mrb[160].mxu0 %v6673_v58 }
0x10ca   : >> { %6896 = vmatprep.mubr.f32.mxu1 %v6678_v34  ;;  %7122 = vmatprep.mubr.f32.mxu0 %v6678_v34 }
0x10cd   : >> { %6897 = vmatmul.mubr.f32.gmra.mrb[128].mxu1 %v6677_v12  ;;  %7123 = vmatmul.mubr.f32.gmra.mrb[162].mxu0 %v6677_v12 }
0x10ce   : >> { %6902 = vmatprep.mubr.f32.mxu1 %v6682_v13  ;;  %7128 = vmatprep.mubr.f32.mxu0 %v6682_v13 }
0x10d1   : >> { %6903 = vmatmul.mubr.f32.gmra.mrb[130].mxu1 %v6681_v59  ;;  %7129 = vmatmul.mubr.f32.gmra.mrb[164].mxu0 %v6681_v59 }
0x10d2   : >> { %7231 = vmatprep.mubr.f32.mxu1 %v20354_v55  ;;  %7308 = vmatprep.mubr.f32.mxu0 %v20354_v55 }
0x1188   : >> { %v6862_v31 = vpop.f32.mrb[116].mxu1  ;;  %v7088_v27 = vpop.f32.mrb[150].mxu0 }
0x1189   : >> { %v6864_v56 = vpop.f32.mrb[117].mxu1  ;;  %v7090_v4 = vpop.f32.mrb[151].mxu0  ;;  %v14332_v26 = vadd.f32 %v6862_v31, %v20842_v24  ;;  %v14348_v29 = vadd.f32 %v7088_v27, %v20843_v30 }
0x118a   : >> { %v14333_v62 = vadd.f32 %v6864_v56, %v20844_v37  ;;  %v14349_v40 = vadd.f32 %v7090_v4, %v20845_v5 }
0x118b   : >> { %v7135_v28 = vmax.f32 %v14332_v26, 0.0  ;;  %v7137_v34 = vmax.f32 %v14348_v29, 0.0 }
0x118c   : >> { %v6868_v14 = vpop.f32.mrb[118].mxu1  ;;  %v7094_v46 = vpop.f32.mrb[152].mxu0  ;;  %v7136_v16 = vmax.f32 %v14333_v62, 0.0  ;;  %v7138_v13 = vmax.f32 %v14349_v40, 0.0 }
0x118d   : >> { %v14334_v49 = vadd.f32 %v6868_v14, %v20842_v24  ;;  %v14350_v20 = vadd.f32 %v7094_v46, %v20843_v30  ;;  %v6870_v63 = vpop.f32.mrb[119].mxu1  ;;  %v7096_v22 = vpop.f32.mrb[153].mxu0 }
0x118e   : >> { %v14335_v48 = vadd.f32 %v6870_v63, %v20844_v37  ;;  %v14351_v58 = vadd.f32 %v7096_v22, %v20845_v5 }
0x118f   : >> { %v7139_v50 = vmax.f32 %v14334_v49, 0.0  ;;  %v7141_v12 = vmax.f32 %v14350_v20, 0.0 }
0x1190   : >> { %v7140_v59 = vmax.f32 %v14335_v48, 0.0  ;;  %v7142_v31 = vmax.f32 %v14351_v58, 0.0  ;;  %v6874_v27 = vpop.f32.mrb[120].mxu1  ;;  %v7100_v56 = vpop.f32.mrb[154].mxu0 }
0x1191   : >> { %v13151_v4 = vpack.c.bf16 %v7139_v50, %v7135_v28  ;;  %v13167_v14 = vpack.c.bf16 %v7141_v12, %v7137_v34  ;;  %v6876_v6 = vpop.f32.mrb[121].mxu1  ;;  %v7102_v46 = vpop.f32.mrb[155].mxu0  ;;  %v14336_v63 = vadd.f32 %v6874_v27, %v20842_v24  ;;  %v14352_v22 = vadd.f32 %v7100_v56, %v20843_v30 }
0x1192   : >> { %v13149_v44 = vpack.c.bf16 %v7140_v59, %v7136_v16  ;;  %v13165_v1 = vpack.c.bf16 %v7142_v31, %v7138_v13  ;;  %v14337_v26 = vadd.f32 %v6876_v6, %v20844_v37  ;;  %v14353_v29 = vadd.f32 %v7102_v46, %v20845_v5 }
0x1193   : >> { %v7143_v50 = vmax.f32 %v14336_v63, 0.0  ;;  %v7145_v6 = vmax.f32 %v14352_v22, 0.0 }
0x1194   : >> { %v6880_v62 = vpop.f32.mrb[122].mxu1  ;;  %v7106_v40 = vpop.f32.mrb[156].mxu0  ;;  %13150 = vmatprep.subr.bf16.mxu1 %v13149_v44  ;;  %13166 = vmatprep.subr.bf16.mxu0 %v13165_v1  ;;  %v7144_v13 = vmax.f32 %v14337_v26, 0.0  ;;  %v7146_v59 = vmax.f32 %v14353_v29, 0.0 }
0x1195   : >> { %v14338_v49 = vadd.f32 %v6880_v62, %v20842_v24  ;;  %v14354_v20 = vadd.f32 %v7106_v40, %v20843_v30  ;;  %v6882_v48 = vpop.f32.mrb[123].mxu1  ;;  %v7108_v58 = vpop.f32.mrb[157].mxu0  ;;  %13152 = vmatpush1.bf16.msra.mxu1 %v13151_v4  ;;  %13168 = vmatpush1.bf16.msra.mxu0 %v13167_v14 }
0x1196   : >> { %v14339_v28 = vadd.f32 %v6882_v48, %v20844_v37  ;;  %v14355_v34 = vadd.f32 %v7108_v58, %v20845_v5 }
0x1197   : >> { %v7147_v12 = vmax.f32 %v14338_v49, 0.0  ;;  %v7149_v16 = vmax.f32 %v14354_v20, 0.0 }
0x1198   : >> { %v7148_v44 = vmax.f32 %v14339_v28, 0.0  ;;  %v7150_v1 = vmax.f32 %v14355_v34, 0.0  ;;  %v6886_v31 = vpop.f32.mrb[124].mxu1  ;;  %v7112_v27 = vpop.f32.mrb[158].mxu0 }
0x1199   : >> { %v13155_v56 = vpack.c.bf16 %v7147_v12, %v7143_v50  ;;  %v13171_v46 = vpack.c.bf16 %v7149_v16, %v7145_v6  ;;  %v6888_v62 = vpop.f32.mrb[125].mxu1  ;;  %v7114_v40 = vpop.f32.mrb[159].mxu0  ;;  %v14340_v48 = vadd.f32 %v6886_v31, %v20842_v24  ;;  %v14356_v58 = vadd.f32 %v7112_v27, %v20843_v30 }
0x119a   : >> { %v13153_v4 = vpack.c.bf16 %v7148_v44, %v7144_v13  ;;  %v13169_v14 = vpack.c.bf16 %v7150_v1, %v7146_v59  ;;  %v14341_v63 = vadd.f32 %v6888_v62, %v20844_v37  ;;  %v14357_v22 = vadd.f32 %v7114_v40, %v20845_v5 }
0x119b   : >> { %v7151_v12 = vmax.f32 %v14340_v48, 0.0  ;;  %v7153_v16 = vmax.f32 %v14356_v58, 0.0 }
0x119c   : >> { %v6892_v26 = vpop.f32.mrb[126].mxu1  ;;  %v7118_v29 = vpop.f32.mrb[160].mxu0  ;;  %13154 = vmatprep.subr.bf16.mxu1 %v13153_v4  ;;  %13170 = vmatprep.subr.bf16.mxu0 %v13169_v14  ;;  %v7152_v44 = vmax.f32 %v14341_v63, 0.0  ;;  %v7154_v1 = vmax.f32 %v14357_v22, 0.0 }
0x119d   : >> { %v14342_v49 = vadd.f32 %v6892_v26, %v20842_v24  ;;  %v14358_v20 = vadd.f32 %v7118_v29, %v20843_v30  ;;  %v6894_v28 = vpop.f32.mrb[127].mxu1  ;;  %v7120_v34 = vpop.f32.mrb[161].mxu0  ;;  %13156 = vmatpush1.bf16.msra.mxu1 %v13155_v56  ;;  %13172 = vmatpush1.bf16.msra.mxu0 %v13171_v46 }
0x119e   : >> { %v14343_v50 = vadd.f32 %v6894_v28, %v20844_v37  ;;  %v14359_v6 = vadd.f32 %v7120_v34, %v20845_v5 }
0x119f   : >> { %v7155_v13 = vmax.f32 %v14342_v49, 0.0  ;;  %v7157_v59 = vmax.f32 %v14358_v20, 0.0 }
0x11a0   : >> { %v7156_v31 = vmax.f32 %v14343_v50, 0.0  ;;  %v7158_v27 = vmax.f32 %v14359_v6, 0.0  ;;  %v6898_v62 = vpop.f32.mrb[128].mxu1  ;;  %v7124_v40 = vpop.f32.mrb[162].mxu0 }
0x11a1   : >> { %v13159_v4 = vpack.c.bf16 %v7155_v13, %v7151_v12  ;;  %v13175_v14 = vpack.c.bf16 %v7157_v59, %v7153_v16  ;;  %v6900_v26 = vpop.f32.mrb[129].mxu1  ;;  %v7126_v29 = vpop.f32.mrb[163].mxu0  ;;  %v14344_v28 = vadd.f32 %v6898_v62, %v20842_v24  ;;  %v14360_v34 = vadd.f32 %v7124_v40, %v20843_v30 }
0x11a2   : >> { %v13157_v56 = vpack.c.bf16 %v7156_v31, %v7152_v44  ;;  %v13173_v46 = vpack.c.bf16 %v7158_v27, %v7154_v1  ;;  %v14345_v48 = vadd.f32 %v6900_v26, %v20844_v37  ;;  %v14361_v58 = vadd.f32 %v7126_v29, %v20845_v5 }
0x11a3   : >> { %v7159_v13 = vmax.f32 %v14344_v28, 0.0  ;;  %v7161_v59 = vmax.f32 %v14360_v34, 0.0  ;;  %v21145_v28 = vld [vmem:[#allocation196_spill] sm:$0xff]  ;;  %v21146_v34 = vld [vmem:[#allocation198_spill] sm:$0xff] }
0x11a4   : >> { %v6904_v63 = vpop.f32.mrb[130].mxu1  ;;  %v7130_v22 = vpop.f32.mrb[164].mxu0  ;;  %13158 = vmatprep.subr.bf16.mxu1 %v13157_v56  ;;  %13174 = vmatprep.subr.bf16.mxu0 %v13173_v46  ;;  %v7160_v31 = vmax.f32 %v14345_v48, 0.0  ;;  %v7162_v27 = vmax.f32 %v14361_v58, 0.0  ;;  %v14865_v48 = vld [vmem:[%s19492_s6 + $0x8] sm:$0xff]  ;;  %v21147_v58 = vld [vmem:[#allocation200_spill] sm:$0xff] }
0x11a5   : >> { %v14346_v49 = vadd.f32 %v6904_v63, %v20842_v24  ;;  %v14362_v20 = vadd.f32 %v7130_v22, %v20843_v30  ;;  %v6906_v50 = vpop.f32.mrb[131].mxu1  ;;  %v7132_v6 = vpop.f32.mrb[165].mxu0  ;;  %13160 = vmatpush1.bf16.msra.mxu1 %v13159_v4  ;;  %13176 = vmatpush1.bf16.msra.mxu0 %v13175_v14  ;;  %v21144_v4 = vld [vmem:[#allocation194_spill] sm:$0xff]  ;;  %v14864_v14 = vld [vmem:[%s19492_s6] sm:$0xff]  ;;  %v21204_v24 = vld [vmem:[#allocation271_spill] sm:$0xff] }
0x11a6   : >> { %v14347_v12 = vadd.f32 %v6906_v50, %v20844_v37  ;;  %v14363_v16 = vadd.f32 %v7132_v6, %v20845_v5  ;;  %v21148_v63 = vld [vmem:[#allocation202_spill] sm:$0xff]  ;;  %v21149_v22 = vld [vmem:[#allocation204_spill] sm:$0xff]  ;;  %v21196_v5 = vld [vmem:[#allocation263_spill] sm:$0xff] }
0x11a7   : >> { %v7163_v44 = vmax.f32 %v14346_v49, 0.0  ;;  %v7165_v1 = vmax.f32 %v14362_v20, 0.0  ;;  %v21150_v49 = vld [vmem:[#allocation206_spill] sm:$0xff]  ;;  %v21151_v20 = vld [vmem:[#allocation208_spill] sm:$0xff] }
0x11a8   : >> { %v7164_v62 = vmax.f32 %v14347_v12, 0.0  ;;  %v7166_v40 = vmax.f32 %v14363_v16, 0.0  ;;  %v21152_v50 = vld [vmem:[#allocation210_spill] sm:$0xff]  ;;  %v21153_v6 = vld [vmem:[#allocation212_spill] sm:$0xff] }
0x11a9   : >> { %v13163_v26 = vpack.c.bf16 %v7163_v44, %v7159_v13  ;;  %v13179_v29 = vpack.c.bf16 %v7165_v1, %v7161_v59  ;;  %v21154_v12 = vld [vmem:[#allocation214_spill] sm:$0xff]  ;;  %v21155_v16 = vld [vmem:[#allocation216_spill] sm:$0xff] }
0x11aa   : >> { %v13161_v56 = vpack.c.bf16 %v7164_v62, %v7160_v31  ;;  %v13177_v46 = vpack.c.bf16 %v7166_v40, %v7162_v27  ;;  %v21156_v13 = vld [vmem:[#allocation218_spill] sm:$0xff]  ;;  %v21157_v59 = vld [vmem:[#allocation220_spill] sm:$0xff]  ;;  %v21162_v62 = vld [vmem:[#allocation229_spill] sm:$0xff] }
0x11ab   : >> { %v21158_v44 = vld [vmem:[#allocation222_spill] sm:$0xff]  ;;  %v21159_v1 = vld [vmem:[#allocation224_spill] sm:$0xff] }
0x11ac   : >> { %13162 = vmatprep.subr.bf16.mxu1 %v13161_v56  ;;  %13178 = vmatprep.subr.bf16.mxu0 %v13177_v46  ;;  %v21160_v31 = vld [vmem:[#allocation226_spill] sm:$0xff]  ;;  %v21161_v27 = vld [vmem:[#allocation228_spill] sm:$0xff]  ;;  %v21166_v56 = vld [vmem:[#allocation233_spill] sm:$0xff] }
0x11ad   : >> { %13164 = vmatpush1.bf16.msra.mxu1 %v13163_v26  ;;  %13180 = vmatpush1.bf16.msra.mxu0 %v13179_v29  ;;  %v21163_v40 = vld [vmem:[#allocation230_spill] sm:$0xff]  ;;  %v21164_v26 = vld [vmem:[#allocation231_spill] sm:$0xff]  ;;  %v21165_v29 = vld [vmem:[#allocation232_spill] sm:$0xff] }
0x11ae   : >> { %13182 = vmatprep.subr.bf16.mxu1 %v21144_v4  ;;  %13310 = vmatprep.subr.bf16.mxu0 %v20846_v43  ;;  %v21167_v46 = vld [vmem:[#allocation234_spill] sm:$0xff] }
0x11af   : >> { %v21203_v30 = vld [vmem:[#allocation270_spill] sm:$0xff] }
0x11b0   : >> { %10683 = vmatmul.mubr.msk.f32.vlgmr.msra.gmra.mrb[132].mxu1 %vm1068_vm2, %v14864_v14  ;;  %10685 = vmatmul.mubr.msk.f32.vlgmr.msra.gmra.mrb[166].mxu0 %vm1068_vm2, %v14864_v14  ;;  %v21168_v14 = vld [vmem:[#allocation235_spill] sm:$0xff] }
0x11b1   : >> { %7237 = vmatprep.mubr.f32.mxu1 %v20354_v55  ;;  %7314 = vmatprep.mubr.f32.mxu0 %v20354_v55 }
0x11b2   : >> { %13184 = vmatpush1.bf16.msra.mxu1 %v21145_v28  ;;  %13312 = vmatpush1.bf16.msra.mxu0 %v20847_v11 }
0x11b3   : >> { %13186 = vmatprep.subr.bf16.mxu1 %v21146_v34  ;;  %13314 = vmatprep.subr.bf16.mxu0 %v20848_v15 }
0x11b4   : >> { %10684 = vmatmul.mubr.msk.f32.gmra.mrb[134].mxu1 %vm1068_vm2, %v14865_v48  ;;  %10686 = vmatmul.mubr.msk.f32.gmra.mrb[168].mxu0 %vm1068_vm2, %v14865_v48  ;;  %v21169_v48 = vld [vmem:[#allocation236_spill] sm:$0xff] }
0x11b6   : >> { %13188 = vmatpush1.bf16.msra.mxu1 %v21147_v58  ;;  %13316 = vmatpush1.bf16.msra.mxu0 %v20849_v60 }
0x11b7   : >> { %13190 = vmatprep.subr.bf16.mxu1 %v21148_v63  ;;  %13318 = vmatprep.subr.bf16.mxu0 %v20850_v25  ;;  %v21192_v25 = vld [vmem:[#allocation259_spill] sm:$0xff] }
0x11ba   : >> { %13192 = vmatpush1.bf16.msra.mxu1 %v21149_v22  ;;  %13320 = vmatpush1.bf16.msra.mxu0 %v20851_v2  ;;  %v21190_v2 = vld [vmem:[#allocation257_spill] sm:$0xff] }
0x11bb   : >> { %13194 = vmatprep.subr.bf16.mxu1 %v21150_v49  ;;  %13322 = vmatprep.subr.bf16.mxu0 %v20852_v41  ;;  %v21188_v41 = vld [vmem:[#allocation255_spill] sm:$0xff] }
0x11be   : >> { %13196 = vmatpush1.bf16.msra.mxu1 %v21151_v20  ;;  %13324 = vmatpush1.bf16.msra.mxu0 %v20853_v21  ;;  %v21186_v21 = vld [vmem:[#allocation253_spill] sm:$0xff] }
0x11bf   : >> { %13198 = vmatprep.subr.bf16.mxu1 %v21152_v50  ;;  %13326 = vmatprep.subr.bf16.mxu0 %v20854_v57  ;;  %v21184_v57 = vld [vmem:[#allocation251_spill] sm:$0xff] }
0x11c2   : >> { %13200 = vmatpush1.bf16.msra.mxu1 %v21153_v6  ;;  %13328 = vmatpush1.bf16.msra.mxu0 %v20855_v51  ;;  %v21182_v51 = vld [vmem:[#allocation249_spill] sm:$0xff] }
0x11c3   : >> { %13202 = vmatprep.subr.bf16.mxu1 %v21154_v12  ;;  %13330 = vmatprep.subr.bf16.mxu0 %v20856_v0  ;;  %v21180_v0 = vld [vmem:[#allocation247_spill] sm:$0xff] }
0x11c6   : >> { %13204 = vmatpush1.bf16.msra.mxu1 %v21155_v16  ;;  %13332 = vmatpush1.bf16.msra.mxu0 %v20857_v9  ;;  %v21178_v9 = vld [vmem:[#allocation245_spill] sm:$0xff] }
0x11c7   : >> { %13206 = vmatprep.subr.bf16.mxu1 %v21156_v13  ;;  %13334 = vmatprep.subr.bf16.mxu0 %v20858_v52  ;;  %v21176_v52 = vld [vmem:[#allocation243_spill] sm:$0xff] }
0x11ca   : >> { %13208 = vmatpush1.bf16.msra.mxu1 %v21157_v59  ;;  %13336 = vmatpush1.bf16.msra.mxu0 %v20859_v32  ;;  %v21174_v32 = vld [vmem:[#allocation241_spill] sm:$0xff] }
0x11cb   : >> { %13210 = vmatprep.subr.bf16.mxu1 %v21158_v44  ;;  %13338 = vmatprep.subr.bf16.mxu0 %v20860_v45  ;;  %v21172_v45 = vld [vmem:[#allocation239_spill] sm:$0xff] }
0x11ce   : >> { %13212 = vmatpush1.bf16.msra.mxu1 %v21159_v1  ;;  %13340 = vmatpush1.bf16.msra.mxu0 %v20861_v3  ;;  %v21170_v3 = vld [vmem:[#allocation237_spill] sm:$0xff] }
0x11cf   : >> { %13214 = vmatprep.subr.bf16.mxu1 %v21160_v31  ;;  %13342 = vmatprep.subr.bf16.mxu0 %v20862_v47  ;;  %v21171_v47 = vld [vmem:[#allocation238_spill] sm:$0xff] }
0x11d2   : >> { %13216 = vmatpush1.bf16.msra.mxu1 %v21161_v27  ;;  %13344 = vmatpush1.bf16.msra.mxu0 %v21162_v62  ;;  %v21173_v62 = vld [vmem:[#allocation240_spill] sm:$0xff] }
0x11d3   : >> { %13218 = vmatprep.subr.bf16.mxu1 %v21163_v40  ;;  %13346 = vmatprep.subr.bf16.mxu0 %v21164_v26  ;;  %v21175_v26 = vld [vmem:[#allocation242_spill] sm:$0xff] }
0x11d6   : >> { %13220 = vmatpush1.bf16.msra.mxu1 %v21165_v29  ;;  %13348 = vmatpush1.bf16.msra.mxu0 %v21166_v56  ;;  %v21177_v56 = vld [vmem:[#allocation244_spill] sm:$0xff] }
0x11d7   : >> { %13222 = vmatprep.subr.bf16.mxu1 %v21167_v46  ;;  %13350 = vmatprep.subr.bf16.mxu0 %v21168_v14  ;;  %v21179_v14 = vld [vmem:[#allocation246_spill] sm:$0xff] }
0x11da   : >> { %13224 = vmatpush1.bf16.msra.mxu1 %v21169_v48  ;;  %13352 = vmatpush1.bf16.msra.mxu0 %v21170_v3  ;;  %v21181_v3 = vld [vmem:[#allocation248_spill] sm:$0xff] }
0x11db   : >> { %13226 = vmatprep.subr.bf16.mxu1 %v21171_v47  ;;  %13354 = vmatprep.subr.bf16.mxu0 %v21172_v45  ;;  %v21183_v45 = vld [vmem:[#allocation250_spill] sm:$0xff] }
0x11de   : >> { %13228 = vmatpush1.bf16.msra.mxu1 %v21173_v62  ;;  %13356 = vmatpush1.bf16.msra.mxu0 %v21174_v32  ;;  %v21185_v32 = vld [vmem:[#allocation252_spill] sm:$0xff] }
0x11df   : >> { %13230 = vmatprep.subr.bf16.mxu1 %v21175_v26  ;;  %13358 = vmatprep.subr.bf16.mxu0 %v21176_v52  ;;  %v21187_v52 = vld [vmem:[#allocation254_spill] sm:$0xff] }
0x11e2   : >> { %13232 = vmatpush1.bf16.msra.mxu1 %v21177_v56  ;;  %13360 = vmatpush1.bf16.msra.mxu0 %v21178_v9  ;;  %v21189_v9 = vld [vmem:[#allocation256_spill] sm:$0xff] }
0x11e3   : >> { %13234 = vmatprep.subr.bf16.mxu1 %v21179_v14  ;;  %13362 = vmatprep.subr.bf16.mxu0 %v21180_v0  ;;  %v21191_v0 = vld [vmem:[#allocation258_spill] sm:$0xff] }
0x11e6   : >> { %13236 = vmatpush1.bf16.msra.mxu1 %v21181_v3  ;;  %13364 = vmatpush1.bf16.msra.mxu0 %v21182_v51 }
0x11e7   : >> { %13238 = vmatprep.subr.bf16.mxu1 %v21183_v45  ;;  %13366 = vmatprep.subr.bf16.mxu0 %v21184_v57 }
0x11ea   : >> { %13240 = vmatpush1.bf16.msra.mxu1 %v21185_v32  ;;  %13368 = vmatpush1.bf16.msra.mxu0 %v21186_v21  ;;  %v21193_v21 = vld [vmem:[#allocation260_spill] sm:$0xff] }
0x11eb   : >> { %13242 = vmatprep.subr.bf16.mxu1 %v21187_v52  ;;  %13370 = vmatprep.subr.bf16.mxu0 %v21188_v41  ;;  %v21194_v41 = vld [vmem:[#allocation261_spill] sm:$0xff] }
0x11ee   : >> { %13244 = vmatpush1.bf16.msra.mxu1 %v21189_v9  ;;  %13372 = vmatpush1.bf16.msra.mxu0 %v21190_v2  ;;  %v21195_v2 = vld [vmem:[#allocation262_spill] sm:$0xff] }
0x11ef   : >> { %13246 = vmatprep.subr.bf16.mxu1 %v21191_v0  ;;  %13374 = vmatprep.subr.bf16.mxu0 %v21192_v25 }
0x1283   : >> { %v7233_v51 = vpop.f32.mrb[132].mxu1  ;;  %v18558_v60 = vpop.f32.mrb[166].mxu0 }
0x1284   : >> { %v7235_v57 = vpop.f32.mrb[133].mxu1  ;;  %v7312_v15 = vpop.f32.mrb[167].mxu0 }
0x1285   : >> { %7385 = vmatprep.mubr.f32.mxu1 %v7235_v57  ;;  %7539 = vmatprep.mubr.f32.mxu0 %v7235_v57  ;;  %v21197_v57 = vld [vmem:[#allocation264_spill] sm:$0xff] }
0x1286   : >> { %7386 = vmatmul.mubr.f32.vlgmr.msra.gmra.mrb[136].mxu1 %v7233_v51  ;;  %7540 = vmatmul.mubr.f32.vlgmr.msra.gmra.mrb[170].mxu0 %v7233_v51  ;;  %v21198_v51 = vld [vmem:[#allocation265_spill] sm:$0xff] }
0x1287   : >> { %13248 = vmatpush1.bf16.msra.mxu1 %v21193_v21  ;;  %13376 = vmatpush1.bf16.msra.mxu0 %v21194_v41  ;;  %v7239_v11 = vpop.f32.mrb[134].mxu1  ;;  %v18562_v43 = vpop.f32.mrb[168].mxu0  ;;  %v21199_v21 = vld [vmem:[#allocation266_spill] sm:$0xff]  ;;  %v21200_v41 = vld [vmem:[#allocation267_spill] sm:$0xff] }
0x1288   : >> { %13250 = vmatprep.subr.bf16.mxu1 %v21195_v2  ;;  %13378 = vmatprep.subr.bf16.mxu0 %v21196_v5  ;;  %v7241_v25 = vpop.f32.mrb[135].mxu1  ;;  %v18566_v37 = vpop.f32.mrb[169].mxu0  ;;  %v21201_v2 = vld [vmem:[#allocation268_spill] sm:$0xff]  ;;  %v21202_v5 = vld [vmem:[#allocation269_spill] sm:$0xff] }
0x1289   : >> { %7391 = vmatprep.mubr.f32.mxu1 %v7241_v25  ;;  %7545 = vmatprep.mubr.f32.mxu0 %v7241_v25  ;;  %v21205_v25 = vld [vmem:[#allocation272_spill] sm:$0xff] }
0x128a   : >> { %7392 = vmatmul.mubr.f32.gmra.mrb[138].mxu1 %v7239_v11  ;;  %7546 = vmatmul.mubr.f32.gmra.mrb[172].mxu0 %v7239_v11  ;;  %v21206_v11 = vld [vmem:[#allocation273_spill] sm:$0xff] }
0x128b   : >> { %13252 = vmatpush1.bf16.msra.mxu1 %v21197_v57  ;;  %13380 = vmatpush1.bf16.msra.mxu0 %v21198_v51  ;;  %v21207_v57 = vld [vmem:[#allocation274_spill] sm:$0xff]  ;;  %v21208_v51 = vld [vmem:[#allocation275_spill] sm:$0xff] }
0x128c   : >> { %13254 = vmatprep.subr.bf16.mxu1 %v21199_v21  ;;  %13382 = vmatprep.subr.bf16.mxu0 %v21200_v41  ;;  %v21209_v21 = vld [vmem:[#allocation276_spill] sm:$0xff]  ;;  %v21210_v41 = vld [vmem:[#allocation277_spill] sm:$0xff] }
0x128d   : >> { %7462 = vmatprep.mubr.f32.mxu1 %v7312_v15  ;;  %7616 = vmatprep.mubr.f32.mxu0 %v7312_v15  ;;  %v21211_v15 = vld [vmem:[#allocation278_spill] sm:$0xff] }
0x128f   : >> { %13256 = vmatpush1.bf16.msra.mxu1 %v21201_v2  ;;  %13384 = vmatpush1.bf16.msra.mxu0 %v21202_v5  ;;  %v21212_v2 = vld [vmem:[#allocation279_spill] sm:$0xff]  ;;  %v21213_v5 = vld [vmem:[#allocation280_spill] sm:$0xff] }
0x1290   : >> { %13258 = vmatprep.subr.bf16.mxu1 %v21203_v30  ;;  %13386 = vmatprep.subr.bf16.mxu0 %v21204_v24  ;;  %v21214_v30 = vld [vmem:[#allocation281_spill] sm:$0xff]  ;;  %v21215_v24 = vld [vmem:[#allocation282_spill] sm:$0xff] }
0x1293   : >> { %13260 = vmatpush1.bf16.msra.mxu1 %v21205_v25  ;;  %13388 = vmatpush1.bf16.msra.mxu0 %v21206_v11  ;;  %v21216_v25 = vld [vmem:[#allocation283_spill] sm:$0xff]  ;;  %v21217_v11 = vld [vmem:[#allocation284_spill] sm:$0xff] }
0x1294   : >> { %13262 = vmatprep.subr.bf16.mxu1 %v21207_v57  ;;  %13390 = vmatprep.subr.bf16.mxu0 %v21208_v51  ;;  %v21218_v57 = vld [vmem:[#allocation285_spill] sm:$0xff]  ;;  %v21219_v51 = vld [vmem:[#allocation286_spill] sm:$0xff] }
0x1297   : >> { %13264 = vmatpush1.bf16.msra.mxu1 %v21209_v21  ;;  %13392 = vmatpush1.bf16.msra.mxu0 %v21210_v41  ;;  %v21220_v21 = vld [vmem:[#allocation287_spill] sm:$0xff]  ;;  %v21221_v41 = vld [vmem:[#allocation288_spill] sm:$0xff] }
0x1298   : >> { %13266 = vmatprep.subr.bf16.mxu1 %v21211_v15  ;;  %13394 = vmatprep.subr.bf16.mxu0 %v21212_v2  ;;  %v21222_v15 = vld [vmem:[#allocation289_spill] sm:$0xff]  ;;  %v21223_v2 = vld [vmem:[#allocation290_spill] sm:$0xff] }
0x129b   : >> { %13268 = vmatpush1.bf16.msra.mxu1 %v21213_v5  ;;  %13396 = vmatpush1.bf16.msra.mxu0 %v21214_v30  ;;  %v21224_v5 = vld [vmem:[#allocation291_spill] sm:$0xff]  ;;  %v21225_v30 = vld [vmem:[#allocation292_spill] sm:$0xff] }
0x129c   : >> { %13270 = vmatprep.subr.bf16.mxu1 %v21215_v24  ;;  %13398 = vmatprep.subr.bf16.mxu0 %v21216_v25  ;;  %v21226_v24 = vld [vmem:[#allocation293_spill] sm:$0xff]  ;;  %v21227_v25 = vld [vmem:[#allocation294_spill] sm:$0xff] }
0x129f   : >> { %13272 = vmatpush1.bf16.msra.mxu1 %v21217_v11  ;;  %13400 = vmatpush1.bf16.msra.mxu0 %v21218_v57  ;;  %v21228_v11 = vld [vmem:[#allocation295_spill] sm:$0xff]  ;;  %v21229_v57 = vld [vmem:[#allocation296_spill] sm:$0xff] }
0x12a0   : >> { %13274 = vmatprep.subr.bf16.mxu1 %v21219_v51  ;;  %13402 = vmatprep.subr.bf16.mxu0 %v21220_v21  ;;  %v21230_v51 = vld [vmem:[#allocation297_spill] sm:$0xff]  ;;  %v21231_v21 = vld [vmem:[#allocation298_spill] sm:$0xff] }
0x12a3   : >> { %13276 = vmatpush1.bf16.msra.mxu1 %v21221_v41  ;;  %13404 = vmatpush1.bf16.msra.mxu0 %v21222_v15  ;;  %v21232_v41 = vld [vmem:[#allocation299_spill] sm:$0xff]  ;;  %v21233_v15 = vld [vmem:[#allocation300_spill] sm:$0xff] }
0x12a4   : >> { %13278 = vmatprep.subr.bf16.mxu1 %v21223_v2  ;;  %13406 = vmatprep.subr.bf16.mxu0 %v21224_v5  ;;  %v21234_v2 = vld [vmem:[#allocation301_spill] sm:$0xff]  ;;  %v21235_v5 = vld [vmem:[#allocation302_spill] sm:$0xff] }
0x12a7   : >> { %13280 = vmatpush1.bf16.msra.mxu1 %v21225_v30  ;;  %13408 = vmatpush1.bf16.msra.mxu0 %v21226_v24  ;;  %v21236_v30 = vld [vmem:[#allocation303_spill] sm:$0xff]  ;;  %v21237_v24 = vld [vmem:[#allocation304_spill] sm:$0xff] }
0x12a8   : >> { %13282 = vmatprep.subr.bf16.mxu1 %v21227_v25  ;;  %13410 = vmatprep.subr.bf16.mxu0 %v21228_v11  ;;  %v21238_v25 = vld [vmem:[#allocation305_spill] sm:$0xff]  ;;  %v21239_v11 = vld [vmem:[#allocation306_spill] sm:$0xff] }
0x12ab   : >> { %13284 = vmatpush1.bf16.msra.mxu1 %v21229_v57  ;;  %13412 = vmatpush1.bf16.msra.mxu0 %v21230_v51  ;;  %v21240_v57 = vld [vmem:[#allocation307_spill] sm:$0xff]  ;;  %v21241_v51 = vld [vmem:[#allocation308_spill] sm:$0xff] }
0x12ac   : >> { %13286 = vmatprep.subr.bf16.mxu1 %v21231_v21  ;;  %13414 = vmatprep.subr.bf16.mxu0 %v21232_v41  ;;  %v21242_v21 = vld [vmem:[#allocation309_spill] sm:$0xff]  ;;  %v21243_v41 = vld [vmem:[#allocation310_spill] sm:$0xff] }
0x12af   : >> { %13288 = vmatpush1.bf16.msra.mxu1 %v21233_v15  ;;  %13416 = vmatpush1.bf16.msra.mxu0 %v21234_v2  ;;  %v21309_v15 = vld [vmem:[#allocation373_spill] sm:$0xff] }
0x12b0   : >> { %13290 = vmatprep.subr.bf16.mxu1 %v21235_v5  ;;  %13418 = vmatprep.subr.bf16.mxu0 %v21236_v30  ;;  %v21244_v5 = vld [vmem:[#allocation313_spill] sm:$0xff]  ;;  %v21245_v30 = vld [vmem:[#allocation314_spill] sm:$0xff] }
0x12b3   : >> { %13292 = vmatpush1.bf16.msra.mxu1 %v21237_v24  ;;  %13420 = vmatpush1.bf16.msra.mxu0 %v21238_v25  ;;  %v21246_v24 = vld [vmem:[#allocation315_spill] sm:$0xff]  ;;  %v21247_v25 = vld [vmem:[#allocation316_spill] sm:$0xff] }
0x12b4   : >> { %13294 = vmatprep.subr.bf16.mxu1 %v21239_v11  ;;  %13422 = vmatprep.subr.bf16.mxu0 %v21240_v57  ;;  %v21248_v11 = vld [vmem:[#allocation317_spill] sm:$0xff]  ;;  %v21249_v57 = vld [vmem:[#allocation318_spill] sm:$0xff] }
0x12b7   : >> { %13296 = vmatpush1.bf16.msra.mxu1 %v21241_v51  ;;  %13424 = vmatpush1.bf16.msra.mxu0 %v21242_v21  ;;  %v21250_v51 = vld [vmem:[#allocation319_spill] sm:$0xff]  ;;  %v21251_v21 = vld [vmem:[#allocation320_spill] sm:$0xff] }
0x12b8   : >> { %13298 = vmatprep.subr.bf16.mxu1 %v21243_v41  ;;  %13426 = vmatprep.subr.bf16.mxu0 %v20929_v17  ;;  %v21252_v41 = vld [vmem:[#allocation321_spill] sm:$0xff]  ;;  %v21253_v17 = vld [vmem:[#allocation322_spill] sm:$0xff] }
0x12bb   : >> { %13300 = vmatpush1.bf16.msra.mxu1 %v20930_v38  ;;  %13428 = vmatpush1.bf16.msra.mxu0 %v21244_v5  ;;  %v21254_v38 = vld [vmem:[#allocation323_spill] sm:$0xff] }
0x12bc   : >> { %13302 = vmatprep.subr.bf16.mxu1 %v21245_v30  ;;  %13430 = vmatprep.subr.bf16.mxu0 %v21246_v24  ;;  %v21255_v24 = vld [vmem:[#allocation324_spill] sm:$0xff] }
0x12bf   : >> { %13304 = vmatpush1.bf16.msra.mxu1 %v21247_v25  ;;  %13432 = vmatpush1.bf16.msra.mxu0 %v21248_v11  ;;  %v21256_v25 = vld [vmem:[#allocation325_spill] sm:$0xff]  ;;  %v21257_v11 = vld [vmem:[#allocation326_spill] sm:$0xff] }
0x12c0   : >> { %13306 = vmatprep.subr.bf16.mxu1 %v21249_v57  ;;  %13434 = vmatprep.subr.bf16.mxu0 %v21250_v51  ;;  %v21258_v57 = vld [vmem:[#allocation327_spill] sm:$0xff] }
0x12c3   : >> { %13308 = vmatpush1.bf16.msra.mxu1 %v21251_v21  ;;  %13436 = vmatpush1.bf16.msra.mxu0 %v21252_v41  ;;  %v21285_v41 = vld [vmem:[#allocation352_spill] sm:$0xff]  ;;  %v21286_v21 = vld [vmem:[#allocation353_spill] sm:$0xff] }
0x12c4   : >> { %13438 = vmatprep.subr.bf16.mxu1 %v21253_v17  ;;  %13454 = vmatprep.subr.bf16.mxu0 %v21254_v38  ;;  %v21259_v38 = vld [vmem:[#allocation328_spill] sm:$0xff]  ;;  %v21260_v17 = vld [vmem:[#allocation329_spill] sm:$0xff] }
0x12c6   : >> { %7463 = vmatmul.mubr.f32.vlgmr.msra.gmra.mrb[136].mxu1 %v18558_v60  ;;  %7617 = vmatmul.mubr.f32.vlgmr.msra.gmra.mrb[170].mxu0 %v18558_v60  ;;  %v21261_v60 = vld [vmem:[#allocation330_spill] sm:$0xff] }
0x12c7   : >> { %13440 = vmatpush1.bf16.msra.mxu1 %v21255_v24  ;;  %13456 = vmatpush1.bf16.msra.mxu0 %v21256_v25  ;;  %v21262_v24 = vld [vmem:[#allocation331_spill] sm:$0xff] }
0x12c8   : >> { %13442 = vmatprep.subr.bf16.mxu1 %v21257_v11  ;;  %13458 = vmatprep.subr.bf16.mxu0 %v21258_v57  ;;  %v21263_v57 = vld [vmem:[#allocation332_spill] sm:$0xff]  ;;  %v21264_v11 = vld [vmem:[#allocation333_spill] sm:$0xff]  ;;  %v21266_v25 = vld [vmem:[#allocation335_spill] sm:$0xff] }
0x12c9   : >> { %7468 = vmatprep.mubr.f32.mxu1 %v18566_v37  ;;  %7622 = vmatprep.mubr.f32.mxu0 %v18566_v37  ;;  %v21265_v37 = vld [vmem:[#allocation334_spill] sm:$0xff] }
0x12ca   : >> { %7469 = vmatmul.mubr.f32.gmra.mrb[138].mxu1 %v18562_v43  ;;  %7623 = vmatmul.mubr.f32.gmra.mrb[172].mxu0 %v18562_v43  ;;  %v21267_v43 = vld [vmem:[#allocation336_spill] sm:$0xff] }
0x12cb   : >> { %13444 = vmatpush1.bf16.msra.mxu1 %v21259_v38  ;;  %13460 = vmatpush1.bf16.msra.mxu0 %v21260_v17  ;;  %v21268_v38 = vld [vmem:[#allocation337_spill] sm:$0xff]  ;;  %v21269_v17 = vld [vmem:[#allocation338_spill] sm:$0xff] }
0x12cc   : >> { %13446 = vmatprep.subr.bf16.mxu1 %v21261_v60  ;;  %13462 = vmatprep.subr.bf16.mxu0 %v21262_v24  ;;  %v21270_v60 = vld [vmem:[#allocation339_spill] sm:$0xff] }
0x12cd   : >> { %7699 = vmatprep.mubr.f32.mxu1 %v20354_v55  ;;  %7776 = vmatprep.mubr.f32.mxu0 %v20354_v55  ;;  %v21271_v24 = vld [vmem:[#allocation151_spill] sm:$0xff] }
0x12cf   : >> { %13448 = vmatpush1.bf16.msra.mxu1 %v21263_v57  ;;  %13464 = vmatpush1.bf16.msra.mxu0 %v21264_v11  ;;  %v21279_v11 = vld [vmem:[#allocation346_spill] sm:$0xff]  ;;  %v21280_v57 = vld [vmem:[#allocation347_spill] sm:$0xff] }
0x12d0   : >> { %13450 = vmatprep.subr.bf16.mxu1 %v21265_v37  ;;  %13466 = vmatprep.subr.bf16.mxu0 %v21266_v25  ;;  %v21272_v37 = vld [vmem:[#allocation340_spill] sm:$0xff]  ;;  %v21273_v25 = vld [vmem:[#allocation341_spill] sm:$0xff] }
0x12d3   : >> { %13452 = vmatpush1.bf16.msra.mxu1 %v21267_v43  ;;  %13468 = vmatpush1.bf16.msra.mxu0 %v21268_v38  ;;  %v21274_v43 = vld [vmem:[#allocation342_spill] sm:$0xff]  ;;  %v21275_v38 = vld [vmem:[#allocation343_spill] sm:$0xff] }
0x12d4   : >> { %13470 = vmatprep.subr.bf16.mxu1 %v21269_v17  ;;  %13502 = vmatprep.subr.bf16.mxu0 %v21270_v60  ;;  %v21276_v17 = vld [vmem:[#allocation152_spill] sm:$0xff] }
0x12d5   : >> { %v21277_v60 = vld [vmem:[#allocation344_spill] sm:$0xff] }
0x12d6   : >> { %10687 = vmatmul.mubr.msk.f32.vlgmr.msra.gmra.mrb[136].mxu1 %vm1068_vm2, %v21271_v24  ;;  %10689 = vmatmul.mubr.msk.f32.vlgmr.msra.gmra.mrb[170].mxu0 %vm1068_vm2, %v21271_v24  ;;  %v21278_v24 = vld [vmem:[#allocation345_spill] sm:$0xff] }
0x12d7   : >> { %7705 = vmatprep.mubr.f32.mxu1 %v20354_v55  ;;  %7782 = vmatprep.mubr.f32.mxu0 %v20354_v55 }
0x12d8   : >> { %13472 = vmatpush3.bf16.msra.mxu1 %v21272_v37  ;;  %13504 = vmatpush3.bf16.msra.mxu0 %v21273_v25  ;;  %v21281_v37 = vld [vmem:[#allocation348_spill] sm:$0xff]  ;;  %v21282_v25 = vld [vmem:[#allocation349_spill] sm:$0xff] }
0x12d9   : >> { %13474 = vmatprep.subr.bf16.mxu1 %v21274_v43  ;;  %13506 = vmatprep.subr.bf16.mxu0 %v21275_v38  ;;  %v21283_v43 = vld [vmem:[#allocation350_spill] sm:$0xff]  ;;  %v21284_v38 = vld [vmem:[#allocation351_spill] sm:$0xff] }
0x12da   : >> { %10688 = vmatmul.mubr.msk.f32.gmra.mrb[138].mxu1 %vm1068_vm2, %v21276_v17  ;;  %10690 = vmatmul.mubr.msk.f32.gmra.mrb[172].mxu0 %vm1068_vm2, %v21276_v17  ;;  %v21287_v17 = vld [vmem:[#allocation354_spill] sm:$0xff] }
0x12dc   : >> { %13476 = vmatpush3.bf16.msra.mxu1 %v21277_v60  ;;  %13508 = vmatpush3.bf16.msra.mxu0 %v21278_v24  ;;  %v21288_v60 = vld [vmem:[#allocation355_spill] sm:$0xff]  ;;  %v21289_v24 = vld [vmem:[#allocation356_spill] sm:$0xff] }
0x12dd   : >> { %13478 = vmatprep.subr.bf16.mxu1 %v21279_v11  ;;  %13510 = vmatprep.subr.bf16.mxu0 %v21280_v57  ;;  %v21290_v11 = vld [vmem:[#allocation357_spill] sm:$0xff]  ;;  %v21300_v57 = vld [vmem:[#allocation367_spill] sm:$0xff] }
0x12e0   : >> { %13480 = vmatpush3.bf16.msra.mxu1 %v21281_v37  ;;  %13512 = vmatpush3.bf16.msra.mxu0 %v21282_v25  ;;  %v21291_v37 = vld [vmem:[#allocation358_spill] sm:$0xff]  ;;  %v21292_v25 = vld [vmem:[#allocation359_spill] sm:$0xff] }
0x12e1   : >> { %13482 = vmatprep.subr.bf16.mxu1 %v21283_v43  ;;  %13514 = vmatprep.subr.bf16.mxu0 %v21284_v38  ;;  %v21293_v43 = vld [vmem:[#allocation360_spill] sm:$0xff]  ;;  %v21294_v38 = vld [vmem:[#allocation361_spill] sm:$0xff] }
0x12e4   : >> { %13484 = vmatpush3.bf16.msra.mxu1 %v21285_v41  ;;  %13516 = vmatpush3.bf16.msra.mxu0 %v21286_v21  ;;  %v21295_v41 = vld [vmem:[#allocation362_spill] sm:$0xff]  ;;  %v21296_v21 = vld [vmem:[#allocation363_spill] sm:$0xff] }
0x12e5   : >> { %13486 = vmatprep.subr.bf16.mxu1 %v21287_v17  ;;  %13518 = vmatprep.subr.bf16.mxu0 %v21288_v60  ;;  %v21297_v17 = vld [vmem:[#allocation364_spill] sm:$0xff]  ;;  %v21298_v60 = vld [vmem:[#allocation365_spill] sm:$0xff] }
0x12e8   : >> { %13488 = vmatpush3.bf16.msra.mxu1 %v21289_v24  ;;  %13520 = vmatpush3.bf16.msra.mxu0 %v21290_v11  ;;  %v21299_v24 = vld [vmem:[#allocation366_spill] sm:$0xff]  ;;  %v21301_v11 = vld [vmem:[#allocation368_spill] sm:$0xff] }
0x12e9   : >> { %13490 = vmatprep.subr.bf16.mxu1 %v21291_v37  ;;  %13522 = vmatprep.subr.bf16.mxu0 %v21292_v25  ;;  %v21302_v37 = vld [vmem:[#allocation369_spill] sm:$0xff] }
0x12ea   : >> { %v21303_v25 = vld [vmem:[#allocation25_spill] sm:$0xff] }
0x12ec   : >> { %13492 = vmatpush3.bf16.msra.mxu1 %v21293_v43  ;;  %13524 = vmatpush3.bf16.msra.mxu0 %v21294_v38  ;;  %v21304_v43 = vmov 0.0|0.0   ;;  %v14866_v38 = vld [vmem:[%s15459_s22] sm:$0xf] }
0x12ed   : >> { %13494 = vmatprep.subr.bf16.mxu1 %v21295_v41  ;;  %13526 = vmatprep.subr.bf16.mxu0 %v21296_v21  ;;  %v21305_v41 = vld [vmem:[#allocation146_spill] sm:$0xff] }
0x12ee   : >> { %v18696_v51 = vrot.slane %v14866_v38, %v21305_v41 }
0x12f0   : >> { %13496 = vmatpush3.bf16.msra.mxu1 %v21297_v17  ;;  %13528 = vmatpush3.bf16.msra.mxu0 %v21298_v60 }
0x12f1   : >> { %13498 = vmatprep.subr.bf16.mxu1 %v21299_v24  ;;  %13530 = vmatprep.subr.bf16.mxu0 %v21300_v57  ;;  %v21306_v24 = vld [vmem:[#allocation370_spill] sm:$0xff]  ;;  %v21307_v57 = vld [vmem:[#allocation371_spill] sm:$0xff] }
0x12f2   : >> { %8138 = vrot.lane.b32.xlu1 %v18696_v51, %s20660_s26 }
0x12f4   : >> { %13500 = vmatpush3.bf16.msra.mxu1 %v21301_v11  ;;  %13532 = vmatpush3.bf16.msra.mxu0 %v21302_v37  ;;  %v21308_v37 = vld [vmem:[#allocation372_spill] sm:$0xff] }
0x12f5   : >> { %13537 = vmatprep.subr.bf16.mxu1 %v21303_v25  ;;  %13533 = vmatprep.subr.bf16.mxu0 %v21304_v43 }
0x13a9   : >> { %v7701_v60 = vpop.f32.mrb[136].mxu1  ;;  %v7778_v17 = vpop.f32.mrb[170].mxu0 }
0x13aa   : >> { %v7789_v21 = vadd.f32 %v7701_v60, %v21306_v24  ;;  %v7791_v30 = vadd.f32 %v7778_v17, %v21307_v57  ;;  %v7703_v11 = vpop.f32.mrb[137].mxu1  ;;  %v7780_v5 = vpop.f32.mrb[171].mxu0 }
0x13ab   : >> { %v7790_v2 = vadd.f32 %v7703_v11, %v21308_v37  ;;  %v7792_v0 = vadd.f32 %v7780_v5, %v21309_v15 }
0x13ac   : >> { %v7797_v38 = vmax.f32 %v7789_v21, 0.0  ;;  %v7799_v32 = vmax.f32 %v7791_v30, 0.0 }
0x13ad   : >> { %v7798_v43 = vmax.f32 %v7790_v2, 0.0  ;;  %v7800_v9 = vmax.f32 %v7792_v0, 0.0  ;;  %v7707_v52 = vpop.f32.mrb[138].mxu1  ;;  %v7784_v41 = vpop.f32.mrb[172].mxu0  ;;  %v21310_v0 = vld [vmem:[#allocation26_spill] sm:$0xff] }
0x13ae   : >> { %v7793_v45 = vadd.f32 %v7707_v52, %v21306_v24  ;;  %v7795_v3 = vadd.f32 %v7784_v41, %v21307_v57  ;;  %v7709_v14 = vpop.f32.mrb[139].mxu1  ;;  %v7786_v60 = vpop.f32.mrb[173].mxu0 }
0x13af   : >> { %v7794_v17 = vadd.f32 %v7709_v14, %v21308_v37  ;;  %v7796_v56 = vadd.f32 %v7786_v60, %v21309_v15  ;;  %7869 = vmatprep.mubr.f32.mxu1 %v7798_v43  ;;  %7944 = vmatprep.mubr.f32.mxu0 %v7800_v9 }
0x13b0   : >> { %7870 = vmatmul.mubr.f32.vlgmr.msra.gmra.mrb[140].mxu1 %v7797_v38  ;;  %7945 = vmatmul.mubr.f32.vlgmr.msra.gmra.mrb[174].mxu0 %v7799_v32  ;;  %v7801_v21 = vmax.f32 %v7793_v45, 0.0  ;;  %v7803_v30 = vmax.f32 %v7795_v3, 0.0  ;;  %v14867_v45 = vld [vmem:[%s20666_s7] ss:$0 sm:$0xff] }
0x13b1   : >> { %v7802_v5 = vmax.f32 %v7794_v17, 0.0  ;;  %v7804_v2 = vmax.f32 %v7796_v56, 0.0  ;;  %13539 = vmatpush3.bf16.msra.mxu1 %v21303_v25  ;;  %v8139_v25 = vpop.permute.xlu1 %8138 }
0x13b2   : >> { %13541 = vmatprep.subr.bf16.mxu1 %v21310_v0 }
0x13b3   : >> { %7874 = vmatprep.mubr.f32.mxu1 %v7802_v5  ;;  %7949 = vmatprep.mubr.f32.mxu0 %v7804_v2 }
0x13b4   : >> { %7875 = vmatmul.mubr.f32.gmra.mrb[142].mxu1 %v7801_v21  ;;  %7950 = vmatmul.mubr.f32.gmra.mrb[176].mxu0 %v7803_v30  ;;  %v21311_v21 = vld [vmem:[#allocation147_spill] sm:$0xff] }
0x13b5   : >> { %13543 = vmatpush3.bf16.msra.mxu1 %v21310_v0  ;;  %11312 = vmatprep.mubr.msk.f32.mxu0 %vm15129_vm3, %v20354_v55 }
0x1483   : >> { %v11019_v9 = vpop.f32.mrb[140].mxu1  ;;  %v11057_v52 = vpop.f32.mrb[174].mxu0 }
0x1484   : >> { %v11020_v32 = vpop.f32.mrb[141].mxu1  ;;  %v11058_v14 = vpop.f32.mrb[175].mxu0 }
0x1485   : >> { %v11021_v56 = vadd.f32 %v11020_v32, %v11019_v9  ;;  %v11059_v11 = vadd.f32 %v11058_v14, %v11057_v52  ;;  %v14868_v52 = vld [vmem:[%s20668_s19] sm:$0xff]  ;;  %v21313_v14 = vld [vmem:[#allocation150_spill] sm:$0xff] }
0x1487   : >> { %v7872_v3 = vadd.f32 %v14867_v45, %v11021_v56  ;;  %v11022_v43 = vpop.f32.mrb[142].mxu1  ;;  %v11060_v41 = vpop.f32.mrb[176].mxu0 }
0x1488   : >> { %v11023_v38 = vpop.f32.mrb[143].mxu1  ;;  %v11061_v60 = vpop.f32.mrb[177].mxu0 }
0x1489   : >> { %v7947_v17 = vadd.f32 %v11059_v11, %v7872_v3  ;;  %v11024_v5 = vadd.f32 %v11023_v38, %v11022_v43  ;;  %v11062_v2 = vadd.f32 %v11061_v60, %v11060_v41 }
0x148b   : >> { %v18717_v30 = vadd.f32 %v7947_v17, %v21311_v21  ;;  %v7877_v0 = vadd.f32 %v14867_v45, %v11024_v5  ;;  %v14869_v45 = vld [vmem:[%s20668_s19 + $0x8] sm:$0xff]  ;;  %v14870_v5 = vld [vmem:[%s19491_s5 + $0x40] sm:$0xff] }
0x148d   : >> { %21312 = vst [vmem:[#allocation375_spill] sm:$0xff] %v18717_v30  ;;  %v7952_v15 = vadd.f32 %v11062_v2, %v7877_v0  ;;  %v8037_v9 = vsub.f32 %v18717_v30, %v18696_v51  ;;  %v7957_v32 = vsub.f32 %v18717_v30, %v14868_v52 }
0x148f   : >> { %v18726_v56 = vadd.f32 %v7952_v15, %v21313_v14  ;;  %v8141_v11 = vsub.f32 %v8037_v9, %v8139_v25  ;;  %v8039_v3 = vmul.f32 %v8037_v9, %v8037_v9  ;;  %v7959_v60 = vmul.f32 %v7957_v32, %v7957_v32 }
0x1491   : >> { %21314 = vst [vmem:[#allocation45_spill] sm:$0xff] %v18726_v56  ;;  %v7958_v0 = vsub.f32 %v18726_v56, %v14869_v45  ;;  %v8038_v43 = vsub.f32 %v18726_v56, %v18696_v51  ;;  %8145 = vrot.lane.b32.xlu0 %v8141_v11, %s20670_s2  ;;  %11323 = vmatprep.mubr.msk.f32.mxu1 %vm681_vm0, %v8039_v3  ;;  %v14871_v51 = vld [vmem:[#allocation4] sm:$0x1]  ;;  %v21317_v11 = vld [vmem:[#allocation27_spill] sm:$0xff]  ;;  %v14873_v45 = vld [vmem:[%s19491_s5 + $0x48] sm:$0xff] }
0x1492   : >> { %v21318_v3 = vld [vmem:[#allocation28_spill] sm:$0xff] }
0x1493   : >> { %v8040_v41 = vmul.f32 %v8038_v43, %v8038_v43  ;;  %v8142_v38 = vsub.f32 %v8038_v43, %v8139_v25  ;;  %v7960_v15 = vmul.f32 %v7958_v0, %v7958_v0  ;;  %v14872_v25 = vld [vmem:[%s19491_s5] sm:$0xff]  ;;  %v14875_v0 = vld [vmem:[%s19491_s5 + $0x50] sm:$0xff] }
0x1495   : >> { %8147 = vrot.lane.b32.xlu1 %v8142_v38, %s20670_s2  ;;  %11324 = vmatmul.mubr.msk.f32.vlgmr.msra.gmra.mrb[144].mxu1 %vm681_vm0, %v8040_v41  ;;  %v13534_v17 = vpack.c.bf16 %v7960_v15, %v7959_v60  ;;  %v21319_v41 = vld [vmem:[#allocation29_spill] sm:$0xff]  ;;  %v21320_v38 = vld [vmem:[#allocation30_spill] sm:$0xff]  ;;  %v21321_v60 = vld [vmem:[#allocation31_spill] sm:$0xff] }
0x1496   : >> { %11342 = vmatprep.mubr.msk.f32.mxu1 %vm763_vm1, %v14870_v5  ;;  %v21322_v15 = vld [vmem:[#allocation32_spill] sm:$0xff]  ;;  %v14878_v5 = vld [vmem:[%s19491_s5 + $0x18] sm:$0xff] }
0x1497   : >> { %13535 = vmatpush3.bf16.msra.mxu0 %v13534_v17  ;;  %v14877_v17 = vld [vmem:[%s19491_s5 + $0x58] sm:$0xff] }
0x149a   : >> { %11313 = vmatmul.mubr.msk.f32.vlgmr.msra.gmra.mrb[178].mxu0 %vm763_vm1, %v14871_v51  ;;  %v14879_v51 = vld [vmem:[%s19491_s5 + $0x60] sm:$0xff] }
0x149b   : >> { %11330 = vmatprep.mubr.msk.f32.mxu0 %vm763_vm1, %v14872_v25  ;;  %v14880_v25 = vld [vmem:[%s19491_s5 + $0x20] sm:$0xff] }
0x1503   : >> { %v8146_v2 = vpop.permute.xlu0 %8145 }
0x1504   : >> { %v18748_v52 = vsel %vm681_vm0, %v8037_v9, %v8146_v2  ;;  %v14874_v9 = vld [vmem:[%s19491_s5 + $0x8] sm:$0xff] }
0x1505   : >> { %21315 = vst [vmem:[#allocation376_spill] sm:$0xff] %v18748_v52  ;;  %v21323_v2 = vld [vmem:[#allocation33_spill] sm:$0xff] }
0x1507   : >> { %v8148_v21 = vpop.permute.xlu1 %8147 }
0x1508   : >> { %v18751_v32 = vsel %vm681_vm0, %v8038_v43, %v8148_v21  ;;  %v14876_v43 = vld [vmem:[%s19491_s5 + $0x10] sm:$0xff] }
0x1509   : >> { %21316 = vst [vmem:[#allocation148_spill] sm:$0xff] %v18751_v32  ;;  %v13544_v14 = vpack.c.bf16 %v18751_v32, %v18748_v52  ;;  %v21324_v21 = vld [vmem:[#allocation34_spill] sm:$0xff] }
0x150b   : >> { %13545 = vmatprep.subr.bf16.mxu0 %v13544_v14  ;;  %14266 = vmatprep.subr.bf16.mxu1 %v13544_v14 }
0x150c   : >> { %13547 = vmatpush3.bf16.msra.mxu0 %v13544_v14  ;;  %14267 = vmatpush3.bf16.msra.mxu1 %v13544_v14  ;;  %v21325_v14 = vld [vmem:[#allocation35_spill] sm:$0xff] }
0x150d   : >> { %13549 = vmatprep.subr.bf16.mxu1 %v21317_v11  ;;  %13565 = vmatprep.subr.bf16.mxu0 %v21318_v3  ;;  %v21326_v11 = vld [vmem:[#allocation36_spill] sm:$0xff]  ;;  %v14881_v3 = vld [vmem:[%s19491_s5 + $0x68] sm:$0xff] }
0x150f   : >> { %11343 = vmatmul.mubr.msk.f32.vlgmr.msra.gmra.mrb[146].mxu1 %vm763_vm1, %v14873_v45  ;;  %11331 = vmatmul.mubr.msk.f32.vlgmr.msra.gmra.mrb[180].mxu0 %vm763_vm1, %v14874_v9  ;;  %v14882_v45 = vld [vmem:[%s19491_s5 + $0x28] sm:$0xff]  ;;  %v14883_v9 = vld [vmem:[%s19491_s5 + $0x70] sm:$0xff] }
0x1510   : >> { %11345 = vmatprep.mubr.msk.f32.mxu1 %vm763_vm1, %v14875_v0  ;;  %11333 = vmatprep.mubr.msk.f32.mxu0 %vm763_vm1, %v14876_v43  ;;  %v14884_v0 = vld [vmem:[%s19491_s5 + $0x30] sm:$0xff]  ;;  %v21327_v43 = vld [vmem:[#allocation37_spill] sm:$0xff] }
0x1511   : >> { %13551 = vmatpush1.bf16.msra.mxu1 %v21319_v41  ;;  %13567 = vmatpush1.bf16.msra.mxu0 %v21320_v38  ;;  %v21328_v41 = vld [vmem:[#allocation38_spill] sm:$0xff]  ;;  %v21329_v38 = vld [vmem:[#allocation39_spill] sm:$0xff] }
0x1512   : >> { %13553 = vmatprep.subr.bf16.mxu1 %v21321_v60  ;;  %13569 = vmatprep.subr.bf16.mxu0 %v21322_v15  ;;  %v21330_v60 = vld [vmem:[#allocation40_spill] sm:$0xff]  ;;  %v14885_v15 = vld [vmem:[%s19491_s5 + $0x78] sm:$0xff] }
0x1513   : >> { %11346 = vmatmul.mubr.msk.f32.gmra.mrb[148].mxu1 %vm763_vm1, %v14877_v17  ;;  %11334 = vmatmul.mubr.msk.f32.gmra.mrb[182].mxu0 %vm763_vm1, %v14878_v5  ;;  %v14886_v17 = vld [vmem:[%s19491_s5 + $0x38] sm:$0xff]  ;;  %v21331_v5 = vld [vmem:[#allocation41_spill] sm:$0xff] }
0x1514   : >> { %11348 = vmatprep.mubr.msk.f32.mxu1 %vm763_vm1, %v14879_v51  ;;  %11336 = vmatprep.mubr.msk.f32.mxu0 %vm763_vm1, %v14880_v25  ;;  %v21332_v51 = vld [vmem:[#allocation42_spill] sm:$0xff]  ;;  %v21333_v25 = vld [vmem:[#allocation43_spill] sm:$0xff] }
0x1515   : >> { %13555 = vmatpush1.bf16.msra.mxu1 %v21323_v2  ;;  %13571 = vmatpush1.bf16.msra.mxu0 %v21324_v21  ;;  %v21334_v2 = vld [vmem:[#allocation44_spill] sm:$0xff] }
0x1516   : >> { %13557 = vmatprep.subr.bf16.mxu1 %v21325_v14  ;;  %13573 = vmatprep.subr.bf16.mxu0 %v21326_v11 }
0x1517   : >> { %11349 = vmatmul.mubr.msk.f32.gmra.mrb[150].mxu1 %vm763_vm1, %v14881_v3  ;;  %11337 = vmatmul.mubr.msk.f32.gmra.mrb[184].mxu0 %vm763_vm1, %v14882_v45 }
0x1518   : >> { %11351 = vmatprep.mubr.msk.f32.mxu1 %vm763_vm1, %v14883_v9  ;;  %11339 = vmatprep.mubr.msk.f32.mxu0 %vm763_vm1, %v14884_v0 }
0x1519   : >> { %13559 = vmatpush1.bf16.msra.mxu1 %v21327_v43  ;;  %13575 = vmatpush1.bf16.msra.mxu0 %v21328_v41 }
0x151a   : >> { %13561 = vmatprep.subr.bf16.mxu1 %v21329_v38  ;;  %13577 = vmatprep.subr.bf16.mxu0 %v21330_v60  ;;  %v21335_v60 = vld [vmem:[#allocation180_spill] sm:$0xff] }
0x151b   : >> { %11352 = vmatmul.mubr.msk.f32.gmra.mrb[152].mxu1 %vm763_vm1, %v14885_v15  ;;  %11340 = vmatmul.mubr.msk.f32.gmra.mrb[186].mxu0 %vm763_vm1, %v14886_v17 }
0x151c   : >> { %8386 = vmatprep.mubr.f32.mxu1 %v20354_v55  ;;  %8499 = vmatprep.mubr.f32.mxu0 %v20354_v55 }
0x151d   : >> { %13563 = vmatpush1.bf16.msra.mxu1 %v21331_v5  ;;  %13579 = vmatpush1.bf16.msra.mxu0 %v21332_v51 }
0x151e   : >> { %13581 = vmatprep.subr.bf16.mxu1 %v21333_v25  ;;  %13597 = vmatprep.subr.bf16.mxu0 %v21334_v2 }
0x1568   : >> { %v11325_v21 = vpop.f32.mrb[144].mxu1 }
0x1569   : >> { %v8123_v14 = vsel %vm763_vm1, %v11325_v21, inf  ;;  %v8113_v11 = vpop.f32.mrb[145].mxu1  ;;  %v21337_v21 = vld [vmem:[#allocation374_spill] sm:$0xff] }
0x156a   : >> { %v8122_v3 = vsel %vm763_vm1, %v8113_v11, inf }
0x156b   : >> { %v8124_v45 = vmin.f32 %v8122_v3, %v8123_v14 }
0x156d   : >> { %v8125_v9 = vrot.slane %v8124_v45, 4  ;;  %v8027_v0 = vpop.f32.mrb[178].mxu0 }
0x156e   : >> { %v8031_v43 = vmul.f32 0.75, %v8027_v0  ;;  %v11314_v41 = vpop.f32.mrb[179].mxu0 }
0x156f   : >> { %v8126_v38 = vmin.f32 %v8124_v45, %v8125_v9  ;;  %v21342_v41 = vld [vmem:[#allocation49_spill] sm:$0xff] }
0x1570   : >> { %v18834_v15 = vadd.f32 %v8031_v43, %v21335_v60  ;;  %v21339_v43 = vld [vmem:[#allocation46_spill] sm:$0xff] }
0x1571   : >> { %v8127_v17 = vrot.slane %v8126_v38, 2 }
0x1572   : >> { %21336 = vst [vmem:[#allocation149_spill] sm:$0xff] %v18834_v15 }
0x1573   : >> { %v8128_v5 = vmin.f32 %v8126_v38, %v8127_v17  ;;  %v21343_v17 = vld [vmem:[#allocation50_spill] sm:$0xff] }
0x1575   : >> { %v8129_v51 = vrot.slane %v8128_v5, 1 }
0x1577   : >> { %v8130_v25 = vmin.f32 %v8128_v5, %v8129_v51  ;;  %v21344_v5 = vld [vmem:[#allocation51_spill] sm:$0xff] }
0x1579   : >> { %v8131_v2 = vsub.f32 0.0025, %v8130_v25  ;;  %v10694_v56 = vadd.f32 -0.0625, %v8130_v25 }
0x157b   : >> { %v8132_v30 = vmax.f32 %v8131_v2, 0.0  ;;  %v8135_v57 = vmax.f32 %v10694_v56, 0.0  ;;  %v21341_v56 = vld [vmem:[#allocation48_spill] sm:$0xff] }
0x157c   : >> { %v21345_v2 = vld [vmem:[#allocation52_spill] sm:$0xff] }
0x157d   : >> { %v8133_v37 = vadd.f32 %v8132_v30, %v21337_v21  ;;  %v21340_v30 = vld [vmem:[#allocation47_spill] sm:$0xff]  ;;  %v21346_v21 = vld [vmem:[#allocation53_spill] sm:$0xff] }
0x157f   : >> { %v18837_v11 = vadd.f32 %v8135_v57, %v8133_v37 }
0x1581   : >> { %21338 = vst [vmem:[#allocation154_spill] sm:$0xff] %v18837_v11 }
0x15e2   : >> { %v11344_v14 = vpop.f32.mrb[146].mxu1  ;;  %v18839_v3 = vpop.f32.mrb[180].mxu0 }
0x15e3   : >> { %v8259_v0 = vpop.f32.mrb[147].mxu1  ;;  %v8219_v45 = vpop.f32.mrb[181].mxu0 }
0x15e4   : >> { %10711 = vmatmul.mubr.msk.f32.vlgmr.msra.gmra.mrb[154].mxu1 %vm1068_vm2, %v8259_v0  ;;  %10719 = vmatmul.mubr.msk.f32.vlgmr.msra.gmra.mrb[188].mxu0 %vm1068_vm2, %v8259_v0 }
0x15e5   : >> { %8392 = vmatprep.mubr.f32.mxu1 %v20354_v55  ;;  %8505 = vmatprep.mubr.f32.mxu0 %v20354_v55 }
0x15e6   : >> { %v11347_v9 = vpop.f32.mrb[148].mxu1  ;;  %13583 = vmatpush1.bf16.msra.mxu1 %v21339_v43  ;;  %13599 = vmatpush1.bf16.msra.mxu0 %v21340_v30  ;;  %v18847_v57 = vpop.f32.mrb[182].mxu0  ;;  %v21347_v43 = vld [vmem:[#allocation54_spill] sm:$0xff]  ;;  %v21348_v30 = vld [vmem:[#allocation55_spill] sm:$0xff] }
0x15e7   : >> { %v8269_v37 = vpop.f32.mrb[149].mxu1  ;;  %13585 = vmatprep.subr.bf16.mxu1 %v21341_v56  ;;  %13601 = vmatprep.subr.bf16.mxu0 %v21342_v41  ;;  %v18851_v38 = vpop.f32.mrb[183].mxu0 }
0x15e8   : >> { %10712 = vmatmul.mubr.msk.f32.gmra.mrb[156].mxu1 %vm1068_vm2, %v11344_v14  ;;  %10720 = vmatmul.mubr.msk.f32.gmra.mrb[190].mxu0 %vm1068_vm2, %v11344_v14 }
0x15e9   : >> { %8398 = vmatprep.mubr.f32.mxu1 %v20354_v55  ;;  %8511 = vmatprep.mubr.f32.mxu0 %v20354_v55 }
0x15ea   : >> { %v11350_v60 = vpop.f32.mrb[150].mxu1  ;;  %13587 = vmatpush1.bf16.msra.mxu1 %v21343_v17  ;;  %13603 = vmatpush1.bf16.msra.mxu0 %v21344_v5  ;;  %v18859_v51 = vpop.f32.mrb[184].mxu0  ;;  %v21349_v17 = vld [vmem:[#allocation56_spill] sm:$0xff]  ;;  %v21350_v5 = vld [vmem:[#allocation57_spill] sm:$0xff] }
0x15eb   : >> { %v8279_v25 = vpop.f32.mrb[151].mxu1  ;;  %13589 = vmatprep.subr.bf16.mxu1 %v21345_v2  ;;  %13605 = vmatprep.subr.bf16.mxu0 %v21346_v21  ;;  %v18863_v0 = vpop.f32.mrb[185].mxu0  ;;  %v21352_v21 = vld [vmem:[#allocation59_spill] sm:$0xff] }
0x15ec   : >> { %10713 = vmatmul.mubr.msk.f32.gmra.mrb[158].mxu1 %vm1068_vm2, %v8269_v37  ;;  %10721 = vmatmul.mubr.msk.f32.gmra.mrb[192].mxu0 %vm1068_vm2, %v8269_v37  ;;  %v21351_v37 = vld [vmem:[#allocation58_spill] sm:$0xff] }
0x15ed   : >> { %8404 = vmatprep.mubr.f32.mxu1 %v20354_v55  ;;  %8517 = vmatprep.mubr.f32.mxu0 %v20354_v55 }
0x15ee   : >> { %v11353_v14 = vpop.f32.mrb[152].mxu1  ;;  %13591 = vmatpush1.bf16.msra.mxu1 %v21347_v43  ;;  %13607 = vmatpush1.bf16.msra.mxu0 %v21348_v30  ;;  %v18871_v56 = vpop.f32.mrb[186].mxu0  ;;  %v21353_v43 = vld [vmem:[#allocation60_spill] sm:$0xff]  ;;  %v21354_v30 = vld [vmem:[#allocation61_spill] sm:$0xff] }
0x15ef   : >> { %v8289_v41 = vpop.f32.mrb[153].mxu1  ;;  %13593 = vmatprep.subr.bf16.mxu1 %v21349_v17  ;;  %13609 = vmatprep.subr.bf16.mxu0 %v21350_v5  ;;  %v18875_v2 = vpop.f32.mrb[187].mxu0  ;;  %v21361_v17 = vld [vmem:[#allocation68_spill] sm:$0xff]  ;;  %v21362_v5 = vld [vmem:[#allocation69_spill] sm:$0xff] }
0x15f0   : >> { %10714 = vmatmul.mubr.msk.f32.gmra.mrb[160].mxu1 %vm1068_vm2, %v11347_v9  ;;  %10722 = vmatmul.mubr.msk.f32.gmra.mrb[194].mxu0 %vm1068_vm2, %v11347_v9  ;;  %v21355_v9 = vld [vmem:[#allocation62_spill] sm:$0xff] }
0x15f1   : >> { %8410 = vmatprep.mubr.f32.mxu1 %v20354_v55  ;;  %8523 = vmatprep.mubr.f32.mxu0 %v20354_v55 }
0x15f2   : >> { %13595 = vmatpush1.bf16.msra.mxu1 %v21351_v37  ;;  %13611 = vmatpush1.bf16.msra.mxu0 %v21352_v21  ;;  %v21364_v37 = vld [vmem:[#allocation71_spill] sm:$0xff]  ;;  %v21365_v21 = vld [vmem:[#allocation72_spill] sm:$0xff] }
0x15f3   : >> { %13613 = vmatprep.subr.bf16.mxu1 %v21353_v43  ;;  %13741 = vmatprep.subr.bf16.mxu0 %v21354_v30  ;;  %v21366_v43 = vld [vmem:[#allocation73_spill] sm:$0xff]  ;;  %v21368_v30 = vld [vmem:[#allocation75_spill] sm:$0xff] }
0x15f4   : >> { %10715 = vmatmul.mubr.msk.f32.gmra.mrb[162].mxu1 %vm1068_vm2, %v8279_v25  ;;  %10723 = vmatmul.mubr.msk.f32.gmra.mrb[196].mxu0 %vm1068_vm2, %v8279_v25  ;;  %v21357_v25 = vld [vmem:[#allocation64_spill] sm:$0xff] }
0x15f5   : >> { %8416 = vmatprep.mubr.f32.mxu1 %v20354_v55  ;;  %8529 = vmatprep.mubr.f32.mxu0 %v20354_v55 }
0x15f8   : >> { %10716 = vmatmul.mubr.msk.f32.gmra.mrb[164].mxu1 %vm1068_vm2, %v11350_v60  ;;  %10724 = vmatmul.mubr.msk.f32.gmra.mrb[198].mxu0 %vm1068_vm2, %v11350_v60  ;;  %v21356_v60 = vld [vmem:[#allocation63_spill] sm:$0xff] }
0x15f9   : >> { %8422 = vmatprep.mubr.f32.mxu1 %v20354_v55  ;;  %8535 = vmatprep.mubr.f32.mxu0 %v20354_v55 }
0x15fc   : >> { %10717 = vmatmul.mubr.msk.f32.gmra.mrb[166].mxu1 %vm1068_vm2, %v8289_v41  ;;  %10725 = vmatmul.mubr.msk.f32.gmra.mrb[200].mxu0 %vm1068_vm2, %v8289_v41  ;;  %v21358_v41 = vld [vmem:[#allocation65_spill] sm:$0xff] }
0x15fd   : >> { %8428 = vmatprep.mubr.f32.mxu1 %v20354_v55  ;;  %8541 = vmatprep.mubr.f32.mxu0 %v20354_v55 }
0x1600   : >> { %10718 = vmatmul.mubr.msk.f32.gmra.mrb[168].mxu1 %vm1068_vm2, %v11353_v14  ;;  %10726 = vmatmul.mubr.msk.f32.gmra.mrb[202].mxu0 %vm1068_vm2, %v11353_v14  ;;  %v21360_v14 = vld [vmem:[#allocation67_spill] sm:$0xff] }
0x1601   : >> { %8636 = vmatprep.mubr.f32.mxu1 %v20354_v55  ;;  %8749 = vmatprep.mubr.f32.mxu0 %v20354_v55 }
0x1604   : >> { %10727 = vmatmul.mubr.msk.f32.vlgmr.msra.gmra.mrb[154].mxu1 %vm1068_vm2, %v8219_v45  ;;  %10735 = vmatmul.mubr.msk.f32.vlgmr.msra.gmra.mrb[188].mxu0 %vm1068_vm2, %v8219_v45  ;;  %v21359_v45 = vld [vmem:[#allocation66_spill] sm:$0xff] }
0x1605   : >> { %8642 = vmatprep.mubr.f32.mxu1 %v20354_v55  ;;  %8755 = vmatprep.mubr.f32.mxu0 %v20354_v55 }
0x1606   : >> { %13615 = vmatpush1.bf16.msra.mxu1 %v21355_v9  ;;  %13743 = vmatpush1.bf16.msra.mxu0 %v21356_v60  ;;  %v21369_v9 = vld [vmem:[#allocation76_spill] sm:$0xff]  ;;  %v21370_v60 = vld [vmem:[#allocation77_spill] sm:$0xff] }
0x1607   : >> { %13617 = vmatprep.subr.bf16.mxu1 %v21357_v25  ;;  %13745 = vmatprep.subr.bf16.mxu0 %v21358_v41  ;;  %v21372_v25 = vld [vmem:[#allocation79_spill] sm:$0xff]  ;;  %v21373_v41 = vld [vmem:[#allocation80_spill] sm:$0xff] }
0x1608   : >> { %10728 = vmatmul.mubr.msk.f32.gmra.mrb[156].mxu1 %vm1068_vm2, %v18839_v3  ;;  %10736 = vmatmul.mubr.msk.f32.gmra.mrb[190].mxu0 %vm1068_vm2, %v18839_v3  ;;  %v21363_v3 = vld [vmem:[#allocation70_spill] sm:$0xff] }
0x1609   : >> { %8648 = vmatprep.mubr.f32.mxu1 %v20354_v55  ;;  %8761 = vmatprep.mubr.f32.mxu0 %v20354_v55 }
0x160a   : >> { %13619 = vmatpush1.bf16.msra.mxu1 %v21359_v45  ;;  %13747 = vmatpush1.bf16.msra.mxu0 %v21360_v14  ;;  %v21374_v45 = vld [vmem:[#allocation81_spill] sm:$0xff]  ;;  %v21376_v14 = vld [vmem:[#allocation83_spill] sm:$0xff] }
0x160b   : >> { %13621 = vmatprep.subr.bf16.mxu1 %v21361_v17  ;;  %13749 = vmatprep.subr.bf16.mxu0 %v21362_v5  ;;  %v21377_v17 = vld [vmem:[#allocation84_spill] sm:$0xff]  ;;  %v21378_v5 = vld [vmem:[#allocation85_spill] sm:$0xff] }
0x160c   : >> { %10729 = vmatmul.mubr.msk.f32.gmra.mrb[158].mxu1 %vm1068_vm2, %v18851_v38  ;;  %10737 = vmatmul.mubr.msk.f32.gmra.mrb[192].mxu0 %vm1068_vm2, %v18851_v38  ;;  %v21367_v38 = vld [vmem:[#allocation74_spill] sm:$0xff] }
0x160d   : >> { %8654 = vmatprep.mubr.f32.mxu1 %v20354_v55  ;;  %8767 = vmatprep.mubr.f32.mxu0 %v20354_v55 }
0x160e   : >> { %13623 = vmatpush1.bf16.msra.mxu1 %v21363_v3  ;;  %13751 = vmatpush1.bf16.msra.mxu0 %v21364_v37  ;;  %v21380_v3 = vld [vmem:[#allocation87_spill] sm:$0xff]  ;;  %v21381_v37 = vld [vmem:[#allocation88_spill] sm:$0xff] }
0x160f   : >> { %13625 = vmatprep.subr.bf16.mxu1 %v21365_v21  ;;  %13753 = vmatprep.subr.bf16.mxu0 %v21366_v43  ;;  %v21382_v21 = vld [vmem:[#allocation89_spill] sm:$0xff]  ;;  %v21383_v43 = vld [vmem:[#allocation90_spill] sm:$0xff] }
0x1610   : >> { %10730 = vmatmul.mubr.msk.f32.gmra.mrb[160].mxu1 %vm1068_vm2, %v18847_v57  ;;  %10738 = vmatmul.mubr.msk.f32.gmra.mrb[194].mxu0 %vm1068_vm2, %v18847_v57  ;;  %v21371_v57 = vld [vmem:[#allocation78_spill] sm:$0xff] }
0x1611   : >> { %8660 = vmatprep.mubr.f32.mxu1 %v20354_v55  ;;  %8773 = vmatprep.mubr.f32.mxu0 %v20354_v55 }
0x1612   : >> { %13627 = vmatpush1.bf16.msra.mxu1 %v21367_v38  ;;  %13755 = vmatpush1.bf16.msra.mxu0 %v21368_v30  ;;  %v21385_v38 = vld [vmem:[#allocation92_spill] sm:$0xff]  ;;  %v21386_v30 = vld [vmem:[#allocation93_spill] sm:$0xff] }
0x1613   : >> { %13629 = vmatprep.subr.bf16.mxu1 %v21369_v9  ;;  %13757 = vmatprep.subr.bf16.mxu0 %v21370_v60  ;;  %v21387_v9 = vld [vmem:[#allocation94_spill] sm:$0xff]  ;;  %v21388_v60 = vld [vmem:[#allocation95_spill] sm:$0xff] }
0x1614   : >> { %10731 = vmatmul.mubr.msk.f32.gmra.mrb[162].mxu1 %vm1068_vm2, %v18863_v0  ;;  %10739 = vmatmul.mubr.msk.f32.gmra.mrb[196].mxu0 %vm1068_vm2, %v18863_v0  ;;  %v21375_v0 = vld [vmem:[#allocation82_spill] sm:$0xff] }
0x1615   : >> { %8666 = vmatprep.mubr.f32.mxu1 %v20354_v55  ;;  %8779 = vmatprep.mubr.f32.mxu0 %v20354_v55 }
0x1616   : >> { %13631 = vmatpush1.bf16.msra.mxu1 %v21371_v57  ;;  %13759 = vmatpush1.bf16.msra.mxu0 %v21372_v25  ;;  %v21389_v57 = vld [vmem:[#allocation96_spill] sm:$0xff]  ;;  %v21390_v25 = vld [vmem:[#allocation97_spill] sm:$0xff] }
0x1617   : >> { %13633 = vmatprep.subr.bf16.mxu1 %v21373_v41  ;;  %13761 = vmatprep.subr.bf16.mxu0 %v21374_v45  ;;  %v21391_v41 = vld [vmem:[#allocation98_spill] sm:$0xff]  ;;  %v21392_v45 = vld [vmem:[#allocation99_spill] sm:$0xff] }
0x1618   : >> { %10732 = vmatmul.mubr.msk.f32.gmra.mrb[164].mxu1 %vm1068_vm2, %v18859_v51  ;;  %10740 = vmatmul.mubr.msk.f32.gmra.mrb[198].mxu0 %vm1068_vm2, %v18859_v51  ;;  %v21379_v51 = vld [vmem:[#allocation86_spill] sm:$0xff] }
0x1619   : >> { %8672 = vmatprep.mubr.f32.mxu1 %v20354_v55  ;;  %8785 = vmatprep.mubr.f32.mxu0 %v20354_v55 }
0x161a   : >> { %13635 = vmatpush1.bf16.msra.mxu1 %v21375_v0  ;;  %13763 = vmatpush1.bf16.msra.mxu0 %v21376_v14  ;;  %v21394_v0 = vld [vmem:[#allocation101_spill] sm:$0xff]  ;;  %v21395_v14 = vld [vmem:[#allocation102_spill] sm:$0xff] }
0x161b   : >> { %13637 = vmatprep.subr.bf16.mxu1 %v21377_v17  ;;  %13765 = vmatprep.subr.bf16.mxu0 %v21378_v5  ;;  %v21396_v17 = vld [vmem:[#allocation103_spill] sm:$0xff]  ;;  %v21397_v5 = vld [vmem:[#allocation104_spill] sm:$0xff] }
0x161c   : >> { %10733 = vmatmul.mubr.msk.f32.gmra.mrb[166].mxu1 %vm1068_vm2, %v18875_v2  ;;  %10741 = vmatmul.mubr.msk.f32.gmra.mrb[200].mxu0 %vm1068_vm2, %v18875_v2  ;;  %v21384_v2 = vld [vmem:[#allocation91_spill] sm:$0xff] }
0x161d   : >> { %8678 = vmatprep.mubr.f32.mxu1 %v20354_v55  ;;  %8791 = vmatprep.mubr.f32.mxu0 %v20354_v55 }
0x161e   : >> { %13639 = vmatpush1.bf16.msra.mxu1 %v21379_v51  ;;  %13767 = vmatpush1.bf16.msra.mxu0 %v21380_v3  ;;  %v21398_v51 = vld [vmem:[#allocation105_spill] sm:$0xff]  ;;  %v21399_v3 = vld [vmem:[#allocation106_spill] sm:$0xff] }
0x161f   : >> { %13641 = vmatprep.subr.bf16.mxu1 %v21381_v37  ;;  %13769 = vmatprep.subr.bf16.mxu0 %v21382_v21  ;;  %v21400_v37 = vld [vmem:[#allocation107_spill] sm:$0xff]  ;;  %v21401_v21 = vld [vmem:[#allocation108_spill] sm:$0xff] }
0x1620   : >> { %10734 = vmatmul.mubr.msk.f32.gmra.mrb[168].mxu1 %vm1068_vm2, %v18871_v56  ;;  %10742 = vmatmul.mubr.msk.f32.gmra.mrb[202].mxu0 %vm1068_vm2, %v18871_v56  ;;  %v21393_v56 = vld [vmem:[#allocation100_spill] sm:$0xff] }
0x1622   : >> { %13643 = vmatpush1.bf16.msra.mxu1 %v21383_v43  ;;  %13771 = vmatpush1.bf16.msra.mxu0 %v21384_v2  ;;  %v21402_v43 = vld [vmem:[#allocation109_spill] sm:$0xff]  ;;  %v21403_v2 = vld [vmem:[#allocation110_spill] sm:$0xff] }
0x1623   : >> { %13645 = vmatprep.subr.bf16.mxu1 %v21385_v38  ;;  %13773 = vmatprep.subr.bf16.mxu0 %v21386_v30  ;;  %v21404_v38 = vld [vmem:[#allocation111_spill] sm:$0xff]  ;;  %v21405_v30 = vld [vmem:[#allocation112_spill] sm:$0xff] }
0x1626   : >> { %13647 = vmatpush1.bf16.msra.mxu1 %v21387_v9  ;;  %13775 = vmatpush1.bf16.msra.mxu0 %v21388_v60  ;;  %v21406_v9 = vld [vmem:[#allocation113_spill] sm:$0xff]  ;;  %v21407_v60 = vld [vmem:[#allocation114_spill] sm:$0xff] }
0x1627   : >> { %13649 = vmatprep.subr.bf16.mxu1 %v21389_v57  ;;  %13777 = vmatprep.subr.bf16.mxu0 %v21390_v25  ;;  %v21408_v57 = vld [vmem:[#allocation115_spill] sm:$0xff]  ;;  %v21409_v25 = vld [vmem:[#allocation116_spill] sm:$0xff] }
0x162a   : >> { %13651 = vmatpush1.bf16.msra.mxu1 %v21391_v41  ;;  %13779 = vmatpush1.bf16.msra.mxu0 %v21392_v45  ;;  %v21410_v41 = vld [vmem:[#allocation117_spill] sm:$0xff]  ;;  %v21411_v45 = vld [vmem:[#allocation118_spill] sm:$0xff] }
0x162b   : >> { %13653 = vmatprep.subr.bf16.mxu1 %v21393_v56  ;;  %13781 = vmatprep.subr.bf16.mxu0 %v21394_v0  ;;  %v21412_v56 = vld [vmem:[#allocation119_spill] sm:$0xff]  ;;  %v21413_v0 = vld [vmem:[#allocation120_spill] sm:$0xff] }
0x162e   : >> { %13655 = vmatpush1.bf16.msra.mxu1 %v21395_v14  ;;  %13783 = vmatpush1.bf16.msra.mxu0 %v21396_v17  ;;  %v21414_v14 = vld [vmem:[#allocation121_spill] sm:$0xff]  ;;  %v21415_v17 = vld [vmem:[#allocation122_spill] sm:$0xff] }
0x162f   : >> { %13657 = vmatprep.subr.bf16.mxu1 %v21397_v5  ;;  %13785 = vmatprep.subr.bf16.mxu0 %v21398_v51  ;;  %v21416_v5 = vld [vmem:[#allocation123_spill] sm:$0xff]  ;;  %v21417_v51 = vld [vmem:[#allocation124_spill] sm:$0xff] }
0x1632   : >> { %13659 = vmatpush1.bf16.msra.mxu1 %v21399_v3  ;;  %13787 = vmatpush1.bf16.msra.mxu0 %v21400_v37  ;;  %v21418_v3 = vld [vmem:[#allocation125_spill] sm:$0xff] }
0x1633   : >> { %13661 = vmatprep.subr.bf16.mxu1 %v21401_v21  ;;  %13789 = vmatprep.subr.bf16.mxu0 %v21402_v43 }
0x1636   : >> { %13663 = vmatpush1.bf16.msra.mxu1 %v21403_v2  ;;  %13791 = vmatpush1.bf16.msra.mxu0 %v21404_v38 }
0x1637   : >> { %13665 = vmatprep.subr.bf16.mxu1 %v21405_v30  ;;  %13793 = vmatprep.subr.bf16.mxu0 %v21406_v9 }
0x163a   : >> { %13667 = vmatpush1.bf16.msra.mxu1 %v21407_v60  ;;  %13795 = vmatpush1.bf16.msra.mxu0 %v21408_v57 }
0x163b   : >> { %13669 = vmatprep.subr.bf16.mxu1 %v21409_v25  ;;  %13797 = vmatprep.subr.bf16.mxu0 %v21410_v41 }
0x163e   : >> { %13671 = vmatpush1.bf16.msra.mxu1 %v21411_v45  ;;  %13799 = vmatpush1.bf16.msra.mxu0 %v21412_v56 }
0x163f   : >> { %13673 = vmatprep.subr.bf16.mxu1 %v21413_v0  ;;  %13801 = vmatprep.subr.bf16.mxu0 %v21414_v14 }
0x1642   : >> { %13675 = vmatpush1.bf16.msra.mxu1 %v21415_v17  ;;  %13803 = vmatpush1.bf16.msra.mxu0 %v21416_v5  ;;  %v21419_v17 = vld [vmem:[#allocation126_spill] sm:$0xff]  ;;  %v21420_v5 = vld [vmem:[#allocation127_spill] sm:$0xff] }
0x1643   : >> { %13677 = vmatprep.subr.bf16.mxu1 %v21417_v51  ;;  %13805 = vmatprep.subr.bf16.mxu0 %v21418_v3 }
0x16d7   : >> { %v8638_v37 = vpop.f32.mrb[154].mxu1  ;;  %v19009_v21 = vpop.f32.mrb[188].mxu0 }
0x16d8   : >> { %v8798_v43 = vadd.f32 %v8638_v37, %v16167_v39  ;;  %v8640_v2 = vpop.f32.mrb[155].mxu1  ;;  %v19012_v38 = vpop.f32.mrb[189].mxu0 }
0x16d9   : >> { %v8799_v30 = vadd.f32 %v8640_v2, %v16171_v42 }
0x16da   : >> { %v8830_v25 = vmax.f32 %v8798_v43, 0.0 }
0x16db   : >> { %v8831_v9 = vmax.f32 %v8799_v30, 0.0  ;;  %v8644_v60 = vpop.f32.mrb[156].mxu1  ;;  %v19015_v57 = vpop.f32.mrb[190].mxu0 }
0x16dc   : >> { %v8802_v41 = vadd.f32 %v8644_v60, %v16167_v39  ;;  %v8646_v45 = vpop.f32.mrb[157].mxu1  ;;  %v19018_v56 = vpop.f32.mrb[191].mxu0  ;;  %v21421_v60 = vld [vmem:[#allocation128_spill] sm:$0xff] }
0x16dd   : >> { %v8803_v0 = vadd.f32 %v8646_v45, %v16171_v42  ;;  %8926 = vmatprep.mubr.f32.mxu1 %v8831_v9  ;;  %9152 = vmatprep.mubr.f32.mxu0 %v8831_v9  ;;  %v21422_v45 = vld [vmem:[#allocation129_spill] sm:$0xff] }
0x16de   : >> { %8927 = vmatmul.mubr.f32.vlgmr.msra.gmra.mrb[170].mxu1 %v8830_v25  ;;  %9153 = vmatmul.mubr.f32.vlgmr.msra.gmra.mrb[204].mxu0 %v8830_v25  ;;  %v8834_v37 = vmax.f32 %v8802_v41, 0.0 }
0x16df   : >> { %v8835_v14 = vmax.f32 %v8803_v0, 0.0  ;;  %13679 = vmatpush1.bf16.msra.mxu1 %v21419_v17  ;;  %13807 = vmatpush1.bf16.msra.mxu0 %v21420_v5  ;;  %v8650_v51 = vpop.f32.mrb[158].mxu1  ;;  %v19023_v3 = vpop.f32.mrb[192].mxu0  ;;  %v21423_v0 = vld [vmem:[#allocation130_spill] sm:$0xff]  ;;  %v21424_v17 = vld [vmem:[#allocation131_spill] sm:$0xff] }
0x16e0   : >> { %v8806_v43 = vadd.f32 %v8650_v51, %v16167_v39  ;;  %v8652_v2 = vpop.f32.mrb[159].mxu1  ;;  %v19026_v30 = vpop.f32.mrb[193].mxu0  ;;  %13681 = vmatprep.subr.bf16.mxu1 %v21421_v60  ;;  %13809 = vmatprep.subr.bf16.mxu0 %v21422_v45  ;;  %v21425_v45 = vld [vmem:[#allocation132_spill] sm:$0xff] }
0x16e1   : >> { %v8807_v9 = vadd.f32 %v8652_v2, %v16171_v42  ;;  %8932 = vmatprep.mubr.f32.mxu1 %v8835_v14  ;;  %9158 = vmatprep.mubr.f32.mxu0 %v8835_v14  ;;  %v21426_v2 = vld [vmem:[#allocation133_spill] sm:$0xff] }
0x16e2   : >> { %8933 = vmatmul.mubr.f32.gmra.mrb[172].mxu1 %v8834_v37  ;;  %9159 = vmatmul.mubr.f32.gmra.mrb[206].mxu0 %v8834_v37  ;;  %v8838_v51 = vmax.f32 %v8806_v43, 0.0 }
0x16e3   : >> { %v8839_v25 = vmax.f32 %v8807_v9, 0.0  ;;  %13683 = vmatpush1.bf16.msra.mxu1 %v21423_v0  ;;  %13811 = vmatpush1.bf16.msra.mxu0 %v21424_v17  ;;  %v8656_v41 = vpop.f32.mrb[160].mxu1  ;;  %v19033_v5 = vpop.f32.mrb[194].mxu0  ;;  %v21427_v9 = vld [vmem:[#allocation134_spill] sm:$0xff]  ;;  %v21428_v0 = vld [vmem:[#allocation135_spill] sm:$0xff] }
0x16e4   : >> { %v8810_v11 = vadd.f32 %v8656_v41, %v16167_v39  ;;  %v8658_v60 = vpop.f32.mrb[161].mxu1  ;;  %v19036_v15 = vpop.f32.mrb[195].mxu0  ;;  %13685 = vmatprep.subr.bf16.mxu1 %v21425_v45  ;;  %13813 = vmatprep.subr.bf16.mxu0 %v21426_v2  ;;  %v21429_v2 = vld [vmem:[#allocation136_spill] sm:$0xff] }
0x16e5   : >> { %v8811_v14 = vadd.f32 %v8658_v60, %v16171_v42  ;;  %8938 = vmatprep.mubr.f32.mxu1 %v8839_v25  ;;  %9164 = vmatprep.mubr.f32.mxu0 %v8839_v25  ;;  %v21430_v60 = vld [vmem:[#allocation137_spill] sm:$0xff] }
0x16e6   : >> { %8939 = vmatmul.mubr.f32.gmra.mrb[174].mxu1 %v8838_v51  ;;  %9165 = vmatmul.mubr.f32.gmra.mrb[208].mxu0 %v8838_v51  ;;  %v8842_v41 = vmax.f32 %v8810_v11, 0.0 }
0x16e7   : >> { %v8843_v37 = vmax.f32 %v8811_v14, 0.0  ;;  %13687 = vmatpush1.bf16.msra.mxu1 %v21427_v9  ;;  %13815 = vmatpush1.bf16.msra.mxu0 %v21428_v0  ;;  %v8662_v43 = vpop.f32.mrb[162].mxu1  ;;  %v19043_v17 = vpop.f32.mrb[196].mxu0  ;;  %v21431_v14 = vld [vmem:[#allocation138_spill] sm:$0xff]  ;;  %v21432_v9 = vld [vmem:[#allocation139_spill] sm:$0xff] }
0x16e8   : >> { %v8814_v24 = vadd.f32 %v8662_v43, %v16167_v39  ;;  %v8664_v45 = vpop.f32.mrb[163].mxu1  ;;  %v19046_v32 = vpop.f32.mrb[197].mxu0  ;;  %13689 = vmatprep.subr.bf16.mxu1 %v21429_v2  ;;  %13817 = vmatprep.subr.bf16.mxu0 %v21430_v60  ;;  %v21433_v60 = vld [vmem:[#allocation140_spill] sm:$0xff] }
0x16e9   : >> { %v8815_v25 = vadd.f32 %v8664_v45, %v16171_v42  ;;  %8944 = vmatprep.mubr.f32.mxu1 %v8843_v37  ;;  %9170 = vmatprep.mubr.f32.mxu0 %v8843_v37  ;;  %v21434_v45 = vld [vmem:[#allocation141_spill] sm:$0xff] }
0x16ea   : >> { %8945 = vmatmul.mubr.f32.gmra.mrb[176].mxu1 %v8842_v41  ;;  %9171 = vmatmul.mubr.f32.gmra.mrb[210].mxu0 %v8842_v41  ;;  %v8846_v43 = vmax.f32 %v8814_v24, 0.0 }
0x16eb   : >> { %v8847_v51 = vmax.f32 %v8815_v25, 0.0  ;;  %13691 = vmatpush1.bf16.msra.mxu1 %v21431_v14  ;;  %13819 = vmatpush1.bf16.msra.mxu0 %v21432_v9  ;;  %v8668_v11 = vpop.f32.mrb[164].mxu1  ;;  %v19053_v0 = vpop.f32.mrb[198].mxu0  ;;  %v21435_v25 = vld [vmem:[#allocation142_spill] sm:$0xff]  ;;  %v21436_v14 = vld [vmem:[#allocation143_spill] sm:$0xff] }
0x16ec   : >> { %v8818_v52 = vadd.f32 %v8668_v11, %v16167_v39  ;;  %v8670_v2 = vpop.f32.mrb[165].mxu1  ;;  %v19056_v26 = vpop.f32.mrb[199].mxu0  ;;  %13693 = vmatprep.subr.bf16.mxu1 %v21433_v60  ;;  %13821 = vmatprep.subr.bf16.mxu0 %v21434_v45  ;;  %v21437_v45 = vld [vmem:[#allocation144_spill] sm:$0xff] }
0x16ed   : >> { %v8819_v37 = vadd.f32 %v8670_v2, %v16171_v42  ;;  %8950 = vmatprep.mubr.f32.mxu1 %v8847_v51  ;;  %9176 = vmatprep.mubr.f32.mxu0 %v8847_v51  ;;  %v21438_v2 = vld [vmem:[#allocation145_spill] sm:$0xff] }
0x16ee   : >> { %8951 = vmatmul.mubr.f32.gmra.mrb[178].mxu1 %v8846_v43  ;;  %9177 = vmatmul.mubr.f32.gmra.mrb[212].mxu0 %v8846_v43  ;;  %v8850_v11 = vmax.f32 %v8818_v52, 0.0 }
0x16ef   : >> { %v8851_v41 = vmax.f32 %v8819_v37, 0.0  ;;  %13695 = vmatpush1.bf16.msra.mxu1 %v21435_v25  ;;  %13823 = vmatpush1.bf16.msra.mxu0 %v21436_v14  ;;  %v8674_v24 = vpop.f32.mrb[166].mxu1  ;;  %v19063_v9 = vpop.f32.mrb[200].mxu0 }
0x16f0   : >> { %v8822_v62 = vadd.f32 %v8674_v24, %v16167_v39  ;;  %v8676_v60 = vpop.f32.mrb[167].mxu1  ;;  %v19066_v47 = vpop.f32.mrb[201].mxu0  ;;  %13697 = vmatprep.subr.bf16.mxu1 %v21437_v45  ;;  %13825 = vmatprep.subr.bf16.mxu0 %v21438_v2  ;;  %v21452_v2 = vld [vmem:[#allocation170_spill] sm:$0xff] }
0x16f1   : >> { %v8823_v51 = vadd.f32 %v8676_v60, %v16171_v42  ;;  %8956 = vmatprep.mubr.f32.mxu1 %v8851_v41  ;;  %9182 = vmatprep.mubr.f32.mxu0 %v8851_v41  ;;  %v21450_v60 = vld [vmem:[#allocation168_spill] sm:$0xff] }
0x16f2   : >> { %8957 = vmatmul.mubr.f32.gmra.mrb[180].mxu1 %v8850_v11  ;;  %9183 = vmatmul.mubr.f32.gmra.mrb[214].mxu0 %v8850_v11  ;;  %v8854_v25 = vmax.f32 %v8822_v62, 0.0  ;;  %v21444_v62 = vld [vmem:[#allocation162_spill] sm:$0xff] }
0x16f3   : >> { %v8855_v43 = vmax.f32 %v8823_v51, 0.0  ;;  %13699 = vmatpush1.bf16.msra.mxu1 %v20780_v33  ;;  %13827 = vmatpush1.bf16.msra.mxu0 %v21110_v23  ;;  %v8680_v52 = vpop.f32.mrb[168].mxu1  ;;  %v19073_v37 = vpop.f32.mrb[202].mxu0  ;;  %v8801_v33 = vadd.f32 %v19012_v38, %v16288_v36  ;;  %v21445_v38 = vld [vmem:[#allocation163_spill] sm:$0xff]  ;;  %v21448_v11 = vld [vmem:[#allocation166_spill] sm:$0xff] }
0x16f4   : >> { %v8826_v14 = vadd.f32 %v8680_v52, %v16167_v39  ;;  %v8682_v24 = vpop.f32.mrb[169].mxu1  ;;  %v19076_v45 = vpop.f32.mrb[203].mxu0  ;;  %13701 = vmatprep.subr.bf16.mxu1 %v21111_v54  ;;  %13829 = vmatprep.subr.bf16.mxu0 %v20783_v53  ;;  %v21439_v54 = vld [vmem:[#allocation153_spill] sm:$0xff]  ;;  %v21453_v51 = vld [vmem:[#allocation171_spill] sm:$0xff] }
0x16f5   : >> { %v8827_v41 = vadd.f32 %v8682_v24, %v16171_v42  ;;  %8962 = vmatprep.mubr.f32.mxu1 %v8855_v43  ;;  %9188 = vmatprep.mubr.f32.mxu0 %v8855_v43  ;;  %v8833_v42 = vmax.f32 %v8801_v33, 0.0  ;;  %v21440_v53 = vld [vmem:[#allocation157_spill] sm:$0xff]  ;;  %v21454_v43 = vld [vmem:[#allocation172_spill] sm:$0xff]  ;;  %v21460_v33 = vld [vmem:[#allocation178_spill] sm:$0xff] }
0x16f6   : >> { %8963 = vmatmul.mubr.f32.gmra.mrb[182].mxu1 %v8854_v25  ;;  %9189 = vmatmul.mubr.f32.gmra.mrb[216].mxu0 %v8854_v25  ;;  %v8858_v39 = vmax.f32 %v8826_v14, 0.0  ;;  %v21455_v52 = vld [vmem:[#allocation173_spill] sm:$0xff]  ;;  %v21456_v25 = vld [vmem:[#allocation174_spill] sm:$0xff]  ;;  %v21457_v14 = vld [vmem:[#allocation175_spill] sm:$0xff] }
0x16f7   : >> { %v8859_v23 = vmax.f32 %v8827_v41, 0.0  ;;  %13703 = vmatpush1.bf16.msra.mxu1 %v20784_v18  ;;  %13831 = vmatpush1.bf16.msra.mxu0 %v16296_v8  ;;  %v21441_v8 = vld [vmem:[#allocation159_spill] sm:$0xff]  ;;  %v21443_v18 = vld [vmem:[#allocation161_spill] sm:$0xff]  ;;  %v21458_v24 = vld [vmem:[#allocation176_spill] sm:$0xff] }
0x16f8   : >> { %13705 = vmatprep.subr.bf16.mxu1 %v20785_v10  ;;  %13833 = vmatprep.subr.bf16.mxu0 %v21439_v54  ;;  %v21442_v10 = vld [vmem:[#allocation160_spill] sm:$0xff]  ;;  %v21459_v41 = vld [vmem:[#allocation177_spill] sm:$0xff]  ;;  %v21463_v54 = vld [vmem:[#allocation182_spill] sm:$0xff] }
0x16f9   : >> { %8968 = vmatprep.mubr.f32.mxu1 %v8859_v23  ;;  %9194 = vmatprep.mubr.f32.mxu0 %v8859_v23  ;;  %v21461_v23 = vld [vmem:[#allocation179_spill] sm:$0xff] }
0x16fa   : >> { %8969 = vmatmul.mubr.f32.gmra.mrb[184].mxu1 %v8858_v39  ;;  %9195 = vmatmul.mubr.f32.gmra.mrb[218].mxu0 %v8858_v39  ;;  %v21462_v39 = vld [vmem:[#allocation181_spill] sm:$0xff] }
0x16fb   : >> { %13707 = vmatpush1.bf16.msra.mxu1 %v21113_v35  ;;  %13835 = vmatpush1.bf16.msra.mxu0 %v21114_v61  ;;  %v21446_v35 = vld [vmem:[#allocation164_spill] sm:$0xff]  ;;  %v21447_v61 = vld [vmem:[#allocation165_spill] sm:$0xff] }
0x16fc   : >> { %9039 = vmatprep.mubr.f32.mxu1 %v8833_v42  ;;  %9265 = vmatprep.mubr.f32.mxu0 %v8833_v42  ;;  %v21464_v42 = vld [vmem:[#allocation183_spill] sm:$0xff] }
0x16fd   : >> { %13709 = vmatprep.subr.bf16.mxu1 %v21115_v19  ;;  %13837 = vmatprep.subr.bf16.mxu0 %v21440_v53  ;;  %v21449_v19 = vld [vmem:[#allocation167_spill] sm:$0xff]  ;;  %v21465_v53 = vld [vmem:[#allocation184_spill] sm:$0xff] }
0x16ff   : >> { %13711 = vmatpush1.bf16.msra.mxu1 %v21117_v7  ;;  %13839 = vmatpush1.bf16.msra.mxu0 %v21441_v8  ;;  %v21451_v7 = vld [vmem:[#allocation169_spill] sm:$0xff] }
0x1700   : >> { %13713 = vmatprep.subr.bf16.mxu1 %v21442_v10  ;;  %13841 = vmatprep.subr.bf16.mxu0 %v21443_v18  ;;  %v21466_v8 = vld [vmem:[#allocation185_spill] sm:$0xff]  ;;  %v21467_v18 = vld [vmem:[#allocation186_spill] sm:$0xff] }
0x1701   : >> { %v8800_v10 = vadd.f32 %v19009_v21, %v21466_v8  ;;  %v8809_v21 = vadd.f32 %v19026_v30, %v16288_v36  ;;  %v8812_v30 = vadd.f32 %v19033_v5, %v21466_v8 }
0x1703   : >> { %13715 = vmatpush1.bf16.msra.mxu1 %v21444_v62  ;;  %13843 = vmatpush1.bf16.msra.mxu0 %v21445_v38  ;;  %v21468_v62 = vld [vmem:[#allocation187_spill] sm:$0xff]  ;;  %v8805_v38 = vadd.f32 %v19018_v56, %v16288_v36  ;;  %v8808_v56 = vadd.f32 %v19023_v3, %v21466_v8 }
0x1704   : >> { %13717 = vmatprep.subr.bf16.mxu1 %v21446_v35  ;;  %13845 = vmatprep.subr.bf16.mxu0 %v21447_v61  ;;  %v21469_v35 = vld [vmem:[#allocation188_spill] sm:$0xff]  ;;  %v21470_v61 = vld [vmem:[#allocation189_spill] sm:$0xff] }
0x1707   : >> { %13719 = vmatpush1.bf16.msra.mxu1 %v21448_v11  ;;  %13847 = vmatpush1.bf16.msra.mxu0 %v21449_v19  ;;  %v8832_v11 = vmax.f32 %v8800_v10, 0.0  ;;  %v8804_v19 = vadd.f32 %v19015_v57, %v21466_v8  ;;  %v8813_v57 = vadd.f32 %v19036_v15, %v16288_v36  ;;  %v8816_v15 = vadd.f32 %v19043_v17, %v21466_v8 }
0x1708   : >> { %13721 = vmatprep.subr.bf16.mxu1 %v21450_v60  ;;  %13849 = vmatprep.subr.bf16.mxu0 %v21451_v7  ;;  %v8837_v60 = vmax.f32 %v8805_v38, 0.0 }
0x1709   : >> { %v8836_v7 = vmax.f32 %v8804_v19, 0.0 }
0x170b   : >> { %13723 = vmatpush1.bf16.msra.mxu1 %v21452_v2  ;;  %13851 = vmatpush1.bf16.msra.mxu0 %v21453_v51  ;;  %v8841_v2 = vmax.f32 %v8809_v21, 0.0  ;;  %v8845_v51 = vmax.f32 %v8813_v57, 0.0 }
0x170c   : >> { %13725 = vmatprep.subr.bf16.mxu1 %v21454_v43  ;;  %13853 = vmatprep.subr.bf16.mxu0 %v21455_v52  ;;  %v21483_v52 = vld [vmem:[#allocation191_spill] sm:$0xff] }
0x170f   : >> { %13727 = vmatpush1.bf16.msra.mxu1 %v21456_v25  ;;  %13855 = vmatpush1.bf16.msra.mxu0 %v21457_v14  ;;  %v21484_v14 = vld [vmem:[#allocation192_spill] sm:$0xff] }
0x1710   : >> { %13729 = vmatprep.subr.bf16.mxu1 %v21458_v24  ;;  %13857 = vmatprep.subr.bf16.mxu0 %v21459_v41  ;;  %v21485_v41 = vld [vmem:[#allocation193_spill] sm:$0xff] }
0x1713   : >> { %13731 = vmatpush1.bf16.msra.mxu1 %v21460_v33  ;;  %13859 = vmatpush1.bf16.msra.mxu0 %v21461_v23 }
0x1714   : >> { %13733 = vmatprep.subr.bf16.mxu1 %v21462_v39  ;;  %13861 = vmatprep.subr.bf16.mxu0 %v21463_v54 }
0x1717   : >> { %13735 = vmatpush1.bf16.msra.mxu1 %v21464_v42  ;;  %13863 = vmatpush1.bf16.msra.mxu0 %v21465_v53 }
0x1718   : >> { %13737 = vmatprep.subr.bf16.mxu1 %v21467_v18  ;;  %13865 = vmatprep.subr.bf16.mxu0 %v21468_v62 }
0x171b   : >> { %13739 = vmatpush1.bf16.msra.mxu1 %v21469_v35  ;;  %13867 = vmatpush1.bf16.msra.mxu0 %v21470_v61 }
0x171c   : >> { %13901 = vmatprep.subr.bf16.mxu0 %v21144_v4  ;;  %v8840_v4 = vmax.f32 %v8808_v56, 0.0 }
0x171e   : >> { %9040 = vmatmul.mubr.f32.vlgmr.msra.gmra.mrb[170].mxu1 %v8832_v11  ;;  %9266 = vmatmul.mubr.f32.vlgmr.msra.gmra.mrb[204].mxu0 %v8832_v11 }
0x171f   : >> { %9045 = vmatprep.mubr.f32.mxu1 %v8837_v60  ;;  %9271 = vmatprep.mubr.f32.mxu0 %v8837_v60 }
0x1720   : >> { %13903 = vmatpush1.bf16.msra.mxu0 %v21145_v28  ;;  %v8817_v28 = vadd.f32 %v19046_v32, %v16288_v36  ;;  %v8820_v32 = vadd.f32 %v19053_v0, %v21466_v8 }
0x1721   : >> { %13905 = vmatprep.subr.bf16.mxu0 %v21146_v34  ;;  %v8844_v34 = vmax.f32 %v8812_v30, 0.0 }
0x1722   : >> { %9046 = vmatmul.mubr.f32.gmra.mrb[172].mxu1 %v8836_v7  ;;  %9272 = vmatmul.mubr.f32.gmra.mrb[206].mxu0 %v8836_v7  ;;  %v8849_v3 = vmax.f32 %v8817_v28, 0.0 }
0x1723   : >> { %9051 = vmatprep.mubr.f32.mxu1 %v8841_v2  ;;  %9277 = vmatprep.mubr.f32.mxu0 %v8841_v2 }
0x1724   : >> { %13907 = vmatpush1.bf16.msra.mxu0 %v21147_v58  ;;  %v8821_v58 = vadd.f32 %v19056_v26, %v16288_v36  ;;  %v8824_v26 = vadd.f32 %v19063_v9, %v21466_v8 }
0x1725   : >> { %13909 = vmatprep.subr.bf16.mxu0 %v21148_v63  ;;  %v8848_v63 = vmax.f32 %v8816_v15, 0.0 }
0x1726   : >> { %9052 = vmatmul.mubr.f32.gmra.mrb[174].mxu1 %v8840_v4  ;;  %9278 = vmatmul.mubr.f32.gmra.mrb[208].mxu0 %v8840_v4  ;;  %v8853_v5 = vmax.f32 %v8821_v58, 0.0 }
0x1727   : >> { %9057 = vmatprep.mubr.f32.mxu1 %v8845_v51  ;;  %9283 = vmatprep.mubr.f32.mxu0 %v8845_v51 }
0x1728   : >> { %13911 = vmatpush1.bf16.msra.mxu0 %v21149_v22  ;;  %v8825_v22 = vadd.f32 %v19066_v47, %v16288_v36  ;;  %v8856_v47 = vmax.f32 %v8824_v26, 0.0 }
0x1729   : >> { %13913 = vmatprep.subr.bf16.mxu0 %v21150_v49  ;;  %v8852_v49 = vmax.f32 %v8820_v32, 0.0 }
0x172a   : >> { %9058 = vmatmul.mubr.f32.gmra.mrb[176].mxu1 %v8844_v34  ;;  %9284 = vmatmul.mubr.f32.gmra.mrb[210].mxu0 %v8844_v34  ;;  %v8857_v17 = vmax.f32 %v8825_v22, 0.0 }
0x172b   : >> { %9063 = vmatprep.mubr.f32.mxu1 %v8849_v3  ;;  %9289 = vmatprep.mubr.f32.mxu0 %v8849_v3 }
0x172c   : >> { %13915 = vmatpush1.bf16.msra.mxu0 %v21151_v20  ;;  %v8829_v20 = vadd.f32 %v19076_v45, %v16288_v36  ;;  %v21482_v45 = vld [vmem:[#allocation190_spill] sm:$0xff] }
0x172d   : >> { %13917 = vmatprep.subr.bf16.mxu0 %v21152_v50  ;;  %v8828_v50 = vadd.f32 %v19073_v37, %v21466_v8 }
0x172e   : >> { %9064 = vmatmul.mubr.f32.gmra.mrb[178].mxu1 %v8848_v63  ;;  %9290 = vmatmul.mubr.f32.gmra.mrb[212].mxu0 %v8848_v63  ;;  %v8861_v0 = vmax.f32 %v8829_v20, 0.0 }
0x172f   : >> { %9069 = vmatprep.mubr.f32.mxu1 %v8853_v5  ;;  %9295 = vmatprep.mubr.f32.mxu0 %v8853_v5  ;;  %v8860_v36 = vmax.f32 %v8828_v50, 0.0 }
0x1730   : >> { %13919 = vmatpush1.bf16.msra.mxu0 %v21153_v6  ;;  %v21471_v6 = vld [vmem:[#allocation238_spill] sm:$0xff] }
0x1731   : >> { %13921 = vmatprep.subr.bf16.mxu0 %v21154_v12  ;;  %v21472_v12 = vld [vmem:[#allocation240_spill] sm:$0xff] }
0x1732   : >> { %9070 = vmatmul.mubr.f32.gmra.mrb[180].mxu1 %v8852_v49  ;;  %9296 = vmatmul.mubr.f32.gmra.mrb[214].mxu0 %v8852_v49 }
0x1733   : >> { %9075 = vmatprep.mubr.f32.mxu1 %v8857_v17  ;;  %9301 = vmatprep.mubr.f32.mxu0 %v8857_v17 }
0x1734   : >> { %13923 = vmatpush1.bf16.msra.mxu0 %v21155_v16  ;;  %v21473_v16 = vld [vmem:[#allocation242_spill] sm:$0xff] }
0x1735   : >> { %13925 = vmatprep.subr.bf16.mxu0 %v21156_v13  ;;  %v21474_v13 = vld [vmem:[#allocation244_spill] sm:$0xff] }
0x1736   : >> { %9076 = vmatmul.mubr.f32.gmra.mrb[182].mxu1 %v8856_v47  ;;  %9302 = vmatmul.mubr.f32.gmra.mrb[216].mxu0 %v8856_v47 }
0x1737   : >> { %9081 = vmatprep.mubr.f32.mxu1 %v8861_v0  ;;  %9307 = vmatprep.mubr.f32.mxu0 %v8861_v0 }
0x1738   : >> { %13927 = vmatpush1.bf16.msra.mxu0 %v21157_v59  ;;  %v21475_v59 = vld [vmem:[#allocation246_spill] sm:$0xff] }
0x1739   : >> { %13929 = vmatprep.subr.bf16.mxu0 %v21158_v44  ;;  %v21476_v44 = vld [vmem:[#allocation248_spill] sm:$0xff] }
0x173a   : >> { %9082 = vmatmul.mubr.f32.gmra.mrb[184].mxu1 %v8860_v36  ;;  %9308 = vmatmul.mubr.f32.gmra.mrb[218].mxu0 %v8860_v36 }
0x173b   : >> { %9410 = vmatprep.mubr.f32.mxu1 %v20354_v55 }
0x173c   : >> { %13931 = vmatpush1.bf16.msra.mxu0 %v21159_v1  ;;  %v21477_v1 = vld [vmem:[#allocation250_spill] sm:$0xff] }
0x173d   : >> { %13933 = vmatprep.subr.bf16.mxu0 %v21160_v31  ;;  %v21478_v31 = vld [vmem:[#allocation252_spill] sm:$0xff] }
0x1740   : >> { %13935 = vmatpush1.bf16.msra.mxu0 %v21161_v27  ;;  %v21479_v27 = vld [vmem:[#allocation254_spill] sm:$0xff] }
0x1741   : >> { %13937 = vmatprep.subr.bf16.mxu0 %v21163_v40  ;;  %v21480_v40 = vld [vmem:[#allocation256_spill] sm:$0xff] }
0x1744   : >> { %13939 = vmatpush1.bf16.msra.mxu0 %v21165_v29  ;;  %v21481_v29 = vld [vmem:[#allocation258_spill] sm:$0xff] }
0x1745   : >> { %13941 = vmatprep.subr.bf16.mxu0 %v21167_v46 }
0x1748   : >> { %13943 = vmatpush1.bf16.msra.mxu0 %v21169_v48 }
0x1749   : >> { %13945 = vmatprep.subr.bf16.mxu0 %v21471_v6 }
0x174c   : >> { %13947 = vmatpush1.bf16.msra.mxu0 %v21472_v12 }
0x174d   : >> { %13949 = vmatprep.subr.bf16.mxu0 %v21473_v16 }
0x1750   : >> { %13951 = vmatpush1.bf16.msra.mxu0 %v21474_v13 }
0x1751   : >> { %13953 = vmatprep.subr.bf16.mxu0 %v21475_v59 }
0x1754   : >> { %13955 = vmatpush1.bf16.msra.mxu0 %v21476_v44 }
0x1755   : >> { %13957 = vmatprep.subr.bf16.mxu0 %v21477_v1 }
0x1758   : >> { %13959 = vmatpush1.bf16.msra.mxu0 %v21478_v31 }
0x1759   : >> { %13961 = vmatprep.subr.bf16.mxu0 %v21479_v27 }
0x175c   : >> { %13963 = vmatpush1.bf16.msra.mxu0 %v21480_v40 }
0x175d   : >> { %13965 = vmatprep.subr.bf16.mxu0 %v21481_v29 }
0x17f1   : >> { %v9041_v46 = vpop.f32.mrb[170].mxu1  ;;  %v9267_v48 = vpop.f32.mrb[204].mxu0 }
0x17f2   : >> { %v9043_v9 = vpop.f32.mrb[171].mxu1  ;;  %v9269_v37 = vpop.f32.mrb[205].mxu0  ;;  %v14364_v43 = vadd.f32 %v9041_v46, %v21482_v45  ;;  %v14380_v25 = vadd.f32 %v9267_v48, %v21483_v52 }
0x17f3   : >> { %v14365_v24 = vadd.f32 %v9043_v9, %v21484_v14  ;;  %v14381_v33 = vadd.f32 %v9269_v37, %v21485_v41 }
0x17f4   : >> { %v9314_v62 = vmax.f32 %v14364_v43, 0.0  ;;  %v9316_v38 = vmax.f32 %v14380_v25, 0.0 }
0x17f5   : >> { %v9047_v23 = vpop.f32.mrb[172].mxu1  ;;  %v9273_v39 = vpop.f32.mrb[206].mxu0  ;;  %v9315_v11 = vmax.f32 %v14365_v24, 0.0  ;;  %v9317_v19 = vmax.f32 %v14381_v33, 0.0 }
0x17f6   : >> { %v14366_v54 = vadd.f32 %v9047_v23, %v21482_v45  ;;  %v14382_v42 = vadd.f32 %v9273_v39, %v21483_v52  ;;  %v9049_v53 = vpop.f32.mrb[173].mxu1  ;;  %v9275_v8 = vpop.f32.mrb[207].mxu0 }
0x17f7   : >> { %v14367_v10 = vadd.f32 %v9049_v53, %v21484_v14  ;;  %v14383_v18 = vadd.f32 %v9275_v8, %v21485_v41 }
0x17f8   : >> { %v9318_v35 = vmax.f32 %v14366_v54, 0.0  ;;  %v9320_v61 = vmax.f32 %v14382_v42, 0.0 }
0x17f9   : >> { %v9319_v60 = vmax.f32 %v14367_v10, 0.0  ;;  %v9321_v21 = vmax.f32 %v14383_v18, 0.0  ;;  %v9053_v7 = vpop.f32.mrb[174].mxu1  ;;  %v9279_v56 = vpop.f32.mrb[208].mxu0 }
0x17fa   : >> { %v13870_v2 = vpack.c.bf16 %v9318_v35, %v9314_v62  ;;  %v19193_v57 = vpack.c.bf16 %v9320_v61, %v9316_v38  ;;  %v9055_v4 = vpop.f32.mrb[175].mxu1  ;;  %v9281_v30 = vpop.f32.mrb[209].mxu0  ;;  %v14368_v34 = vadd.f32 %v9053_v7, %v21482_v45  ;;  %v14384_v15 = vadd.f32 %v9279_v56, %v21483_v52 }
0x17fb   : >> { %v13868_v51 = vpack.c.bf16 %v9319_v60, %v9315_v11  ;;  %v19195_v28 = vpack.c.bf16 %v9321_v21, %v9317_v19  ;;  %v14369_v3 = vadd.f32 %v9055_v4, %v21484_v14  ;;  %v14385_v58 = vadd.f32 %v9281_v30, %v21485_v41 }
0x17fc   : >> { %v9322_v47 = vmax.f32 %v14368_v34, 0.0  ;;  %v9324_v50 = vmax.f32 %v14384_v15, 0.0 }
0x17fd   : >> { %v9059_v63 = vpop.f32.mrb[176].mxu1  ;;  %v9285_v32 = vpop.f32.mrb[210].mxu0  ;;  %13869 = vmatprep.subr.bf16.mxu1 %v13868_v51  ;;  %v9323_v6 = vmax.f32 %v14369_v3, 0.0  ;;  %v9325_v12 = vmax.f32 %v14385_v58, 0.0 }
0x17fe   : >> { %v14370_v5 = vadd.f32 %v9059_v63, %v21482_v45  ;;  %v14386_v22 = vadd.f32 %v9285_v32, %v21483_v52  ;;  %v9061_v49 = vpop.f32.mrb[177].mxu1  ;;  %v9287_v26 = vpop.f32.mrb[211].mxu0  ;;  %13871 = vmatpush1.bf16.msra.mxu1 %v13870_v2 }
0x17ff   : >> { %v14371_v17 = vadd.f32 %v9061_v49, %v21484_v14  ;;  %v14387_v20 = vadd.f32 %v9287_v26, %v21485_v41 }
0x1800   : >> { %v9326_v0 = vmax.f32 %v14370_v5, 0.0  ;;  %v9328_v36 = vmax.f32 %v14386_v22, 0.0 }
0x1801   : >> { %v9327_v16 = vmax.f32 %v14371_v17, 0.0  ;;  %v9329_v13 = vmax.f32 %v14387_v20, 0.0  ;;  %v9065_v59 = vpop.f32.mrb[178].mxu1  ;;  %v9291_v44 = vpop.f32.mrb[212].mxu0 }
0x1802   : >> { %v13874_v1 = vpack.c.bf16 %v9326_v0, %v9322_v47  ;;  %v19205_v31 = vpack.c.bf16 %v9328_v36, %v9324_v50  ;;  %v9067_v27 = vpop.f32.mrb[179].mxu1  ;;  %v9293_v40 = vpop.f32.mrb[213].mxu0  ;;  %v14372_v48 = vadd.f32 %v9065_v59, %v21482_v45  ;;  %v14388_v9 = vadd.f32 %v9291_v44, %v21483_v52 }
0x1803   : >> { %v13872_v29 = vpack.c.bf16 %v9327_v16, %v9323_v6  ;;  %v19207_v46 = vpack.c.bf16 %v9329_v13, %v9325_v12  ;;  %v14373_v37 = vadd.f32 %v9067_v27, %v21484_v14  ;;  %v14389_v43 = vadd.f32 %v9293_v40, %v21485_v41  ;;  %v21491_v27 = vld [vmem:[#allocation205_spill] sm:$0xff]  ;;  %v21492_v40 = vld [vmem:[#allocation207_spill] sm:$0xff] }
0x1804   : >> { %v9330_v8 = vmax.f32 %v14372_v48, 0.0  ;;  %v9332_v10 = vmax.f32 %v14388_v9, 0.0  ;;  %v21495_v48 = vld [vmem:[#allocation213_spill] sm:$0xff]  ;;  %v21496_v9 = vld [vmem:[#allocation215_spill] sm:$0xff] }
0x1805   : >> { %v9071_v25 = vpop.f32.mrb[180].mxu1  ;;  %v9297_v24 = vpop.f32.mrb[214].mxu0  ;;  %13873 = vmatprep.subr.bf16.mxu1 %v13872_v29  ;;  %v9331_v38 = vmax.f32 %v14373_v37, 0.0  ;;  %v9333_v35 = vmax.f32 %v14389_v43, 0.0  ;;  %v21493_v29 = vld [vmem:[#allocation209_spill] sm:$0xff]  ;;  %v21498_v43 = vld [vmem:[#allocation219_spill] sm:$0xff] }
0x1806   : >> { %v14374_v33 = vadd.f32 %v9071_v25, %v21482_v45  ;;  %v14390_v23 = vadd.f32 %v9297_v24, %v21483_v52  ;;  %v9073_v39 = vpop.f32.mrb[181].mxu1  ;;  %v9299_v54 = vpop.f32.mrb[215].mxu0  ;;  %13875 = vmatpush1.bf16.msra.mxu1 %v13874_v1  ;;  %v21489_v1 = vld [vmem:[#allocation201_spill] sm:$0xff]  ;;  %v21500_v24 = vld [vmem:[#allocation223_spill] sm:$0xff] }
0x1807   : >> { %v14375_v42 = vadd.f32 %v9073_v39, %v21484_v14  ;;  %v14391_v53 = vadd.f32 %v9299_v54, %v21485_v41  ;;  %v21497_v37 = vld [vmem:[#allocation217_spill] sm:$0xff]  ;;  %v21504_v54 = vld [vmem:[#allocation231_spill] sm:$0xff] }
0x1808   : >> { %v9334_v18 = vmax.f32 %v14374_v33, 0.0  ;;  %v9336_v62 = vmax.f32 %v14390_v23, 0.0  ;;  %v21499_v25 = vld [vmem:[#allocation221_spill] sm:$0xff]  ;;  %v21502_v23 = vld [vmem:[#allocation227_spill] sm:$0xff] }
0x1809   : >> { %v9335_v61 = vmax.f32 %v14375_v42, 0.0  ;;  %v9337_v11 = vmax.f32 %v14391_v53, 0.0  ;;  %v9077_v19 = vpop.f32.mrb[182].mxu1  ;;  %v9303_v60 = vpop.f32.mrb[216].mxu0  ;;  %v21501_v33 = vld [vmem:[#allocation225_spill] sm:$0xff]  ;;  %v21506_v53 = vld [vmem:[#allocation235_spill] sm:$0xff] }
0x180a   : >> { %v13878_v21 = vpack.c.bf16 %v9334_v18, %v9330_v8  ;;  %v13894_v7 = vpack.c.bf16 %v9336_v62, %v9332_v10  ;;  %v9079_v56 = vpop.f32.mrb[183].mxu1  ;;  %v9305_v2 = vpop.f32.mrb[217].mxu0  ;;  %v14376_v51 = vadd.f32 %v9077_v19, %v21482_v45  ;;  %v14392_v34 = vadd.f32 %v9303_v60, %v21483_v52  ;;  %v21503_v39 = vld [vmem:[#allocation229_spill] sm:$0xff]  ;;  %v21508_v10 = vld [vmem:[#allocation239_spill] sm:$0xff] }
0x180b   : >> { %v13876_v4 = vpack.c.bf16 %v9335_v61, %v9331_v38  ;;  %v13892_v30 = vpack.c.bf16 %v9337_v11, %v9333_v35  ;;  %v14377_v15 = vadd.f32 %v9079_v56, %v21484_v14  ;;  %v14393_v3 = vadd.f32 %v9305_v2, %v21485_v41  ;;  %v21505_v42 = vld [vmem:[#allocation233_spill] sm:$0xff]  ;;  %v21510_v62 = vld [vmem:[#allocation243_spill] sm:$0xff] }
0x180c   : >> { %v9338_v20 = vmax.f32 %v14376_v51, 0.0  ;;  %v9340_v47 = vmax.f32 %v14392_v34, 0.0  ;;  %v21507_v8 = vld [vmem:[#allocation237_spill] sm:$0xff]  ;;  %v21512_v35 = vld [vmem:[#allocation247_spill] sm:$0xff]  ;;  %v21521_v34 = vld [vmem:[#allocation262_spill] sm:$0xff] }
0x180d   : >> { %v9083_v58 = vpop.f32.mrb[184].mxu1  ;;  %v9309_v63 = vpop.f32.mrb[218].mxu0  ;;  %13877 = vmatprep.subr.bf16.mxu1 %v13876_v4  ;;  %v9339_v36 = vmax.f32 %v14377_v15, 0.0  ;;  %v9341_v6 = vmax.f32 %v14393_v3, 0.0  ;;  %v21509_v18 = vld [vmem:[#allocation241_spill] sm:$0xff]  ;;  %v21514_v11 = vld [vmem:[#allocation251_spill] sm:$0xff] }
0x180e   : >> { %v14378_v32 = vadd.f32 %v9083_v58, %v21482_v45  ;;  %v14394_v5 = vadd.f32 %v9309_v63, %v21483_v52  ;;  %v9085_v22 = vpop.f32.mrb[185].mxu1  ;;  %v9311_v49 = vpop.f32.mrb[219].mxu0  ;;  %13879 = vmatpush1.bf16.msra.mxu1 %v13878_v21  ;;  %v14887_v52 = vld [vmem:[%s19492_s6] sm:$0xff]  ;;  %v21511_v38 = vld [vmem:[#allocation245_spill] sm:$0xff]  ;;  %v21516_v60 = vld [vmem:[#allocation255_spill] sm:$0xff] }
0x180f   : >> { %v14379_v26 = vadd.f32 %v9085_v22, %v21484_v14  ;;  %v14395_v17 = vadd.f32 %v9311_v49, %v21485_v41  ;;  %v14888_v14 = vld [vmem:[%s19492_s6 + $0x8] sm:$0xff]  ;;  %v21486_v41 = vld [vmem:[#allocation195_spill] sm:$0xff]  ;;  %v21519_v4 = vld [vmem:[#allocation260_spill] sm:$0xff] }
0x1810   : >> { %v9342_v50 = vmax.f32 %v14378_v32, 0.0  ;;  %v9344_v0 = vmax.f32 %v14394_v5, 0.0  ;;  %v21513_v61 = vld [vmem:[#allocation249_spill] sm:$0xff]  ;;  %v21522_v15 = vld [vmem:[#allocation263_spill] sm:$0xff]  ;;  %v21523_v58 = vld [vmem:[#allocation264_spill] sm:$0xff] }
0x1811   : >> { %v9343_v12 = vmax.f32 %v14379_v26, 0.0  ;;  %v9345_v16 = vmax.f32 %v14395_v17, 0.0  ;;  %v21515_v19 = vld [vmem:[#allocation253_spill] sm:$0xff]  ;;  %v21525_v32 = vld [vmem:[#allocation266_spill] sm:$0xff]  ;;  %v21526_v5 = vld [vmem:[#allocation267_spill] sm:$0xff] }
0x1812   : >> { %v13882_v13 = vpack.c.bf16 %v9342_v50, %v9338_v20  ;;  %v13898_v59 = vpack.c.bf16 %v9344_v0, %v9340_v47  ;;  %v21517_v21 = vld [vmem:[#allocation257_spill] sm:$0xff]  ;;  %v21527_v22 = vld [vmem:[#allocation268_spill] sm:$0xff]  ;;  %v21529_v26 = vld [vmem:[#allocation270_spill] sm:$0xff] }
0x1813   : >> { %v13880_v45 = vpack.c.bf16 %v9343_v12, %v9339_v36  ;;  %v13896_v44 = vpack.c.bf16 %v9345_v16, %v9341_v6  ;;  %v21524_v63 = vld [vmem:[#allocation265_spill] sm:$0xff]  ;;  %v21530_v17 = vld [vmem:[#allocation271_spill] sm:$0xff]  ;;  %v21531_v20 = vld [vmem:[#allocation272_spill] sm:$0xff] }
0x1814   : >> { %v21528_v49 = vld [vmem:[#allocation269_spill] sm:$0xff]  ;;  %v21533_v0 = vld [vmem:[#allocation274_spill] sm:$0xff]  ;;  %v21534_v36 = vld [vmem:[#allocation275_spill] sm:$0xff] }
0x1815   : >> { %13881 = vmatprep.subr.bf16.mxu1 %v13880_v45  ;;  %v21532_v47 = vld [vmem:[#allocation273_spill] sm:$0xff]  ;;  %v21535_v12 = vld [vmem:[#allocation276_spill] sm:$0xff]  ;;  %v21538_v45 = vld [vmem:[#allocation279_spill] sm:$0xff] }
0x1816   : >> { %13883 = vmatpush1.bf16.msra.mxu1 %v13882_v13  ;;  %v21536_v16 = vld [vmem:[#allocation277_spill] sm:$0xff] }
0x1817   : >> { %13885 = vmatprep.subr.bf16.mxu1 %v19195_v28  ;;  %v21488_v28 = vld [vmem:[#allocation199_spill] sm:$0xff] }
0x1819   : >> { %10743 = vmatmul.mubr.msk.f32.vlgmr.msra.gmra.mrb[186].mxu1 %vm1068_vm2, %v14887_v52 }
0x181a   : >> { %13887 = vmatpush1.bf16.msra.mxu1 %v19193_v57  ;;  %9416 = vmatprep.mubr.f32.mxu1 %v20354_v55  ;;  %v21487_v57 = vld [vmem:[#allocation197_spill] sm:$0xff] }
0x181b   : >> { %13889 = vmatprep.subr.bf16.mxu1 %v19207_v46  ;;  %v21494_v46 = vld [vmem:[#allocation211_spill] sm:$0xff] }
0x181d   : >> { %10744 = vmatmul.mubr.msk.f32.gmra.mrb[188].mxu1 %vm1068_vm2, %v14888_v14 }
0x181e   : >> { %13891 = vmatpush1.bf16.msra.mxu1 %v19205_v31  ;;  %9487 = vmatprep.mubr.f32.mxu1 %v20354_v55  ;;  %v21490_v31 = vld [vmem:[#allocation203_spill] sm:$0xff] }
0x181f   : >> { %13893 = vmatprep.subr.bf16.mxu1 %v13892_v30  ;;  %v21520_v30 = vld [vmem:[#allocation261_spill] sm:$0xff] }
0x1822   : >> { %13895 = vmatpush1.bf16.msra.mxu1 %v13894_v7  ;;  %v21518_v7 = vld [vmem:[#allocation259_spill] sm:$0xff] }
0x1823   : >> { %13897 = vmatprep.subr.bf16.mxu1 %v13896_v44 }
0x1826   : >> { %13899 = vmatpush1.bf16.msra.mxu1 %v13898_v59  ;;  %v21537_v59 = vld [vmem:[#allocation278_spill] sm:$0xff] }
0x1827   : >> { %14029 = vmatprep.subr.bf16.mxu1 %v21486_v41  ;;  %v21541_v41 = vld [vmem:[#allocation282_spill] sm:$0xff] }
0x1829   : >> { %10745 = vmatmul.mubr.msk.f32.vlgmr.msra.gmra.mrb[190].mxu1 %vm1068_vm2, %v14887_v52  ;;  %v21539_v52 = vld [vmem:[#allocation280_spill] sm:$0xff] }
0x182a   : >> { %9493 = vmatprep.mubr.f32.mxu1 %v20354_v55  ;;  %14031 = vmatpush1.bf16.msra.mxu1 %v21487_v57  ;;  %v21542_v57 = vld [vmem:[#allocation283_spill] sm:$0xff] }
0x182b   : >> { %14033 = vmatprep.subr.bf16.mxu1 %v21488_v28  ;;  %v21543_v28 = vld [vmem:[#allocation284_spill] sm:$0xff] }
0x182d   : >> { %10746 = vmatmul.mubr.msk.f32.gmra.mrb[192].mxu1 %vm1068_vm2, %v14888_v14  ;;  %v21540_v14 = vld [vmem:[#allocation281_spill] sm:$0xff] }
0x182e   : >> { %14035 = vmatpush1.bf16.msra.mxu1 %v21489_v1  ;;  %v21544_v1 = vld [vmem:[#allocation285_spill] sm:$0xff] }
0x182f   : >> { %14037 = vmatprep.subr.bf16.mxu1 %v21490_v31  ;;  %v21545_v31 = vld [vmem:[#allocation286_spill] sm:$0xff] }
0x1832   : >> { %14039 = vmatpush1.bf16.msra.mxu1 %v21491_v27  ;;  %v21546_v27 = vld [vmem:[#allocation287_spill] sm:$0xff] }
0x1833   : >> { %14041 = vmatprep.subr.bf16.mxu1 %v21492_v40  ;;  %v21547_v40 = vld [vmem:[#allocation288_spill] sm:$0xff] }
0x1836   : >> { %14043 = vmatpush1.bf16.msra.mxu1 %v21493_v29  ;;  %v21548_v29 = vld [vmem:[#allocation289_spill] sm:$0xff] }
0x1837   : >> { %14045 = vmatprep.subr.bf16.mxu1 %v21494_v46  ;;  %v21549_v46 = vld [vmem:[#allocation290_spill] sm:$0xff] }
0x183a   : >> { %14047 = vmatpush1.bf16.msra.mxu1 %v21495_v48  ;;  %v21550_v48 = vld [vmem:[#allocation291_spill] sm:$0xff] }
0x183b   : >> { %14049 = vmatprep.subr.bf16.mxu1 %v21496_v9  ;;  %v21551_v9 = vld [vmem:[#allocation292_spill] sm:$0xff] }
0x183e   : >> { %14051 = vmatpush1.bf16.msra.mxu1 %v21497_v37  ;;  %v21552_v37 = vld [vmem:[#allocation293_spill] sm:$0xff] }
0x183f   : >> { %14053 = vmatprep.subr.bf16.mxu1 %v21498_v43  ;;  %v21553_v43 = vld [vmem:[#allocation294_spill] sm:$0xff] }
0x1842   : >> { %14055 = vmatpush1.bf16.msra.mxu1 %v21499_v25  ;;  %v21554_v25 = vld [vmem:[#allocation295_spill] sm:$0xff] }
0x1843   : >> { %14057 = vmatprep.subr.bf16.mxu1 %v21500_v24  ;;  %v21555_v24 = vld [vmem:[#allocation296_spill] sm:$0xff] }
0x1846   : >> { %14059 = vmatpush1.bf16.msra.mxu1 %v21501_v33  ;;  %v21556_v33 = vld [vmem:[#allocation297_spill] sm:$0xff] }
0x1847   : >> { %14061 = vmatprep.subr.bf16.mxu1 %v21502_v23  ;;  %v21557_v23 = vld [vmem:[#allocation298_spill] sm:$0xff] }
0x184a   : >> { %14063 = vmatpush1.bf16.msra.mxu1 %v21503_v39  ;;  %v21558_v39 = vld [vmem:[#allocation299_spill] sm:$0xff] }
0x184b   : >> { %14065 = vmatprep.subr.bf16.mxu1 %v21504_v54  ;;  %v21559_v54 = vld [vmem:[#allocation300_spill] sm:$0xff] }
0x184e   : >> { %14067 = vmatpush1.bf16.msra.mxu1 %v21505_v42  ;;  %v21560_v42 = vld [vmem:[#allocation301_spill] sm:$0xff] }
0x184f   : >> { %14069 = vmatprep.subr.bf16.mxu1 %v21506_v53  ;;  %v21561_v53 = vld [vmem:[#allocation302_spill] sm:$0xff] }
0x1852   : >> { %14071 = vmatpush1.bf16.msra.mxu1 %v21507_v8  ;;  %v21562_v8 = vld [vmem:[#allocation303_spill] sm:$0xff] }
0x1853   : >> { %14073 = vmatprep.subr.bf16.mxu1 %v21508_v10  ;;  %v21563_v10 = vld [vmem:[#allocation304_spill] sm:$0xff] }
0x1856   : >> { %14075 = vmatpush1.bf16.msra.mxu1 %v21509_v18  ;;  %v21564_v18 = vld [vmem:[#allocation305_spill] sm:$0xff] }
0x1857   : >> { %14077 = vmatprep.subr.bf16.mxu1 %v21510_v62  ;;  %v21565_v62 = vld [vmem:[#allocation306_spill] sm:$0xff] }
0x185a   : >> { %14079 = vmatpush1.bf16.msra.mxu1 %v21511_v38  ;;  %v21566_v38 = vld [vmem:[#allocation307_spill] sm:$0xff] }
0x185b   : >> { %14081 = vmatprep.subr.bf16.mxu1 %v21512_v35  ;;  %v21567_v35 = vld [vmem:[#allocation308_spill] sm:$0xff] }
0x185e   : >> { %14083 = vmatpush1.bf16.msra.mxu1 %v21513_v61  ;;  %v21568_v61 = vld [vmem:[#allocation309_spill] sm:$0xff] }
0x185f   : >> { %14085 = vmatprep.subr.bf16.mxu1 %v21514_v11  ;;  %v21569_v11 = vld [vmem:[#allocation310_spill] sm:$0xff] }
0x1862   : >> { %14087 = vmatpush1.bf16.msra.mxu1 %v21515_v19  ;;  %v21570_v19 = vld [vmem:[#allocation311_spill] sm:$0xff] }
0x1863   : >> { %14089 = vmatprep.subr.bf16.mxu1 %v21516_v60  ;;  %v21571_v60 = vld [vmem:[#allocation312_spill] sm:$0xff] }
0x1866   : >> { %14091 = vmatpush1.bf16.msra.mxu1 %v21517_v21  ;;  %v21572_v21 = vld [vmem:[#allocation313_spill] sm:$0xff] }
0x1867   : >> { %14093 = vmatprep.subr.bf16.mxu1 %v21518_v7  ;;  %v21573_v7 = vld [vmem:[#allocation314_spill] sm:$0xff] }
0x18ec   : >> { %v9412_v56 = vpop.f32.mrb[186].mxu1 }
0x18ed   : >> { %v9414_v2 = vpop.f32.mrb[187].mxu1 }
0x18ee   : >> { %9564 = vmatprep.mubr.f32.mxu0 %v9414_v2  ;;  %9718 = vmatprep.mubr.f32.mxu1 %v9414_v2  ;;  %v21575_v2 = vld [vmem:[#allocation316_spill] sm:$0xff] }
0x18ef   : >> { %9565 = vmatmul.mubr.f32.vlgmr.msra.gmra.mrb[220].mxu0 %v9412_v56  ;;  %9719 = vmatmul.mubr.f32.vlgmr.msra.gmra.mrb[194].mxu1 %v9412_v56  ;;  %v21574_v56 = vld [vmem:[#allocation315_spill] sm:$0xff] }
0x18f0   : >> { %13967 = vmatpush1.bf16.msra.mxu0 %v21519_v4  ;;  %14095 = vmatpush1.bf16.msra.mxu1 %v21520_v30  ;;  %v9418_v51 = vpop.f32.mrb[188].mxu1  ;;  %v21576_v4 = vld [vmem:[#allocation317_spill] sm:$0xff]  ;;  %v21577_v30 = vld [vmem:[#allocation318_spill] sm:$0xff] }
0x18f1   : >> { %13969 = vmatprep.subr.bf16.mxu0 %v21521_v34  ;;  %14097 = vmatprep.subr.bf16.mxu1 %v21522_v15  ;;  %v9420_v3 = vpop.f32.mrb[189].mxu1  ;;  %v21579_v34 = vld [vmem:[#allocation320_spill] sm:$0xff]  ;;  %v21580_v15 = vld [vmem:[#allocation321_spill] sm:$0xff] }
0x18f2   : >> { %9570 = vmatprep.mubr.f32.mxu0 %v9420_v3  ;;  %9724 = vmatprep.mubr.f32.mxu1 %v9420_v3  ;;  %v21581_v3 = vld [vmem:[#allocation322_spill] sm:$0xff] }
0x18f3   : >> { %9571 = vmatmul.mubr.f32.gmra.mrb[222].mxu0 %v9418_v51  ;;  %9725 = vmatmul.mubr.f32.gmra.mrb[196].mxu1 %v9418_v51  ;;  %v21578_v51 = vld [vmem:[#allocation319_spill] sm:$0xff] }
0x18f4   : >> { %13971 = vmatpush1.bf16.msra.mxu0 %v21523_v58  ;;  %14099 = vmatpush1.bf16.msra.mxu1 %v21524_v63  ;;  %v21582_v58 = vld [vmem:[#allocation323_spill] sm:$0xff]  ;;  %v21583_v63 = vld [vmem:[#allocation324_spill] sm:$0xff] }
0x18f5   : >> { %13973 = vmatprep.subr.bf16.mxu0 %v21525_v32  ;;  %14101 = vmatprep.subr.bf16.mxu1 %v21526_v5  ;;  %v21584_v32 = vld [vmem:[#allocation325_spill] sm:$0xff]  ;;  %v21585_v5 = vld [vmem:[#allocation326_spill] sm:$0xff] }
0x18f8   : >> { %13975 = vmatpush1.bf16.msra.mxu0 %v21527_v22  ;;  %14103 = vmatpush1.bf16.msra.mxu1 %v21528_v49  ;;  %v21586_v22 = vld [vmem:[#allocation327_spill] sm:$0xff]  ;;  %v21587_v49 = vld [vmem:[#allocation328_spill] sm:$0xff] }
0x18f9   : >> { %13977 = vmatprep.subr.bf16.mxu0 %v21529_v26  ;;  %14105 = vmatprep.subr.bf16.mxu1 %v21530_v17  ;;  %v21588_v26 = vld [vmem:[#allocation329_spill] sm:$0xff]  ;;  %v21589_v17 = vld [vmem:[#allocation330_spill] sm:$0xff] }
0x18fc   : >> { %13979 = vmatpush1.bf16.msra.mxu0 %v21531_v20  ;;  %14107 = vmatpush1.bf16.msra.mxu1 %v21532_v47  ;;  %v9489_v50 = vpop.f32.mrb[190].mxu1  ;;  %v21590_v20 = vld [vmem:[#allocation331_spill] sm:$0xff]  ;;  %v21591_v47 = vld [vmem:[#allocation332_spill] sm:$0xff] }
0x18fd   : >> { %13981 = vmatprep.subr.bf16.mxu0 %v21533_v0  ;;  %14109 = vmatprep.subr.bf16.mxu1 %v21534_v36  ;;  %v9491_v6 = vpop.f32.mrb[191].mxu1  ;;  %v21593_v0 = vld [vmem:[#allocation334_spill] sm:$0xff]  ;;  %v21594_v36 = vld [vmem:[#allocation335_spill] sm:$0xff] }
0x18fe   : >> { %9641 = vmatprep.mubr.f32.mxu0 %v9491_v6  ;;  %9795 = vmatprep.mubr.f32.mxu1 %v9491_v6  ;;  %v21595_v6 = vld [vmem:[#allocation336_spill] sm:$0xff] }
0x1900   : >> { %13983 = vmatpush1.bf16.msra.mxu0 %v21535_v12  ;;  %14111 = vmatpush1.bf16.msra.mxu1 %v21536_v16  ;;  %v9495_v13 = vpop.f32.mrb[192].mxu1  ;;  %v21596_v12 = vld [vmem:[#allocation337_spill] sm:$0xff]  ;;  %v21597_v16 = vld [vmem:[#allocation338_spill] sm:$0xff] }
0x1901   : >> { %13985 = vmatprep.subr.bf16.mxu0 %v21537_v59  ;;  %14113 = vmatprep.subr.bf16.mxu1 %v21538_v45  ;;  %v9497_v44 = vpop.f32.mrb[193].mxu1  ;;  %v21599_v59 = vld [vmem:[#allocation376_spill] sm:$0xff] }
0x1902   : >> { %v21600_v45 = vld [vmem:[#allocation340_spill] sm:$0xff] }
0x1904   : >> { %13987 = vmatpush1.bf16.msra.mxu0 %v21539_v52  ;;  %14115 = vmatpush1.bf16.msra.mxu1 %v21540_v14  ;;  %v21602_v52 = vld [vmem:[#allocation342_spill] sm:$0xff]  ;;  %v21603_v14 = vld [vmem:[#allocation343_spill] sm:$0xff] }
0x1905   : >> { %13989 = vmatprep.subr.bf16.mxu0 %v21541_v41  ;;  %14117 = vmatprep.subr.bf16.mxu1 %v21542_v57  ;;  %v21604_v41 = vld [vmem:[#allocation148_spill] sm:$0xff] }
0x1906   : >> { %v21605_v57 = vld [vmem:[#allocation344_spill] sm:$0xff] }
0x1908   : >> { %13991 = vmatpush1.bf16.msra.mxu0 %v21543_v28  ;;  %14119 = vmatpush1.bf16.msra.mxu1 %v21544_v1  ;;  %v21606_v28 = vld [vmem:[#allocation345_spill] sm:$0xff]  ;;  %v21607_v1 = vld [vmem:[#allocation346_spill] sm:$0xff] }
0x1909   : >> { %13993 = vmatprep.subr.bf16.mxu0 %v21545_v31  ;;  %14121 = vmatprep.subr.bf16.mxu1 %v21546_v27  ;;  %v21608_v31 = vld [vmem:[#allocation347_spill] sm:$0xff]  ;;  %v21609_v27 = vld [vmem:[#allocation348_spill] sm:$0xff] }
0x190c   : >> { %13995 = vmatpush1.bf16.msra.mxu0 %v21547_v40  ;;  %14123 = vmatpush1.bf16.msra.mxu1 %v21548_v29  ;;  %v21610_v40 = vld [vmem:[#allocation349_spill] sm:$0xff]  ;;  %v21611_v29 = vld [vmem:[#allocation350_spill] sm:$0xff] }
0x190d   : >> { %13997 = vmatprep.subr.bf16.mxu0 %v21549_v46  ;;  %14125 = vmatprep.subr.bf16.mxu1 %v21550_v48  ;;  %v21612_v46 = vld [vmem:[#allocation351_spill] sm:$0xff]  ;;  %v21613_v48 = vld [vmem:[#allocation352_spill] sm:$0xff] }
0x1910   : >> { %13999 = vmatpush1.bf16.msra.mxu0 %v21551_v9  ;;  %14127 = vmatpush1.bf16.msra.mxu1 %v21552_v37  ;;  %v21614_v9 = vld [vmem:[#allocation353_spill] sm:$0xff]  ;;  %v21615_v37 = vld [vmem:[#allocation354_spill] sm:$0xff] }
0x1911   : >> { %14001 = vmatprep.subr.bf16.mxu0 %v21553_v43  ;;  %14129 = vmatprep.subr.bf16.mxu1 %v21554_v25  ;;  %v21616_v43 = vld [vmem:[#allocation355_spill] sm:$0xff]  ;;  %v21617_v25 = vld [vmem:[#allocation356_spill] sm:$0xff] }
0x1914   : >> { %14003 = vmatpush1.bf16.msra.mxu0 %v21555_v24  ;;  %14131 = vmatpush1.bf16.msra.mxu1 %v21556_v33  ;;  %v21618_v24 = vld [vmem:[#allocation357_spill] sm:$0xff]  ;;  %v21619_v33 = vld [vmem:[#allocation358_spill] sm:$0xff] }
0x1915   : >> { %14005 = vmatprep.subr.bf16.mxu0 %v21557_v23  ;;  %14133 = vmatprep.subr.bf16.mxu1 %v21558_v39  ;;  %v21620_v23 = vld [vmem:[#allocation359_spill] sm:$0xff]  ;;  %v21621_v39 = vld [vmem:[#allocation360_spill] sm:$0xff] }
0x1918   : >> { %14007 = vmatpush1.bf16.msra.mxu0 %v21559_v54  ;;  %14135 = vmatpush1.bf16.msra.mxu1 %v21560_v42  ;;  %v21622_v54 = vld [vmem:[#allocation361_spill] sm:$0xff]  ;;  %v21623_v42 = vld [vmem:[#allocation362_spill] sm:$0xff] }
0x1919   : >> { %14009 = vmatprep.subr.bf16.mxu0 %v21561_v53  ;;  %14137 = vmatprep.subr.bf16.mxu1 %v21562_v8  ;;  %v21624_v53 = vld [vmem:[#allocation363_spill] sm:$0xff]  ;;  %v21625_v8 = vld [vmem:[#allocation364_spill] sm:$0xff] }
0x191c   : >> { %14011 = vmatpush1.bf16.msra.mxu0 %v21563_v10  ;;  %14139 = vmatpush1.bf16.msra.mxu1 %v21564_v18  ;;  %v21626_v10 = vld [vmem:[#allocation365_spill] sm:$0xff]  ;;  %v21627_v18 = vld [vmem:[#allocation366_spill] sm:$0xff] }
0x191d   : >> { %14013 = vmatprep.subr.bf16.mxu0 %v21565_v62  ;;  %14141 = vmatprep.subr.bf16.mxu1 %v21566_v38  ;;  %v21628_v62 = vld [vmem:[#allocation367_spill] sm:$0xff]  ;;  %v21629_v38 = vld [vmem:[#allocation368_spill] sm:$0xff] }
0x1920   : >> { %14015 = vmatpush1.bf16.msra.mxu0 %v21567_v35  ;;  %14143 = vmatpush1.bf16.msra.mxu1 %v21568_v61  ;;  %v21630_v35 = vld [vmem:[#allocation369_spill] sm:$0xff]  ;;  %v21631_v61 = vmov 0.0|0.0  }
0x1921   : >> { %14017 = vmatprep.subr.bf16.mxu0 %v21569_v11  ;;  %14145 = vmatprep.subr.bf16.mxu1 %v21570_v19 }
0x1924   : >> { %14019 = vmatpush1.bf16.msra.mxu0 %v21571_v60  ;;  %14147 = vmatpush1.bf16.msra.mxu1 %v21572_v21  ;;  %v21632_v60 = vld [vmem:[#allocation370_spill] sm:$0xff] }
0x1925   : >> { %14021 = vmatprep.subr.bf16.mxu0 %v21573_v7  ;;  %14149 = vmatprep.subr.bf16.mxu1 %v21574_v56  ;;  %v21633_v7 = vld [vmem:[#allocation371_spill] sm:$0xff] }
0x1928   : >> { %14023 = vmatpush1.bf16.msra.mxu0 %v21575_v2  ;;  %14151 = vmatpush1.bf16.msra.mxu1 %v21576_v4 }
0x1929   : >> { %14025 = vmatprep.subr.bf16.mxu0 %v21577_v30  ;;  %14153 = vmatprep.subr.bf16.mxu1 %v21578_v51  ;;  %v21634_v30 = vld [vmem:[#allocation372_spill] sm:$0xff] }
0x192c   : >> { %14027 = vmatpush1.bf16.msra.mxu0 %v21579_v34  ;;  %14155 = vmatpush1.bf16.msra.mxu1 %v21580_v15  ;;  %v21635_v34 = vld [vmem:[#allocation373_spill] sm:$0xff] }
0x192d   : >> { %14157 = vmatprep.subr.bf16.mxu0 %v21581_v3  ;;  %14173 = vmatprep.subr.bf16.mxu1 %v21582_v58 }
0x192f   : >> { %9642 = vmatmul.mubr.f32.vlgmr.msra.gmra.mrb[220].mxu0 %v9489_v50  ;;  %9796 = vmatmul.mubr.f32.vlgmr.msra.gmra.mrb[194].mxu1 %v9489_v50  ;;  %v21592_v50 = vld [vmem:[#allocation333_spill] sm:$0xff] }
0x1930   : >> { %14159 = vmatpush1.bf16.msra.mxu0 %v21583_v63  ;;  %14175 = vmatpush1.bf16.msra.mxu1 %v21584_v32 }
0x1931   : >> { %14161 = vmatprep.subr.bf16.mxu0 %v21585_v5  ;;  %14177 = vmatprep.subr.bf16.mxu1 %v21586_v22 }
0x1932   : >> { %9647 = vmatprep.mubr.f32.mxu0 %v9497_v44  ;;  %9801 = vmatprep.mubr.f32.mxu1 %v9497_v44  ;;  %v21601_v44 = vld [vmem:[#allocation341_spill] sm:$0xff] }
0x1933   : >> { %9648 = vmatmul.mubr.f32.gmra.mrb[222].mxu0 %v9495_v13  ;;  %9802 = vmatmul.mubr.f32.gmra.mrb[196].mxu1 %v9495_v13  ;;  %v21598_v13 = vld [vmem:[#allocation339_spill] sm:$0xff] }
0x1934   : >> { %14163 = vmatpush1.bf16.msra.mxu0 %v21587_v49  ;;  %14179 = vmatpush1.bf16.msra.mxu1 %v21588_v26 }
0x1935   : >> { %14165 = vmatprep.subr.bf16.mxu0 %v21589_v17  ;;  %14181 = vmatprep.subr.bf16.mxu1 %v21590_v20 }
0x1936   : >> { %9878 = vmatprep.mubr.f32.mxu0 %v20354_v55  ;;  %9955 = vmatprep.mubr.f32.mxu1 %v20354_v55 }
0x1938   : >> { %14167 = vmatpush1.bf16.msra.mxu0 %v21591_v47  ;;  %14183 = vmatpush1.bf16.msra.mxu1 %v21592_v50 }
0x1939   : >> { %14169 = vmatprep.subr.bf16.mxu0 %v21593_v0  ;;  %14185 = vmatprep.subr.bf16.mxu1 %v21594_v36 }
0x193c   : >> { %14171 = vmatpush1.bf16.msra.mxu0 %v21595_v6  ;;  %14187 = vmatpush1.bf16.msra.mxu1 %v21596_v12 }
0x193d   : >> { %14189 = vmatprep.subr.bf16.mxu0 %v21597_v16  ;;  %14221 = vmatprep.subr.bf16.mxu1 %v21598_v13 }
0x193f   : >> { %10747 = vmatmul.mubr.msk.f32.vlgmr.msra.gmra.mrb[220].mxu0 %vm1068_vm2, %v21599_v59  ;;  %10749 = vmatmul.mubr.msk.f32.vlgmr.msra.gmra.mrb[194].mxu1 %vm1068_vm2, %v21599_v59 }
0x1940   : >> { %9884 = vmatprep.mubr.f32.mxu0 %v20354_v55  ;;  %9961 = vmatprep.mubr.f32.mxu1 %v20354_v55 }
0x1941   : >> { %14191 = vmatpush3.bf16.msra.mxu0 %v21600_v45  ;;  %14223 = vmatpush3.bf16.msra.mxu1 %v21601_v44 }
0x1942   : >> { %14193 = vmatprep.subr.bf16.mxu0 %v21602_v52  ;;  %14225 = vmatprep.subr.bf16.mxu1 %v21603_v14  ;;  %v14889_v14 = vld [vmem:[%s20666_s7] ss:$0 sm:$0xff] }
0x1943   : >> { %10748 = vmatmul.mubr.msk.f32.gmra.mrb[222].mxu0 %vm1068_vm2, %v21604_v41  ;;  %10750 = vmatmul.mubr.msk.f32.gmra.mrb[196].mxu1 %vm1068_vm2, %v21604_v41 }
0x1945   : >> { %14195 = vmatpush3.bf16.msra.mxu0 %v21605_v57  ;;  %14227 = vmatpush3.bf16.msra.mxu1 %v21606_v28 }
0x1946   : >> { %14197 = vmatprep.subr.bf16.mxu0 %v21607_v1  ;;  %14229 = vmatprep.subr.bf16.mxu1 %v21608_v31 }
0x1949   : >> { %14199 = vmatpush3.bf16.msra.mxu0 %v21609_v27  ;;  %14231 = vmatpush3.bf16.msra.mxu1 %v21610_v40 }
0x194a   : >> { %14201 = vmatprep.subr.bf16.mxu0 %v21611_v29  ;;  %14233 = vmatprep.subr.bf16.mxu1 %v21612_v46  ;;  %v21636_v46 = vld [vmem:[#allocation375_spill] sm:$0xff] }
0x194d   : >> { %14203 = vmatpush3.bf16.msra.mxu0 %v21613_v48  ;;  %14235 = vmatpush3.bf16.msra.mxu1 %v21614_v9 }
0x194e   : >> { %14205 = vmatprep.subr.bf16.mxu0 %v21615_v37  ;;  %14237 = vmatprep.subr.bf16.mxu1 %v21616_v43  ;;  %v14890_v43 = vld [vmem:[%s20668_s19] sm:$0xff] }
0x1951   : >> { %14207 = vmatpush3.bf16.msra.mxu0 %v21617_v25  ;;  %14239 = vmatpush3.bf16.msra.mxu1 %v21618_v24  ;;  %v21637_v24 = vld [vmem:[#allocation45_spill] sm:$0xff] }
0x1952   : >> { %14209 = vmatprep.subr.bf16.mxu0 %v21619_v33  ;;  %14241 = vmatprep.subr.bf16.mxu1 %v21620_v23  ;;  %v14891_v23 = vld [vmem:[%s20668_s19 + $0x8] sm:$0xff] }
0x1955   : >> { %14211 = vmatpush3.bf16.msra.mxu0 %v21621_v39  ;;  %14243 = vmatpush3.bf16.msra.mxu1 %v21622_v54 }
0x1956   : >> { %14213 = vmatprep.subr.bf16.mxu0 %v21623_v42  ;;  %14245 = vmatprep.subr.bf16.mxu1 %v21624_v53 }
0x1959   : >> { %14215 = vmatpush3.bf16.msra.mxu0 %v21625_v8  ;;  %14247 = vmatpush3.bf16.msra.mxu1 %v21626_v10  ;;  %v14892_v8 = vld [vmem:[#allocation4] sm:$0x1]  ;;  %v21638_v10 = vld [vmem:[#allocation25_spill] sm:$0xff] }
0x195a   : >> { %14217 = vmatprep.subr.bf16.mxu0 %v21627_v18  ;;  %14249 = vmatprep.subr.bf16.mxu1 %v21628_v62  ;;  %v21639_v18 = vld [vmem:[#allocation26_spill] sm:$0xff] }
0x195d   : >> { %14219 = vmatpush3.bf16.msra.mxu0 %v21629_v38  ;;  %14251 = vmatpush3.bf16.msra.mxu1 %v21630_v35  ;;  %v21640_v38 = vld [vmem:[#allocation149_spill] sm:$0xff] }
0x195e   : >> { %14252 = vmatprep.subr.bf16.mxu0 %v21631_v61 }
0x1a12   : >> { %v9880_v11 = vpop.f32.mrb[220].mxu0  ;;  %v9957_v19 = vpop.f32.mrb[194].mxu1 }
0x1a13   : >> { %v9968_v21 = vadd.f32 %v9880_v11, %v21632_v60  ;;  %v9970_v56 = vadd.f32 %v9957_v19, %v21633_v7  ;;  %v9882_v2 = vpop.f32.mrb[221].mxu0  ;;  %v9959_v4 = vpop.f32.mrb[195].mxu1  ;;  %v10287_v19 = vld [vmem:[%s10286_s14] sm:$0xff] }
0x1a14   : >> { %v9969_v51 = vadd.f32 %v9882_v2, %v21634_v30  ;;  %v9971_v15 = vadd.f32 %v9959_v4, %v21635_v34 }
0x1a15   : >> { %v9976_v5 = vmax.f32 %v9968_v21, 0.0  ;;  %v9978_v22 = vmax.f32 %v9970_v56, 0.0 }
0x1a16   : >> { %v9977_v3 = vmax.f32 %v9969_v51, 0.0  ;;  %v9979_v58 = vmax.f32 %v9971_v15, 0.0  ;;  %v9886_v63 = vpop.f32.mrb[222].mxu0  ;;  %v9963_v32 = vpop.f32.mrb[196].mxu1 }
0x1a17   : >> { %v9972_v49 = vadd.f32 %v9886_v63, %v21632_v60  ;;  %v9974_v26 = vadd.f32 %v9963_v32, %v21633_v7  ;;  %v9888_v17 = vpop.f32.mrb[223].mxu0  ;;  %v9965_v20 = vpop.f32.mrb[197].mxu1  ;;  %v10288_v60 = vld [vmem:[%s10286_s14 + $0x8] sm:$0xff] }
0x1a18   : >> { %v9973_v47 = vadd.f32 %v9888_v17, %v21634_v30  ;;  %v9975_v50 = vadd.f32 %v9965_v20, %v21635_v34  ;;  %10048 = vmatprep.mubr.f32.mxu0 %v9977_v3  ;;  %10123 = vmatprep.mubr.f32.mxu1 %v9979_v58  ;;  %v14262_v21 = vpack.c.bf16 %v10288_v60, %v10287_v19  ;;  %v10285_v30 = vld [vmem:[%s15437_s30] sm:$0x1] }
0x1a19   : >> { %10049 = vmatmul.mubr.f32.vlgmr.msra.gmra.mrb[224].mxu0 %v9976_v5  ;;  %10124 = vmatmul.mubr.f32.vlgmr.msra.gmra.mrb[198].mxu1 %v9978_v22  ;;  %v9980_v6 = vmax.f32 %v9972_v49, 0.0  ;;  %v9982_v12 = vmax.f32 %v9974_v26, 0.0 }
0x1a1a   : >> { %v9981_v0 = vmax.f32 %v9973_v47, 0.0  ;;  %v9983_v36 = vmax.f32 %v9975_v50, 0.0 }
0x1a1c   : >> { %10053 = vmatprep.mubr.f32.mxu0 %v9981_v0  ;;  %10128 = vmatprep.mubr.f32.mxu1 %v9983_v36 }
0x1a1d   : >> { %10054 = vmatmul.mubr.f32.gmra.mrb[226].mxu0 %v9980_v6  ;;  %10129 = vmatmul.mubr.f32.gmra.mrb[200].mxu1 %v9982_v12 }
0x1a1e   : >> { %11358 = vmatprep.mubr.msk.f32.mxu0 %vm15129_vm3, %v20354_v55 }
0x1aec   : >> { %v11122_v16 = vpop.f32.mrb[224].mxu0  ;;  %v11160_v13 = vpop.f32.mrb[198].mxu1 }
0x1aed   : >> { %v11123_v59 = vpop.f32.mrb[225].mxu0  ;;  %v11161_v45 = vpop.f32.mrb[199].mxu1 }
0x1aee   : >> { %v11124_v44 = vadd.f32 %v11123_v59, %v11122_v16  ;;  %v11162_v52 = vadd.f32 %v11161_v45, %v11160_v13 }
0x1af0   : >> { %v10051_v41 = vadd.f32 %v14889_v14, %v11124_v44  ;;  %v11125_v57 = vpop.f32.mrb[226].mxu0  ;;  %v11163_v28 = vpop.f32.mrb[200].mxu1 }
0x1af1   : >> { %v11126_v1 = vpop.f32.mrb[227].mxu0  ;;  %v11164_v31 = vpop.f32.mrb[201].mxu1 }
0x1af2   : >> { %v10126_v27 = vadd.f32 %v11162_v52, %v10051_v41  ;;  %v11127_v40 = vadd.f32 %v11126_v1, %v11125_v57  ;;  %v11165_v29 = vadd.f32 %v11164_v31, %v11163_v28 }
0x1af4   : >> { %v10134_v48 = vadd.f32 %v10126_v27, %v21636_v46  ;;  %v10056_v9 = vadd.f32 %v14889_v14, %v11127_v40 }
0x1af6   : >> { %v10131_v37 = vadd.f32 %v11165_v29, %v10056_v9  ;;  %v10136_v25 = vsub.f32 %v10134_v48, %v14890_v43 }
0x1af8   : >> { %v10135_v33 = vadd.f32 %v10131_v37, %v21637_v24  ;;  %v10138_v54 = vmul.f32 %v10136_v25, %v10136_v25 }
0x1afa   : >> { %v10137_v39 = vsub.f32 %v10135_v33, %v14891_v23 }
0x1afc   : >> { %v10139_v42 = vmul.f32 %v10137_v39, %v10137_v39 }
0x1afe   : >> { %v14253_v53 = vpack.c.bf16 %v10139_v42, %v10138_v54 }
0x1b00   : >> { %14254 = vmatpush3.bf16.msra.mxu0 %v14253_v53 }
0x1b01   : >> { %14255 = vmatprep.subr.bf16.mxu0 %v21631_v61 }
0x1b03   : >> { %11359 = vmatmul.mubr.msk.f32.vlgmr.msra.gmra.mrb[228].mxu0 %vm763_vm1, %v14892_v8 }
0x1b04   : >> { %14257 = vmatpush3.bf16.msra.mxu0 %v21638_v10  ;;  %11369 = vmatprep.mubr.msk.f32.mxu0 %vm15129_vm3, %v20354_v55 }
0x1b05   : >> { %14258 = vmatprep.subr.bf16.mxu0 %v21631_v61 }
0x1b08   : >> { %14260 = vmatpush3.bf16.msra.mxu0 %v21639_v18 }
0x1b09   : >> { %14261 = vmatprep.subr.bf16.mxu0 %v21631_v61  ;;  %v21643_v61 = vld [vmem:[#allocation154_spill] sm:$0xff] }
0x1b0a   : >> { %v10211_v7 = vmul.f32 100000.0, %v21643_v61 }
0x1bd6   : >> { %v10206_v62 = vpop.f32.mrb[228].mxu0 }
0x1bd7   : >> { %v10210_v35 = vadd.f32 %v10206_v62, %v21640_v38  ;;  %v11360_v11 = vpop.f32.mrb[229].mxu0 }
0x1bd9   : >> { %11370 = vmatmul.mubr.msk.f32.vlgmr.msra.gmra.mrb[230].mxu0 %vm681_vm0, %v10210_v35 }
0x1bda   : >> { %11376 = vmatprep.mubr.msk.f32.mxu0 %vm15129_vm3, %v20354_v55  ;;  %14263 = vmatpush3.bf16.msra.mxu0 %v14262_v21 }
0x1cac   : >> { %v10281_v56 = vpop.f32.mrb[230].mxu0 }
0x1cad   : >> { %v10282_v2 = vadd.f32 %v10281_v56, %v10211_v7  ;;  %v11371_v4 = vpop.f32.mrb[231].mxu0 }
0x1caf   : >> { %11377 = vmatmul.mubr.msk.f32.vlgmr.msra.gmra.mrb[232].mxu0 %vm763_vm1, %v10282_v2 }
0x1d82   : >> { %v10358_v51 = vpop.f32.mrb[232].mxu0 }
0x1d83   : >> { %v10362_v34 = vadd.f32 %v10358_v51, %v10285_v30  ;;  %v11378_v55 = vpop.f32.mrb[233].mxu0 }
0x1d85   : >> { %10363 = vst [vmem:[%s15437_s30] sm:$0x1] %v10362_v34 }
0x1d86 PF: >> { %s654_s21 = sadd.s32 1, %s15115_s21  }
0x1d87   : >> { %p651_p11 = scmp.ge.s32.totalorder %s654_s21, 8  }
0x1d88   : > { %s21644_s20 = sld [smem:[#allocation23_spill]] (%p651_p11)  ;;  %s10754_s2 = sshll.u32 (%p651_p11), %s15255_s23, 4 }
0x1d89   : > { %653 = sbr.rel (!%p651_p11) target bundleno = 178 (0xb2), region = 161  ;;  %s21645_s25 = sld [smem:[#allocation386_spill]] (%p651_p11) }
0x1d8a   : > { %s10377_s18 = sshll.u32 (%p651_p11), %s15437_s30, 4  ;;  %s21646_s3 = sand.u32 (%p651_p11), 1, %s15103_s1   ;;  %s10378_s18 = int_to_ptr.vmem [resolvable:$true] %s10377_s18 }
0x1d8b   : > { %s10365_s4 = scalar_lea.sflag (%p651_p11), [#allocation6], %s21646_s3  ;;  %s15033_s8 = scalar_lea.vmem (%p651_p11), %s10378_s18, 16 }
0x1d8c   : > { %p15034_p13 = scmp.ne.s32.totalorder (%p651_p11), %s10378_s18, %s15033_s8  ;;  %s15130_s21 = smov (%p651_p11), [#allocation13]  }
0x1d8d   : > { %s15037_s24 = sshll.u32 (%p651_p11), %s15130_s21, 4  ;;  %s15038_s24 = int_to_ptr.vmem [resolvable:$false] %s15037_s24 }
0x1d8e   : > { %p21647_p1 = scmp.ne.s32.totalorder (%p651_p11), %s21644_s20, 0  ;;  %s15039_s27 = scalar_lea.vmem (%p651_p11), %s15038_s24, 32 }
0x1d8f   : > { %s19447_s28 = scalar_lea.hbm (%p651_p11), %s21645_s25, %s10754_s2  ;;  %p15040_p5 = scmp.lt.s32.totalorder (%p651_p11), %s10378_s18, %s15038_s24 }
0x1d90   : > { %p15035_p6 = pnand %p15034_p13, %p21647_p1  ;;  %p15041_p10 = scmp.lt.s32.totalorder %s15039_s27, %s15033_s8 }
0x1d92   : > { %p15036_p9 = pneg %p15035_p6  ;;  %p15042_p0 = por %p15041_p10, %p15040_p5 }
0x1d94   : > { %p15043_p2 = pnand %p15042_p0, %p15036_p9 }
0x1d96   : > { %15046 = shalt.err (!%p15043_p2)
}
0x1d97   : > { %s15047_s23 = scalar_lea.hbm %s19447_s28, 16  ;;  %s15051_s2 = scalar_lea.hbm %s21645_s25, 32 }
0x1d98   : > { %p15048_p3 = scmp.ne.s32.totalorder %s19447_s28, %s15047_s23  ;;  %p15052_p7 = scmp.lt.u32.totalorder %s19447_s28, %s21645_s25 }
0x1d99   : > { %p15053_p8 = scmp.lt.u32.totalorder %s15051_s2, %s15047_s23  ;;  %p15055_p13 = scmp.lt.u32.totalorder %s15047_s23, %s19447_s28 }
0x1d9a   : > { %p15049_p4 = pnand %p15048_p3, %p21647_p1 }
0x1d9b   : > { %p15054_p11 = por %p15053_p8, %p15052_p7 }
0x1d9c   : > { %p15050_p12 = pneg %p15049_p4 }
0x1d9d   : > { %p15056_p6 = por %p15055_p13, %p15054_p11 }
0x1d9f   : > { %p15057_p9 = pnand %p15056_p6, %p15050_p12 }
0x1da1   : > { %15060 = shalt.err (!%p15057_p9)
}
0x1da2   : > { %14736 = dma.vmem_to_hbm [thread:$0]  (%p21647_p1), %s10378_s18, 16, %s19447_s28, %s10365_s4  }
0x1da3 PF: > { %s21648_s3 = sld [smem:[#allocation20_spill]]  ;;  %s21649_s8 = sld [smem:[#allocation18_spill]] }
0x1da4   : > { %s21650_s21 = sld [smem:[#allocation24_spill]] }
0x1da9   : > { %p14768_p5 = scmp.ge.s32.totalorder %s21648_s3, 2  ;;  %s10389_s24 = sand.u32 1, %s21649_s8  }
0x1daa   : > { %p21651_p10 = scmp.ne.s32.totalorder %s21650_s21, 0  ;;  %s10390_s27 = scalar_lea.sflag [#allocation6], %s10389_s24 }
0x1dac   : > { %p14755_p0 = pnand %p14768_p5, %p21651_p10 }
0x1dae   : > { %15094 = dma.done.wait (!%p14755_p0), %s10390_s27, 16  }
0x1daf   : > { %15096 = vsyncadd (!%p14755_p0), %s10390_s27, 4294967280  ;;  %s21652_s2 = sld [smem:[#allocation21_spill]]  ;;  %s21653_s23 = sld [smem:[#allocation19_spill]] }
0x1db0   : > { %s21654_s22 = sld [smem:[#allocation22_spill]]  ;;  %s21655_s21 = smov %s15103_s1 }
0x1db5   : > { %p33_p2 = scmp.ge.s32.totalorder %s21652_s2, 4   ;;  %s21656_s1 = smov %s21653_s23 }
0x1db7   :  { %35 = sbr.rel (!%p33_p2) target bundleno = 18 (0x12), region = 172 }
0x1dbe   :  { %10394 = vsyncpa [#allocation5], 1 }
0x1dbf   :  { %10396 = vsyncpa [#allocation5 + $0x1], 1 }
0x1dc0   :  { %10397 = vsyncpa [#allocation8], 1 }
0x1dc1   :  { %10398 = vsyncpa [#allocation11], 1 }
0x1dc2   :  { %10399 = vsyncpa [#allocation6], 1 }
0x1dc3   :  { %10401 = vsyncpa [#allocation6 + $0x1], 1 }

</bundles_post_ra>
